<compile_context>
chip_gen: v6e
topology: v6e:2x2x1
jax: 0.10.0
libtpu: 0.0.40
codegen_flags: <defaults>
</compile_context>

<pallas_src>
import functools

import jax
import jax.numpy as jnp
from jax.experimental import pallas as pl
from jax.experimental.pallas import tpu as pltpu

EPS = 1e-5


def _bn_train(y, g_ref, b_ref):
    """Training-mode BatchNorm folded into a single scale+shift pass.

    y: (M, C) f32 activations, M = N*H*W. Biased variance, eps=1e-5.
    """
    m = y.shape[0]
    inv_m = 1.0 / m
    mu = jnp.sum(y, axis=0, keepdims=True) * inv_m            # E[y]
    ex2 = jnp.sum(y * y, axis=0, keepdims=True) * inv_m       # E[y^2]
    var = ex2 - mu * mu                                       # biased variance
    scale = g_ref[...] * jax.lax.rsqrt(var + EPS)
    shift = b_ref[...] - mu * scale
    return y * scale + shift                                  # one fused pass


def _sigmoid(z):
    return 1.0 / (1.0 + jnp.exp(-z))


def se_bottleneck_kernel(
    x_ref,                    # (M, Cin)         flattened NHWC input, f32
    w1_ref,                   # (Cin, Chid)      layer1 1x1 conv, bf16
    g1_ref, b1_ref,           # (1, Chid)        BN1
    w2_ref,                   # (9*Chid, Chid)   layer2 3x3 conv (im2col), bf16
    g2_ref, b2_ref,           # (1, Chid)        BN2
    w3_ref,                   # (Chid, Cout)     layer3 1x1 conv, bf16
    g3_ref, b3_ref,           # (1, Cout)        BN3
    wf1_ref,                  # (Cout, Shid)     SE fc1, f32
    wf2_ref,                  # (Shid, Cout)     SE fc2, f32
    ws_ref,                   # (Cin, Cout)      skip 1x1 conv, bf16
    gs_ref, bs_ref,           # (1, Cout)        skip BN
    o_ref,                    # (M, Cout)        output
    hbuf,                     # scratch (N, H+2, W+2, Chid) f32: padded hidden
    cbuf,                     # scratch (M, 9*Chid) f32: im2col patch matrix
    *, N, H, W,
):
    M = x_ref.shape[0]
    Chid = w1_ref.shape[-1]
    Cout = w3_ref.shape[-1]

    # ---- layer1: 1x1 conv -> BN -> ReLU (one bf16 MXU matmul) -----------------
    x_bf = x_ref[...].astype(jnp.bfloat16)        # reused by the skip branch
    y1 = jnp.dot(x_bf, w1_ref[...], preferred_element_type=jnp.float32)
    y1 = jnp.maximum(_bn_train(y1, g1_ref, b1_ref), 0.0)          # (M, Chid)

    # ---- layer2: 3x3 conv (pad=1) -> BN -> ReLU -------------------------------
    # Zero only the 1-pixel halo of the padded scratch, then write the interior.
    hbuf[:, 0:1, :, :] = jnp.zeros((N, 1, W + 2, Chid), jnp.float32)
    hbuf[:, H + 1:H + 2, :, :] = jnp.zeros((N, 1, W + 2, Chid), jnp.float32)
    hbuf[:, 1:H + 1, 0:1, :] = jnp.zeros((N, H, 1, Chid), jnp.float32)
    hbuf[:, 1:H + 1, W + 1:W + 2, :] = jnp.zeros((N, H, 1, Chid), jnp.float32)
    hbuf[:, 1:H + 1, 1:W + 1, :] = y1.reshape(N, H, W, Chid)

    # Build the im2col matrix once; run ONE K = 9*Chid matmul instead of nine
    # K = Chid matmuls + 8 accumulation adds.
    t = 0
    for dy in range(3):
        for dx in range(3):
            cbuf[:, t * Chid:(t + 1) * Chid] = (
                hbuf[:, dy:dy + H, dx:dx + W, :].reshape(M, Chid))
            t += 1
    y2 = jnp.dot(cbuf[...].astype(jnp.bfloat16), w2_ref[...],
                 preferred_element_type=jnp.float32)
    y2 = jnp.maximum(_bn_train(y2, g2_ref, b2_ref), 0.0)          # (M, Chid)

    # ---- layer3: 1x1 conv -> BN (no ReLU) -------------------------------------
    y3 = jnp.dot(y2.astype(jnp.bfloat16), w3_ref[...],
                 preferred_element_type=jnp.float32)
    y3 = _bn_train(y3, g3_ref, b3_ref)                            # (M, Cout)

    # ---- SE: global avg-pool -> fc -> ReLU -> fc -> sigmoid -> channel scale --
    y3n = y3.reshape(N, H * W, Cout)
    pooled = jnp.mean(y3n, axis=1)                                # (N, Cout)
    s = jnp.maximum(jnp.dot(pooled, wf1_ref[...],
                            preferred_element_type=jnp.float32), 0.0)
    s = _sigmoid(jnp.dot(s, wf2_ref[...],
                         preferred_element_type=jnp.float32))     # (N, Cout)
    y_se = (y3n * s[:, None, :]).reshape(M, Cout)

    # ---- skip: 1x1 conv -> BN (present since in_planes != out_planes) ---------
    xs = jnp.dot(x_bf, ws_ref[...], preferred_element_type=jnp.float32)
    xs = _bn_train(xs, gs_ref, bs_ref)                            # (M, Cout)

    # ---- residual add + ReLU ---------------------------------------------------
    o_ref[...] = jnp.maximum(xs + y_se, 0.0)


def se_bottleneck_pallas(x_nchw, params):
    (w1, g1, b1, w2, g2, b2, w3, g3, b3, wf1, wf2, ws, gs, bs) = params
    N, Cin, H, W = x_nchw.shape
    Chid = w1.shape[-1]
    Cout = w3.shape[-1]
    Shid = wf1.shape[-1]
    M = N * H * W

    # NCHW -> NHWC -> (M, Cin): channels on the lane axis.
    x2d = jnp.transpose(x_nchw, (0, 2, 3, 1)).reshape(M, Cin).astype(jnp.float32)

    # MXU operands in bf16 (accumulation stays f32 inside the kernel).
    w1b = w1.astype(jnp.bfloat16)
    w2b = w2.reshape(9 * Chid, Chid).astype(jnp.bfloat16)   # HWIO -> (9*Chid, Chid)
    w3b = w3.astype(jnp.bfloat16)
    wsb = ws.astype(jnp.bfloat16)

    full = lambda shape: pl.BlockSpec(shape, lambda i: (0,) * len(shape))
    kernel = functools.partial(se_bottleneck_kernel, N=N, H=H, W=W)

    out2d = pl.pallas_call(
        kernel,
        out_shape=jax.ShapeDtypeStruct((M, Cout), jnp.float32),
        grid=(1,),
        in_specs=[
            full((M, Cin)),
            full((Cin, Chid)), full((1, Chid)), full((1, Chid)),
            full((9 * Chid, Chid)), full((1, Chid)), full((1, Chid)),
            full((Chid, Cout)), full((1, Cout)), full((1, Cout)),
            full((Cout, Shid)), full((Shid, Cout)),
            full((Cin, Cout)), full((1, Cout)), full((1, Cout)),
        ],
        out_specs=full((M, Cout)),
        scratch_shapes=[
            pltpu.VMEM((N, H + 2, W + 2, Chid), jnp.float32),
            pltpu.VMEM((M, 9 * Chid), jnp.float32),
        ],
        compiler_params=pltpu.CompilerParams(
            dimension_semantics=("arbitrary",)),
    )(x2d, w1b, g1, b1, w2b, g2, b2, w3b, g3, b3, wf1, wf2, wsb, gs, bs)

    # back to PyTorch NCHW convention
    return jnp.transpose(out2d.reshape(N, H, W, Cout), (0, 3, 1, 2))


def se_bottleneck_reference(x_nchw, params):
    """Pure-JAX reference (lax convs, same bf16 operand casts) for checking."""
    (w1, g1, b1, w2, g2, b2, w3, g3, b3, wf1, wf2, ws, gs, bs) = params
    x = jnp.transpose(x_nchw, (0, 2, 3, 1)).astype(jnp.float32)

    def conv(x, w, pad):
        return jax.lax.conv_general_dilated(
            x.astype(jnp.bfloat16), w.astype(jnp.bfloat16), (1, 1), pad,
            dimension_numbers=("NHWC", "HWIO", "NHWC"),
            preferred_element_type=jnp.float32)

    def bn(y, g, b):
        mu = jnp.mean(y, axis=(0, 1, 2), keepdims=True)
        var = jnp.mean((y - mu) ** 2, axis=(0, 1, 2), keepdims=True)
        return (y - mu) * jax.lax.rsqrt(var + EPS) * g.reshape(1, 1, 1, -1) \
            + b.reshape(1, 1, 1, -1)

    y = jax.nn.relu(bn(conv(x, w1[None, None], [(0, 0), (0, 0)]), g1, b1))
    y = jax.nn.relu(bn(conv(y, w2, [(1, 1), (1, 1)]), g2, b2))
    y = bn(conv(y, w3[None, None], [(0, 0), (0, 0)]), g3, b3)
    # SE
    pooled = jnp.mean(y, axis=(1, 2))                         # (N, Cout)
    s = jax.nn.relu(pooled @ wf1)
    s = 1.0 / (1.0 + jnp.exp(-(s @ wf2)))                     # (N, Cout)
    y = y * s[:, None, None, :]
    # skip (present: in_planes != out_planes)
    skip = bn(conv(x, ws[None, None], [(0, 0), (0, 0)]), gs, bs)
    out = jax.nn.relu(skip + y)
    return jnp.transpose(out, (0, 3, 1, 2))


def init_params(key, in_planes, hidden_planes, out_planes, reduction=4):
    se_hidden = out_planes // reduction
    ks = jax.random.split(key, 14)
    # Conv weights directly in HWIO-style layouts (1x1 convs as (Cin, Cout)).
    w1 = jax.random.normal(ks[0], (in_planes, hidden_planes), jnp.float32) * 0.1
    w2 = jax.random.normal(ks[1], (3, 3, hidden_planes, hidden_planes),
                           jnp.float32) * 0.1
    w3 = jax.random.normal(ks[2], (hidden_planes, out_planes), jnp.float32) * 0.1
    ws = jax.random.normal(ks[3], (in_planes, out_planes), jnp.float32) * 0.1
    # SE linear weights (stored pre-transposed: y = x @ W).
    wf1 = jax.random.normal(ks[4], (out_planes, se_hidden), jnp.float32) * 0.1
    wf2 = jax.random.normal(ks[5], (se_hidden, out_planes), jnp.float32) * 0.1
    # BatchNorm affine params, (1, C) for lane-friendly broadcast.
    g1 = 1.0 + 0.1 * jax.random.normal(ks[6], (1, hidden_planes), jnp.float32)
    b1 = 0.1 * jax.random.normal(ks[7], (1, hidden_planes), jnp.float32)
    g2 = 1.0 + 0.1 * jax.random.normal(ks[8], (1, hidden_planes), jnp.float32)
    b2 = 0.1 * jax.random.normal(ks[9], (1, hidden_planes), jnp.float32)
    g3 = 1.0 + 0.1 * jax.random.normal(ks[10], (1, out_planes), jnp.float32)
    b3 = 0.1 * jax.random.normal(ks[11], (1, out_planes), jnp.float32)
    gs = 1.0 + 0.1 * jax.random.normal(ks[12], (1, out_planes), jnp.float32)
    bs = 0.1 * jax.random.normal(ks[13], (1, out_planes), jnp.float32)
    return (w1, g1, b1, w2, g2, b2, w3, g3, b3, wf1, wf2, ws, gs, bs)


if __name__ == "__main__":
    key = jax.random.PRNGKey(0)
    kx, kp = jax.random.split(key)

    # SE_Bottleneck(in_planes=4, hidden_planes=8, out_planes=8, reduction=4):
    #   layer1 1x1 (4->8), layer2 3x3 (8->8), layer3 1x1 (8->8),
    #   SE hidden = 8 // 4 = 2, skip 1x1 conv present (4 != 8).
    N, Cin, H, W = 2, 4, 16, 16
    Chid, Cout = 8, 8

    x = jax.random.normal(kx, (N, Cin, H, W), jnp.float32)
    params = init_params(kp, Cin, Chid, Cout, reduction=4)

    out = jax.block_until_ready(se_bottleneck_pallas(x, params))
    ref = jax.block_until_ready(se_bottleneck_reference(x, params))

    assert out.shape == (N, Cout, H, W)
    assert jnp.allclose(out, ref, atol=2e-3, rtol=2e-3), "mismatch vs reference"
    print("KERNEL_OK")
</pallas_src>

<mosaic_0001>
module attributes {stable_mosaic.version = 11 : i64} {
  func.func @se_bottleneck_kernel(%arg0: i32, %arg1: memref<512x4xf32, #tpu.memory_space<vmem>>, %arg2: memref<4x8xbf16, #tpu.memory_space<vmem>>, %arg3: memref<1x8xf32, #tpu.memory_space<vmem>>, %arg4: memref<1x8xf32, #tpu.memory_space<vmem>>, %arg5: memref<72x8xbf16, #tpu.memory_space<vmem>>, %arg6: memref<1x8xf32, #tpu.memory_space<vmem>>, %arg7: memref<1x8xf32, #tpu.memory_space<vmem>>, %arg8: memref<8x8xbf16, #tpu.memory_space<vmem>>, %arg9: memref<1x8xf32, #tpu.memory_space<vmem>>, %arg10: memref<1x8xf32, #tpu.memory_space<vmem>>, %arg11: memref<8x2xf32, #tpu.memory_space<vmem>>, %arg12: memref<2x8xf32, #tpu.memory_space<vmem>>, %arg13: memref<4x8xbf16, #tpu.memory_space<vmem>>, %arg14: memref<1x8xf32, #tpu.memory_space<vmem>>, %arg15: memref<1x8xf32, #tpu.memory_space<vmem>>, %arg16: memref<512x8xf32, #tpu.memory_space<vmem>>, %arg17: memref<2x18x18x8xf32, #tpu.memory_space<vmem>>, %arg18: memref<512x72xf32, #tpu.memory_space<vmem>>) attributes {dimension_semantics = [#tpu.dimension_semantics<arbitrary>], iteration_bounds = array<i64: 1>, scalar_prefetch = 0 : i64, scratch_operands = 2 : i64, tpu.core_type = #tpu.core_type<tc>, window_params = [{pipeline_mode = #tpu.pipeline_mode<synchronous>, transform_indices = @transform_0, window_bounds = array<i64: 512, 4>}, {pipeline_mode = #tpu.pipeline_mode<synchronous>, transform_indices = @transform_1, window_bounds = array<i64: 4, 8>}, {pipeline_mode = #tpu.pipeline_mode<synchronous>, transform_indices = @transform_2, window_bounds = array<i64: 1, 8>}, {pipeline_mode = #tpu.pipeline_mode<synchronous>, transform_indices = @transform_3, window_bounds = array<i64: 1, 8>}, {pipeline_mode = #tpu.pipeline_mode<synchronous>, transform_indices = @transform_4, window_bounds = array<i64: 72, 8>}, {pipeline_mode = #tpu.pipeline_mode<synchronous>, transform_indices = @transform_5, window_bounds = array<i64: 1, 8>}, {pipeline_mode = #tpu.pipeline_mode<synchronous>, transform_indices = @transform_6, window_bounds = array<i64: 1, 8>}, {pipeline_mode = #tpu.pipeline_mode<synchronous>, transform_indices = @transform_7, window_bounds = array<i64: 8, 8>}, {pipeline_mode = #tpu.pipeline_mode<synchronous>, transform_indices = @transform_8, window_bounds = array<i64: 1, 8>}, {pipeline_mode = #tpu.pipeline_mode<synchronous>, transform_indices = @transform_9, window_bounds = array<i64: 1, 8>}, {pipeline_mode = #tpu.pipeline_mode<synchronous>, transform_indices = @transform_10, window_bounds = array<i64: 8, 2>}, {pipeline_mode = #tpu.pipeline_mode<synchronous>, transform_indices = @transform_11, window_bounds = array<i64: 2, 8>}, {pipeline_mode = #tpu.pipeline_mode<synchronous>, transform_indices = @transform_12, window_bounds = array<i64: 4, 8>}, {pipeline_mode = #tpu.pipeline_mode<synchronous>, transform_indices = @transform_13, window_bounds = array<i64: 1, 8>}, {pipeline_mode = #tpu.pipeline_mode<synchronous>, transform_indices = @transform_14, window_bounds = array<i64: 1, 8>}, {pipeline_mode = #tpu.pipeline_mode<synchronous>, transform_indices = @transform_15, window_bounds = array<i64: 512, 8>}]} {
    %c0 = arith.constant 0 : index
    %c0_0 = arith.constant 0 : index
    %0 = vector.load %arg1[%c0, %c0_0] : memref<512x4xf32, #tpu.memory_space<vmem>>, vector<512x4xf32>
    %1 = arith.truncf %0 : vector<512x4xf32> to vector<512x4xbf16>
    %c0_1 = arith.constant 0 : index
    %c0_2 = arith.constant 0 : index
    %2 = vector.load %arg2[%c0_1, %c0_2] : memref<4x8xbf16, #tpu.memory_space<vmem>>, vector<4x8xbf16>
    %cst = arith.constant dense<0.000000e+00> : vector<512x8xf32>
    %3 = tpu.matmul %1, %2, %cst {dimension_numbers = #tpu.dot_dimension_numbers<[1], [0], [0], [1], [0, 0, 1, 1], [], []>} : vector<512x4xbf16>, vector<4x8xbf16>, vector<512x8xf32> -> vector<512x8xf32>
    %cst_3 = arith.constant dense<0.000000e+00> : vector<8xf32>
    %4 = vector.multi_reduction <add>, %3, %cst_3 [0] : vector<512x8xf32> to vector<8xf32>
    %5 = vector.shape_cast %4 : vector<8xf32> to vector<1x8xf32>
    %cst_4 = arith.constant 0.001953125 : f32
    %6 = vector.broadcast %cst_4 : f32 to vector<1x8xf32>
    %7 = arith.mulf %5, %6 : vector<1x8xf32>
    %8 = arith.mulf %3, %3 : vector<512x8xf32>
    %cst_5 = arith.constant dense<0.000000e+00> : vector<8xf32>
    %9 = vector.multi_reduction <add>, %8, %cst_5 [0] : vector<512x8xf32> to vector<8xf32>
    %10 = vector.shape_cast %9 : vector<8xf32> to vector<1x8xf32>
    %cst_6 = arith.constant 0.001953125 : f32
    %11 = vector.broadcast %cst_6 : f32 to vector<1x8xf32>
    %12 = arith.mulf %10, %11 : vector<1x8xf32>
    %13 = arith.mulf %7, %7 : vector<1x8xf32>
    %14 = arith.subf %12, %13 : vector<1x8xf32>
    %c0_7 = arith.constant 0 : index
    %c0_8 = arith.constant 0 : index
    %15 = vector.load %arg3[%c0_7, %c0_8] : memref<1x8xf32, #tpu.memory_space<vmem>>, vector<1x8xf32>
    %cst_9 = arith.constant 9.99999974E-6 : f32
    %16 = vector.broadcast %cst_9 : f32 to vector<1x8xf32>
    %17 = arith.addf %14, %16 : vector<1x8xf32>
    %18 = math.rsqrt %17 : vector<1x8xf32>
    %19 = arith.mulf %15, %18 : vector<1x8xf32>
    %c0_10 = arith.constant 0 : index
    %c0_11 = arith.constant 0 : index
    %20 = vector.load %arg4[%c0_10, %c0_11] : memref<1x8xf32, #tpu.memory_space<vmem>>, vector<1x8xf32>
    %21 = arith.mulf %7, %19 : vector<1x8xf32>
    %22 = arith.subf %20, %21 : vector<1x8xf32>
    %23 = vector.broadcast %19 : vector<1x8xf32> to vector<512x8xf32>
    %24 = arith.mulf %3, %23 : vector<512x8xf32>
    %25 = vector.broadcast %22 : vector<1x8xf32> to vector<512x8xf32>
    %26 = arith.addf %24, %25 : vector<512x8xf32>
    %cst_12 = arith.constant 0.000000e+00 : f32
    %27 = vector.broadcast %cst_12 : f32 to vector<512x8xf32>
    %28 = arith.maximumf %26, %27 : vector<512x8xf32>
    %cst_13 = arith.constant 0.000000e+00 : f32
    %29 = vector.broadcast %cst_13 : f32 to vector<2x1x18x8xf32>
    %c0_14 = arith.constant 0 : index
    %c0_15 = arith.constant 0 : index
    %c0_16 = arith.constant 0 : index
    %c0_17 = arith.constant 0 : index
    %30 = vector.load %arg17[%c0_14, %c0_15, %c0_16, %c0_17] : memref<2x18x18x8xf32, #tpu.memory_space<vmem>>, vector<2x1x18x8xf32>
    tpu.vector_store %arg17[%c0_14, %c0_15, %c0_16, %c0_17], %29 {strides = array<i32>} : memref<2x18x18x8xf32, #tpu.memory_space<vmem>>, vector<2x1x18x8xf32>,
    %cst_18 = arith.constant 0.000000e+00 : f32
    %31 = vector.broadcast %cst_18 : f32 to vector<2x1x18x8xf32>
    %c0_19 = arith.constant 0 : index
    %c17 = arith.constant 17 : index
    %c0_20 = arith.constant 0 : index
    %c0_21 = arith.constant 0 : index
    %32 = vector.load %arg17[%c0_19, %c17, %c0_20, %c0_21] : memref<2x18x18x8xf32, #tpu.memory_space<vmem>>, vector<2x1x18x8xf32>
    tpu.vector_store %arg17[%c0_19, %c17, %c0_20, %c0_21], %31 {strides = array<i32>} : memref<2x18x18x8xf32, #tpu.memory_space<vmem>>, vector<2x1x18x8xf32>,
    %cst_22 = arith.constant 0.000000e+00 : f32
    %33 = vector.broadcast %cst_22 : f32 to vector<2x16x1x8xf32>
    %c0_23 = arith.constant 0 : index
    %c1 = arith.constant 1 : index
    %c0_24 = arith.constant 0 : index
    %c0_25 = arith.constant 0 : index
    %34 = vector.load %arg17[%c0_23, %c1, %c0_24, %c0_25] : memref<2x18x18x8xf32, #tpu.memory_space<vmem>>, vector<2x16x1x8xf32>
    tpu.vector_store %arg17[%c0_23, %c1, %c0_24, %c0_25], %33 {strides = array<i32>} : memref<2x18x18x8xf32, #tpu.memory_space<vmem>>, vector<2x16x1x8xf32>,
    %cst_26 = arith.constant 0.000000e+00 : f32
    %35 = vector.broadcast %cst_26 : f32 to vector<2x16x1x8xf32>
    %c0_27 = arith.constant 0 : index
    %c1_28 = arith.constant 1 : index
    %c17_29 = arith.constant 17 : index
    %c0_30 = arith.constant 0 : index
    %36 = vector.load %arg17[%c0_27, %c1_28, %c17_29, %c0_30] : memref<2x18x18x8xf32, #tpu.memory_space<vmem>>, vector<2x16x1x8xf32>
    tpu.vector_store %arg17[%c0_27, %c1_28, %c17_29, %c0_30], %35 {strides = array<i32>} : memref<2x18x18x8xf32, #tpu.memory_space<vmem>>, vector<2x16x1x8xf32>,
    %37 = vector.shape_cast %28 : vector<512x8xf32> to vector<2x16x16x8xf32>
    %c0_31 = arith.constant 0 : index
    %c1_32 = arith.constant 1 : index
    %c1_33 = arith.constant 1 : index
    %c0_34 = arith.constant 0 : index
    %38 = vector.load %arg17[%c0_31, %c1_32, %c1_33, %c0_34] : memref<2x18x18x8xf32, #tpu.memory_space<vmem>>, vector<2x16x16x8xf32>
    tpu.vector_store %arg17[%c0_31, %c1_32, %c1_33, %c0_34], %37 {strides = array<i32>} : memref<2x18x18x8xf32, #tpu.memory_space<vmem>>, vector<2x16x16x8xf32>,
    %c0_35 = arith.constant 0 : index
    %c0_36 = arith.constant 0 : index
    %c0_37 = arith.constant 0 : index
    %c0_38 = arith.constant 0 : index
    %39 = vector.load %arg17[%c0_35, %c0_36, %c0_37, %c0_38] : memref<2x18x18x8xf32, #tpu.memory_space<vmem>>, vector<2x16x16x8xf32>
    %40 = vector.shape_cast %39 : vector<2x16x16x8xf32> to vector<512x8xf32>
    %c0_39 = arith.constant 0 : index
    %c0_40 = arith.constant 0 : index
    %41 = vector.load %arg18[%c0_39, %c0_40] : memref<512x72xf32, #tpu.memory_space<vmem>>, vector<512x8xf32>
    tpu.vector_store %arg18[%c0_39, %c0_40], %40 {strides = array<i32>} : memref<512x72xf32, #tpu.memory_space<vmem>>, vector<512x8xf32>,
    %c0_41 = arith.constant 0 : index
    %c0_42 = arith.constant 0 : index
    %c1_43 = arith.constant 1 : index
    %c0_44 = arith.constant 0 : index
    %42 = vector.load %arg17[%c0_41, %c0_42, %c1_43, %c0_44] : memref<2x18x18x8xf32, #tpu.memory_space<vmem>>, vector<2x16x16x8xf32>
    %43 = vector.shape_cast %42 : vector<2x16x16x8xf32> to vector<512x8xf32>
    %c0_45 = arith.constant 0 : index
    %c8 = arith.constant 8 : index
    %44 = vector.load %arg18[%c0_45, %c8] : memref<512x72xf32, #tpu.memory_space<vmem>>, vector<512x8xf32>
    tpu.vector_store %arg18[%c0_45, %c8], %43 {strides = array<i32>} : memref<512x72xf32, #tpu.memory_space<vmem>>, vector<512x8xf32>,
    %c0_46 = arith.constant 0 : index
    %c0_47 = arith.constant 0 : index
    %c2 = arith.constant 2 : index
    %c0_48 = arith.constant 0 : index
    %45 = vector.load %arg17[%c0_46, %c0_47, %c2, %c0_48] : memref<2x18x18x8xf32, #tpu.memory_space<vmem>>, vector<2x16x16x8xf32>
    %46 = vector.shape_cast %45 : vector<2x16x16x8xf32> to vector<512x8xf32>
    %c0_49 = arith.constant 0 : index
    %c16 = arith.constant 16 : index
    %47 = vector.load %arg18[%c0_49, %c16] : memref<512x72xf32, #tpu.memory_space<vmem>>, vector<512x8xf32>
    tpu.vector_store %arg18[%c0_49, %c16], %46 {strides = array<i32>} : memref<512x72xf32, #tpu.memory_space<vmem>>, vector<512x8xf32>,
    %c0_50 = arith.constant 0 : index
    %c1_51 = arith.constant 1 : index
    %c0_52 = arith.constant 0 : index
    %c0_53 = arith.constant 0 : index
    %48 = vector.load %arg17[%c0_50, %c1_51, %c0_52, %c0_53] : memref<2x18x18x8xf32, #tpu.memory_space<vmem>>, vector<2x16x16x8xf32>
    %49 = vector.shape_cast %48 : vector<2x16x16x8xf32> to vector<512x8xf32>
    %c0_54 = arith.constant 0 : index
    %c24 = arith.constant 24 : index
    %50 = vector.load %arg18[%c0_54, %c24] : memref<512x72xf32, #tpu.memory_space<vmem>>, vector<512x8xf32>
    tpu.vector_store %arg18[%c0_54, %c24], %49 {strides = array<i32>} : memref<512x72xf32, #tpu.memory_space<vmem>>, vector<512x8xf32>,
    %c0_55 = arith.constant 0 : index
    %c1_56 = arith.constant 1 : index
    %c1_57 = arith.constant 1 : index
    %c0_58 = arith.constant 0 : index
    %51 = vector.load %arg17[%c0_55, %c1_56, %c1_57, %c0_58] : memref<2x18x18x8xf32, #tpu.memory_space<vmem>>, vector<2x16x16x8xf32>
    %52 = vector.shape_cast %51 : vector<2x16x16x8xf32> to vector<512x8xf32>
    %c0_59 = arith.constant 0 : index
    %c32 = arith.constant 32 : index
    %53 = vector.load %arg18[%c0_59, %c32] : memref<512x72xf32, #tpu.memory_space<vmem>>, vector<512x8xf32>
    tpu.vector_store %arg18[%c0_59, %c32], %52 {strides = array<i32>} : memref<512x72xf32, #tpu.memory_space<vmem>>, vector<512x8xf32>,
    %c0_60 = arith.constant 0 : index
    %c1_61 = arith.constant 1 : index
    %c2_62 = arith.constant 2 : index
    %c0_63 = arith.constant 0 : index
    %54 = vector.load %arg17[%c0_60, %c1_61, %c2_62, %c0_63] : memref<2x18x18x8xf32, #tpu.memory_space<vmem>>, vector<2x16x16x8xf32>
    %55 = vector.shape_cast %54 : vector<2x16x16x8xf32> to vector<512x8xf32>
    %c0_64 = arith.constant 0 : index
    %c40 = arith.constant 40 : index
    %56 = vector.load %arg18[%c0_64, %c40] : memref<512x72xf32, #tpu.memory_space<vmem>>, vector<512x8xf32>
    tpu.vector_store %arg18[%c0_64, %c40], %55 {strides = array<i32>} : memref<512x72xf32, #tpu.memory_space<vmem>>, vector<512x8xf32>,
    %c0_65 = arith.constant 0 : index
    %c2_66 = arith.constant 2 : index
    %c0_67 = arith.constant 0 : index
    %c0_68 = arith.constant 0 : index
    %57 = vector.load %arg17[%c0_65, %c2_66, %c0_67, %c0_68] : memref<2x18x18x8xf32, #tpu.memory_space<vmem>>, vector<2x16x16x8xf32>
    %58 = vector.shape_cast %57 : vector<2x16x16x8xf32> to vector<512x8xf32>
    %c0_69 = arith.constant 0 : index
    %c48 = arith.constant 48 : index
    %59 = vector.load %arg18[%c0_69, %c48] : memref<512x72xf32, #tpu.memory_space<vmem>>, vector<512x8xf32>
    tpu.vector_store %arg18[%c0_69, %c48], %58 {strides = array<i32>} : memref<512x72xf32, #tpu.memory_space<vmem>>, vector<512x8xf32>,
    %c0_70 = arith.constant 0 : index
    %c2_71 = arith.constant 2 : index
    %c1_72 = arith.constant 1 : index
    %c0_73 = arith.constant 0 : index
    %60 = vector.load %arg17[%c0_70, %c2_71, %c1_72, %c0_73] : memref<2x18x18x8xf32, #tpu.memory_space<vmem>>, vector<2x16x16x8xf32>
    %61 = vector.shape_cast %60 : vector<2x16x16x8xf32> to vector<512x8xf32>
    %c0_74 = arith.constant 0 : index
    %c56 = arith.constant 56 : index
    %62 = vector.load %arg18[%c0_74, %c56] : memref<512x72xf32, #tpu.memory_space<vmem>>, vector<512x8xf32>
    tpu.vector_store %arg18[%c0_74, %c56], %61 {strides = array<i32>} : memref<512x72xf32, #tpu.memory_space<vmem>>, vector<512x8xf32>,
    %c0_75 = arith.constant 0 : index
    %c2_76 = arith.constant 2 : index
    %c2_77 = arith.constant 2 : index
    %c0_78 = arith.constant 0 : index
    %63 = vector.load %arg17[%c0_75, %c2_76, %c2_77, %c0_78] : memref<2x18x18x8xf32, #tpu.memory_space<vmem>>, vector<2x16x16x8xf32>
    %64 = vector.shape_cast %63 : vector<2x16x16x8xf32> to vector<512x8xf32>
    %c0_79 = arith.constant 0 : index
    %c64 = arith.constant 64 : index
    %65 = vector.load %arg18[%c0_79, %c64] : memref<512x72xf32, #tpu.memory_space<vmem>>, vector<512x8xf32>
    tpu.vector_store %arg18[%c0_79, %c64], %64 {strides = array<i32>} : memref<512x72xf32, #tpu.memory_space<vmem>>, vector<512x8xf32>,
    %c0_80 = arith.constant 0 : index
    %c0_81 = arith.constant 0 : index
    %66 = vector.load %arg18[%c0_80, %c0_81] : memref<512x72xf32, #tpu.memory_space<vmem>>, vector<512x72xf32>
    %67 = arith.truncf %66 : vector<512x72xf32> to vector<512x72xbf16>
    %c0_82 = arith.constant 0 : index
    %c0_83 = arith.constant 0 : index
    %68 = vector.load %arg5[%c0_82, %c0_83] : memref<72x8xbf16, #tpu.memory_space<vmem>>, vector<72x8xbf16>
    %cst_84 = arith.constant dense<0.000000e+00> : vector<512x8xf32>
    %69 = tpu.matmul %67, %68, %cst_84 {dimension_numbers = #tpu.dot_dimension_numbers<[1], [0], [0], [1], [0, 0, 1, 1], [], []>} : vector<512x72xbf16>, vector<72x8xbf16>, vector<512x8xf32> -> vector<512x8xf32>
    %cst_85 = arith.constant dense<0.000000e+00> : vector<8xf32>
    %70 = vector.multi_reduction <add>, %69, %cst_85 [0] : vector<512x8xf32> to vector<8xf32>
    %71 = vector.shape_cast %70 : vector<8xf32> to vector<1x8xf32>
    %cst_86 = arith.constant 0.001953125 : f32
    %72 = vector.broadcast %cst_86 : f32 to vector<1x8xf32>
    %73 = arith.mulf %71, %72 : vector<1x8xf32>
    %74 = arith.mulf %69, %69 : vector<512x8xf32>
    %cst_87 = arith.constant dense<0.000000e+00> : vector<8xf32>
    %75 = vector.multi_reduction <add>, %74, %cst_87 [0] : vector<512x8xf32> to vector<8xf32>
    %76 = vector.shape_cast %75 : vector<8xf32> to vector<1x8xf32>
    %cst_88 = arith.constant 0.001953125 : f32
    %77 = vector.broadcast %cst_88 : f32 to vector<1x8xf32>
    %78 = arith.mulf %76, %77 : vector<1x8xf32>
    %79 = arith.mulf %73, %73 : vector<1x8xf32>
    %80 = arith.subf %78, %79 : vector<1x8xf32>
    %c0_89 = arith.constant 0 : index
    %c0_90 = arith.constant 0 : index
    %81 = vector.load %arg6[%c0_89, %c0_90] : memref<1x8xf32, #tpu.memory_space<vmem>>, vector<1x8xf32>
    %cst_91 = arith.constant 9.99999974E-6 : f32
    %82 = vector.broadcast %cst_91 : f32 to vector<1x8xf32>
    %83 = arith.addf %80, %82 : vector<1x8xf32>
    %84 = math.rsqrt %83 : vector<1x8xf32>
    %85 = arith.mulf %81, %84 : vector<1x8xf32>
    %c0_92 = arith.constant 0 : index
    %c0_93 = arith.constant 0 : index
    %86 = vector.load %arg7[%c0_92, %c0_93] : memref<1x8xf32, #tpu.memory_space<vmem>>, vector<1x8xf32>
    %87 = arith.mulf %73, %85 : vector<1x8xf32>
    %88 = arith.subf %86, %87 : vector<1x8xf32>
    %89 = vector.broadcast %85 : vector<1x8xf32> to vector<512x8xf32>
    %90 = arith.mulf %69, %89 : vector<512x8xf32>
    %91 = vector.broadcast %88 : vector<1x8xf32> to vector<512x8xf32>
    %92 = arith.addf %90, %91 : vector<512x8xf32>
    %cst_94 = arith.constant 0.000000e+00 : f32
    %93 = vector.broadcast %cst_94 : f32 to vector<512x8xf32>
    %94 = arith.maximumf %92, %93 : vector<512x8xf32>
    %95 = arith.truncf %94 : vector<512x8xf32> to vector<512x8xbf16>
    %c0_95 = arith.constant 0 : index
    %c0_96 = arith.constant 0 : index
    %96 = vector.load %arg8[%c0_95, %c0_96] : memref<8x8xbf16, #tpu.memory_space<vmem>>, vector<8x8xbf16>
    %cst_97 = arith.constant dense<0.000000e+00> : vector<512x8xf32>
    %97 = tpu.matmul %95, %96, %cst_97 {dimension_numbers = #tpu.dot_dimension_numbers<[1], [0], [0], [1], [0, 0, 1, 1], [], []>} : vector<512x8xbf16>, vector<8x8xbf16>, vector<512x8xf32> -> vector<512x8xf32>
    %cst_98 = arith.constant dense<0.000000e+00> : vector<8xf32>
    %98 = vector.multi_reduction <add>, %97, %cst_98 [0] : vector<512x8xf32> to vector<8xf32>
    %99 = vector.shape_cast %98 : vector<8xf32> to vector<1x8xf32>
    %cst_99 = arith.constant 0.001953125 : f32
    %100 = vector.broadcast %cst_99 : f32 to vector<1x8xf32>
    %101 = arith.mulf %99, %100 : vector<1x8xf32>
    %102 = arith.mulf %97, %97 : vector<512x8xf32>
    %cst_100 = arith.constant dense<0.000000e+00> : vector<8xf32>
    %103 = vector.multi_reduction <add>, %102, %cst_100 [0] : vector<512x8xf32> to vector<8xf32>
    %104 = vector.shape_cast %103 : vector<8xf32> to vector<1x8xf32>
    %cst_101 = arith.constant 0.001953125 : f32
    %105 = vector.broadcast %cst_101 : f32 to vector<1x8xf32>
    %106 = arith.mulf %104, %105 : vector<1x8xf32>
    %107 = arith.mulf %101, %101 : vector<1x8xf32>
    %108 = arith.subf %106, %107 : vector<1x8xf32>
    %c0_102 = arith.constant 0 : index
    %c0_103 = arith.constant 0 : index
    %109 = vector.load %arg9[%c0_102, %c0_103] : memref<1x8xf32, #tpu.memory_space<vmem>>, vector<1x8xf32>
    %cst_104 = arith.constant 9.99999974E-6 : f32
    %110 = vector.broadcast %cst_104 : f32 to vector<1x8xf32>
    %111 = arith.addf %108, %110 : vector<1x8xf32>
    %112 = math.rsqrt %111 : vector<1x8xf32>
    %113 = arith.mulf %109, %112 : vector<1x8xf32>
    %c0_105 = arith.constant 0 : index
    %c0_106 = arith.constant 0 : index
    %114 = vector.load %arg10[%c0_105, %c0_106] : memref<1x8xf32, #tpu.memory_space<vmem>>, vector<1x8xf32>
    %115 = arith.mulf %101, %113 : vector<1x8xf32>
    %116 = arith.subf %114, %115 : vector<1x8xf32>
    %117 = vector.broadcast %113 : vector<1x8xf32> to vector<512x8xf32>
    %118 = arith.mulf %97, %117 : vector<512x8xf32>
    %119 = vector.broadcast %116 : vector<1x8xf32> to vector<512x8xf32>
    %120 = arith.addf %118, %119 : vector<512x8xf32>
    %121 = vector.shape_cast %120 : vector<512x8xf32> to vector<2x256x8xf32>
    %cst_107 = arith.constant dense<0.000000e+00> : vector<2x8xf32>
    %122 = vector.multi_reduction <add>, %121, %cst_107 [1] : vector<2x256x8xf32> to vector<2x8xf32>
    %cst_108 = arith.constant 2.560000e+02 : f32
    %123 = vector.broadcast %cst_108 : f32 to vector<2x8xf32>
    %124 = arith.divf %122, %123 : vector<2x8xf32>
    %c0_109 = arith.constant 0 : index
    %c0_110 = arith.constant 0 : index
    %125 = vector.load %arg11[%c0_109, %c0_110] : memref<8x2xf32, #tpu.memory_space<vmem>>, vector<8x2xf32>
    %cst_111 = arith.constant dense<0.000000e+00> : vector<2x2xf32>
    %126 = tpu.matmul %124, %125, %cst_111 {dimension_numbers = #tpu.dot_dimension_numbers<[1], [0], [0], [1], [0, 0, 1, 1], [], []>} : vector<2x8xf32>, vector<8x2xf32>, vector<2x2xf32> -> vector<2x2xf32>
    %cst_112 = arith.constant 0.000000e+00 : f32
    %127 = vector.broadcast %cst_112 : f32 to vector<2x2xf32>
    %128 = arith.maximumf %126, %127 : vector<2x2xf32>
    %c0_113 = arith.constant 0 : index
    %c0_114 = arith.constant 0 : index
    %129 = vector.load %arg12[%c0_113, %c0_114] : memref<2x8xf32, #tpu.memory_space<vmem>>, vector<2x8xf32>
    %cst_115 = arith.constant dense<0.000000e+00> : vector<2x8xf32>
    %130 = tpu.matmul %128, %129, %cst_115 {dimension_numbers = #tpu.dot_dimension_numbers<[1], [0], [0], [1], [0, 0, 1, 1], [], []>} : vector<2x2xf32>, vector<2x8xf32>, vector<2x8xf32> -> vector<2x8xf32>
    %cst_116 = arith.constant 0.000000e+00 : f32
    %131 = vector.broadcast %cst_116 : f32 to vector<2x8xf32>
    %132 = arith.subf %131, %130 : vector<2x8xf32>
    %133 = math.exp %132 : vector<2x8xf32>
    %cst_117 = arith.constant 1.000000e+00 : f32
    %134 = vector.broadcast %cst_117 : f32 to vector<2x8xf32>
    %135 = arith.addf %134, %133 : vector<2x8xf32>
    %cst_118 = arith.constant 1.000000e+00 : f32
    %136 = vector.broadcast %cst_118 : f32 to vector<2x8xf32>
    %137 = arith.divf %136, %135 : vector<2x8xf32>
    %138 = vector.shape_cast %137 : vector<2x8xf32> to vector<2x1x8xf32>
    %139 = vector.broadcast %138 : vector<2x1x8xf32> to vector<2x256x8xf32>
    %140 = arith.mulf %121, %139 : vector<2x256x8xf32>
    %141 = vector.shape_cast %140 : vector<2x256x8xf32> to vector<512x8xf32>
    %c0_119 = arith.constant 0 : index
    %c0_120 = arith.constant 0 : index
    %142 = vector.load %arg13[%c0_119, %c0_120] : memref<4x8xbf16, #tpu.memory_space<vmem>>, vector<4x8xbf16>
    %cst_121 = arith.constant dense<0.000000e+00> : vector<512x8xf32>
    %143 = tpu.matmul %1, %142, %cst_121 {dimension_numbers = #tpu.dot_dimension_numbers<[1], [0], [0], [1], [0, 0, 1, 1], [], []>} : vector<512x4xbf16>, vector<4x8xbf16>, vector<512x8xf32> -> vector<512x8xf32>
    %cst_122 = arith.constant dense<0.000000e+00> : vector<8xf32>
    %144 = vector.multi_reduction <add>, %143, %cst_122 [0] : vector<512x8xf32> to vector<8xf32>
    %145 = vector.shape_cast %144 : vector<8xf32> to vector<1x8xf32>
    %cst_123 = arith.constant 0.001953125 : f32
    %146 = vector.broadcast %cst_123 : f32 to vector<1x8xf32>
    %147 = arith.mulf %145, %146 : vector<1x8xf32>
    %148 = arith.mulf %143, %143 : vector<512x8xf32>
    %cst_124 = arith.constant dense<0.000000e+00> : vector<8xf32>
    %149 = vector.multi_reduction <add>, %148, %cst_124 [0] : vector<512x8xf32> to vector<8xf32>
    %150 = vector.shape_cast %149 : vector<8xf32> to vector<1x8xf32>
    %cst_125 = arith.constant 0.001953125 : f32
    %151 = vector.broadcast %cst_125 : f32 to vector<1x8xf32>
    %152 = arith.mulf %150, %151 : vector<1x8xf32>
    %153 = arith.mulf %147, %147 : vector<1x8xf32>
    %154 = arith.subf %152, %153 : vector<1x8xf32>
    %c0_126 = arith.constant 0 : index
    %c0_127 = arith.constant 0 : index
    %155 = vector.load %arg14[%c0_126, %c0_127] : memref<1x8xf32, #tpu.memory_space<vmem>>, vector<1x8xf32>
    %cst_128 = arith.constant 9.99999974E-6 : f32
    %156 = vector.broadcast %cst_128 : f32 to vector<1x8xf32>
    %157 = arith.addf %154, %156 : vector<1x8xf32>
    %158 = math.rsqrt %157 : vector<1x8xf32>
    %159 = arith.mulf %155, %158 : vector<1x8xf32>
    %c0_129 = arith.constant 0 : index
    %c0_130 = arith.constant 0 : index
    %160 = vector.load %arg15[%c0_129, %c0_130] : memref<1x8xf32, #tpu.memory_space<vmem>>, vector<1x8xf32>
    %161 = arith.mulf %147, %159 : vector<1x8xf32>
    %162 = arith.subf %160, %161 : vector<1x8xf32>
    %163 = vector.broadcast %159 : vector<1x8xf32> to vector<512x8xf32>
    %164 = arith.mulf %143, %163 : vector<512x8xf32>
    %165 = vector.broadcast %162 : vector<1x8xf32> to vector<512x8xf32>
    %166 = arith.addf %164, %165 : vector<512x8xf32>
    %167 = arith.addf %166, %141 : vector<512x8xf32>
    %cst_131 = arith.constant 0.000000e+00 : f32
    %168 = vector.broadcast %cst_131 : f32 to vector<512x8xf32>
    %169 = arith.maximumf %167, %168 : vector<512x8xf32>
    %c0_132 = arith.constant 0 : index
    %c0_133 = arith.constant 0 : index
    %170 = vector.load %arg16[%c0_132, %c0_133] : memref<512x8xf32, #tpu.memory_space<vmem>>, vector<512x8xf32>
    tpu.vector_store %arg16[%c0_132, %c0_133], %169 {strides = array<i32>} : memref<512x8xf32, #tpu.memory_space<vmem>>, vector<512x8xf32>,
    return
  }
  func.func @transform_0(%arg0: i32) -> (i32, i32) {
    %c0_i32 = arith.constant 0 : i32
    %c0_i32_0 = arith.constant 0 : i32
    %c0_i32_1 = arith.constant 0 : i32
    return %c0_i32, %c0_i32_0 : i32, i32
  }
  func.func @transform_1(%arg0: i32) -> (i32, i32) {
    %c0_i32 = arith.constant 0 : i32
    %c0_i32_0 = arith.constant 0 : i32
    %c0_i32_1 = arith.constant 0 : i32
    return %c0_i32, %c0_i32_0 : i32, i32
  }
  func.func @transform_2(%arg0: i32) -> (i32, i32) {
    %c0_i32 = arith.constant 0 : i32
    %c0_i32_0 = arith.constant 0 : i32
    %c0_i32_1 = arith.constant 0 : i32
    return %c0_i32, %c0_i32_0 : i32, i32
  }
  func.func @transform_3(%arg0: i32) -> (i32, i32) {
    %c0_i32 = arith.constant 0 : i32
    %c0_i32_0 = arith.constant 0 : i32
    %c0_i32_1 = arith.constant 0 : i32
    return %c0_i32, %c0_i32_0 : i32, i32
  }
  func.func @transform_4(%arg0: i32) -> (i32, i32) {
    %c0_i32 = arith.constant 0 : i32
    %c0_i32_0 = arith.constant 0 : i32
    %c0_i32_1 = arith.constant 0 : i32
    return %c0_i32, %c0_i32_0 : i32, i32
  }
  func.func @transform_5(%arg0: i32) -> (i32, i32) {
    %c0_i32 = arith.constant 0 : i32
    %c0_i32_0 = arith.constant 0 : i32
    %c0_i32_1 = arith.constant 0 : i32
    return %c0_i32, %c0_i32_0 : i32, i32
  }
  func.func @transform_6(%arg0: i32) -> (i32, i32) {
    %c0_i32 = arith.constant 0 : i32
    %c0_i32_0 = arith.constant 0 : i32
    %c0_i32_1 = arith.constant 0 : i32
    return %c0_i32, %c0_i32_0 : i32, i32
  }
  func.func @transform_7(%arg0: i32) -> (i32, i32) {
    %c0_i32 = arith.constant 0 : i32
    %c0_i32_0 = arith.constant 0 : i32
    %c0_i32_1 = arith.constant 0 : i32
    return %c0_i32, %c0_i32_0 : i32, i32
  }
  func.func @transform_8(%arg0: i32) -> (i32, i32) {
    %c0_i32 = arith.constant 0 : i32
    %c0_i32_0 = arith.constant 0 : i32
    %c0_i32_1 = arith.constant 0 : i32
    return %c0_i32, %c0_i32_0 : i32, i32
  }
  func.func @transform_9(%arg0: i32) -> (i32, i32) {
    %c0_i32 = arith.constant 0 : i32
    %c0_i32_0 = arith.constant 0 : i32
    %c0_i32_1 = arith.constant 0 : i32
    return %c0_i32, %c0_i32_0 : i32, i32
  }
  func.func @transform_10(%arg0: i32) -> (i32, i32) {
    %c0_i32 = arith.constant 0 : i32
    %c0_i32_0 = arith.constant 0 : i32
    %c0_i32_1 = arith.constant 0 : i32
    return %c0_i32, %c0_i32_0 : i32, i32
  }
  func.func @transform_11(%arg0: i32) -> (i32, i32) {
    %c0_i32 = arith.constant 0 : i32
    %c0_i32_0 = arith.constant 0 : i32
    %c0_i32_1 = arith.constant 0 : i32
    return %c0_i32, %c0_i32_0 : i32, i32
  }
  func.func @transform_12(%arg0: i32) -> (i32, i32) {
    %c0_i32 = arith.constant 0 : i32
    %c0_i32_0 = arith.constant 0 : i32
    %c0_i32_1 = arith.constant 0 : i32
    return %c0_i32, %c0_i32_0 : i32, i32
  }
  func.func @transform_13(%arg0: i32) -> (i32, i32) {
    %c0_i32 = arith.constant 0 : i32
    %c0_i32_0 = arith.constant 0 : i32
    %c0_i32_1 = arith.constant 0 : i32
    return %c0_i32, %c0_i32_0 : i32, i32
  }
  func.func @transform_14(%arg0: i32) -> (i32, i32) {
    %c0_i32 = arith.constant 0 : i32
    %c0_i32_0 = arith.constant 0 : i32
    %c0_i32_1 = arith.constant 0 : i32
    return %c0_i32, %c0_i32_0 : i32, i32
  }
  func.func @transform_15(%arg0: i32) -> (i32, i32) {
    %c0_i32 = arith.constant 0 : i32
    %c0_i32_0 = arith.constant 0 : i32
    %c0_i32_1 = arith.constant 0 : i32
    return %c0_i32, %c0_i32_0 : i32, i32
  }
}

</mosaic_0001>

<bundles_post_ra>
// kernel: tpu_custom_call.1
= control target key start
LH: loop header
LB: loop body
LE: loop exit
PB: predicated region body
PF: predicated region fallthrough
CT: control target
= control target key end

     0   :  { %vm245_vm0 = vcmask 1041408   ;;  %vm148_vm1 = vcmask 31744   ;;  %vm538_vm2 = vcmask 64512   ;;  %vm1086_vm3 = vcmask 58368   ;;  %s8379_s20 = smov 16   ;;  %s8382_s25 = smov 40   ;;  %s15354_s1 = inlined_call_operand.vmem [shape: bf16[4,8], index: 1, kind: input, shape index: {}]   ;;  %s15355_s0 = inlined_call_operand.vmem [shape: f32[512,4], index: 0, kind: input, shape index: {}]   ;;  %s15356_s2 = inlined_call_operand.vmem [shape: f32[1,8], index: 2, kind: input, shape index: {}]   ;;  %s15357_s3 = inlined_call_operand.vmem [shape: f32[1,8], index: 3, kind: input, shape index: {}]   ;;  %s15358_s4 = inlined_call_operand.vmem [shape: bf16[72,8], index: 4, kind: input, shape index: {}]   ;;  %s15359_s7 = inlined_call_operand.vmem [shape: bf16[8,8], index: 7, kind: input, shape index: {}]   ;;  %s15360_s5 = inlined_call_operand.vmem [shape: f32[1,8], index: 5, kind: input, shape index: {}]   ;;  %s15361_s6 = inlined_call_operand.vmem [shape: f32[1,8], index: 6, kind: input, shape index: {}]   ;;  %s15362_s10 = inlined_call_operand.vmem [shape: f32[8,2], index: 10, kind: input, shape index: {}]   ;;  %s15363_s8 = inlined_call_operand.vmem [shape: f32[1,8], index: 8, kind: input, shape index: {}]   ;;  %s15364_s11 = inlined_call_operand.vmem [shape: f32[2,8], index: 11, kind: input, shape index: {}]   ;;  %s15365_s9 = inlined_call_operand.vmem [shape: f32[1,8], index: 9, kind: input, shape index: {}]   ;;  %s15366_s12 = inlined_call_operand.vmem [shape: bf16[4,8], index: 12, kind: input, shape index: {}]   ;;  %s15367_s13 = inlined_call_operand.vmem [shape: f32[1,8], index: 13, kind: input, shape index: {}]   ;;  %s15368_s14 = inlined_call_operand.vmem [shape: f32[1,8], index: 14, kind: input, shape index: {}]   ;;  %s15369_s15 = inlined_call_operand.vmem [shape: f32[512,8], index: 15, kind: output, shape index: {}]  }
   0x1   :  { %v147_v0 = vld [vmem:[%s15354_s1] sm:$0x3]  ;;  %v52_v2 = vld [vmem:[%s15355_s0 + $0x8] sm:$0xff]  ;;  %v53_v5 = vld [vmem:[%s15355_s0 + $0x10] sm:$0xff]  ;;  %vm1099_vm4 = vcmask 57344   ;;  %vm1676_vm5 = vcmask 130112  }
   0x2   :  { %v51_v1 = vld [vmem:[%s15355_s0] sm:$0xff]  ;;  %8344 = vmatprep.subr.msk.bf16.mxu0 %vm245_vm0, %v147_v0  ;;  %v247_v3 = vsel %vm245_vm0, %v147_v0, 0  ;;  %v54_v6 = vld [vmem:[%s15355_s0 + $0x18] sm:$0xff]  ;;  %v56_v9 = vld [vmem:[%s15355_s0 + $0x28] sm:$0xff]  ;;  %vm2061_vm6 = vcmask 195712   ;;  %s8383_s1 = smov 48  }
   0x3   :  { %v8479_v4 = vpack.c.bf16 %v52_v2, %v51_v1  ;;  %v55_v7 = vld [vmem:[%s15355_s0 + $0x20] sm:$0xff]  ;;  %8053 = vmatpush3.bf16.msra.mxu0 %v247_v3  ;;  %v8490_v8 = vpack.c.bf16 %v54_v6, %v53_v5  ;;  %v57_v11 = vld [vmem:[%s15355_s0 + $0x30] sm:$0xff]  ;;  %v58_v12 = vld [vmem:[%s15355_s0 + $0x38] sm:$0xff]  ;;  %s8384_s26 = smov 56   ;;  %vm4666_vm7 = vcmask 1043456   ;;  %s8385_s16 = smov 64  }
   0x4   :  { %v8497_v10 = vpack.c.bf16 %v56_v9, %v55_v7  ;;  %v59_v13 = vld [vmem:[%s15355_s0 + $0x40] sm:$0xff]  ;;  %v60_v14 = vld [vmem:[%s15355_s0 + $0x48] sm:$0xff]  ;;  %v8515_v15 = vpack.c.bf16 %v58_v12, %v57_v11  ;;  %v61_v17 = vld [vmem:[%s15355_s0 + $0x50] sm:$0xff]  ;;  %vm2446_vm8 = vcmask 261312   ;;  %vm2831_vm9 = vcmask 326912  }
   0x5   :  { %15571 = vst [vmem:[#allocation4_spill] sm:$0xff] %v8479_v4  ;;  %15572 = vst [vmem:[#allocation5_spill] sm:$0xff] %v8490_v8  ;;  %8054 = vmatprep.mubr.msk.bf16.mxu0 %vm148_vm1, %v8479_v4  ;;  %v8517_v16 = vpack.c.bf16 %v60_v14, %v59_v13  ;;  %v62_v18 = vld [vmem:[%s15355_s0 + $0x58] sm:$0xff]  ;;  %v63_v19 = vld [vmem:[%s15355_s0 + $0x60] sm:$0xff]  ;;  %vm3216_vm10 = vcmask 392512   ;;  %vm3602_vm11 = vcmask 458112  }
   0x6   :  { %15573 = vst [vmem:[#allocation6_spill] sm:$0xff] %v8497_v10  ;;  %8055 = vmatmul.mubr.msk.bf16.vlgmr.msra.gmra.mxu0 %vm148_vm1, %v8490_v8  ;;  %15574 = vst [vmem:[#allocation7_spill] sm:$0xff] %v8515_v15  ;;  %v64_v20 = vld [vmem:[%s15355_s0 + $0x68] sm:$0xff]  ;;  %v8535_v21 = vpack.c.bf16 %v62_v18, %v61_v17  ;;  %v65_v23 = vld [vmem:[%s15355_s0 + $0x70] sm:$0xff]  ;;  %vm3987_vm12 = vcmask 523712   ;;  %vm4372_vm13 = vcmask 589312  }
   0x7   :  { %8058 = vmatprep.mubr.msk.bf16.mxu0 %vm148_vm1, %v8497_v10  ;;  %15575 = vst [vmem:[#allocation8_spill] sm:$0xff] %v8517_v16  ;;  %v8537_v22 = vpack.c.bf16 %v64_v20, %v63_v19  ;;  %v66_v24 = vld [vmem:[%s15355_s0 + $0x78] sm:$0xff]  ;;  %v67_v25 = vld [vmem:[%s15355_s0 + $0x80] sm:$0xff]  ;;  %v68_v26 = vld [vmem:[%s15355_s0 + $0x88] sm:$0xff]  ;;  %vm4569_vm14 = vcmask 588800   ;;  %vm8386_vm15 = vmmov 0  }
   0x8   :  { %15576 = vst [vmem:[#allocation9_spill] sm:$0xff] %v8535_v21  ;;  %v8555_v27 = vpack.c.bf16 %v66_v24, %v65_v23  ;;  %v8557_v28 = vpack.c.bf16 %v68_v26, %v67_v25  ;;  %v69_v29 = vld [vmem:[%s15355_s0 + $0x90] sm:$0xff]  ;;  %v70_v30 = vld [vmem:[%s15355_s0 + $0x98] sm:$0xff]  ;;  %v71_v31 = vld [vmem:[%s15355_s0 + $0xa0] sm:$0xff] }
   0x9   :  { %15577 = vst [vmem:[#allocation10_spill] sm:$0xff] %v8537_v22  ;;  %v72_v32 = vld [vmem:[%s15355_s0 + $0xa8] sm:$0xff]  ;;  %v8575_v33 = vpack.c.bf16 %v70_v30, %v69_v29  ;;  %v73_v35 = vld [vmem:[%s15355_s0 + $0xb0] sm:$0xff]  ;;  %v74_v36 = vld [vmem:[%s15355_s0 + $0xb8] sm:$0xff] }
   0xa   :  { %15578 = vst [vmem:[#allocation11_spill] sm:$0xff] %v8555_v27  ;;  %15579 = vst [vmem:[#allocation12_spill] sm:$0xff] %v8557_v28  ;;  %v8577_v34 = vpack.c.bf16 %v72_v32, %v71_v31  ;;  %v75_v37 = vld [vmem:[%s15355_s0 + $0xc0] sm:$0xff]  ;;  %v76_v38 = vld [vmem:[%s15355_s0 + $0xc8] sm:$0xff]  ;;  %v8595_v39 = vpack.c.bf16 %v74_v36, %v73_v35 }
   0xb   :  { %15580 = vst [vmem:[#allocation13_spill] sm:$0xff] %v8575_v33  ;;  %v8597_v40 = vpack.c.bf16 %v76_v38, %v75_v37  ;;  %v77_v41 = vld [vmem:[%s15355_s0 + $0xd0] sm:$0xff]  ;;  %v78_v42 = vld [vmem:[%s15355_s0 + $0xd8] sm:$0xff]  ;;  %v79_v43 = vld [vmem:[%s15355_s0 + $0xe0] sm:$0xff] }
   0xc   :  { %15581 = vst [vmem:[#allocation14_spill] sm:$0xff] %v8577_v34  ;;  %15582 = vst [vmem:[#allocation15_spill] sm:$0xff] %v8595_v39  ;;  %v80_v44 = vld [vmem:[%s15355_s0 + $0xe8] sm:$0xff]  ;;  %v8615_v45 = vpack.c.bf16 %v78_v42, %v77_v41  ;;  %v81_v47 = vld [vmem:[%s15355_s0 + $0xf0] sm:$0xff] }
   0xd   :  { %15583 = vst [vmem:[#allocation16_spill] sm:$0xff] %v8597_v40  ;;  %v8617_v46 = vpack.c.bf16 %v80_v44, %v79_v43  ;;  %v82_v48 = vld [vmem:[%s15355_s0 + $0xf8] sm:$0xff]  ;;  %v83_v49 = vld [vmem:[%s15355_s0 + $0x100] sm:$0xff]  ;;  %v84_v50 = vld [vmem:[%s15355_s0 + $0x108] sm:$0xff] }
   0xe   :  { %8059 = vmatmul.mubr.msk.bf16.gmra.mxu0 %vm148_vm1, %v8515_v15  ;;  %15584 = vst [vmem:[#allocation17_spill] sm:$0xff] %v8615_v45  ;;  %v8635_v51 = vpack.c.bf16 %v82_v48, %v81_v47  ;;  %v8637_v52 = vpack.c.bf16 %v84_v50, %v83_v49  ;;  %v85_v53 = vld [vmem:[%s15355_s0 + $0x110] sm:$0xff]  ;;  %v86_v54 = vld [vmem:[%s15355_s0 + $0x118] sm:$0xff]  ;;  %v87_v55 = vld [vmem:[%s15355_s0 + $0x120] sm:$0xff] }
   0xf   :  { %8062 = vmatprep.mubr.msk.bf16.mxu0 %vm148_vm1, %v8517_v16  ;;  %15585 = vst [vmem:[#allocation18_spill] sm:$0xff] %v8617_v46  ;;  %v88_v56 = vld [vmem:[%s15355_s0 + $0x128] sm:$0xff]  ;;  %v8655_v57 = vpack.c.bf16 %v86_v54, %v85_v53  ;;  %v89_v59 = vld [vmem:[%s15355_s0 + $0x130] sm:$0xff]  ;;  %v90_v60 = vld [vmem:[%s15355_s0 + $0x138] sm:$0xff] }
  0x10   :  { %15586 = vst [vmem:[#allocation19_spill] sm:$0xff] %v8635_v51  ;;  %15587 = vst [vmem:[#allocation20_spill] sm:$0xff] %v8637_v52  ;;  %v8657_v58 = vpack.c.bf16 %v88_v56, %v87_v55  ;;  %v91_v61 = vld [vmem:[%s15355_s0 + $0x140] sm:$0xff]  ;;  %v92_v62 = vld [vmem:[%s15355_s0 + $0x148] sm:$0xff]  ;;  %v8675_v63 = vpack.c.bf16 %v90_v60, %v89_v59 }
  0x11   :  { %15588 = vst [vmem:[#allocation21_spill] sm:$0xff] %v8655_v57  ;;  %v8677_v0 = vpack.c.bf16 %v92_v62, %v91_v61  ;;  %v93_v1 = vld [vmem:[%s15355_s0 + $0x150] sm:$0xff]  ;;  %v94_v2 = vld [vmem:[%s15355_s0 + $0x158] sm:$0xff]  ;;  %v95_v3 = vld [vmem:[%s15355_s0 + $0x160] sm:$0xff] }
  0x12   :  { %15589 = vst [vmem:[#allocation22_spill] sm:$0xff] %v8657_v58  ;;  %15590 = vst [vmem:[#allocation23_spill] sm:$0xff] %v8675_v63  ;;  %v96_v5 = vld [vmem:[%s15355_s0 + $0x168] sm:$0xff]  ;;  %v8695_v6 = vpack.c.bf16 %v94_v2, %v93_v1  ;;  %v97_v9 = vld [vmem:[%s15355_s0 + $0x170] sm:$0xff] }
  0x13   :  { %15591 = vst [vmem:[#allocation24_spill] sm:$0xff] %v8677_v0  ;;  %v8697_v7 = vpack.c.bf16 %v96_v5, %v95_v3  ;;  %v98_v11 = vld [vmem:[%s15355_s0 + $0x178] sm:$0xff]  ;;  %v99_v12 = vld [vmem:[%s15355_s0 + $0x180] sm:$0xff]  ;;  %v100_v13 = vld [vmem:[%s15355_s0 + $0x188] sm:$0xff] }
  0x14   :  { %15592 = vst [vmem:[#allocation25_spill] sm:$0xff] %v8695_v6  ;;  %v8715_v14 = vpack.c.bf16 %v98_v11, %v97_v9  ;;  %v8717_v17 = vpack.c.bf16 %v100_v13, %v99_v12  ;;  %v101_v18 = vld [vmem:[%s15355_s0 + $0x190] sm:$0xff]  ;;  %v102_v19 = vld [vmem:[%s15355_s0 + $0x198] sm:$0xff]  ;;  %v103_v20 = vld [vmem:[%s15355_s0 + $0x1a0] sm:$0xff] }
  0x15   :  { %15593 = vst [vmem:[#allocation26_spill] sm:$0xff] %v8697_v7  ;;  %v104_v23 = vld [vmem:[%s15355_s0 + $0x1a8] sm:$0xff]  ;;  %v8735_v24 = vpack.c.bf16 %v102_v19, %v101_v18  ;;  %v105_v26 = vld [vmem:[%s15355_s0 + $0x1b0] sm:$0xff]  ;;  %v106_v29 = vld [vmem:[%s15355_s0 + $0x1b8] sm:$0xff] }
  0x16   :  { %8063 = vmatmul.mubr.msk.bf16.gmra.mxu0 %vm148_vm1, %v8535_v21  ;;  %15594 = vst [vmem:[#allocation27_spill] sm:$0xff] %v8715_v14  ;;  %15595 = vst [vmem:[#allocation28_spill] sm:$0xff] %v8717_v17  ;;  %v8737_v25 = vpack.c.bf16 %v104_v23, %v103_v20  ;;  %v107_v30 = vld [vmem:[%s15355_s0 + $0x1c0] sm:$0xff]  ;;  %v108_v31 = vld [vmem:[%s15355_s0 + $0x1c8] sm:$0xff]  ;;  %v8755_v32 = vpack.c.bf16 %v106_v29, %v105_v26 }
  0x17   :  { %8066 = vmatprep.mubr.msk.bf16.mxu0 %vm148_vm1, %v8537_v22  ;;  %15596 = vst [vmem:[#allocation29_spill] sm:$0xff] %v8735_v24  ;;  %v8757_v35 = vpack.c.bf16 %v108_v31, %v107_v30  ;;  %v109_v36 = vld [vmem:[%s15355_s0 + $0x1d0] sm:$0xff]  ;;  %v110_v37 = vld [vmem:[%s15355_s0 + $0x1d8] sm:$0xff]  ;;  %v111_v38 = vld [vmem:[%s15355_s0 + $0x1e0] sm:$0xff] }
  0x18   :  { %15597 = vst [vmem:[#allocation30_spill] sm:$0xff] %v8737_v25  ;;  %15598 = vst [vmem:[#allocation31_spill] sm:$0xff] %v8755_v32  ;;  %v112_v41 = vld [vmem:[%s15355_s0 + $0x1e8] sm:$0xff]  ;;  %v8775_v42 = vpack.c.bf16 %v110_v37, %v109_v36  ;;  %v113_v44 = vld [vmem:[%s15355_s0 + $0x1f0] sm:$0xff] }
  0x19   :  { %15599 = vst [vmem:[#allocation32_spill] sm:$0xff] %v8757_v35  ;;  %v8777_v43 = vpack.c.bf16 %v112_v41, %v111_v38  ;;  %v114_v47 = vld [vmem:[%s15355_s0 + $0x1f8] sm:$0xff]  ;;  %s8378_s0 = smov 8  }
  0x1a   :  { %15600 = vst [vmem:[#allocation33_spill] sm:$0xff] %v8775_v42  ;;  %v8789_v48 = vpack.c.bf16 %v114_v47, %v113_v44 }
  0x1b   :  { %15601 = vst [vmem:[#allocation34_spill] sm:$0xff] %v8777_v43 }
  0x1c   :  { %15602 = vst [vmem:[#allocation35_spill] sm:$0xff] %v8789_v48 }
  0x1e   :  { %8067 = vmatmul.mubr.msk.bf16.gmra.mxu0 %vm148_vm1, %v8555_v27 }
  0x1f   :  { %8070 = vmatprep.mubr.msk.bf16.mxu0 %vm148_vm1, %v8557_v28 }
  0x26   :  { %8071 = vmatmul.mubr.msk.bf16.gmra.mxu0 %vm148_vm1, %v8575_v33 }
  0x27   :  { %8074 = vmatprep.mubr.msk.bf16.mxu0 %vm148_vm1, %v8577_v34 }
  0x2e   :  { %8075 = vmatmul.mubr.msk.bf16.gmra.mxu0 %vm148_vm1, %v8595_v39 }
  0x2f   :  { %8078 = vmatprep.mubr.msk.bf16.mxu0 %vm148_vm1, %v8597_v40 }
  0x36   :  { %8079 = vmatmul.mubr.msk.bf16.gmra.mxu0 %vm148_vm1, %v8615_v45  ;;  %v15603_v45 = vmov 0.0  }
  0x37   :  { %8082 = vmatprep.mubr.msk.bf16.mxu0 %vm148_vm1, %v8617_v46  ;;  %1087 = vst.msk [vmem:[#allocation2 + $0x10] sm:$0x3] %vm1086_vm3, %v15603_v45  ;;  %1090 = vst.msk [vmem:[#allocation2 + $0x1c0] sm:$0x3] %vm1086_vm3, %v15603_v45 }
  0x38   :  { %1094 = vst.msk [vmem:[#allocation2 + $0x1a8] sm:$0x3] %vm1086_vm3, %v15603_v45  ;;  %1097 = vst.msk [vmem:[#allocation2 + $0x358] sm:$0x3] %vm1086_vm3, %v15603_v45  ;;  %vm6550_vm3 = vcmask 1041409  }
  0x39   :  { %1100 = vst.msk [vmem:[#allocation2 + $0x18] sm:$0x1] %vm1099_vm4, %v15603_v45  ;;  %1101 = vst.msk [vmem:[#allocation2 + $0x30] sm:$0x1] %vm1099_vm4, %v15603_v45 }
  0x3a   :  { %1102 = vst.msk [vmem:[#allocation2 + $0x48] sm:$0x1] %vm1099_vm4, %v15603_v45  ;;  %1103 = vst.msk [vmem:[#allocation2 + $0x60] sm:$0x1] %vm1099_vm4, %v15603_v45 }
  0x3b   :  { %1104 = vst.msk [vmem:[#allocation2 + $0x78] sm:$0x1] %vm1099_vm4, %v15603_v45  ;;  %1105 = vst.msk [vmem:[#allocation2 + $0x90] sm:$0x1] %vm1099_vm4, %v15603_v45 }
  0x3c   :  { %1106 = vst.msk [vmem:[#allocation2 + $0xa8] sm:$0x1] %vm1099_vm4, %v15603_v45  ;;  %1107 = vst.msk [vmem:[#allocation2 + $0xc0] sm:$0x1] %vm1099_vm4, %v15603_v45 }
  0x3d   :  { %1108 = vst.msk [vmem:[#allocation2 + $0xd8] sm:$0x1] %vm1099_vm4, %v15603_v45  ;;  %1109 = vst.msk [vmem:[#allocation2 + $0xf0] sm:$0x1] %vm1099_vm4, %v15603_v45 }
  0x3e   :  { %8083 = vmatmul.mubr.msk.bf16.gmra.mxu0 %vm148_vm1, %v8635_v51  ;;  %1110 = vst.msk [vmem:[#allocation2 + $0x108] sm:$0x1] %vm1099_vm4, %v15603_v45  ;;  %1111 = vst.msk [vmem:[#allocation2 + $0x120] sm:$0x1] %vm1099_vm4, %v15603_v45 }
  0x3f   :  { %8086 = vmatprep.mubr.msk.bf16.mxu0 %vm148_vm1, %v8637_v52  ;;  %1112 = vst.msk [vmem:[#allocation2 + $0x138] sm:$0x1] %vm1099_vm4, %v15603_v45  ;;  %1113 = vst.msk [vmem:[#allocation2 + $0x150] sm:$0x1] %vm1099_vm4, %v15603_v45 }
  0x40   :  { %1114 = vst.msk [vmem:[#allocation2 + $0x168] sm:$0x1] %vm1099_vm4, %v15603_v45  ;;  %1115 = vst.msk [vmem:[#allocation2 + $0x180] sm:$0x1] %vm1099_vm4, %v15603_v45 }
  0x41   :  { %1116 = vst.msk [vmem:[#allocation2 + $0x1c8] sm:$0x1] %vm1099_vm4, %v15603_v45  ;;  %1117 = vst.msk [vmem:[#allocation2 + $0x1e0] sm:$0x1] %vm1099_vm4, %v15603_v45 }
  0x42   :  { %1118 = vst.msk [vmem:[#allocation2 + $0x1f8] sm:$0x1] %vm1099_vm4, %v15603_v45  ;;  %1119 = vst.msk [vmem:[#allocation2 + $0x210] sm:$0x1] %vm1099_vm4, %v15603_v45 }
  0x43   :  { %1120 = vst.msk [vmem:[#allocation2 + $0x228] sm:$0x1] %vm1099_vm4, %v15603_v45  ;;  %1121 = vst.msk [vmem:[#allocation2 + $0x240] sm:$0x1] %vm1099_vm4, %v15603_v45 }
  0x44   :  { %1122 = vst.msk [vmem:[#allocation2 + $0x258] sm:$0x1] %vm1099_vm4, %v15603_v45  ;;  %1123 = vst.msk [vmem:[#allocation2 + $0x270] sm:$0x1] %vm1099_vm4, %v15603_v45 }
  0x45   :  { %1124 = vst.msk [vmem:[#allocation2 + $0x288] sm:$0x1] %vm1099_vm4, %v15603_v45  ;;  %1125 = vst.msk [vmem:[#allocation2 + $0x2a0] sm:$0x1] %vm1099_vm4, %v15603_v45 }
  0x46   :  { %8087 = vmatmul.mubr.msk.bf16.gmra.mxu0 %vm148_vm1, %v8655_v57  ;;  %1126 = vst.msk [vmem:[#allocation2 + $0x2b8] sm:$0x1] %vm1099_vm4, %v15603_v45  ;;  %1127 = vst.msk [vmem:[#allocation2 + $0x2d0] sm:$0x1] %vm1099_vm4, %v15603_v45 }
  0x47   :  { %8090 = vmatprep.mubr.msk.bf16.mxu0 %vm148_vm1, %v8657_v58  ;;  %1128 = vst.msk [vmem:[#allocation2 + $0x2e8] sm:$0x1] %vm1099_vm4, %v15603_v45  ;;  %1129 = vst.msk [vmem:[#allocation2 + $0x300] sm:$0x1] %vm1099_vm4, %v15603_v45 }
  0x48   :  { %1130 = vst.msk [vmem:[#allocation2 + $0x318] sm:$0x1] %vm1099_vm4, %v15603_v45  ;;  %1131 = vst.msk [vmem:[#allocation2 + $0x330] sm:$0x1] %vm1099_vm4, %v15603_v45 }
  0x49   :  { %1132 = vst.msk [vmem:[#allocation2 + $0x29] sm:$0x1] %vm1099_vm4, %v15603_v45  ;;  %1133 = vst.msk [vmem:[#allocation2 + $0x41] sm:$0x1] %vm1099_vm4, %v15603_v45 }
  0x4a   :  { %1134 = vst.msk [vmem:[#allocation2 + $0x59] sm:$0x1] %vm1099_vm4, %v15603_v45  ;;  %1135 = vst.msk [vmem:[#allocation2 + $0x71] sm:$0x1] %vm1099_vm4, %v15603_v45 }
  0x4b   :  { %1136 = vst.msk [vmem:[#allocation2 + $0x89] sm:$0x1] %vm1099_vm4, %v15603_v45  ;;  %1137 = vst.msk [vmem:[#allocation2 + $0xa1] sm:$0x1] %vm1099_vm4, %v15603_v45 }
  0x4c   :  { %1138 = vst.msk [vmem:[#allocation2 + $0xb9] sm:$0x1] %vm1099_vm4, %v15603_v45  ;;  %1139 = vst.msk [vmem:[#allocation2 + $0xd1] sm:$0x1] %vm1099_vm4, %v15603_v45 }
  0x4d   :  { %1140 = vst.msk [vmem:[#allocation2 + $0xe9] sm:$0x1] %vm1099_vm4, %v15603_v45  ;;  %1141 = vst.msk [vmem:[#allocation2 + $0x101] sm:$0x1] %vm1099_vm4, %v15603_v45 }
  0x4e   :  { %8091 = vmatmul.mubr.msk.bf16.gmra.mxu0 %vm148_vm1, %v8675_v63  ;;  %1142 = vst.msk [vmem:[#allocation2 + $0x119] sm:$0x1] %vm1099_vm4, %v15603_v45  ;;  %1143 = vst.msk [vmem:[#allocation2 + $0x131] sm:$0x1] %vm1099_vm4, %v15603_v45 }
  0x4f   :  { %8094 = vmatprep.mubr.msk.bf16.mxu0 %vm148_vm1, %v8677_v0  ;;  %1144 = vst.msk [vmem:[#allocation2 + $0x149] sm:$0x1] %vm1099_vm4, %v15603_v45  ;;  %1145 = vst.msk [vmem:[#allocation2 + $0x161] sm:$0x1] %vm1099_vm4, %v15603_v45 }
  0x50   :  { %1146 = vst.msk [vmem:[#allocation2 + $0x179] sm:$0x1] %vm1099_vm4, %v15603_v45  ;;  %1147 = vst.msk [vmem:[#allocation2 + $0x191] sm:$0x1] %vm1099_vm4, %v15603_v45 }
  0x51   :  { %1148 = vst.msk [vmem:[#allocation2 + $0x1d9] sm:$0x1] %vm1099_vm4, %v15603_v45  ;;  %1149 = vst.msk [vmem:[#allocation2 + $0x1f1] sm:$0x1] %vm1099_vm4, %v15603_v45 }
  0x52   :  { %1150 = vst.msk [vmem:[#allocation2 + $0x209] sm:$0x1] %vm1099_vm4, %v15603_v45  ;;  %1151 = vst.msk [vmem:[#allocation2 + $0x221] sm:$0x1] %vm1099_vm4, %v15603_v45 }
  0x53   :  { %1152 = vst.msk [vmem:[#allocation2 + $0x239] sm:$0x1] %vm1099_vm4, %v15603_v45  ;;  %1153 = vst.msk [vmem:[#allocation2 + $0x251] sm:$0x1] %vm1099_vm4, %v15603_v45 }
  0x54   :  { %1154 = vst.msk [vmem:[#allocation2 + $0x269] sm:$0x1] %vm1099_vm4, %v15603_v45  ;;  %1155 = vst.msk [vmem:[#allocation2 + $0x281] sm:$0x1] %vm1099_vm4, %v15603_v45 }
  0x55   :  { %1156 = vst.msk [vmem:[#allocation2 + $0x299] sm:$0x1] %vm1099_vm4, %v15603_v45  ;;  %1157 = vst.msk [vmem:[#allocation2 + $0x2b1] sm:$0x1] %vm1099_vm4, %v15603_v45 }
  0x56   :  { %8095 = vmatmul.mubr.msk.bf16.gmra.mxu0 %vm148_vm1, %v8695_v6  ;;  %v15381_v6 = vmov 0.0   ;;  %1158 = vst.msk [vmem:[#allocation2 + $0x2c9] sm:$0x1] %vm1099_vm4, %v15603_v45  ;;  %1159 = vst.msk [vmem:[#allocation2 + $0x2e1] sm:$0x1] %vm1099_vm4, %v15603_v45 }
  0x57   :  { %8098 = vmatprep.mubr.msk.bf16.mxu0 %vm148_vm1, %v8697_v7  ;;  %1084 = vst.msk [vmem:[#allocation2] sm:$0xff] %vm538_vm2, %v15381_v6  ;;  %1085 = vst.msk [vmem:[#allocation2 + $0x8] sm:$0xff] %vm538_vm2, %v15381_v6 }
  0x58   :  { %1088 = vst.msk [vmem:[#allocation2 + $0x1b0] sm:$0xff] %vm538_vm2, %v15381_v6  ;;  %1089 = vst.msk [vmem:[#allocation2 + $0x1b8] sm:$0xff] %vm538_vm2, %v15381_v6 }
  0x59   :  { %1092 = vst.msk [vmem:[#allocation2 + $0x198] sm:$0xff] %vm538_vm2, %v15381_v6  ;;  %1093 = vst.msk [vmem:[#allocation2 + $0x1a0] sm:$0xff] %vm538_vm2, %v15381_v6 }
  0x5a   :  { %1095 = vst.msk [vmem:[#allocation2 + $0x348] sm:$0xff] %vm538_vm2, %v15381_v6  ;;  %1096 = vst.msk [vmem:[#allocation2 + $0x350] sm:$0xff] %vm538_vm2, %v15381_v6 }
  0x5b   :  { %1160 = vst.msk [vmem:[#allocation2 + $0x2f9] sm:$0x1] %vm1099_vm4, %v15603_v45  ;;  %1161 = vst.msk [vmem:[#allocation2 + $0x311] sm:$0x1] %vm1099_vm4, %v15603_v45 }
  0x5c   :  { %1162 = vst.msk [vmem:[#allocation2 + $0x329] sm:$0x1] %vm1099_vm4, %v15603_v45  ;;  %1163 = vst.msk [vmem:[#allocation2 + $0x341] sm:$0x1] %vm1099_vm4, %v15603_v45  ;;  %vm6626_vm4 = vcmask 15360  }
  0x5e   :  { %8099 = vmatmul.mubr.msk.bf16.gmra.mxu0 %vm148_vm1, %v8715_v14  ;;  %v1742_v8 = vld [vmem:[#allocation2 + $0xa] sm:$0xff] }
  0x5f   :  { %8102 = vmatprep.mubr.msk.bf16.mxu0 %vm148_vm1, %v8717_v17  ;;  %1871 = vrot.lane.b32.xlu1 %v1742_v8, %s8379_s20 }
  0x66   :  { %8103 = vmatmul.mubr.msk.bf16.gmra.mxu0 %vm148_vm1, %v8735_v24 }
  0x67   :  { %8106 = vmatprep.mubr.msk.bf16.mxu0 %vm148_vm1, %v8737_v25 }
  0x6e   :  { %8107 = vmatmul.mubr.msk.bf16.gmra.mxu0 %vm148_vm1, %v8755_v32 }
  0x6f   :  { %8110 = vmatprep.mubr.msk.bf16.mxu0 %vm148_vm1, %v8757_v35 }
  0x76   :  { %8111 = vmatmul.mubr.msk.bf16.gmra.mxu0 %vm148_vm1, %v8775_v42 }
  0x77   :  { %8114 = vmatprep.mubr.msk.bf16.mxu0 %vm148_vm1, %v8777_v43 }
  0x7e   :  { %8115 = vmatmul.mubr.msk.bf16.gmra.mxu0 %vm148_vm1, %v8789_v48 }
  0xc6   :  { %v8793_v49 = vpop.f32.mrf.mxu0 }
  0xc7   :  { %v675_v56 = vmul.f32 %v8793_v49, %v8793_v49  ;;  %v542_v2 = vsel %vm538_vm2, %v8793_v49, 0.0 }
  0xc8   :  { %v8795_v50 = vpop.f32.mrf.mxu0 }
  0xc9   :  { %v673_v54 = vmul.f32 %v8795_v50, %v8795_v50  ;;  %v539_v59 = vsel %vm538_vm2, %v8795_v50, 0.0  ;;  %v740_v18 = vsel %vm538_vm2, %v675_v56, 0.0 }
  0xca   :  { %v8797_v53 = vpop.f32.mrf.mxu0 }
  0xcb   :  { %v737_v3 = vsel %vm538_vm2, %v673_v54, 0.0  ;;  %v676_v5 = vmul.f32 %v8797_v53, %v8797_v53  ;;  %v544_v19 = vsel %vm538_vm2, %v8797_v53, 0.0 }
  0xcc   :  { %v8801_v55 = vpop.f32.mrf.mxu0 }
  0xcd   :  { %v540_v60 = vsel %vm538_vm2, %v8801_v55, 0.0  ;;  %v674_v61 = vmul.f32 %v8801_v55, %v8801_v55  ;;  %v742_v30 = vsel %vm538_vm2, %v676_v5, 0.0 }
  0xce   :  { %v541_v62 = vadd.f32 %v540_v60, %v539_v59  ;;  %v8811_v1 = vpop.f32.mrf.mxu0 }
  0xcf   :  { %v738_v9 = vsel %vm538_vm2, %v674_v61, 0.0  ;;  %v679_v41 = vmul.f32 %v8811_v1, %v8811_v1  ;;  %v550_v61 = vsel %vm538_vm2, %v8811_v1, 0.0 }
  0xd0   :  { %v739_v11 = vadd.f32 %v738_v9, %v737_v3  ;;  %v8819_v12 = vpop.f32.mrf.mxu0  ;;  %v543_v13 = vadd.f32 %v542_v2, %v541_v62 }
  0xd1   :  { %v677_v20 = vmul.f32 %v8819_v12, %v8819_v12  ;;  %v546_v31 = vsel %vm538_vm2, %v8819_v12, 0.0 }
  0xd2   :  { %v545_v23 = vadd.f32 %v544_v19, %v543_v13  ;;  %v741_v26 = vadd.f32 %v740_v18, %v739_v11  ;;  %v8826_v29 = vpop.f32.mrf.mxu0  ;;  %v748_v11 = vsel %vm538_vm2, %v679_v41, 0.0 }
  0xd3   :  { %v744_v44 = vsel %vm538_vm2, %v677_v20, 0.0  ;;  %v680_v62 = vmul.f32 %v8826_v29, %v8826_v29  ;;  %v552_v13 = vsel %vm538_vm2, %v8826_v29, 0.0 }
  0xd4   :  { %v547_v36 = vadd.f32 %v546_v31, %v545_v23  ;;  %v743_v37 = vadd.f32 %v742_v30, %v741_v26  ;;  %v8831_v38 = vpop.f32.mrf.mxu0 }
  0xd5   :  { %v548_v47 = vsel %vm538_vm2, %v8831_v38, 0.0  ;;  %v678_v54 = vmul.f32 %v8831_v38, %v8831_v38  ;;  %v750_v26 = vsel %vm538_vm2, %v680_v62, 0.0 }
  0xd6   :  { %v745_v56 = vadd.f32 %v744_v44, %v743_v37  ;;  %v549_v59 = vadd.f32 %v548_v47, %v547_v36  ;;  %v8840_v60 = vpop.f32.mrf.mxu0 }
  0xd7   :  { %v746_v2 = vsel %vm538_vm2, %v678_v54, 0.0  ;;  %v683_v41 = vmul.f32 %v8840_v60, %v8840_v60  ;;  %v558_v62 = vsel %vm538_vm2, %v8840_v60, 0.0 }
  0xd8   :  { %v747_v3 = vadd.f32 %v746_v2, %v745_v56  ;;  %v8847_v5 = vpop.f32.mrf.mxu0  ;;  %v551_v9 = vadd.f32 %v550_v61, %v549_v59 }
  0xd9   :  { %v681_v18 = vmul.f32 %v8847_v5, %v8847_v5  ;;  %v554_v30 = vsel %vm538_vm2, %v8847_v5, 0.0 }
  0xda   :  { %v553_v19 = vadd.f32 %v552_v13, %v551_v9  ;;  %v749_v20 = vadd.f32 %v748_v11, %v747_v3  ;;  %v8854_v23 = vpop.f32.mrf.mxu0 }
  0xdb   :  { %v752_v44 = vsel %vm538_vm2, %v681_v18, 0.0  ;;  %v684_v2 = vmul.f32 %v8854_v23, %v8854_v23  ;;  %v756_v18 = vsel %vm538_vm2, %v683_v41, 0.0 }
  0xdc   :  { %v555_v31 = vadd.f32 %v554_v30, %v553_v19  ;;  %v751_v36 = vadd.f32 %v750_v26, %v749_v20  ;;  %v8859_v37 = vpop.f32.mrf.mxu0  ;;  %v560_v19 = vsel %vm538_vm2, %v8854_v23, 0.0 }
  0xdd   :  { %v556_v47 = vsel %vm538_vm2, %v8859_v37, 0.0  ;;  %v682_v54 = vmul.f32 %v8859_v37, %v8859_v37 }
  0xde   :  { %v753_v56 = vadd.f32 %v752_v44, %v751_v36  ;;  %v557_v59 = vadd.f32 %v556_v47, %v555_v31  ;;  %v8868_v61 = vpop.f32.mrf.mxu0  ;;  %v758_v36 = vsel %vm538_vm2, %v684_v2, 0.0 }
  0xdf   :  { %v754_v3 = vsel %vm538_vm2, %v682_v54, 0.0  ;;  %v687_v41 = vmul.f32 %v8868_v61, %v8868_v61 }
  0xe0   :  { %v755_v9 = vadd.f32 %v754_v3, %v753_v56  ;;  %v8875_v11 = vpop.f32.mrf.mxu0  ;;  %v559_v13 = vadd.f32 %v558_v62, %v557_v59 }
  0xe1   :  { %v685_v20 = vmul.f32 %v8875_v11, %v8875_v11  ;;  %v562_v44 = vsel %vm538_vm2, %v8875_v11, 0.0 }
  0xe2   :  { %v561_v26 = vadd.f32 %v560_v19, %v559_v13  ;;  %v757_v30 = vadd.f32 %v756_v18, %v755_v9  ;;  %v8882_v31 = vpop.f32.mrf.mxu0  ;;  %v566_v18 = vsel %vm538_vm2, %v8868_v61, 0.0 }
  0xe3   :  { %v760_v59 = vsel %vm538_vm2, %v685_v20, 0.0  ;;  %v688_v19 = vmul.f32 %v8882_v31, %v8882_v31 }
  0xe4   :  { %v563_v47 = vadd.f32 %v562_v44, %v561_v26  ;;  %v759_v54 = vadd.f32 %v758_v36, %v757_v30  ;;  %v8887_v56 = vpop.f32.mrf.mxu0  ;;  %v764_v44 = vsel %vm538_vm2, %v687_v41, 0.0 }
  0xe5   :  { %v564_v62 = vsel %vm538_vm2, %v8887_v56, 0.0  ;;  %v686_v3 = vmul.f32 %v8887_v56, %v8887_v56  ;;  %v766_v43 = vsel %vm538_vm2, %v688_v19, 0.0 }
  0xe6   :  { %v761_v9 = vadd.f32 %v760_v59, %v759_v54  ;;  %v565_v2 = vadd.f32 %v564_v62, %v563_v47  ;;  %v8896_v13 = vpop.f32.mrf.mxu0  ;;  %v568_v54 = vsel %vm538_vm2, %v8882_v31, 0.0 }
  0xe7   :  { %v762_v26 = vsel %vm538_vm2, %v686_v3, 0.0  ;;  %v691_v41 = vmul.f32 %v8896_v13, %v8896_v13 }
  0xe8   :  { %v763_v30 = vadd.f32 %v762_v26, %v761_v9  ;;  %v8903_v20 = vpop.f32.mrf.mxu0  ;;  %v567_v36 = vadd.f32 %v566_v18, %v565_v2 }
  0xe9   :  { %v689_v47 = vmul.f32 %v8903_v20, %v8903_v20  ;;  %v570_v3 = vsel %vm538_vm2, %v8903_v20, 0.0  ;;  %v772_v35 = vsel %vm538_vm2, %v691_v41, 0.0 }
  0xea   :  { %v569_v59 = vadd.f32 %v568_v54, %v567_v36  ;;  %v765_v62 = vadd.f32 %v764_v44, %v763_v30  ;;  %v8910_v48 = vpop.f32.mrf.mxu0 }
  0xeb   :  { %v768_v18 = vsel %vm538_vm2, %v689_v47, 0.0 }
  0xec   :  { %v571_v9 = vadd.f32 %v570_v3, %v569_v59  ;;  %v767_v26 = vadd.f32 %v766_v43, %v765_v62  ;;  %v8915_v2 = vpop.f32.mrf.mxu0  ;;  %v574_v43 = vsel %vm538_vm2, %v8896_v13, 0.0  ;;  %v692_v59 = vmul.f32 %v8910_v48, %v8910_v48 }
  0xed   :  { %v572_v36 = vsel %vm538_vm2, %v8915_v2, 0.0  ;;  %v690_v30 = vmul.f32 %v8915_v2, %v8915_v2 }
  0xee   :  { %v769_v44 = vadd.f32 %v768_v18, %v767_v26  ;;  %v573_v19 = vadd.f32 %v572_v36, %v571_v9  ;;  %v8924_v54 = vpop.f32.mrf.mxu0  ;;  %v576_v26 = vsel %vm538_vm2, %v8910_v48, 0.0  ;;  %v774_v25 = vsel %vm538_vm2, %v692_v59, 0.0 }
  0xef   :  { %v770_v62 = vsel %vm538_vm2, %v690_v30, 0.0  ;;  %v695_v41 = vmul.f32 %v8924_v54, %v8924_v54  ;;  %v582_v24 = vsel %vm538_vm2, %v8924_v54, 0.0 }
  0xf0   :  { %v575_v3 = vadd.f32 %v574_v43, %v573_v19  ;;  %v771_v47 = vadd.f32 %v770_v62, %v769_v44  ;;  %v8931_v42 = vpop.f32.mrf.mxu0 }
  0xf1   :  { %v693_v9 = vmul.f32 %v8931_v42, %v8931_v42  ;;  %v578_v30 = vsel %vm538_vm2, %v8931_v42, 0.0  ;;  %v780_v17 = vsel %vm538_vm2, %v695_v41, 0.0 }
  0xf2   :  { %v773_v18 = vadd.f32 %v772_v35, %v771_v47  ;;  %v8938_v36 = vpop.f32.mrf.mxu0  ;;  %v577_v32 = vadd.f32 %v576_v26, %v575_v3 }
  0xf3   :  { %v776_v62 = vsel %vm538_vm2, %v693_v9, 0.0 }
  0xf4   :  { %v8943_v44 = vpop.f32.mrf.mxu0  ;;  %v579_v19 = vadd.f32 %v578_v30, %v577_v32  ;;  %v775_v43 = vadd.f32 %v774_v25, %v773_v18  ;;  %v696_v25 = vmul.f32 %v8938_v36, %v8938_v36 }
  0xf5   :  { %v580_v35 = vsel %vm538_vm2, %v8943_v44, 0.0  ;;  %v694_v3 = vmul.f32 %v8943_v44, %v8943_v44 }
  0xf6   :  { %v581_v47 = vadd.f32 %v580_v35, %v579_v19  ;;  %v777_v59 = vadd.f32 %v776_v62, %v775_v43  ;;  %v8952_v26 = vpop.f32.mrf.mxu0  ;;  %v584_v19 = vsel %vm538_vm2, %v8938_v36, 0.0  ;;  %v782_v7 = vsel %vm538_vm2, %v696_v25, 0.0 }
  0xf7   :  { %v778_v32 = vsel %vm538_vm2, %v694_v3, 0.0  ;;  %v699_v3 = vmul.f32 %v8952_v26, %v8952_v26 }
  0xf8   :  { %v583_v18 = vadd.f32 %v582_v24, %v581_v47  ;;  %v779_v9 = vadd.f32 %v778_v32, %v777_v59  ;;  %v8959_v30 = vpop.f32.mrf.mxu0 }
  0xf9   :  { %v697_v43 = vmul.f32 %v8959_v30, %v8959_v30  ;;  %v586_v24 = vsel %vm538_vm2, %v8959_v30, 0.0 }
  0xfa   :  { %v781_v62 = vadd.f32 %v780_v17, %v779_v9  ;;  %v585_v35 = vadd.f32 %v584_v19, %v583_v18  ;;  %v8966_v14 = vpop.f32.mrf.mxu0 }
  0xfb   :  { %v784_v32 = vsel %vm538_vm2, %v697_v43, 0.0  ;;  %v700_v43 = vmul.f32 %v8966_v14, %v8966_v14 }
  0xfc   :  { %v587_v47 = vadd.f32 %v586_v24, %v585_v35  ;;  %v783_v41 = vadd.f32 %v782_v7, %v781_v62  ;;  %v8973_v59 = vpop.f32.mrf.mxu0  ;;  %v590_v7 = vsel %vm538_vm2, %v8952_v26, 0.0 }
  0xfd   :  { %v588_v17 = vsel %vm538_vm2, %v8973_v59, 0.0  ;;  %v698_v18 = vmul.f32 %v8973_v59, %v8973_v59  ;;  %v790_v58 = vsel %vm538_vm2, %v700_v43, 0.0 }
  0xfe   :  { %v785_v9 = vadd.f32 %v784_v32, %v783_v41  ;;  %v589_v25 = vadd.f32 %v588_v17, %v587_v47  ;;  %v8980_v19 = vpop.f32.mrf.mxu0  ;;  %v788_v41 = vsel %vm538_vm2, %v699_v3, 0.0  ;;  %v592_v32 = vsel %vm538_vm2, %v8966_v14, 0.0 }
  0xff   :  { %v786_v62 = vsel %vm538_vm2, %v698_v18, 0.0  ;;  %v703_v3 = vmul.f32 %v8980_v19, %v8980_v19 }
 0x100   :  { %v591_v35 = vadd.f32 %v590_v7, %v589_v25  ;;  %v787_v24 = vadd.f32 %v786_v62, %v785_v9  ;;  %v9003_v47 = vpop.f32.mrf.mxu0 }
 0x101   :  { %v701_v17 = vmul.f32 %v9003_v47, %v9003_v47  ;;  %v594_v18 = vsel %vm538_vm2, %v9003_v47, 0.0 }
 0x102   :  { %v789_v6 = vadd.f32 %v788_v41, %v787_v24  ;;  %v593_v0 = vadd.f32 %v592_v32, %v591_v35  ;;  %v9010_v63 = vpop.f32.mrf.mxu0  ;;  %v1356_v41 = vld [vmem:[#allocation2 + $0x1] sm:$0xff] }
 0x103   :  { %v792_v62 = vsel %vm538_vm2, %v701_v17, 0.0  ;;  %1484 = vrot.lane.b32.xlu0 %v1356_v41, %s8378_s0 }
 0x104   :  { %v595_v9 = vadd.f32 %v594_v18, %v593_v0  ;;  %v791_v25 = vadd.f32 %v790_v58, %v789_v6  ;;  %v9015_v7 = vpop.f32.mrf.mxu0  ;;  %v598_v58 = vsel %vm538_vm2, %v8980_v19, 0.0  ;;  %v704_v0 = vmul.f32 %v9010_v63, %v9010_v63 }
 0x105   :  { %v596_v24 = vsel %vm538_vm2, %v9015_v7, 0.0  ;;  %v702_v35 = vmul.f32 %v9015_v7, %v9015_v7 }
 0x106   :  { %v793_v43 = vadd.f32 %v792_v62, %v791_v25  ;;  %v597_v32 = vadd.f32 %v596_v24, %v595_v9  ;;  %v9024_v57 = vpop.f32.mrf.mxu0  ;;  %v796_v25 = vsel %vm538_vm2, %v703_v3, 0.0  ;;  %v600_v9 = vsel %vm538_vm2, %v9010_v63, 0.0 }
 0x107   :  { %v794_v6 = vsel %vm538_vm2, %v702_v35, 0.0  ;;  %v798_v46 = vsel %vm538_vm2, %v704_v0, 0.0 }
 0x108   :  { %v599_v17 = vadd.f32 %v598_v58, %v597_v32  ;;  %v795_v18 = vadd.f32 %v794_v6, %v793_v43  ;;  %v9032_v52 = vpop.f32.mrf.mxu0  ;;  %v707_v43 = vmul.f32 %v9024_v57, %v9024_v57 }
 0x109   :  { %v705_v62 = vmul.f32 %v9032_v52, %v9032_v52  ;;  %v602_v35 = vsel %vm538_vm2, %v9032_v52, 0.0 }
 0x10a   :  { %v797_v24 = vadd.f32 %v796_v25, %v795_v18  ;;  %v601_v41 = vadd.f32 %v600_v9, %v599_v17  ;;  %v9039_v51 = vpop.f32.mrf.mxu0 }
 0x10b   :  { %v800_v6 = vsel %vm538_vm2, %v705_v62, 0.0  ;;  %v708_v62 = vmul.f32 %v9039_v51, %v9039_v51 }
 0x10c   :  { %v603_v32 = vadd.f32 %v602_v35, %v601_v41  ;;  %v799_v3 = vadd.f32 %v798_v46, %v797_v24  ;;  %v9046_v58 = vpop.f32.mrf.mxu0  ;;  %v606_v46 = vsel %vm538_vm2, %v9024_v57, 0.0 }
 0x10d   :  { %v604_v18 = vsel %vm538_vm2, %v9046_v58, 0.0  ;;  %v706_v17 = vmul.f32 %v9046_v58, %v9046_v58  ;;  %v806_v33 = vsel %vm538_vm2, %v708_v62, 0.0 }
 0x10e   :  { %v801_v0 = vadd.f32 %v800_v6, %v799_v3  ;;  %v605_v25 = vadd.f32 %v604_v18, %v603_v32  ;;  %v9053_v9 = vpop.f32.mrf.mxu0  ;;  %v804_v3 = vsel %vm538_vm2, %v707_v43, 0.0  ;;  %v608_v6 = vsel %vm538_vm2, %v9039_v51, 0.0 }
 0x10f   :  { %v802_v24 = vsel %vm538_vm2, %v706_v17, 0.0  ;;  %v711_v43 = vmul.f32 %v9053_v9, %v9053_v9 }
 0x110   :  { %v607_v41 = vadd.f32 %v606_v46, %v605_v25  ;;  %v803_v35 = vadd.f32 %v802_v24, %v801_v0  ;;  %v9064_v32 = vpop.f32.mrf.mxu0 }
 0x111   :  { %v709_v18 = vmul.f32 %v9064_v32, %v9064_v32  ;;  %v610_v17 = vsel %vm538_vm2, %v9064_v32, 0.0  ;;  %v812_v22 = vsel %vm538_vm2, %v711_v43, 0.0 }
 0x112   :  { %v805_v40 = vadd.f32 %v804_v3, %v803_v35  ;;  %v609_v39 = vadd.f32 %v608_v6, %v607_v41  ;;  %v9071_v34 = vpop.f32.mrf.mxu0  ;;  %v1357_v3 = vld [vmem:[#allocation2 + $0x9] sm:$0xff] }
 0x113   :  { %15604 = vst [vmem:[#allocation36_spill] sm:$0xff] %v9071_v34  ;;  %v808_v24 = vsel %vm538_vm2, %v709_v18, 0.0  ;;  %1486 = vrot.lane.b32.xlu0 %v1357_v3, %s8378_s0 }
 0x114   :  { %v611_v0 = vadd.f32 %v610_v17, %v609_v39  ;;  %v807_v25 = vadd.f32 %v806_v33, %v805_v40  ;;  %v9076_v46 = vpop.f32.mrf.mxu0  ;;  %v614_v33 = vsel %vm538_vm2, %v9053_v9, 0.0  ;;  %v712_v39 = vmul.f32 %v9071_v34, %v9071_v34 }
 0x115   :  { %v612_v35 = vsel %vm538_vm2, %v9076_v46, 0.0  ;;  %v710_v41 = vmul.f32 %v9076_v46, %v9076_v46 }
 0x116   :  { %v809_v62 = vadd.f32 %v808_v24, %v807_v25  ;;  %v613_v6 = vadd.f32 %v612_v35, %v611_v0  ;;  %v9085_v28 = vpop.f32.mrf.mxu0  ;;  %v616_v0 = vsel %vm538_vm2, %v9071_v34, 0.0  ;;  %v814_v21 = vsel %vm538_vm2, %v712_v39, 0.0 }
 0x117   :  { %15605 = vst [vmem:[#allocation37_spill] sm:$0xff] %v9085_v28  ;;  %v810_v40 = vsel %vm538_vm2, %v710_v41, 0.0  ;;  %v715_v43 = vmul.f32 %v9085_v28, %v9085_v28 }
 0x118   :  { %v615_v18 = vadd.f32 %v614_v33, %v613_v6  ;;  %v811_v17 = vadd.f32 %v810_v40, %v809_v62  ;;  %v9093_v27 = vpop.f32.mrf.mxu0 }
 0x119   :  { %15606 = vst [vmem:[#allocation38_spill] sm:$0xff] %v9093_v27  ;;  %v713_v25 = vmul.f32 %v9093_v27, %v9093_v27  ;;  %v618_v41 = vsel %vm538_vm2, %v9093_v27, 0.0  ;;  %v820_v15 = vsel %vm538_vm2, %v715_v43, 0.0 }
 0x11a   :  { %v813_v24 = vadd.f32 %v812_v22, %v811_v17  ;;  %v617_v35 = vadd.f32 %v616_v0, %v615_v18  ;;  %v9100_v3 = vpop.f32.mrf.mxu0 }
 0x11b   :  { %15607 = vst [vmem:[#allocation39_spill] sm:$0xff] %v9100_v3  ;;  %v816_v40 = vsel %vm538_vm2, %v713_v25, 0.0 }
 0x11c   :  { %v619_v62 = vadd.f32 %v618_v41, %v617_v35  ;;  %v815_v6 = vadd.f32 %v814_v21, %v813_v24  ;;  %v9105_v33 = vpop.f32.mrf.mxu0  ;;  %v622_v21 = vsel %vm538_vm2, %v9085_v28, 0.0  ;;  %v716_v24 = vmul.f32 %v9100_v3, %v9100_v3 }
 0x11d   :  { %15608 = vst [vmem:[#allocation40_spill] sm:$0xff] %v9105_v33  ;;  %v620_v22 = vsel %vm538_vm2, %v9105_v33, 0.0  ;;  %v714_v18 = vmul.f32 %v9105_v33, %v9105_v33 }
 0x11e   :  { %v817_v17 = vadd.f32 %v816_v40, %v815_v6  ;;  %v621_v39 = vadd.f32 %v620_v22, %v619_v62  ;;  %v9114_v0 = vpop.f32.mrf.mxu0  ;;  %v624_v6 = vsel %vm538_vm2, %v9100_v3, 0.0 }
 0x11f   :  { %15609 = vst [vmem:[#allocation41_spill] sm:$0xff] %v9114_v0  ;;  %v818_v35 = vsel %vm538_vm2, %v714_v18, 0.0  ;;  %v822_v18 = vsel %vm538_vm2, %v716_v24, 0.0  ;;  %v719_v8 = vmul.f32 %v9114_v0, %v9114_v0 }
 0x120   :  { %v623_v41 = vadd.f32 %v622_v21, %v621_v39  ;;  %v819_v25 = vadd.f32 %v818_v35, %v817_v17  ;;  %v9121_v16 = vpop.f32.mrf.mxu0 }
 0x121   :  { %15610 = vst [vmem:[#allocation42_spill] sm:$0xff] %v9121_v16  ;;  %v9128_v62 = vmul.f32 %v9121_v16, %v9121_v16  ;;  %v626_v17 = vsel %vm538_vm2, %v9121_v16, 0.0 }
 0x122   :  { %v821_v40 = vadd.f32 %v820_v15, %v819_v25  ;;  %v625_v22 = vadd.f32 %v624_v6, %v623_v41  ;;  %v9130_v10 = vpop.f32.mrf.mxu0  ;;  %v9142_v15 = vld [vmem:[#allocation2 + $0x2] sm:$0xff] }
 0x123   :  { %15611 = vst [vmem:[#allocation43_spill] sm:$0xff] %v9130_v10  ;;  %v824_v24 = vsel %vm538_vm2, %v9128_v62, 0.0  ;;  %1869 = vrot.lane.b32.xlu0 %v9142_v15, %s8379_s20  ;;  %v720_v62 = vmul.f32 %v9130_v10, %v9130_v10  ;;  %v828_v15 = vsel %vm538_vm2, %v719_v8, 0.0 }
 0x124   :  { %v9136_v43 = vadd.f32 %v626_v17, %v625_v22  ;;  %v9138_v39 = vadd.f32 %v822_v18, %v821_v40  ;;  %v9140_v21 = vpop.f32.mrf.mxu0  ;;  %v630_v22 = vsel %vm538_vm2, %v9114_v0, 0.0 }
 0x125   :  { %15612 = vst [vmem:[#allocation44_spill] sm:$0xff] %v9140_v21  ;;  %v628_v35 = vsel %vm538_vm2, %v9140_v21, 0.0  ;;  %v718_v41 = vmul.f32 %v9140_v21, %v9140_v21  ;;  %v830_v21 = vsel %vm538_vm2, %v720_v62, 0.0 }
 0x126   :  { %v825_v25 = vadd.f32 %v824_v24, %v9138_v39  ;;  %v629_v6 = vadd.f32 %v628_v35, %v9136_v43  ;;  %v9284_v40 = vpop.f32.mrf.mxu0  ;;  %v632_v39 = vsel %vm538_vm2, %v9130_v10, 0.0 }
 0x127   :  { %15613 = vst [vmem:[#allocation45_spill] sm:$0xff] %v9284_v40  ;;  %v826_v18 = vsel %vm538_vm2, %v718_v41, 0.0  ;;  %v723_v8 = vmul.f32 %v9284_v40, %v9284_v40 }
 0x128   :  { %v631_v17 = vadd.f32 %v630_v22, %v629_v6  ;;  %v827_v4 = vadd.f32 %v826_v18, %v825_v25  ;;  %v9291_v45 = vpop.f32.mrf.mxu0 }
 0x129   :  { %15614 = vst [vmem:[#allocation46_spill] sm:$0xff] %v9291_v45  ;;  %v721_v43 = vmul.f32 %v9291_v45, %v9291_v45  ;;  %v634_v41 = vsel %vm538_vm2, %v9291_v45, 0.0  ;;  %v836_v10 = vsel %vm538_vm2, %v723_v8, 0.0 }
 0x12a   :  { %v829_v24 = vadd.f32 %v828_v15, %v827_v4  ;;  %v633_v35 = vadd.f32 %v632_v39, %v631_v17  ;;  %v9298_v0 = vpop.f32.mrf.mxu0 }
 0x12b   :  { %15615 = vst [vmem:[#allocation47_spill] sm:$0xff] %v9298_v0  ;;  %v832_v18 = vsel %vm538_vm2, %v721_v43, 0.0 }
 0x12c   :  { %v635_v25 = vadd.f32 %v634_v41, %v633_v35  ;;  %v831_v6 = vadd.f32 %v830_v21, %v829_v24  ;;  %v9303_v22 = vpop.f32.mrf.mxu0  ;;  %v638_v21 = vsel %vm538_vm2, %v9284_v40, 0.0  ;;  %v724_v24 = vmul.f32 %v9298_v0, %v9298_v0 }
 0x12d   :  { %15616 = vst [vmem:[#allocation48_spill] sm:$0xff] %v9303_v22  ;;  %v636_v4 = vsel %vm538_vm2, %v9303_v22, 0.0  ;;  %v722_v17 = vmul.f32 %v9303_v22, %v9303_v22 }
 0x12e   :  { %v833_v15 = vadd.f32 %v832_v18, %v831_v6  ;;  %v637_v62 = vadd.f32 %v636_v4, %v635_v25  ;;  %v9312_v39 = vpop.f32.mrf.mxu0  ;;  %v640_v6 = vsel %vm538_vm2, %v9298_v0, 0.0  ;;  %v838_v22 = vsel %vm538_vm2, %v724_v24, 0.0 }
 0x12f   :  { %15617 = vst [vmem:[#allocation49_spill] sm:$0xff] %v9312_v39  ;;  %v834_v35 = vsel %vm538_vm2, %v722_v17, 0.0  ;;  %v727_v8 = vmul.f32 %v9312_v39, %v9312_v39 }
 0x130   :  { %v639_v41 = vadd.f32 %v638_v21, %v637_v62  ;;  %v835_v43 = vadd.f32 %v834_v35, %v833_v15  ;;  %v9319_v45 = vpop.f32.mrf.mxu0 }
 0x131   :  { %15618 = vst [vmem:[#allocation50_spill] sm:$0xff] %v9319_v45  ;;  %v725_v25 = vmul.f32 %v9319_v45, %v9319_v45  ;;  %v642_v17 = vsel %vm538_vm2, %v9319_v45, 0.0  ;;  %v844_v0 = vsel %vm538_vm2, %v727_v8, 0.0 }
 0x132   :  { %v837_v18 = vadd.f32 %v836_v10, %v835_v43  ;;  %v641_v4 = vadd.f32 %v640_v6, %v639_v41  ;;  %v9326_v40 = vpop.f32.mrf.mxu0 }
 0x133   :  { %15619 = vst [vmem:[#allocation51_spill] sm:$0xff] %v9326_v40  ;;  %v840_v35 = vsel %vm538_vm2, %v725_v25, 0.0 }
 0x134   :  { %v643_v15 = vadd.f32 %v642_v17, %v641_v4  ;;  %v839_v62 = vadd.f32 %v838_v22, %v837_v18  ;;  %v9331_v21 = vpop.f32.mrf.mxu0  ;;  %v646_v22 = vsel %vm538_vm2, %v9312_v39, 0.0  ;;  %v728_v18 = vmul.f32 %v9326_v40, %v9326_v40 }
 0x135   :  { %15620 = vst [vmem:[#allocation52_spill] sm:$0xff] %v9331_v21  ;;  %v644_v10 = vsel %vm538_vm2, %v9331_v21, 0.0  ;;  %v726_v41 = vmul.f32 %v9331_v21, %v9331_v21 }
 0x136   :  { %v841_v43 = vadd.f32 %v840_v35, %v839_v62  ;;  %v645_v24 = vadd.f32 %v644_v10, %v643_v15  ;;  %v9340_v6 = vpop.f32.mrf.mxu0  ;;  %v648_v62 = vsel %vm538_vm2, %v9326_v40, 0.0  ;;  %v846_v21 = vsel %vm538_vm2, %v728_v18, 0.0 }
 0x137   :  { %15621 = vst [vmem:[#allocation53_spill] sm:$0xff] %v9340_v6  ;;  %v842_v4 = vsel %vm538_vm2, %v726_v41, 0.0  ;;  %v731_v8 = vmul.f32 %v9340_v6, %v9340_v6 }
 0x138   :  { %v647_v17 = vadd.f32 %v646_v22, %v645_v24  ;;  %v843_v25 = vadd.f32 %v842_v4, %v841_v43  ;;  %v9347_v45 = vpop.f32.mrf.mxu0 }
 0x139   :  { %15622 = vst [vmem:[#allocation54_spill] sm:$0xff] %v9347_v45  ;;  %v729_v15 = vmul.f32 %v9347_v45, %v9347_v45  ;;  %v650_v41 = vsel %vm538_vm2, %v9347_v45, 0.0  ;;  %v852_v40 = vsel %vm538_vm2, %v731_v8, 0.0 }
 0x13a   :  { %v845_v35 = vadd.f32 %v844_v0, %v843_v25  ;;  %v649_v10 = vadd.f32 %v648_v62, %v647_v17  ;;  %v9354_v39 = vpop.f32.mrf.mxu0 }
 0x13b   :  { %15623 = vst [vmem:[#allocation55_spill] sm:$0xff] %v9354_v39  ;;  %v848_v4 = vsel %vm538_vm2, %v729_v15, 0.0 }
 0x13c   :  { %v651_v43 = vadd.f32 %v650_v41, %v649_v10  ;;  %v847_v24 = vadd.f32 %v846_v21, %v845_v35  ;;  %v9359_v22 = vpop.f32.mrf.mxu0  ;;  %v654_v21 = vsel %vm538_vm2, %v9340_v6, 0.0  ;;  %v732_v35 = vmul.f32 %v9354_v39, %v9354_v39 }
 0x13d   :  { %15624 = vst [vmem:[#allocation56_spill] sm:$0xff] %v9359_v22  ;;  %v652_v0 = vsel %vm538_vm2, %v9359_v22, 0.0  ;;  %v730_v17 = vmul.f32 %v9359_v22, %v9359_v22 }
 0x13e   :  { %v849_v25 = vadd.f32 %v848_v4, %v847_v24  ;;  %v653_v18 = vadd.f32 %v652_v0, %v651_v43  ;;  %v9368_v62 = vpop.f32.mrf.mxu0  ;;  %v656_v24 = vsel %vm538_vm2, %v9354_v39, 0.0  ;;  %v854_v22 = vsel %vm538_vm2, %v732_v35, 0.0 }
 0x13f   :  { %15625 = vst [vmem:[#allocation57_spill] sm:$0xff] %v9368_v62  ;;  %v850_v10 = vsel %vm538_vm2, %v730_v17, 0.0  ;;  %v735_v8 = vmul.f32 %v9368_v62, %v9368_v62 }
 0x140   :  { %v655_v41 = vadd.f32 %v654_v21, %v653_v18  ;;  %v851_v15 = vadd.f32 %v850_v10, %v849_v25  ;;  %v9375_v45 = vpop.f32.mrf.mxu0 }
 0x141   :  { %15626 = vst [vmem:[#allocation58_spill] sm:$0xff] %v9375_v45  ;;  %v733_v43 = vmul.f32 %v9375_v45, %v9375_v45  ;;  %v658_v17 = vsel %vm538_vm2, %v9375_v45, 0.0 }
 0x142   :  { %v853_v4 = vadd.f32 %v852_v40, %v851_v15  ;;  %v657_v0 = vadd.f32 %v656_v24, %v655_v41  ;;  %v9382_v6 = vpop.f32.mrf.mxu0  ;;  %v662_v15 = vsel %vm538_vm2, %v9368_v62, 0.0 }
 0x143   :  { %15627 = vst [vmem:[#allocation59_spill] sm:$0xff] %v9382_v6  ;;  %v856_v10 = vsel %vm538_vm2, %v733_v43, 0.0  ;;  %v736_v35 = vmul.f32 %v9382_v6, %v9382_v6  ;;  %v664_v43 = vsel %vm538_vm2, %v9382_v6, 0.0 }
 0x144   :  { %v659_v25 = vadd.f32 %v658_v17, %v657_v0  ;;  %v855_v18 = vadd.f32 %v854_v22, %v853_v4  ;;  %v526_v21 = vpop.f32.mrf.mxu0  ;;  %v860_v0 = vsel %vm538_vm2, %v735_v8, 0.0 }
 0x145   :  { %v660_v39 = vsel %vm538_vm2, %v526_v21, 0.0  ;;  %v734_v16 = vmul.f32 %v526_v21, %v526_v21 }
 0x146   :  { %v857_v40 = vadd.f32 %v856_v10, %v855_v18  ;;  %v661_v41 = vadd.f32 %v660_v39, %v659_v25  ;;  %v862_v18 = vsel %vm538_vm2, %v736_v35, 0.0  ;;  %v881_v35 = vlaneseq }
 0x147   :  { %v858_v24 = vsel %vm538_vm2, %v734_v16, 0.0 }
 0x148   :  { %v663_v22 = vadd.f32 %v662_v15, %v661_v41  ;;  %v859_v4 = vadd.f32 %v858_v24, %v857_v40 }
 0x14a   :  { %v665_v17 = vadd.f32 %v664_v43, %v663_v22  ;;  %v861_v45 = vadd.f32 %v860_v0, %v859_v4  ;;  %v9400_v0 = vshrl.u32 %v881_v35, 7 }
 0x14c   :  { %v666_v39 = vrot.slane %v665_v17, 4  ;;  %v863_v25 = vadd.f32 %v862_v18, %v861_v45  ;;  %15628 = vst [vmem:[#allocation60_spill] sm:$0xff] %v9400_v0  ;;  %v873_v45 = vld [vmem:[%s15356_s2] sm:$0x1]  ;;  %s8380_s2 = smov 24  }
 0x14e   :  { %v667_v10 = vadd.f32 %v666_v39, %v665_v17  ;;  %v864_v62 = vrot.slane %v863_v25, 4 }
 0x150   :  { %v668_v3 = vrot.slane %v667_v10, 2  ;;  %v865_v28 = vadd.f32 %v864_v62, %v863_v25 }
 0x152   :  { %v669_v33 = vadd.f32 %v668_v3, %v667_v10  ;;  %v866_v27 = vrot.slane %v865_v28, 2  ;;  %v9406_v3 = vsub.s32 0, %v9400_v0  ;;  %v15651_v0 = vld [vmem:[#allocation51_spill] sm:$0xff] }
 0x154   :  { %v670_v16 = vrot.slane %v669_v33, 1  ;;  %v867_v41 = vadd.f32 %v866_v27, %v865_v28  ;;  %15629 = vst [vmem:[#allocation61_spill] sm:$0xff] %v9406_v3 }
 0x156   :  { %v671_v40 = vadd.f32 %v670_v16, %v669_v33  ;;  %v868_v15 = vrot.slane %v867_v41, 1  ;;  %v877_v33 = vld [vmem:[%s15357_s3] sm:$0x1]  ;;  %s8381_s3 = smov 32  }
 0x158   :  { %v672_v8 = vmul.f32 0.001953125, %v671_v40  ;;  %v869_v24 = vadd.f32 %v868_v15, %v867_v41  ;;  %v15630_v40 = vld [vmem:[#allocation36_spill] sm:$0xff]  ;;  %v15631_v15 = vld [vmem:[#allocation38_spill] sm:$0xff] }
 0x15a   :  { %v870_v34 = vmul.f32 0.001953125, %v869_v24  ;;  %v871_v6 = vmul.f32 %v672_v8, %v672_v8  ;;  %v15633_v24 = vld [vmem:[#allocation37_spill] sm:$0xff] }
 0x15c   :  { %v872_v22 = vsub.f32 %v870_v34, %v871_v6 }
 0x15e   :  { %v874_v4 = vadd.f32 1e-05, %v872_v22  ;;  %v15634_v22 = vld [vmem:[#allocation39_spill] sm:$0xff] }
 0x160   :  { %8365 = vrsqrt.f32 %v874_v4  ;;  %v15635_v4 = vld [vmem:[#allocation42_spill] sm:$0xff] }
 0x16d   :  { %v8366_v27 = vpop.eup %8365 }
 0x16e   :  { %v876_v28 = vmul.f32 %v8366_v27, %v873_v45  ;;  %v15636_v45 = vld [vmem:[#allocation44_spill] sm:$0xff] }
 0x170   :  { %v878_v62 = vmul.f32 %v876_v28, %v672_v8  ;;  %v9412_v34 = vrot.slane %v876_v28, %v9406_v3  ;;  %v15632_v8 = vld [vmem:[#allocation40_spill] sm:$0xff]  ;;  %v15637_v28 = vld [vmem:[#allocation41_spill] sm:$0xff] }
 0x172   :  { %v879_v6 = vsub.f32 %v877_v33, %v878_v62  ;;  %v947_v43 = vmul.f32 %v9412_v34, %v526_v21  ;;  %v9417_v17 = vmul.f32 %v9412_v34, %v8795_v50  ;;  %v9421_v18 = vmul.f32 %v9412_v34, %v8801_v55  ;;  %v15638_v62 = vld [vmem:[#allocation43_spill] sm:$0xff] }
 0x173   :  { %v9425_v39 = vmul.f32 %v8793_v49, %v9412_v34  ;;  %v9429_v25 = vmul.f32 %v8797_v53, %v9412_v34  ;;  %v9433_v10 = vmul.f32 %v9412_v34, %v8819_v12  ;;  %v9437_v50 = vmul.f32 %v9412_v34, %v8831_v38 }
 0x174   :  { %v9440_v21 = vrot.slane %v879_v6, %v9406_v3  ;;  %v9444_v55 = vmul.f32 %v8811_v1, %v9412_v34  ;;  %v9448_v49 = vmul.f32 %v8826_v29, %v9412_v34  ;;  %v9452_v53 = vmul.f32 %v9412_v34, %v8847_v5  ;;  %v15652_v3 = vld [vmem:[#allocation54_spill] sm:$0xff] }
 0x175   :  { %v9456_v12 = vmul.f32 %v9412_v34, %v8859_v37  ;;  %v9460_v38 = vmul.f32 %v8840_v60, %v9412_v34  ;;  %v9464_v1 = vmul.f32 %v8854_v23, %v9412_v34  ;;  %v9468_v29 = vmul.f32 %v9412_v34, %v8875_v11 }
 0x176   :  { %v1017_v16 = vadd.f32 %v9440_v21, %v947_v43  ;;  %v9473_v5 = vmul.f32 %v9412_v34, %v8887_v56  ;;  %v9477_v37 = vmul.f32 %v8868_v61, %v9412_v34  ;;  %v9481_v60 = vmul.f32 %v8882_v31, %v9412_v34  ;;  %v15639_v43 = vld [vmem:[#allocation46_spill] sm:$0xff] }
 0x177   :  { %v9485_v23 = vmul.f32 %v9412_v34, %v8903_v20  ;;  %v9489_v11 = vmul.f32 %v9412_v34, %v8915_v2  ;;  %v9493_v56 = vmul.f32 %v8896_v13, %v9412_v34  ;;  %v9497_v61 = vmul.f32 %v8910_v48, %v9412_v34 }
 0x178   :  { %v1081_v41 = vmax.f32 %v1017_v16, 0.0  ;;  %v9501_v31 = vmul.f32 %v9412_v34, %v8931_v42  ;;  %v9505_v20 = vmul.f32 %v9412_v34, %v8943_v44  ;;  %v9509_v2 = vmul.f32 %v8924_v54, %v9412_v34 }
 0x179   :  { %v9513_v13 = vmul.f32 %v8938_v36, %v9412_v34  ;;  %v9517_v48 = vmul.f32 %v9412_v34, %v8959_v30  ;;  %v9521_v42 = vmul.f32 %v9412_v34, %v8973_v59  ;;  %v9525_v44 = vmul.f32 %v8952_v26, %v9412_v34 }
 0x17a   :  { %1225 = vst.msk [vmem:[#allocation2 + $0x321] sm:$0xff] %vm538_vm2, %v1081_v41  ;;  %v9530_v54 = vmul.f32 %v8966_v14, %v9412_v34  ;;  %v9534_v36 = vmul.f32 %v9412_v34, %v9003_v47  ;;  %v9538_v30 = vmul.f32 %v9412_v34, %v9015_v7  ;;  %v9542_v59 = vmul.f32 %v8980_v19, %v9412_v34  ;;  %v15640_v41 = vld [vmem:[#allocation48_spill] sm:$0xff] }
 0x17b   :  { %v9546_v26 = vmul.f32 %v9010_v63, %v9412_v34  ;;  %v9550_v14 = vmul.f32 %v9412_v34, %v9032_v52  ;;  %v9554_v47 = vmul.f32 %v9412_v34, %v9046_v58  ;;  %v9558_v7 = vmul.f32 %v9024_v57, %v9412_v34 }
 0x17c   :  { %v9562_v19 = vmul.f32 %v9039_v51, %v9412_v34  ;;  %v9566_v63 = vmul.f32 %v9412_v34, %v9064_v32  ;;  %v9570_v52 = vmul.f32 %v9412_v34, %v9076_v46  ;;  %v9574_v58 = vmul.f32 %v9053_v9, %v9412_v34 }
 0x17d   :  { %v9578_v57 = vmul.f32 %v15630_v40, %v9412_v34  ;;  %v9582_v51 = vmul.f32 %v9412_v34, %v15631_v15  ;;  %v9586_v32 = vmul.f32 %v9412_v34, %v15632_v8  ;;  %v9590_v46 = vmul.f32 %v15633_v24, %v9412_v34  ;;  %v15641_v15 = vld [vmem:[#allocation45_spill] sm:$0xff]  ;;  %v15643_v24 = vld [vmem:[#allocation47_spill] sm:$0xff] }
 0x17e   :  { %v9594_v9 = vmul.f32 %v15634_v22, %v9412_v34  ;;  %v9598_v35 = vmul.f32 %v9412_v34, %v15635_v4  ;;  %v9602_v27 = vmul.f32 %v9412_v34, %v15636_v45  ;;  %v9606_v33 = vmul.f32 %v15637_v28, %v9412_v34  ;;  %v15645_v4 = vld [vmem:[#allocation50_spill] sm:$0xff]  ;;  %v15647_v28 = vld [vmem:[#allocation52_spill] sm:$0xff] }
 0x17f   :  { %v9610_v6 = vmul.f32 %v15638_v62, %v9412_v34  ;;  %v9614_v16 = vmul.f32 %v9412_v34, %v15639_v43  ;;  %v9618_v40 = vmul.f32 %v9412_v34, %v15640_v41  ;;  %v9622_v8 = vmul.f32 %v15641_v15, %v9412_v34  ;;  %v15649_v43 = vld [vmem:[#allocation49_spill] sm:$0xff] }
 0x180   :  { %v9626_v22 = vmul.f32 %v15643_v24, %v9412_v34  ;;  %v9630_v45 = vmul.f32 %v9412_v34, %v15645_v4  ;;  %v9634_v62 = vmul.f32 %v9412_v34, %v15647_v28  ;;  %v9638_v41 = vmul.f32 %v15649_v43, %v9412_v34  ;;  %v15657_v43 = vld [vmem:[#allocation55_spill] sm:$0xff] }
 0x181   :  { %15642 = vst [vmem:[#allocation36_spill] sm:$0xff] %v9622_v8  ;;  %v9642_v15 = vmul.f32 %v15651_v0, %v9412_v34  ;;  %v9646_v24 = vmul.f32 %v9412_v34, %v15652_v3  ;;  %v15658_v8 = vld [vmem:[#allocation58_spill] sm:$0xff]  ;;  %v15659_v3 = vld [vmem:[#allocation57_spill] sm:$0xff] }
 0x182   :  { %15644 = vst [vmem:[#allocation38_spill] sm:$0xff] %v9626_v22  ;;  %15646 = vst [vmem:[#allocation40_spill] sm:$0xff] %v9630_v45  ;;  %v15654_v22 = vld [vmem:[#allocation56_spill] sm:$0xff]  ;;  %v15656_v45 = vld [vmem:[#allocation53_spill] sm:$0xff]  ;;  %v9662_v0 = vmul.f32 %v9412_v34, %v15658_v8  ;;  %v9683_v8 = vadd.f32 %v9440_v21, %v9425_v39  ;;  %v9703_v39 = vadd.f32 %v9440_v21, %v9448_v49 }
 0x183   :  { %15648 = vst [vmem:[#allocation37_spill] sm:$0xff] %v9634_v62  ;;  %15650 = vst [vmem:[#allocation39_spill] sm:$0xff] %v9638_v41  ;;  %v9650_v4 = vmul.f32 %v9412_v34, %v15654_v22  ;;  %v9654_v28 = vmul.f32 %v15656_v45, %v9412_v34  ;;  %v1228_v62 = vld [vmem:[#allocation2] sm:$0xff]  ;;  %v9658_v41 = vmul.f32 %v15657_v43, %v9412_v34  ;;  %v15660_v22 = vld [vmem:[#allocation59_spill] sm:$0xff] }
 0x184   :  { %15653 = vst [vmem:[#allocation42_spill] sm:$0xff] %v9646_v24  ;;  %v9666_v24 = vmul.f32 %v15659_v3, %v9412_v34  ;;  %1292 = vst.msk [vmem:[#allocation3] sm:$0xff] %vm538_vm2, %v1228_v62  ;;  %v9675_v45 = vadd.f32 %v9440_v21, %v9417_v17  ;;  %v9679_v43 = vadd.f32 %v9440_v21, %v9421_v18  ;;  %v1229_v62 = vld [vmem:[#allocation2 + $0x8] sm:$0xff] }
 0x185   :  { %15655 = vst [vmem:[#allocation44_spill] sm:$0xff] %v9650_v4  ;;  %v9670_v4 = vmul.f32 %v15660_v22, %v9412_v34  ;;  %v9687_v3 = vadd.f32 %v9440_v21, %v9429_v25  ;;  %v9691_v34 = vadd.f32 %v9440_v21, %v9433_v10  ;;  %v9695_v17 = vadd.f32 %v9440_v21, %v9437_v50 }
 0x186   :  { %v9699_v18 = vadd.f32 %v9440_v21, %v9444_v55  ;;  %v9707_v25 = vadd.f32 %v9440_v21, %v9452_v53  ;;  %v9711_v10 = vadd.f32 %v9440_v21, %v9456_v12  ;;  %v9715_v50 = vadd.f32 %v9440_v21, %v9460_v38  ;;  %1293 = vst.msk [vmem:[#allocation3 + $0x8] sm:$0xff] %vm538_vm2, %v1229_v62 }
 0x187   :  { %v9719_v55 = vadd.f32 %v9440_v21, %v9464_v1  ;;  %v9723_v49 = vadd.f32 %v9440_v21, %v9468_v29  ;;  %v9727_v53 = vadd.f32 %v9440_v21, %v9473_v5  ;;  %v9731_v12 = vadd.f32 %v9440_v21, %v9477_v37 }
 0x188   :  { %v9735_v38 = vadd.f32 %v9440_v21, %v9481_v60  ;;  %v9740_v1 = vadd.f32 %v9440_v21, %v9485_v23  ;;  %v9744_v29 = vadd.f32 %v9440_v21, %v9489_v11  ;;  %v9748_v5 = vadd.f32 %v9440_v21, %v9493_v56  ;;  %v15664_v22 = vld [vmem:[#allocation36_spill] sm:$0xff] }
 0x189   :  { %v9752_v37 = vadd.f32 %v9440_v21, %v9497_v61  ;;  %v9756_v60 = vadd.f32 %v9440_v21, %v9501_v31  ;;  %v9760_v23 = vadd.f32 %v9440_v21, %v9505_v20  ;;  %v9764_v11 = vadd.f32 %v9440_v21, %v9509_v2  ;;  %v15666_v62 = vld [vmem:[#allocation38_spill] sm:$0xff] }
 0x18a   :  { %v9768_v56 = vadd.f32 %v9440_v21, %v9513_v13  ;;  %v9772_v61 = vadd.f32 %v9440_v21, %v9517_v48  ;;  %v9776_v31 = vadd.f32 %v9440_v21, %v9521_v42  ;;  %v9780_v20 = vadd.f32 %v9440_v21, %v9525_v44 }
 0x18b   :  { %v9784_v2 = vadd.f32 %v9440_v21, %v9530_v54  ;;  %v9788_v13 = vadd.f32 %v9440_v21, %v9534_v36  ;;  %v9792_v48 = vadd.f32 %v9440_v21, %v9538_v30  ;;  %v9796_v42 = vadd.f32 %v9440_v21, %v9542_v59 }
 0x18c   :  { %v9800_v44 = vadd.f32 %v9440_v21, %v9546_v26  ;;  %v9804_v54 = vadd.f32 %v9440_v21, %v9550_v14  ;;  %v9808_v36 = vadd.f32 %v9440_v21, %v9554_v47  ;;  %v9812_v30 = vadd.f32 %v9440_v21, %v9558_v7 }
 0x18d   :  { %v9816_v59 = vadd.f32 %v9440_v21, %v9562_v19  ;;  %v9820_v26 = vadd.f32 %v9440_v21, %v9566_v63  ;;  %v9824_v14 = vadd.f32 %v9440_v21, %v9570_v52  ;;  %v9828_v47 = vadd.f32 %v9440_v21, %v9574_v58 }
 0x18e   :  { %v9832_v7 = vadd.f32 %v9440_v21, %v9578_v57  ;;  %v9836_v19 = vadd.f32 %v9440_v21, %v9582_v51  ;;  %v9840_v63 = vadd.f32 %v9440_v21, %v9586_v32  ;;  %v9844_v52 = vadd.f32 %v9440_v21, %v9590_v46 }
 0x18f   :  { %v9848_v58 = vadd.f32 %v9440_v21, %v9594_v9  ;;  %v9852_v57 = vadd.f32 %v9440_v21, %v9598_v35  ;;  %v9856_v51 = vadd.f32 %v9440_v21, %v9602_v27  ;;  %v9860_v32 = vadd.f32 %v9440_v21, %v9606_v33 }
 0x190   :  { %v9864_v46 = vadd.f32 %v9440_v21, %v9610_v6  ;;  %v9868_v9 = vadd.f32 %v9440_v21, %v9614_v16  ;;  %v9872_v35 = vadd.f32 %v9440_v21, %v9618_v40  ;;  %v9876_v27 = vadd.f32 %v9440_v21, %v15664_v22 }
 0x191   :  { %15661 = vst [vmem:[#allocation41_spill] sm:$0xff] %v9860_v32  ;;  %v9880_v33 = vadd.f32 %v9440_v21, %v15666_v62  ;;  %v15668_v32 = vld [vmem:[#allocation40_spill] sm:$0xff]  ;;  %v9896_v22 = vadd.f32 %v9440_v21, %v9642_v15  ;;  %v9916_v15 = vadd.f32 %v9440_v21, %v9662_v0  ;;  %v1025_v0 = vmax.f32 %v9695_v17, 0.0 }
 0x192   :  { %15662 = vst [vmem:[#allocation43_spill] sm:$0xff] %v9864_v46  ;;  %15663 = vst [vmem:[#allocation46_spill] sm:$0xff] %v9868_v9  ;;  %v9884_v6 = vadd.f32 %v9440_v21, %v15668_v32  ;;  %v15669_v46 = vld [vmem:[#allocation37_spill] sm:$0xff]  ;;  %v15670_v9 = vld [vmem:[#allocation39_spill] sm:$0xff]  ;;  %v1036_v17 = vmax.f32 %v9740_v1, 0.0  ;;  %v1046_v1 = vmax.f32 %v9780_v20, 0.0 }
 0x193   :  { %15665 = vst [vmem:[#allocation48_spill] sm:$0xff] %v9876_v27  ;;  %15667 = vst [vmem:[#allocation45_spill] sm:$0xff] %v9880_v33  ;;  %v9888_v16 = vadd.f32 %v9440_v21, %v15669_v46  ;;  %v9892_v40 = vadd.f32 %v9440_v21, %v15670_v9  ;;  %v15671_v27 = vld [vmem:[#allocation42_spill] sm:$0xff]  ;;  %v15672_v33 = vld [vmem:[#allocation44_spill] sm:$0xff]  ;;  %v9908_v46 = vadd.f32 %v9440_v21, %v9654_v28  ;;  %v1021_v28 = vmax.f32 %v9679_v43, 0.0 }
 0x194   :  { %v9900_v62 = vadd.f32 %v9440_v21, %v15671_v27  ;;  %v9904_v32 = vadd.f32 %v9440_v21, %v15672_v33  ;;  %v9912_v9 = vadd.f32 %v9440_v21, %v9658_v41  ;;  %15676 = vst [vmem:[#allocation49_spill] sm:$0xff] %v9916_v15  ;;  %v9920_v27 = vadd.f32 %v9440_v21, %v9666_v24 }
 0x195   :  { %15674 = vst [vmem:[#allocation50_spill] sm:$0xff] %v9908_v46  ;;  %v9924_v33 = vadd.f32 %v9440_v21, %v9670_v4  ;;  %v1022_v46 = vmax.f32 %v9683_v8, 0.0  ;;  %v1023_v41 = vmax.f32 %v9687_v3, 0.0  ;;  %v1026_v15 = vmax.f32 %v9699_v18, 0.0  ;;  %1165 = vst.msk [vmem:[#allocation2 + $0x21] sm:$0xff] %vm538_vm2, %v1021_v28 }
 0x196   :  { %15673 = vst [vmem:[#allocation47_spill] sm:$0xff] %v9904_v32  ;;  %15675 = vst [vmem:[#allocation52_spill] sm:$0xff] %v9912_v9  ;;  %v1020_v32 = vmax.f32 %v9675_v45, 0.0  ;;  %v1024_v9 = vmax.f32 %v9691_v34, 0.0  ;;  %v1027_v24 = vmax.f32 %v9703_v39, 0.0  ;;  %v1029_v21 = vmax.f32 %v9711_v10, 0.0 }
 0x197   :  { %15677 = vst [vmem:[#allocation51_spill] sm:$0xff] %v9920_v27  ;;  %v1028_v27 = vmax.f32 %v9707_v25, 0.0  ;;  %v1030_v4 = vmax.f32 %v9715_v50, 0.0  ;;  %v1031_v45 = vmax.f32 %v9719_v55, 0.0  ;;  %v1032_v43 = vmax.f32 %v9723_v49, 0.0  ;;  %1166 = vst.msk [vmem:[#allocation2 + $0x31] sm:$0xff] %vm538_vm2, %v1022_v46  ;;  %v9960_v50 = vpop.permute.xlu0 %1484 }
 0x198   :  { %1164 = vst.msk [vmem:[#allocation2 + $0x19] sm:$0xff] %vm538_vm2, %v1020_v32  ;;  %1167 = vst.msk [vmem:[#allocation2 + $0x39] sm:$0xff] %vm538_vm2, %v1023_v41  ;;  %v1033_v8 = vmax.f32 %v9727_v53, 0.0  ;;  %v1034_v3 = vmax.f32 %v9731_v12, 0.0  ;;  %v1035_v34 = vmax.f32 %v9735_v38, 0.0  ;;  %v1037_v18 = vmax.f32 %v9744_v29, 0.0 }
 0x199   :  { %1168 = vst.msk [vmem:[#allocation2 + $0x49] sm:$0xff] %vm538_vm2, %v1024_v9  ;;  %1169 = vst.msk [vmem:[#allocation2 + $0x51] sm:$0xff] %vm538_vm2, %v1025_v0  ;;  %v1038_v39 = vmax.f32 %v9748_v5, 0.0  ;;  %v1039_v25 = vmax.f32 %v9752_v37, 0.0  ;;  %v1040_v10 = vmax.f32 %v9756_v60, 0.0  ;;  %v1041_v55 = vmax.f32 %v9760_v23, 0.0 }
 0x19a   :  { %1170 = vst.msk [vmem:[#allocation2 + $0x61] sm:$0xff] %vm538_vm2, %v1026_v15  ;;  %1171 = vst.msk [vmem:[#allocation2 + $0x69] sm:$0xff] %vm538_vm2, %v1027_v24  ;;  %v1042_v49 = vmax.f32 %v9764_v11, 0.0  ;;  %v1043_v53 = vmax.f32 %v9768_v56, 0.0  ;;  %v1044_v12 = vmax.f32 %v9772_v61, 0.0  ;;  %v1045_v38 = vmax.f32 %v9776_v31, 0.0 }
 0x19b   :  { %1172 = vst.msk [vmem:[#allocation2 + $0x79] sm:$0xff] %vm538_vm2, %v1028_v27  ;;  %1173 = vst.msk [vmem:[#allocation2 + $0x81] sm:$0xff] %vm538_vm2, %v1029_v21  ;;  %v1047_v29 = vmax.f32 %v9784_v2, 0.0  ;;  %v1048_v5 = vmax.f32 %v9788_v13, 0.0  ;;  %v1049_v37 = vmax.f32 %v9792_v48, 0.0  ;;  %v1050_v60 = vmax.f32 %v9796_v42, 0.0 }
 0x19c   :  { %1174 = vst.msk [vmem:[#allocation2 + $0x91] sm:$0xff] %vm538_vm2, %v1030_v4  ;;  %1175 = vst.msk [vmem:[#allocation2 + $0x99] sm:$0xff] %vm538_vm2, %v1031_v45  ;;  %v1051_v23 = vmax.f32 %v9800_v44, 0.0  ;;  %v1052_v11 = vmax.f32 %v9804_v54, 0.0  ;;  %v1053_v56 = vmax.f32 %v9808_v36, 0.0  ;;  %v1054_v61 = vmax.f32 %v9812_v30, 0.0 }
 0x19d   :  { %1176 = vst.msk [vmem:[#allocation2 + $0xa9] sm:$0xff] %vm538_vm2, %v1032_v43  ;;  %1177 = vst.msk [vmem:[#allocation2 + $0xb1] sm:$0xff] %vm538_vm2, %v1033_v8  ;;  %v1055_v31 = vmax.f32 %v9816_v59, 0.0  ;;  %v1056_v20 = vmax.f32 %v9820_v26, 0.0  ;;  %v1057_v48 = vmax.f32 %v9824_v14, 0.0  ;;  %v1058_v42 = vmax.f32 %v9828_v47, 0.0 }
 0x19e   :  { %1178 = vst.msk [vmem:[#allocation2 + $0xc1] sm:$0xff] %vm538_vm2, %v1034_v3  ;;  %1179 = vst.msk [vmem:[#allocation2 + $0xc9] sm:$0xff] %vm538_vm2, %v1035_v34  ;;  %v1059_v44 = vmax.f32 %v9832_v7, 0.0  ;;  %v1060_v54 = vmax.f32 %v9836_v19, 0.0  ;;  %v1061_v30 = vmax.f32 %v9840_v63, 0.0  ;;  %v1062_v59 = vmax.f32 %v9844_v52, 0.0  ;;  %v1487_v7 = vpop.permute.xlu0 %1486 }
 0x19f   :  { %1180 = vst.msk [vmem:[#allocation2 + $0xd9] sm:$0xff] %vm538_vm2, %v1036_v17  ;;  %1181 = vst.msk [vmem:[#allocation2 + $0xe1] sm:$0xff] %vm538_vm2, %v1037_v18  ;;  %v9994_v2 = vld [vmem:[#allocation2 + $0x19] sm:$0xff]  ;;  %v1063_v26 = vmax.f32 %v9848_v58, 0.0  ;;  %v1064_v14 = vmax.f32 %v9852_v57, 0.0  ;;  %v10022_v47 = vld [vmem:[#allocation2 + $0x30] sm:$0xff]  ;;  %v1872_v18 = vpop.permute.xlu1 %1871 }
 0x1a0   :  { %1182 = vst.msk [vmem:[#allocation2 + $0xf1] sm:$0xff] %vm538_vm2, %v1038_v39  ;;  %1183 = vst.msk [vmem:[#allocation2 + $0xf9] sm:$0xff] %vm538_vm2, %v1039_v25  ;;  %v9996_v13 = vld [vmem:[#allocation2 + $0x18] sm:$0xff]  ;;  %1488 = vrot.lane.b32.xlu1 %v9994_v2, %s8378_s0  ;;  %v1065_v19 = vmax.f32 %v9856_v51, 0.0  ;;  %v15678_v63 = vld [vmem:[#allocation41_spill] sm:$0xff]  ;;  %v1069_v51 = vmax.f32 %v9872_v35, 0.0 }
 0x1a1   :  { %1184 = vst.msk [vmem:[#allocation2 + $0x109] sm:$0xff] %vm538_vm2, %v1040_v10  ;;  %1185 = vst.msk [vmem:[#allocation2 + $0x111] sm:$0xff] %vm538_vm2, %v1041_v55  ;;  %v10006_v36 = vld [vmem:[#allocation2 + $0x1a] sm:$0xff]  ;;  %v1066_v52 = vmax.f32 %v15678_v63, 0.0  ;;  %v15680_v32 = vld [vmem:[#allocation46_spill] sm:$0xff]  ;;  %v1072_v0 = vmax.f32 %v9884_v6, 0.0 }
 0x1a2   :  { %1186 = vst.msk [vmem:[#allocation2 + $0x121] sm:$0xff] %vm538_vm2, %v1042_v49  ;;  %1187 = vst.msk [vmem:[#allocation2 + $0x129] sm:$0xff] %vm538_vm2, %v1043_v53  ;;  %1873 = vrot.lane.b32.xlu0 %v10006_v36, %s8379_s20  ;;  %v15679_v58 = vld [vmem:[#allocation43_spill] sm:$0xff]  ;;  %v1068_v46 = vmax.f32 %v15680_v32, 0.0  ;;  %v10032_v9 = vld [vmem:[#allocation2 + $0x20] sm:$0xff]  ;;  %v1073_v35 = vmax.f32 %v9888_v16, 0.0  ;;  %v1870_v53 = vpop.permute.xlu0 %1869 }
 0x1a3   :  { %1188 = vst.msk [vmem:[#allocation2 + $0x139] sm:$0xff] %vm538_vm2, %v1044_v12  ;;  %1189 = vst.msk [vmem:[#allocation2 + $0x141] sm:$0xff] %vm538_vm2, %v1045_v38  ;;  %v1067_v57 = vmax.f32 %v15679_v58, 0.0  ;;  %v15681_v15 = vld [vmem:[#allocation48_spill] sm:$0xff]  ;;  %v15682_v28 = vld [vmem:[#allocation45_spill] sm:$0xff]  ;;  %v1074_v4 = vmax.f32 %v9892_v40, 0.0 }
 0x1a4   :  { %1190 = vst.msk [vmem:[#allocation2 + $0x151] sm:$0xff] %vm538_vm2, %v1046_v1  ;;  %1191 = vst.msk [vmem:[#allocation2 + $0x159] sm:$0xff] %vm538_vm2, %v1047_v29  ;;  %v1070_v27 = vmax.f32 %v15681_v15, 0.0  ;;  %v1071_v41 = vmax.f32 %v15682_v28, 0.0  ;;  %v10044_v24 = vld [vmem:[#allocation2 + $0x21] sm:$0xff]  ;;  %v10046_v21 = vld [vmem:[#allocation2 + $0x38] sm:$0xff] }
 0x1a5   :  { %1192 = vst.msk [vmem:[#allocation2 + $0x169] sm:$0xff] %vm538_vm2, %v1048_v5  ;;  %1193 = vst.msk [vmem:[#allocation2 + $0x171] sm:$0xff] %vm538_vm2, %v1049_v37  ;;  %v1075_v6 = vmax.f32 %v9896_v22, 0.0  ;;  %v1076_v45 = vmax.f32 %v9900_v62, 0.0  ;;  %1490 = vrot.lane.b32.xlu1 %v10044_v24, %s8378_s0  ;;  %v10060_v43 = vld [vmem:[#allocation2 + $0x48] sm:$0xff]  ;;  %v15683_v16 = vld [vmem:[#allocation47_spill] sm:$0xff] }
 0x1a6   :  { %1194 = vst.msk [vmem:[#allocation2 + $0x181] sm:$0xff] %vm538_vm2, %v1050_v60  ;;  %1195 = vst.msk [vmem:[#allocation2 + $0x189] sm:$0xff] %vm538_vm2, %v1051_v23  ;;  %v1077_v40 = vmax.f32 %v15683_v16, 0.0  ;;  %v15684_v22 = vld [vmem:[#allocation50_spill] sm:$0xff]  ;;  %v15685_v8 = vld [vmem:[#allocation52_spill] sm:$0xff]  ;;  %2254 = vrot.lane.b32.xlu0 %v9996_v13, %s8380_s2  ;;  %v1083_v10 = vmax.f32 %v9924_v33, 0.0 }
 0x1a7   :  { %1196 = vst.msk [vmem:[#allocation2 + $0x1c9] sm:$0xff] %vm538_vm2, %v1052_v11  ;;  %1294 = vst.msk [vmem:[#allocation3 + $0x10] sm:$0xff] %vm538_vm2, %v9996_v13  ;;  %v1078_v62 = vmax.f32 %v15684_v22, 0.0  ;;  %v1079_v3 = vmax.f32 %v15685_v8, 0.0  ;;  %v15686_v34 = vld [vmem:[#allocation49_spill] sm:$0xff]  ;;  %v15687_v39 = vld [vmem:[#allocation51_spill] sm:$0xff] }
 0x1a8   :  { %1197 = vst.msk [vmem:[#allocation2 + $0x1d1] sm:$0xff] %vm538_vm2, %v1053_v56  ;;  %1198 = vst.msk [vmem:[#allocation2 + $0x1e1] sm:$0xff] %vm538_vm2, %v1054_v61  ;;  %v1080_v17 = vmax.f32 %v15686_v34, 0.0  ;;  %v1082_v25 = vmax.f32 %v15687_v39, 0.0  ;;  %v10082_v55 = vld [vmem:[#allocation2 + $0x50] sm:$0xff]  ;;  %v10088_v33 = vld [vmem:[#allocation2 + $0x22] sm:$0xff] }
 0x1a9   :  { %1199 = vst.msk [vmem:[#allocation2 + $0x1e9] sm:$0xff] %vm538_vm2, %v1055_v31  ;;  %1200 = vst.msk [vmem:[#allocation2 + $0x1f9] sm:$0xff] %vm538_vm2, %v1056_v20  ;;  %v10090_v49 = vld [vmem:[#allocation2 + $0x60] sm:$0xff]  ;;  %1875 = vrot.lane.b32.xlu1 %v10088_v33, %s8379_s20  ;;  %v10101_v12 = vld [vmem:[#allocation2 + $0x68] sm:$0xff] }
 0x1aa   :  { %1201 = vst.msk [vmem:[#allocation2 + $0x201] sm:$0xff] %vm538_vm2, %v1057_v48  ;;  %1202 = vst.msk [vmem:[#allocation2 + $0x211] sm:$0xff] %vm538_vm2, %v1058_v42  ;;  %2258 = vrot.lane.b32.xlu0 %v10022_v47, %s8380_s2  ;;  %v10113_v38 = vld [vmem:[#allocation2 + $0x80] sm:$0xff]  ;;  %v10117_v1 = vld [vmem:[#allocation2 + $0x90] sm:$0xff] }
 0x1ab   :  { %1203 = vst.msk [vmem:[#allocation2 + $0x219] sm:$0xff] %vm538_vm2, %v1059_v44  ;;  %1204 = vst.msk [vmem:[#allocation2 + $0x229] sm:$0xff] %vm538_vm2, %v1060_v54  ;;  %v10123_v29 = vld [vmem:[#allocation2 + $0x98] sm:$0xff]  ;;  %v10129_v5 = vld [vmem:[#allocation2 + $0xa8] sm:$0xff] }
 0x1ac   :  { %1296 = vst.msk [vmem:[#allocation3 + $0x20] sm:$0xff] %vm538_vm2, %v10022_v47  ;;  %1205 = vst.msk [vmem:[#allocation2 + $0x231] sm:$0xff] %vm538_vm2, %v1061_v30  ;;  %v10133_v37 = vld [vmem:[#allocation2 + $0xb0] sm:$0xff]  ;;  %v10137_v60 = vld [vmem:[#allocation2 + $0xc0] sm:$0xff] }
 0x1ad   :  { %1206 = vst.msk [vmem:[#allocation2 + $0x241] sm:$0xff] %vm538_vm2, %v1062_v59  ;;  %1207 = vst.msk [vmem:[#allocation2 + $0x249] sm:$0xff] %vm538_vm2, %v1063_v26  ;;  %2256 = vrot.lane.b32.xlu1 %v10032_v9, %s8380_s2  ;;  %v10141_v23 = vld [vmem:[#allocation2 + $0x31] sm:$0xff]  ;;  %v10145_v11 = vld [vmem:[#allocation2 + $0xc8] sm:$0xff] }
 0x1ae   :  { %1208 = vst.msk [vmem:[#allocation2 + $0x259] sm:$0xff] %vm538_vm2, %v1064_v14  ;;  %1295 = vst.msk [vmem:[#allocation3 + $0x18] sm:$0xff] %vm538_vm2, %v10032_v9  ;;  %2639 = vrot.lane.b32.xlu0 %v9994_v2, %s8381_s3  ;;  %v10151_v56 = vld [vmem:[#allocation2 + $0xd8] sm:$0xff]  ;;  %v10155_v61 = vld [vmem:[#allocation2 + $0xe0] sm:$0xff] }
 0x1af   :  { %1209 = vst.msk [vmem:[#allocation2 + $0x261] sm:$0xff] %vm538_vm2, %v1065_v19  ;;  %1210 = vst.msk [vmem:[#allocation2 + $0x271] sm:$0xff] %vm538_vm2, %v1066_v52  ;;  %v10159_v31 = vld [vmem:[#allocation2 + $0xf0] sm:$0xff]  ;;  %v10165_v20 = vld [vmem:[#allocation2 + $0xf8] sm:$0xff] }
 0x1b0   :  { %1211 = vst.msk [vmem:[#allocation2 + $0x279] sm:$0xff] %vm538_vm2, %v1067_v57  ;;  %1212 = vst.msk [vmem:[#allocation2 + $0x289] sm:$0xff] %vm538_vm2, %v1068_v46  ;;  %v10171_v2 = vld [vmem:[#allocation2 + $0x108] sm:$0xff]  ;;  %v10175_v13 = vld [vmem:[#allocation2 + $0x110] sm:$0xff] }
 0x1b1   :  { %1297 = vst.msk [vmem:[#allocation3 + $0x28] sm:$0xff] %vm538_vm2, %v10046_v21  ;;  %1213 = vst.msk [vmem:[#allocation2 + $0x291] sm:$0xff] %vm538_vm2, %v1069_v51  ;;  %2260 = vrot.lane.b32.xlu1 %v10046_v21, %s8380_s2  ;;  %v10179_v48 = vld [vmem:[#allocation2 + $0x39] sm:$0xff]  ;;  %v10189_v54 = vld [vmem:[#allocation2 + $0x128] sm:$0xff] }
 0x1b2   :  { %1214 = vst.msk [vmem:[#allocation2 + $0x2a1] sm:$0xff] %vm538_vm2, %v1070_v27  ;;  %1215 = vst.msk [vmem:[#allocation2 + $0x2a9] sm:$0xff] %vm538_vm2, %v1071_v41  ;;  %2643 = vrot.lane.b32.xlu0 %v10141_v23, %s8381_s3  ;;  %v10181_v42 = vld [vmem:[#allocation2 + $0x120] sm:$0xff]  ;;  %v10185_v44 = vld [vmem:[#allocation2 + $0x32] sm:$0xff] }
 0x1b3   :  { %1216 = vst.msk [vmem:[#allocation2 + $0x2b9] sm:$0xff] %vm538_vm2, %v1072_v0  ;;  %1298 = vst.msk [vmem:[#allocation3 + $0x30] sm:$0xff] %vm538_vm2, %v10060_v43  ;;  %v10199_v30 = vld [vmem:[#allocation2 + $0x140] sm:$0xff]  ;;  %v10203_v59 = vld [vmem:[#allocation2 + $0x150] sm:$0xff] }
 0x1b4   :  { %1217 = vst.msk [vmem:[#allocation2 + $0x2c1] sm:$0xff] %vm538_vm2, %v1073_v35  ;;  %1218 = vst.msk [vmem:[#allocation2 + $0x2d1] sm:$0xff] %vm538_vm2, %v1074_v4  ;;  %v10209_v26 = vld [vmem:[#allocation2 + $0x158] sm:$0xff]  ;;  %v10215_v14 = vld [vmem:[#allocation2 + $0x168] sm:$0xff] }
 0x1b5   :  { %1219 = vst.msk [vmem:[#allocation2 + $0x2d9] sm:$0xff] %vm538_vm2, %v1075_v6  ;;  %1220 = vst.msk [vmem:[#allocation2 + $0x2e9] sm:$0xff] %vm538_vm2, %v1076_v45  ;;  %2641 = vrot.lane.b32.xlu1 %v10044_v24, %s8381_s3  ;;  %v10223_v19 = vld [vmem:[#allocation2 + $0x3a] sm:$0xff]  ;;  %v10235_v52 = vld [vmem:[#allocation2 + $0x1d0] sm:$0xff] }
 0x1b6   :  { %1221 = vst.msk [vmem:[#allocation2 + $0x2f1] sm:$0xff] %vm538_vm2, %v1077_v40  ;;  %1222 = vst.msk [vmem:[#allocation2 + $0x301] sm:$0xff] %vm538_vm2, %v1078_v62  ;;  %3024 = vrot.lane.b32.xlu0 %v10006_v36, %s8382_s25  ;;  %v10195_v36 = vld [vmem:[#allocation2 + $0x138] sm:$0xff]  ;;  %v10233_v63 = vld [vmem:[#allocation2 + $0x1e0] sm:$0xff] }
 0x1b7   :  { %1223 = vst.msk [vmem:[#allocation2 + $0x309] sm:$0xff] %vm538_vm2, %v1079_v3  ;;  %1224 = vst.msk [vmem:[#allocation2 + $0x319] sm:$0xff] %vm538_vm2, %v1080_v17  ;;  %v10243_v58 = vld [vmem:[#allocation2 + $0x1e8] sm:$0xff]  ;;  %v10249_v57 = vld [vmem:[#allocation2 + $0x1f8] sm:$0xff] }
 0x1b8   :  { %1677 = vst.msk [vmem:[#allocation3] sm:$0xff] %vm1676_vm5, %v9960_v50  ;;  %1678 = vst.msk [vmem:[#allocation3 + $0x8] sm:$0xff] %vm1676_vm5, %v1487_v7  ;;  %v10109_v50 = vld [vmem:[#allocation2 + $0x78] sm:$0xff]  ;;  %v10219_v7 = vld [vmem:[#allocation2 + $0x170] sm:$0xff] }
 0x1b9   :  { %1299 = vst.msk [vmem:[#allocation3 + $0x38] sm:$0xff] %vm538_vm2, %v10082_v55  ;;  %1226 = vst.msk [vmem:[#allocation2 + $0x331] sm:$0xff] %vm538_vm2, %v1082_v25  ;;  %2645 = vrot.lane.b32.xlu1 %v10179_v48, %s8381_s3  ;;  %v10253_v32 = vld [vmem:[#allocation2 + $0x49] sm:$0xff]  ;;  %v8360_v46 = vld [vmem:[%s15358_s4 + $0x20] ss:$0 sps:$4 sm:$0xff]  }
 0x1ba   :  { %1227 = vst.msk [vmem:[#allocation2 + $0x339] sm:$0xff] %vm538_vm2, %v1083_v10  ;;  %1300 = vst.msk [vmem:[#allocation3 + $0x40] sm:$0xff] %vm538_vm2, %v10090_v49  ;;  %3028 = vrot.lane.b32.xlu0 %v10185_v44, %s8382_s25  ;;  %8345 = vmatprep.subr.msk.bf16.mxu0 %vm4666_vm7, %v8360_v46  ;;  %v4668_v9 = vsel %vm4666_vm7, %v8360_v46, 0  ;;  %v10264_v51 = vld [vmem:[#allocation2 + $0x200] sm:$0xff]  ;;  %v8361_v15 = vld [vmem:[%s15358_s4 + $0x18] sm:$0xff]  }
 0x1bb   :  { %2063 = vst.msk [vmem:[#allocation3 + $0x8] sm:$0xff] %vm2061_vm6, %v1872_v18  ;;  %2062 = vst.msk [vmem:[#allocation3] sm:$0xff] %vm2061_vm6, %v1870_v53  ;;  %8119 = vmatpush3.bf16.msra.mxu0 %v4668_v9  ;;  %8346 = vmatprep.subr.msk.bf16.mxu1 %vm4666_vm7, %v8360_v46  ;;  %v10274_v27 = vld [vmem:[#allocation2 + $0x210] sm:$0xff]  ;;  %v10276_v28 = vld [vmem:[#allocation2 + $0x218] sm:$0xff] }
 0x1bc   :  { %1301 = vst.msk [vmem:[#allocation3 + $0x48] sm:$0xff] %vm538_vm2, %v10101_v12  ;;  %1302 = vst.msk [vmem:[#allocation3 + $0x50] sm:$0xff] %vm538_vm2, %v10109_v50  ;;  %8120 = vmatprep.subr.bf16.mxu0 %v8361_v15  ;;  %8339 = vmatpush3.bf16.msra.mxu1 %v4668_v9  ;;  %v10280_v41 = vld [vmem:[#allocation2 + $0x228] sm:$0xff]  ;;  %v8362_v0 = vld [vmem:[%s15358_s4 + $0x10] sm:$0xff]  }
 0x1bd   :  { %1303 = vst.msk [vmem:[#allocation3 + $0x58] sm:$0xff] %vm538_vm2, %v10113_v38  ;;  %1304 = vst.msk [vmem:[#allocation3 + $0x60] sm:$0xff] %vm538_vm2, %v10117_v1  ;;  %3026 = vrot.lane.b32.xlu1 %v10088_v33, %s8382_s25  ;;  %8335 = vmatprep.subr.bf16.mxu1 %v8361_v15  ;;  %v10293_v24 = vld [vmem:[#allocation2 + $0x230] sm:$0xff]  ;;  %v10297_v35 = vld [vmem:[#allocation2 + $0x240] sm:$0xff] }
 0x1be   :  { %1305 = vst.msk [vmem:[#allocation3 + $0x68] sm:$0xff] %vm538_vm2, %v10123_v29  ;;  %1306 = vst.msk [vmem:[#allocation3 + $0x70] sm:$0xff] %vm538_vm2, %v10129_v5  ;;  %3410 = vrot.lane.b32.xlu0 %v10022_v47, %s8383_s1  ;;  %v10231_v47 = vld [vmem:[#allocation2 + $0x1c8] sm:$0xff]  ;;  %v10312_v45 = vld [vmem:[#allocation2 + $0x258] sm:$0xff] }
 0x1bf   :  { %1307 = vst.msk [vmem:[#allocation3 + $0x78] sm:$0xff] %vm538_vm2, %v10133_v37  ;;  %1308 = vst.msk [vmem:[#allocation3 + $0x80] sm:$0xff] %vm538_vm2, %v10137_v60  ;;  %8121 = vmatpush3.bf16.msra.mxu0 %v8361_v15  ;;  %v10303_v4 = vld [vmem:[#allocation2 + $0x248] sm:$0xff]  ;;  %v10316_v16 = vld [vmem:[#allocation2 + $0x260] sm:$0xff] }
 0x1c0   :  { %1309 = vst.msk [vmem:[#allocation3 + $0x88] sm:$0xff] %vm538_vm2, %v10145_v11  ;;  %1310 = vst.msk [vmem:[#allocation3 + $0x90] sm:$0xff] %vm538_vm2, %v10151_v56  ;;  %8122 = vmatprep.subr.bf16.mxu0 %v8362_v0  ;;  %8340 = vmatpush3.bf16.msra.mxu1 %v8361_v15  ;;  %v8363_v6 = vld [vmem:[%s15358_s4 + $0x8] sm:$0xff]   ;;  %v10320_v40 = vld [vmem:[#allocation2 + $0x270] sm:$0xff] }
 0x1c1   :  { %1311 = vst.msk [vmem:[#allocation3 + $0x98] sm:$0xff] %vm538_vm2, %v10155_v61  ;;  %1312 = vst.msk [vmem:[#allocation3 + $0xa0] sm:$0xff] %vm538_vm2, %v10159_v31  ;;  %3030 = vrot.lane.b32.xlu1 %v10223_v19, %s8382_s25  ;;  %8336 = vmatprep.subr.bf16.mxu1 %v8362_v0  ;;  %v4054_v22 = vld [vmem:[#allocation2 + $0x4a] sm:$0xff]  ;;  %v10326_v62 = vld [vmem:[#allocation2 + $0x278] sm:$0xff] }
 0x1c2   :  { %1313 = vst.msk [vmem:[#allocation3 + $0xa8] sm:$0xff] %vm538_vm2, %v10165_v20  ;;  %1314 = vst.msk [vmem:[#allocation3 + $0xb0] sm:$0xff] %vm538_vm2, %v10171_v2  ;;  %3414 = vrot.lane.b32.xlu0 %v10060_v43, %s8383_s1  ;;  %v8364_v8 = vld [vmem:[%s15358_s4] sm:$0xff]   ;;  %v10334_v3 = vld [vmem:[#allocation2 + $0x288] sm:$0xff] }
 0x1c3   :  { %1315 = vst.msk [vmem:[#allocation3 + $0xb8] sm:$0xff] %vm538_vm2, %v10175_v13  ;;  %1316 = vst.msk [vmem:[#allocation3 + $0xc0] sm:$0xff] %vm538_vm2, %v10181_v42  ;;  %8123 = vmatpush3.bf16.msra.mxu0 %v8362_v0  ;;  %v10338_v34 = vld [vmem:[#allocation2 + $0x290] sm:$0xff]  ;;  %v10346_v17 = vld [vmem:[#allocation2 + $0x2a0] sm:$0xff] }
 0x1c4   :  { %1317 = vst.msk [vmem:[#allocation3 + $0xc8] sm:$0xff] %vm538_vm2, %v10189_v54  ;;  %1318 = vst.msk [vmem:[#allocation3 + $0xd0] sm:$0xff] %vm538_vm2, %v10195_v36  ;;  %8124 = vmatprep.subr.bf16.mxu0 %v8363_v6  ;;  %8341 = vmatpush3.bf16.msra.mxu1 %v8362_v0  ;;  %v10348_v18 = vld [vmem:[#allocation2 + $0x2a8] sm:$0xff]  ;;  %v10352_v39 = vld [vmem:[#allocation2 + $0x2b8] sm:$0xff] }
 0x1c5   :  { %1319 = vst.msk [vmem:[#allocation3 + $0xd8] sm:$0xff] %vm538_vm2, %v10199_v30  ;;  %1320 = vst.msk [vmem:[#allocation3 + $0xe0] sm:$0xff] %vm538_vm2, %v10203_v59  ;;  %3412 = vrot.lane.b32.xlu1 %v10046_v21, %s8383_s1  ;;  %v10295_v21 = vld [vmem:[#allocation2 + $0x51] sm:$0xff]  ;;  %8337 = vmatprep.subr.bf16.mxu1 %v8363_v6  ;;  %v10358_v25 = vld [vmem:[#allocation2 + $0x2c0] sm:$0xff] }
 0x1c6   :  { %1321 = vst.msk [vmem:[#allocation3 + $0xe8] sm:$0xff] %vm538_vm2, %v10209_v26  ;;  %1322 = vst.msk [vmem:[#allocation3 + $0xf0] sm:$0xff] %vm538_vm2, %v10215_v14  ;;  %3795 = vrot.lane.b32.xlu0 %v10141_v23, %s8384_s26  ;;  %v4055_v10 = vld [vmem:[#allocation2 + $0x52] sm:$0xff]  ;;  %v10388_v9 = vld [vmem:[#allocation2 + $0x308] sm:$0xff] }
 0x1c7   :  { %1323 = vst.msk [vmem:[#allocation3 + $0xf8] sm:$0xff] %vm538_vm2, %v10219_v7  ;;  %1326 = vst.msk [vmem:[#allocation3 + $0x110] sm:$0xff] %vm538_vm2, %v10231_v47  ;;  %8125 = vmatpush3.bf16.msra.mxu0 %v8363_v6  ;;  %v10365_v33 = vld [vmem:[#allocation2 + $0x2d0] sm:$0xff]  ;;  %v10367_v53 = vld [vmem:[#allocation2 + $0x2d8] sm:$0xff] }
 0x1c8   :  { %1328 = vst.msk [vmem:[#allocation3 + $0x120] sm:$0xff] %vm538_vm2, %v10233_v63  ;;  %1327 = vst.msk [vmem:[#allocation3 + $0x118] sm:$0xff] %vm538_vm2, %v10235_v52  ;;  %8126 = vmatprep.subr.bf16.mxu0 %v8364_v8  ;;  %8342 = vmatpush3.bf16.msra.mxu1 %v8363_v6  ;;  %v10378_v46 = vld [vmem:[#allocation2 + $0x2f0] sm:$0xff]  ;;  %v10391_v15 = vld [vmem:[#allocation2 + $0x318] sm:$0xff] }
 0x1c9   :  { %1329 = vst.msk [vmem:[#allocation3 + $0x128] sm:$0xff] %vm538_vm2, %v10243_v58  ;;  %1330 = vst.msk [vmem:[#allocation3 + $0x130] sm:$0xff] %vm538_vm2, %v10249_v57  ;;  %3416 = vrot.lane.b32.xlu1 %v10082_v55, %s8383_s1  ;;  %8338 = vmatprep.subr.bf16.mxu1 %v8364_v8  ;;  %v10397_v0 = vld [vmem:[#allocation2 + $0x320] sm:$0xff] }
 0x1ca   :  { %3799 = vrot.lane.b32.xlu0 %v10253_v32, %s8384_s26  ;;  %1331 = vst.msk [vmem:[#allocation3 + $0x138] sm:$0xff] %vm538_vm2, %v10264_v51  ;;  %1332 = vst.msk [vmem:[#allocation3 + $0x140] sm:$0xff] %vm538_vm2, %v10274_v27  ;;  %v2517_v6 = vld [vmem:[#allocation2 + $0x61] sm:$0xff] }
 0x1cb   :  { %1333 = vst.msk [vmem:[#allocation3 + $0x148] sm:$0xff] %vm538_vm2, %v10276_v28  ;;  %1334 = vst.msk [vmem:[#allocation3 + $0x150] sm:$0xff] %vm538_vm2, %v10280_v41  ;;  %8127 = vmatpush3.bf16.msra.mxu0 %v8364_v8 }
 0x1cc   :  { %1335 = vst.msk [vmem:[#allocation3 + $0x158] sm:$0xff] %vm538_vm2, %v10293_v24  ;;  %1336 = vst.msk [vmem:[#allocation3 + $0x160] sm:$0xff] %vm538_vm2, %v10297_v35  ;;  %8343 = vmatpush3.bf16.msra.mxu1 %v8364_v8 }
 0x1cd   :  { %3797 = vrot.lane.b32.xlu1 %v10179_v48, %s8384_s26  ;;  %1337 = vst.msk [vmem:[#allocation3 + $0x168] sm:$0xff] %vm538_vm2, %v10303_v4  ;;  %1338 = vst.msk [vmem:[#allocation3 + $0x170] sm:$0xff] %vm538_vm2, %v10312_v45 }
 0x1ce   :  { %4180 = vrot.lane.b32.xlu0 %v10185_v44, %s8385_s16  ;;  %1339 = vst.msk [vmem:[#allocation3 + $0x178] sm:$0xff] %vm538_vm2, %v10316_v16  ;;  %1340 = vst.msk [vmem:[#allocation3 + $0x180] sm:$0xff] %vm538_vm2, %v10320_v40 }
 0x1cf   :  { %1341 = vst.msk [vmem:[#allocation3 + $0x188] sm:$0xff] %vm538_vm2, %v10326_v62  ;;  %1342 = vst.msk [vmem:[#allocation3 + $0x190] sm:$0xff] %vm538_vm2, %v10334_v3 }
 0x1d0   :  { %1343 = vst.msk [vmem:[#allocation3 + $0x198] sm:$0xff] %vm538_vm2, %v10338_v34  ;;  %1344 = vst.msk [vmem:[#allocation3 + $0x1a0] sm:$0xff] %vm538_vm2, %v10346_v17 }
 0x1d1   :  { %3801 = vrot.lane.b32.xlu1 %v10295_v21, %s8384_s26  ;;  %1345 = vst.msk [vmem:[#allocation3 + $0x1a8] sm:$0xff] %vm538_vm2, %v10348_v18  ;;  %1346 = vst.msk [vmem:[#allocation3 + $0x1b0] sm:$0xff] %vm538_vm2, %v10352_v39 }
 0x1d2   :  { %1492 = vrot.lane.b32.xlu0 %v10141_v23, %s8378_s0  ;;  %1347 = vst.msk [vmem:[#allocation3 + $0x1b8] sm:$0xff] %vm538_vm2, %v10358_v25  ;;  %v15688_v23 = vmov 0.0   ;;  %1348 = vst.msk [vmem:[#allocation3 + $0x1c0] sm:$0xff] %vm538_vm2, %v10365_v33 }
 0x1d3   :  { %8263 = vmatprep.subr.mxu1 %v15688_v23  ;;  %1349 = vst.msk [vmem:[#allocation3 + $0x1c8] sm:$0xff] %vm538_vm2, %v10367_v53  ;;  %1351 = vst.msk [vmem:[#allocation3 + $0x1d8] sm:$0xff] %vm538_vm2, %v10378_v46 }
 0x1d4   :  { %1353 = vst.msk [vmem:[#allocation3 + $0x1e8] sm:$0xff] %vm538_vm2, %v10388_v9  ;;  %1354 = vst.msk [vmem:[#allocation3 + $0x1f0] sm:$0xff] %vm538_vm2, %v10391_v15 }
 0x1d5   :  { %4182 = vrot.lane.b32.xlu1 %v10223_v19, %s8385_s16  ;;  %1355 = vst.msk [vmem:[#allocation3 + $0x1f8] sm:$0xff] %vm538_vm2, %v10397_v0 }
 0x1d6   :  { %4184 = vrot.lane.b32.xlu0 %v4054_v22, %s8385_s16 }
 0x1d9   :  { %1494 = vrot.lane.b32.xlu1 %v10179_v48, %s8378_s0  ;;  %v10372_v48 = vld [vmem:[#allocation2 + $0x2e8] sm:$0xff] }
 0x1da   :  { %1496 = vrot.lane.b32.xlu0 %v10253_v32, %s8378_s0  ;;  %1350 = vst.msk [vmem:[#allocation3 + $0x1d0] sm:$0xff] %vm538_vm2, %v10372_v48 }
 0x1dd   :  { %4186 = vrot.lane.b32.xlu1 %v4055_v10, %s8385_s16 }
 0x1de   :  { %1877 = vrot.lane.b32.xlu0 %v10185_v44, %s8379_s20  ;;  %v10386_v44 = vld [vmem:[#allocation2 + $0x300] sm:$0xff] }
 0x1df   :  { %1352 = vst.msk [vmem:[#allocation3 + $0x1e0] sm:$0xff] %vm538_vm2, %v10386_v44 }
 0x1e1   :  { %1498 = vrot.lane.b32.xlu1 %v10295_v21, %s8378_s0 }
 0x1e2   :  { %1881 = vrot.lane.b32.xlu0 %v4054_v22, %s8379_s20 }
 0x1e5   :  { %1879 = vrot.lane.b32.xlu1 %v10223_v19, %s8379_s20  ;;  %v2902_v19 = vld [vmem:[#allocation2 + $0x62] sm:$0xff] }
 0x1e6   :  { %2262 = vrot.lane.b32.xlu0 %v10060_v43, %s8380_s2  ;;  %v2518_v43 = vld [vmem:[#allocation2 + $0x69] sm:$0xff] }
 0x1e9   :  { %1883 = vrot.lane.b32.xlu1 %v4055_v10, %s8379_s20 }
 0x1ea   :  { %2266 = vrot.lane.b32.xlu0 %v10090_v49, %s8380_s2 }
 0x1ed   :  { %2264 = vrot.lane.b32.xlu1 %v10082_v55, %s8380_s2  ;;  %v2903_v55 = vld [vmem:[#allocation2 + $0x6a] sm:$0xff] }
 0x1ee   :  { %2647 = vrot.lane.b32.xlu0 %v10253_v32, %s8381_s3  ;;  %v3673_v32 = vld [vmem:[#allocation2 + $0x79] sm:$0xff] }
 0x1f1   :  { %2268 = vrot.lane.b32.xlu1 %v10101_v12, %s8380_s2 }
 0x1f2   :  { %2651 = vrot.lane.b32.xlu0 %v2517_v6, %s8381_s3 }
 0x1f5   :  { %2649 = vrot.lane.b32.xlu1 %v10295_v21, %s8381_s3 }
 0x1f6   :  { %3032 = vrot.lane.b32.xlu0 %v4054_v22, %s8382_s25 }
 0x1f9   :  { %2653 = vrot.lane.b32.xlu1 %v2518_v43, %s8381_s3 }
 0x1fa   :  { %3036 = vrot.lane.b32.xlu0 %v2902_v19, %s8382_s25 }
 0x1fd   :  { %3034 = vrot.lane.b32.xlu1 %v4055_v10, %s8382_s25 }
 0x1fe   :  { %3418 = vrot.lane.b32.xlu0 %v10090_v49, %s8383_s1  ;;  %v3674_v49 = vld [vmem:[#allocation2 + $0x81] sm:$0xff] }
 0x201   :  { %3038 = vrot.lane.b32.xlu1 %v2903_v55, %s8382_s25 }
 0x202   :  { %3422 = vrot.lane.b32.xlu0 %v10109_v50, %s8383_s1 }
 0x205   :  { %3420 = vrot.lane.b32.xlu1 %v10101_v12, %s8383_s1  ;;  %v4058_v12 = vld [vmem:[#allocation2 + $0x7a] sm:$0xff] }
 0x206   :  { %3803 = vrot.lane.b32.xlu0 %v2517_v6, %s8384_s26 }
 0x209   :  { %3424 = vrot.lane.b32.xlu1 %v10113_v38, %s8383_s1 }
 0x20a   :  { %3807 = vrot.lane.b32.xlu0 %v3673_v32, %s8384_s26 }
 0x20d   :  { %3805 = vrot.lane.b32.xlu1 %v2518_v43, %s8384_s26 }
 0x20e   :  { %4188 = vrot.lane.b32.xlu0 %v2902_v19, %s8385_s16 }
 0x211   :  { %3809 = vrot.lane.b32.xlu1 %v3674_v49, %s8384_s26 }
 0x212   :  { %1500 = vrot.lane.b32.xlu0 %v2517_v6, %s8378_s0  ;;  %v1489_v21 = vpop.permute.xlu1 %1488 }
 0x213   :  { %1679 = vst.msk [vmem:[#allocation3 + $0x10] sm:$0xff] %vm1676_vm5, %v1489_v21 }
 0x214   :  { %v1874_v22 = vpop.permute.xlu0 %1873 }
 0x215   :  { %2064 = vst.msk [vmem:[#allocation3 + $0x10] sm:$0xff] %vm2061_vm6, %v1874_v22  ;;  %4190 = vrot.lane.b32.xlu1 %v2903_v55, %s8385_s16  ;;  %v4059_v22 = vld [vmem:[#allocation2 + $0x82] sm:$0xff] }
 0x216   :  { %4192 = vrot.lane.b32.xlu0 %v4058_v12, %s8385_s16 }
 0x217   :  { %v1491_v8 = vpop.permute.xlu1 %1490 }
 0x218   :  { %v2255_v10 = vpop.permute.xlu0 %2254  ;;  %1680 = vst.msk [vmem:[#allocation3 + $0x18] sm:$0xff] %vm1676_vm5, %v1491_v8 }
 0x219   :  { %2447 = vst.msk [vmem:[#allocation3] sm:$0xff] %vm2446_vm8, %v2255_v10  ;;  %1502 = vrot.lane.b32.xlu1 %v2518_v43, %s8378_s0 }
 0x21a   :  { %1504 = vrot.lane.b32.xlu0 %v3673_v32, %s8378_s0 }
 0x21b   :  { %v1876_v6 = vpop.permute.xlu1 %1875 }
 0x21c   :  { %v2259_v21 = vpop.permute.xlu0 %2258  ;;  %2065 = vst.msk [vmem:[#allocation3 + $0x18] sm:$0xff] %vm2061_vm6, %v1876_v6 }
 0x21d   :  { %2449 = vst.msk [vmem:[#allocation3 + $0x10] sm:$0xff] %vm2446_vm8, %v2259_v21  ;;  %4194 = vrot.lane.b32.xlu1 %v4059_v22, %s8385_s16 }
 0x21e   :  { %1885 = vrot.lane.b32.xlu0 %v2902_v19, %s8379_s20 }
 0x21f   :  { %v2257_v23 = vpop.permute.xlu1 %2256 }
 0x220   :  { %v2640_v8 = vpop.permute.xlu0 %2639  ;;  %2448 = vst.msk [vmem:[#allocation3 + $0x8] sm:$0xff] %vm2446_vm8, %v2257_v23 }
 0x221   :  { %2832 = vst.msk [vmem:[#allocation3] sm:$0xff] %vm2831_vm9, %v2640_v8  ;;  %1506 = vrot.lane.b32.xlu1 %v3674_v49, %s8378_s0  ;;  %v2521_v8 = vld [vmem:[#allocation2 + $0x91] sm:$0xff] }
 0x222   :  { %1889 = vrot.lane.b32.xlu0 %v4058_v12, %s8379_s20 }
 0x223   :  { %v2261_v43 = vpop.permute.xlu1 %2260 }
 0x224   :  { %v2644_v10 = vpop.permute.xlu0 %2643  ;;  %2450 = vst.msk [vmem:[#allocation3 + $0x18] sm:$0xff] %vm2446_vm8, %v2261_v43 }
 0x225   :  { %2834 = vst.msk [vmem:[#allocation3 + $0x10] sm:$0xff] %vm2831_vm9, %v2644_v10  ;;  %1887 = vrot.lane.b32.xlu1 %v2903_v55, %s8379_s20 }
 0x226   :  { %2270 = vrot.lane.b32.xlu0 %v10109_v50, %s8380_s2 }
 0x227   :  { %v2642_v19 = vpop.permute.xlu1 %2641 }
 0x228   :  { %v3025_v23 = vpop.permute.xlu0 %3024  ;;  %2833 = vst.msk [vmem:[#allocation3 + $0x8] sm:$0xff] %vm2831_vm9, %v2642_v19  ;;  %v10479_v19 = vld [vmem:[#allocation2 + $0x99] sm:$0xff] }
 0x229   :  { %3217 = vst.msk [vmem:[#allocation3] sm:$0xff] %vm3216_vm10, %v3025_v23  ;;  %1891 = vrot.lane.b32.xlu1 %v4059_v22, %s8379_s20  ;;  %v10482_v23 = vld [vmem:[#allocation2 + $0x92] sm:$0xff] }
 0x22a   :  { %2274 = vrot.lane.b32.xlu0 %v10117_v1, %s8380_s2 }
 0x22b   :  { %v2646_v6 = vpop.permute.xlu1 %2645 }
 0x22c   :  { %v3029_v21 = vpop.permute.xlu0 %3028  ;;  %2835 = vst.msk [vmem:[#allocation3 + $0x18] sm:$0xff] %vm2831_vm9, %v2646_v6 }
 0x22d   :  { %3219 = vst.msk [vmem:[#allocation3 + $0x10] sm:$0xff] %vm3216_vm10, %v3029_v21  ;;  %2272 = vrot.lane.b32.xlu1 %v10113_v38, %s8380_s2 }
 0x22e   :  { %2655 = vrot.lane.b32.xlu0 %v3673_v32, %s8381_s3 }
 0x22f   :  { %v3027_v50 = vpop.permute.xlu1 %3026 }
 0x230   :  { %v3411_v55 = vpop.permute.xlu0 %3410  ;;  %3218 = vst.msk [vmem:[#allocation3 + $0x8] sm:$0xff] %vm3216_vm10, %v3027_v50  ;;  %v10494_v50 = vld [vmem:[#allocation2 + $0x9a] sm:$0xff] }
 0x231   :  { %3603 = vst.msk [vmem:[#allocation3] sm:$0xff] %vm3602_vm11, %v3411_v55  ;;  %2276 = vrot.lane.b32.xlu1 %v10123_v29, %s8380_s2 }
 0x232   :  { %2659 = vrot.lane.b32.xlu0 %v2521_v8, %s8381_s3 }
 0x233   :  { %v3031_v43 = vpop.permute.xlu1 %3030 }
 0x234   :  { %v3415_v10 = vpop.permute.xlu0 %3414  ;;  %3220 = vst.msk [vmem:[#allocation3 + $0x18] sm:$0xff] %vm3216_vm10, %v3031_v43 }
 0x235   :  { %3605 = vst.msk [vmem:[#allocation3 + $0x10] sm:$0xff] %vm3602_vm11, %v3415_v10  ;;  %2657 = vrot.lane.b32.xlu1 %v3674_v49, %s8381_s3  ;;  %v10508_v10 = vld [vmem:[#allocation2 + $0xa9] sm:$0xff] }
 0x236   :  { %3040 = vrot.lane.b32.xlu0 %v4058_v12, %s8382_s25 }
 0x237   :  { %v3413_v38 = vpop.permute.xlu1 %3412 }
 0x238   :  { %v3796_v32 = vpop.permute.xlu0 %3795  ;;  %3604 = vst.msk [vmem:[#allocation3 + $0x8] sm:$0xff] %vm3602_vm11, %v3413_v38 }
 0x239   :  { %3988 = vst.msk [vmem:[#allocation3] sm:$0xff] %vm3987_vm12, %v3796_v32  ;;  %2661 = vrot.lane.b32.xlu1 %v10479_v19, %s8381_s3 }
 0x23a   :  { %3044 = vrot.lane.b32.xlu0 %v10482_v23, %s8382_s25 }
 0x23b   :  { %v3417_v49 = vpop.permute.xlu1 %3416 }
 0x23c   :  { %v3800_v6 = vpop.permute.xlu0 %3799  ;;  %3606 = vst.msk [vmem:[#allocation3 + $0x18] sm:$0xff] %vm3602_vm11, %v3417_v49 }
 0x23d   :  { %3990 = vst.msk [vmem:[#allocation3 + $0x10] sm:$0xff] %vm3987_vm12, %v3800_v6  ;;  %3042 = vrot.lane.b32.xlu1 %v4059_v22, %s8382_s25 }
 0x23e   :  { %3426 = vrot.lane.b32.xlu0 %v10117_v1, %s8383_s1 }
 0x23f   :  { %v3798_v12 = vpop.permute.xlu1 %3797 }
 0x240   :  { %v4181_v21 = vpop.permute.xlu0 %4180  ;;  %3989 = vst.msk [vmem:[#allocation3 + $0x8] sm:$0xff] %vm3987_vm12, %v3798_v12 }
 0x241   :  { %4373 = vst.msk [vmem:[#allocation3] sm:$0xff] %vm4372_vm13, %v4181_v21  ;;  %3046 = vrot.lane.b32.xlu1 %v10494_v50, %s8382_s25  ;;  %v10521_v21 = vld [vmem:[#allocation2 + $0xb1] sm:$0xff] }
 0x242   :  { %3430 = vrot.lane.b32.xlu0 %v10129_v5, %s8383_s1 }
 0x243   :  { %v3802_v55 = vpop.permute.xlu1 %3801 }
 0x244   :  { %v1493_v22 = vpop.permute.xlu0 %1492  ;;  %3991 = vst.msk [vmem:[#allocation3 + $0x18] sm:$0xff] %vm3987_vm12, %v3802_v55 }
 0x245   :  { %1681 = vst.msk [vmem:[#allocation3 + $0x20] sm:$0xff] %vm1676_vm5, %v1493_v22  ;;  %3428 = vrot.lane.b32.xlu1 %v10123_v29, %s8383_s1 }
 0x246   :  { %3811 = vrot.lane.b32.xlu0 %v2521_v8, %s8384_s26 }
 0x247   :  { %v4183_v1 = vpop.permute.xlu1 %4182 }
 0x248   :  { %v4185_v43 = vpop.permute.xlu0 %4184  ;;  %4374 = vst.msk [vmem:[#allocation3 + $0x8] sm:$0xff] %vm4372_vm13, %v4183_v1  ;;  %v4437_v49 = vld [vmem:[#allocation3] sm:$0xff] }
 0x249   :  { %4375 = vst.msk [vmem:[#allocation3 + $0x10] sm:$0xff] %vm4372_vm13, %v4185_v43  ;;  %3432 = vrot.lane.b32.xlu1 %v10133_v37, %s8383_s1  ;;  %v4062_v43 = vld [vmem:[#allocation2 + $0xaa] sm:$0xff] }
 0x24a   :  { %3815 = vrot.lane.b32.xlu0 %v10508_v10, %s8384_s26 }
 0x24b   :  { %v1495_v38 = vpop.permute.xlu1 %1494 }
 0x24c   :  { %v1497_v32 = vpop.permute.xlu0 %1496  ;;  %1682 = vst.msk [vmem:[#allocation3 + $0x28] sm:$0xff] %vm1676_vm5, %v1495_v38 }
 0x24d   :  { %1683 = vst.msk [vmem:[#allocation3 + $0x30] sm:$0xff] %vm1676_vm5, %v1497_v32  ;;  %3813 = vrot.lane.b32.xlu1 %v10479_v19, %s8384_s26 }
 0x24e   :  { %4196 = vrot.lane.b32.xlu0 %v10482_v23, %s8385_s16 }
 0x24f   :  { %v4187_v29 = vpop.permute.xlu1 %4186  ;;  %v4438_v6 = vld [vmem:[#allocation3 + $0x8] sm:$0xff] }
 0x250   :  { %v1878_v12 = vpop.permute.xlu0 %1877  ;;  %4376 = vst.msk [vmem:[#allocation3 + $0x18] sm:$0xff] %vm4372_vm13, %v4187_v29  ;;  %v4501_v55 = vpack.c.bf16 %v4438_v6, %v4437_v49  ;;  %v4439_v32 = vld [vmem:[#allocation3 + $0x10] sm:$0xff] }
 0x251   :  { %2066 = vst.msk [vmem:[#allocation3 + $0x20] sm:$0xff] %vm2061_vm6, %v1878_v12  ;;  %3817 = vrot.lane.b32.xlu1 %v10521_v21, %s8384_s26 }
 0x252   :  { %1508 = vrot.lane.b32.xlu0 %v2521_v8, %s8378_s0  ;;  %8128 = vmatprep.mubr.msk.bf16.mxu0 %vm4569_vm14, %v4501_v55  ;;  %v4063_v55 = vld [vmem:[#allocation2 + $0xb2] sm:$0xff] }
 0x253   :  { %v1499_v22 = vpop.permute.xlu1 %1498 }
 0x254   :  { %v1882_v1 = vpop.permute.xlu0 %1881  ;;  %1684 = vst.msk [vmem:[#allocation3 + $0x38] sm:$0xff] %vm1676_vm5, %v1499_v22 }
 0x255   :  { %2068 = vst.msk [vmem:[#allocation3 + $0x30] sm:$0xff] %vm2061_vm6, %v1882_v1  ;;  %4198 = vrot.lane.b32.xlu1 %v10494_v50, %s8385_s16 }
 0x256   :  { %4200 = vrot.lane.b32.xlu0 %v4062_v43, %s8385_s16 }
 0x257   :  { %v1880_v38 = vpop.permute.xlu1 %1879  ;;  %v4440_v29 = vld [vmem:[#allocation3 + $0x18] sm:$0xff] }
 0x258   :  { %v2263_v49 = vpop.permute.xlu0 %2262  ;;  %2067 = vst.msk [vmem:[#allocation3 + $0x28] sm:$0xff] %vm2061_vm6, %v1880_v38  ;;  %v4502_v8 = vpack.c.bf16 %v4440_v29, %v4439_v32 }
 0x259   :  { %2451 = vst.msk [vmem:[#allocation3 + $0x20] sm:$0xff] %vm2446_vm8, %v2263_v49  ;;  %1510 = vrot.lane.b32.xlu1 %v10479_v19, %s8378_s0 }
 0x25a   :  { %1512 = vrot.lane.b32.xlu0 %v10508_v10, %s8378_s0  ;;  %8129 = vmatmul.mubr.msk.bf16.vlgmr.msra.gmra.mxu0 %vm4569_vm14, %v4502_v8  ;;  %v2525_v8 = vld [vmem:[#allocation2 + $0xc1] sm:$0xff] }
 0x25b   :  { %v1884_v6 = vpop.permute.xlu1 %1883 }
 0x25c   :  { %v2267_v12 = vpop.permute.xlu0 %2266  ;;  %2069 = vst.msk [vmem:[#allocation3 + $0x38] sm:$0xff] %vm2061_vm6, %v1884_v6 }
 0x25d   :  { %2453 = vst.msk [vmem:[#allocation3 + $0x30] sm:$0xff] %vm2446_vm8, %v2267_v12  ;;  %4202 = vrot.lane.b32.xlu1 %v4063_v55, %s8385_s16 }
 0x25e   :  { %1893 = vrot.lane.b32.xlu0 %v10482_v23, %s8379_s20 }
 0x25f   :  { %v2265_v22 = vpop.permute.xlu1 %2264 }
 0x260   :  { %v2648_v1 = vpop.permute.xlu0 %2647  ;;  %2452 = vst.msk [vmem:[#allocation3 + $0x28] sm:$0xff] %vm2446_vm8, %v2265_v22  ;;  %v2526_v22 = vld [vmem:[#allocation2 + $0xc9] sm:$0xff] }
 0x261   :  { %2836 = vst.msk [vmem:[#allocation3 + $0x20] sm:$0xff] %vm2831_vm9, %v2648_v1  ;;  %1514 = vrot.lane.b32.xlu1 %v10521_v21, %s8378_s0  ;;  %v10579_v1 = vld [vmem:[#allocation2 + $0xc2] sm:$0xff] }
 0x262   :  { %1897 = vrot.lane.b32.xlu0 %v4062_v43, %s8379_s20 }
 0x263   :  { %v2269_v19 = vpop.permute.xlu1 %2268 }
 0x264   :  { %v2652_v38 = vpop.permute.xlu0 %2651  ;;  %2454 = vst.msk [vmem:[#allocation3 + $0x38] sm:$0xff] %vm2446_vm8, %v2269_v19 }
 0x265   :  { %2838 = vst.msk [vmem:[#allocation3 + $0x30] sm:$0xff] %vm2831_vm9, %v2652_v38  ;;  %1895 = vrot.lane.b32.xlu1 %v10494_v50, %s8379_s20 }
 0x266   :  { %2278 = vrot.lane.b32.xlu0 %v10129_v5, %s8380_s2 }
 0x267   :  { %v2650_v23 = vpop.permute.xlu1 %2649 }
 0x268   :  { %v3033_v32 = vpop.permute.xlu0 %3032  ;;  %2837 = vst.msk [vmem:[#allocation3 + $0x28] sm:$0xff] %vm2831_vm9, %v2650_v23  ;;  %v10590_v23 = vld [vmem:[#allocation2 + $0xca] sm:$0xff] }
 0x269   :  { %3221 = vst.msk [vmem:[#allocation3 + $0x20] sm:$0xff] %vm3216_vm10, %v3033_v32  ;;  %1899 = vrot.lane.b32.xlu1 %v4063_v55, %s8379_s20 }
 0x26a   :  { %2282 = vrot.lane.b32.xlu0 %v10137_v60, %s8380_s2 }
 0x26b   :  { %v2654_v29 = vpop.permute.xlu1 %2653 }
 0x26c   :  { %v3037_v49 = vpop.permute.xlu0 %3036  ;;  %2839 = vst.msk [vmem:[#allocation3 + $0x38] sm:$0xff] %vm2831_vm9, %v2654_v29 }
 0x26d   :  { %3223 = vst.msk [vmem:[#allocation3 + $0x30] sm:$0xff] %vm3216_vm10, %v3037_v49  ;;  %2280 = vrot.lane.b32.xlu1 %v10133_v37, %s8380_s2  ;;  %v10604_v49 = vld [vmem:[#allocation2 + $0xd9] sm:$0xff] }
 0x26e   :  { %2663 = vrot.lane.b32.xlu0 %v10508_v10, %s8381_s3 }
 0x26f   :  { %v3035_v5 = vpop.permute.xlu1 %3034 }
 0x270   :  { %v3419_v50 = vpop.permute.xlu0 %3418  ;;  %3222 = vst.msk [vmem:[#allocation3 + $0x28] sm:$0xff] %vm3216_vm10, %v3035_v5 }
 0x271   :  { %3607 = vst.msk [vmem:[#allocation3 + $0x20] sm:$0xff] %vm3602_vm11, %v3419_v50  ;;  %2284 = vrot.lane.b32.xlu1 %v10145_v11, %s8380_s2 }
 0x272   :  { %2667 = vrot.lane.b32.xlu0 %v2525_v8, %s8381_s3 }
 0x273   :  { %v3039_v6 = vpop.permute.xlu1 %3038 }
 0x274   :  { %v3423_v12 = vpop.permute.xlu0 %3422  ;;  %3224 = vst.msk [vmem:[#allocation3 + $0x38] sm:$0xff] %vm3216_vm10, %v3039_v6 }
 0x275   :  { %3609 = vst.msk [vmem:[#allocation3 + $0x30] sm:$0xff] %vm3602_vm11, %v3423_v12  ;;  %2665 = vrot.lane.b32.xlu1 %v10521_v21, %s8381_s3 }
 0x276   :  { %3048 = vrot.lane.b32.xlu0 %v4062_v43, %s8382_s25 }
 0x277   :  { %v3421_v37 = vpop.permute.xlu1 %3420 }
 0x278   :  { %v3804_v10 = vpop.permute.xlu0 %3803  ;;  %3608 = vst.msk [vmem:[#allocation3 + $0x28] sm:$0xff] %vm3602_vm11, %v3421_v37 }
 0x279   :  { %3992 = vst.msk [vmem:[#allocation3 + $0x20] sm:$0xff] %vm3987_vm12, %v3804_v10  ;;  %2669 = vrot.lane.b32.xlu1 %v2526_v22, %s8381_s3  ;;  %v10616_v10 = vld [vmem:[#allocation2 + $0xe1] sm:$0xff] }
 0x27a   :  { %3052 = vrot.lane.b32.xlu0 %v10579_v1, %s8382_s25 }
 0x27b   :  { %v3425_v19 = vpop.permute.xlu1 %3424 }
 0x27c   :  { %v3808_v38 = vpop.permute.xlu0 %3807  ;;  %3610 = vst.msk [vmem:[#allocation3 + $0x38] sm:$0xff] %vm3602_vm11, %v3425_v19 }
 0x27d   :  { %3994 = vst.msk [vmem:[#allocation3 + $0x30] sm:$0xff] %vm3987_vm12, %v3808_v38  ;;  %3050 = vrot.lane.b32.xlu1 %v4063_v55, %s8382_s25 }
 0x27e   :  { %3434 = vrot.lane.b32.xlu0 %v10137_v60, %s8383_s1 }
 0x27f   :  { %v3806_v21 = vpop.permute.xlu1 %3805 }
 0x280   :  { %v4189_v43 = vpop.permute.xlu0 %4188  ;;  %3993 = vst.msk [vmem:[#allocation3 + $0x28] sm:$0xff] %vm3987_vm12, %v3806_v21 }
 0x281   :  { %4377 = vst.msk [vmem:[#allocation3 + $0x20] sm:$0xff] %vm4372_vm13, %v4189_v43  ;;  %3054 = vrot.lane.b32.xlu1 %v10590_v23, %s8382_s25  ;;  %v4066_v43 = vld [vmem:[#allocation2 + $0xda] sm:$0xff] }
 0x282   :  { %3438 = vrot.lane.b32.xlu0 %v10151_v56, %s8383_s1 }
 0x283   :  { %v3810_v32 = vpop.permute.xlu1 %3809 }
 0x284   :  { %v1501_v29 = vpop.permute.xlu0 %1500  ;;  %3995 = vst.msk [vmem:[#allocation3 + $0x38] sm:$0xff] %vm3987_vm12, %v3810_v32 }
 0x285   :  { %1685 = vst.msk [vmem:[#allocation3 + $0x40] sm:$0xff] %vm1676_vm5, %v1501_v29  ;;  %3436 = vrot.lane.b32.xlu1 %v10145_v11, %s8383_s1 }
 0x286   :  { %3819 = vrot.lane.b32.xlu0 %v2525_v8, %s8384_s26 }
 0x287   :  { %v4191_v60 = vpop.permute.xlu1 %4190 }
 0x288   :  { %v4193_v55 = vpop.permute.xlu0 %4192  ;;  %4378 = vst.msk [vmem:[#allocation3 + $0x28] sm:$0xff] %vm4372_vm13, %v4191_v60  ;;  %v4441_v6 = vld [vmem:[#allocation3 + $0x20] sm:$0xff] }
 0x289   :  { %4379 = vst.msk [vmem:[#allocation3 + $0x30] sm:$0xff] %vm4372_vm13, %v4193_v55  ;;  %3440 = vrot.lane.b32.xlu1 %v10155_v61, %s8383_s1 }
 0x28a   :  { %3823 = vrot.lane.b32.xlu0 %v10604_v49, %s8384_s26 }
 0x28b   :  { %v1503_v5 = vpop.permute.xlu1 %1502 }
 0x28c   :  { %v1505_v50 = vpop.permute.xlu0 %1504  ;;  %1686 = vst.msk [vmem:[#allocation3 + $0x48] sm:$0xff] %vm1676_vm5, %v1503_v5 }
 0x28d   :  { %1687 = vst.msk [vmem:[#allocation3 + $0x50] sm:$0xff] %vm1676_vm5, %v1505_v50  ;;  %3821 = vrot.lane.b32.xlu1 %v2526_v22, %s8384_s26 }
 0x28e   :  { %4204 = vrot.lane.b32.xlu0 %v10579_v1, %s8385_s16 }
 0x28f   :  { %v4195_v11 = vpop.permute.xlu1 %4194  ;;  %v4442_v12 = vld [vmem:[#allocation3 + $0x28] sm:$0xff] }
 0x290   :  { %v1886_v37 = vpop.permute.xlu0 %1885  ;;  %4380 = vst.msk [vmem:[#allocation3 + $0x38] sm:$0xff] %vm4372_vm13, %v4195_v11  ;;  %v4503_v19 = vpack.c.bf16 %v4442_v12, %v4441_v6  ;;  %v4443_v29 = vld [vmem:[#allocation3 + $0x30] sm:$0xff]  ;;  %v4067_v11 = vld [vmem:[#allocation2 + $0xe2] sm:$0xff] }
 0x291   :  { %2070 = vst.msk [vmem:[#allocation3 + $0x40] sm:$0xff] %vm2061_vm6, %v1886_v37  ;;  %3825 = vrot.lane.b32.xlu1 %v10616_v10, %s8384_s26 }
 0x292   :  { %1516 = vrot.lane.b32.xlu0 %v2525_v8, %s8378_s0  ;;  %8132 = vmatprep.mubr.msk.bf16.mxu1 %vm4569_vm14, %v4503_v19 }
 0x293   :  { %v1507_v38 = vpop.permute.xlu1 %1506 }
 0x294   :  { %v1890_v21 = vpop.permute.xlu0 %1889  ;;  %1688 = vst.msk [vmem:[#allocation3 + $0x58] sm:$0xff] %vm1676_vm5, %v1507_v38 }
 0x295   :  { %2072 = vst.msk [vmem:[#allocation3 + $0x50] sm:$0xff] %vm2061_vm6, %v1890_v21  ;;  %4206 = vrot.lane.b32.xlu1 %v10590_v23, %s8385_s16 }
 0x296   :  { %4208 = vrot.lane.b32.xlu0 %v4066_v43, %s8385_s16 }
 0x297   :  { %v1888_v32 = vpop.permute.xlu1 %1887  ;;  %v4444_v60 = vld [vmem:[#allocation3 + $0x38] sm:$0xff] }
 0x298   :  { %v2271_v55 = vpop.permute.xlu0 %2270  ;;  %2071 = vst.msk [vmem:[#allocation3 + $0x48] sm:$0xff] %vm2061_vm6, %v1888_v32  ;;  %v4504_v8 = vpack.c.bf16 %v4444_v60, %v4443_v29  ;;  %v2529_v32 = vld [vmem:[#allocation2 + $0xf1] sm:$0xff] }
 0x299   :  { %2455 = vst.msk [vmem:[#allocation3 + $0x40] sm:$0xff] %vm2446_vm8, %v2271_v55  ;;  %1518 = vrot.lane.b32.xlu1 %v2526_v22, %s8378_s0  ;;  %v2530_v55 = vld [vmem:[#allocation2 + $0xf9] sm:$0xff] }
 0x29a   :  { %1520 = vrot.lane.b32.xlu0 %v10604_v49, %s8378_s0  ;;  %8133 = vmatmul.mubr.msk.bf16.vlgmr.msra.gmra.mxu1 %vm4569_vm14, %v4504_v8  ;;  %v10673_v8 = vld [vmem:[#allocation2 + $0xf2] sm:$0xff] }
 0x29b   :  { %v1892_v5 = vpop.permute.xlu1 %1891 }
 0x29c   :  { %v2275_v50 = vpop.permute.xlu0 %2274  ;;  %2073 = vst.msk [vmem:[#allocation3 + $0x58] sm:$0xff] %vm2061_vm6, %v1892_v5 }
 0x29d   :  { %2457 = vst.msk [vmem:[#allocation3 + $0x50] sm:$0xff] %vm2446_vm8, %v2275_v50  ;;  %4210 = vrot.lane.b32.xlu1 %v4067_v11, %s8385_s16 }
 0x29e   :  { %1901 = vrot.lane.b32.xlu0 %v10579_v1, %s8379_s20 }
 0x29f   :  { %v2273_v6 = vpop.permute.xlu1 %2272 }
 0x2a0   :  { %v2656_v12 = vpop.permute.xlu0 %2655  ;;  %2456 = vst.msk [vmem:[#allocation3 + $0x48] sm:$0xff] %vm2446_vm8, %v2273_v6  ;;  %v10684_v6 = vld [vmem:[#allocation2 + $0xfa] sm:$0xff] }
 0x2a1   :  { %2840 = vst.msk [vmem:[#allocation3 + $0x40] sm:$0xff] %vm2831_vm9, %v2656_v12  ;;  %1522 = vrot.lane.b32.xlu1 %v10616_v10, %s8378_s0 }
 0x2a2   :  { %1905 = vrot.lane.b32.xlu0 %v4066_v43, %s8379_s20 }
 0x2a3   :  { %v2277_v22 = vpop.permute.xlu1 %2276 }
 0x2a4   :  { %v2660_v37 = vpop.permute.xlu0 %2659  ;;  %2458 = vst.msk [vmem:[#allocation3 + $0x58] sm:$0xff] %vm2446_vm8, %v2277_v22 }
 0x2a5   :  { %2842 = vst.msk [vmem:[#allocation3 + $0x50] sm:$0xff] %vm2831_vm9, %v2660_v37  ;;  %1903 = vrot.lane.b32.xlu1 %v10590_v23, %s8379_s20  ;;  %v10698_v37 = vld [vmem:[#allocation2 + $0x109] sm:$0xff] }
 0x2a6   :  { %2286 = vrot.lane.b32.xlu0 %v10151_v56, %s8380_s2 }
 0x2a7   :  { %v2658_v1 = vpop.permute.xlu1 %2657 }
 0x2a8   :  { %v3041_v19 = vpop.permute.xlu0 %3040  ;;  %2841 = vst.msk [vmem:[#allocation3 + $0x48] sm:$0xff] %vm2831_vm9, %v2658_v1 }
 0x2a9   :  { %3225 = vst.msk [vmem:[#allocation3 + $0x40] sm:$0xff] %vm3216_vm10, %v3041_v19  ;;  %1907 = vrot.lane.b32.xlu1 %v4067_v11, %s8379_s20 }
 0x2aa   :  { %2290 = vrot.lane.b32.xlu0 %v10159_v31, %s8380_s2 }
 0x2ab   :  { %v2662_v38 = vpop.permute.xlu1 %2661 }
 0x2ac   :  { %v3045_v21 = vpop.permute.xlu0 %3044  ;;  %2843 = vst.msk [vmem:[#allocation3 + $0x58] sm:$0xff] %vm2831_vm9, %v2662_v38 }
 0x2ad   :  { %3227 = vst.msk [vmem:[#allocation3 + $0x50] sm:$0xff] %vm3216_vm10, %v3045_v21  ;;  %2288 = vrot.lane.b32.xlu1 %v10155_v61, %s8380_s2 }
 0x2ae   :  { %2671 = vrot.lane.b32.xlu0 %v10604_v49, %s8381_s3 }
 0x2af   :  { %v3043_v56 = vpop.permute.xlu1 %3042 }
 0x2b0   :  { %v3427_v23 = vpop.permute.xlu0 %3426  ;;  %3226 = vst.msk [vmem:[#allocation3 + $0x48] sm:$0xff] %vm3216_vm10, %v3043_v56 }
 0x2b1   :  { %3611 = vst.msk [vmem:[#allocation3 + $0x40] sm:$0xff] %vm3602_vm11, %v3427_v23  ;;  %2292 = vrot.lane.b32.xlu1 %v10165_v20, %s8380_s2  ;;  %v10710_v23 = vld [vmem:[#allocation2 + $0x111] sm:$0xff] }
 0x2b2   :  { %2675 = vrot.lane.b32.xlu0 %v2529_v32, %s8381_s3 }
 0x2b3   :  { %v3047_v29 = vpop.permute.xlu1 %3046 }
 0x2b4   :  { %v3431_v60 = vpop.permute.xlu0 %3430  ;;  %3228 = vst.msk [vmem:[#allocation3 + $0x58] sm:$0xff] %vm3216_vm10, %v3047_v29 }
 0x2b5   :  { %3613 = vst.msk [vmem:[#allocation3 + $0x50] sm:$0xff] %vm3602_vm11, %v3431_v60  ;;  %2673 = vrot.lane.b32.xlu1 %v10616_v10, %s8381_s3 }
 0x2b6   :  { %3056 = vrot.lane.b32.xlu0 %v4066_v43, %s8382_s25 }
 0x2b7   :  { %v3429_v61 = vpop.permute.xlu1 %3428 }
 0x2b8   :  { %v3812_v49 = vpop.permute.xlu0 %3811  ;;  %3612 = vst.msk [vmem:[#allocation3 + $0x48] sm:$0xff] %vm3602_vm11, %v3429_v61 }
 0x2b9   :  { %3996 = vst.msk [vmem:[#allocation3 + $0x40] sm:$0xff] %vm3987_vm12, %v3812_v49  ;;  %2677 = vrot.lane.b32.xlu1 %v2530_v55, %s8381_s3  ;;  %v4070_v49 = vld [vmem:[#allocation2 + $0x10a] sm:$0xff] }
 0x2ba   :  { %3060 = vrot.lane.b32.xlu0 %v10673_v8, %s8382_s25 }
 0x2bb   :  { %v3433_v5 = vpop.permute.xlu1 %3432 }
 0x2bc   :  { %v3816_v50 = vpop.permute.xlu0 %3815  ;;  %3614 = vst.msk [vmem:[#allocation3 + $0x58] sm:$0xff] %vm3602_vm11, %v3433_v5 }
 0x2bd   :  { %3998 = vst.msk [vmem:[#allocation3 + $0x50] sm:$0xff] %vm3987_vm12, %v3816_v50  ;;  %3058 = vrot.lane.b32.xlu1 %v4067_v11, %s8382_s25 }
 0x2be   :  { %3442 = vrot.lane.b32.xlu0 %v10159_v31, %s8383_s1 }
 0x2bf   :  { %v3814_v10 = vpop.permute.xlu1 %3813 }
 0x2c0   :  { %v4197_v43 = vpop.permute.xlu0 %4196  ;;  %3997 = vst.msk [vmem:[#allocation3 + $0x48] sm:$0xff] %vm3987_vm12, %v3814_v10 }
 0x2c1   :  { %4381 = vst.msk [vmem:[#allocation3 + $0x40] sm:$0xff] %vm4372_vm13, %v4197_v43  ;;  %3062 = vrot.lane.b32.xlu1 %v10684_v6, %s8382_s25 }
 0x2c2   :  { %3446 = vrot.lane.b32.xlu0 %v10171_v2, %s8383_s1 }
 0x2c3   :  { %v3818_v12 = vpop.permute.xlu1 %3817 }
 0x2c4   :  { %v1509_v22 = vpop.permute.xlu0 %1508  ;;  %3999 = vst.msk [vmem:[#allocation3 + $0x58] sm:$0xff] %vm3987_vm12, %v3818_v12 }
 0x2c5   :  { %1689 = vst.msk [vmem:[#allocation3 + $0x60] sm:$0xff] %vm1676_vm5, %v1509_v22  ;;  %3444 = vrot.lane.b32.xlu1 %v10165_v20, %s8383_s1 }
 0x2c6   :  { %3827 = vrot.lane.b32.xlu0 %v2529_v32, %s8384_s26 }
 0x2c7   :  { %v4199_v31 = vpop.permute.xlu1 %4198 }
 0x2c8   :  { %v4201_v11 = vpop.permute.xlu0 %4200  ;;  %4382 = vst.msk [vmem:[#allocation3 + $0x48] sm:$0xff] %vm4372_vm13, %v4199_v31  ;;  %v4445_v38 = vld [vmem:[#allocation3 + $0x40] sm:$0xff]  ;;  %v4071_v31 = vld [vmem:[#allocation2 + $0x112] sm:$0xff] }
 0x2c9   :  { %4383 = vst.msk [vmem:[#allocation3 + $0x50] sm:$0xff] %vm4372_vm13, %v4201_v11  ;;  %3448 = vrot.lane.b32.xlu1 %v10175_v13, %s8383_s1 }
 0x2ca   :  { %3831 = vrot.lane.b32.xlu0 %v10698_v37, %s8384_s26 }
 0x2cb   :  { %v1511_v1 = vpop.permute.xlu1 %1510 }
 0x2cc   :  { %v1513_v19 = vpop.permute.xlu0 %1512  ;;  %1690 = vst.msk [vmem:[#allocation3 + $0x68] sm:$0xff] %vm1676_vm5, %v1511_v1 }
 0x2cd   :  { %1691 = vst.msk [vmem:[#allocation3 + $0x70] sm:$0xff] %vm1676_vm5, %v1513_v19  ;;  %3829 = vrot.lane.b32.xlu1 %v2530_v55, %s8384_s26 }
 0x2ce   :  { %4212 = vrot.lane.b32.xlu0 %v10673_v8, %s8385_s16 }
 0x2cf   :  { %v4203_v20 = vpop.permute.xlu1 %4202  ;;  %v4446_v21 = vld [vmem:[#allocation3 + $0x48] sm:$0xff] }
 0x2d0   :  { %v1894_v56 = vpop.permute.xlu0 %1893  ;;  %4384 = vst.msk [vmem:[#allocation3 + $0x58] sm:$0xff] %vm4372_vm13, %v4203_v20  ;;  %v4505_v29 = vpack.c.bf16 %v4446_v21, %v4445_v38  ;;  %v4447_v50 = vld [vmem:[#allocation3 + $0x50] sm:$0xff] }
 0x2d1   :  { %2074 = vst.msk [vmem:[#allocation3 + $0x60] sm:$0xff] %vm2061_vm6, %v1894_v56  ;;  %3833 = vrot.lane.b32.xlu1 %v10710_v23, %s8384_s26  ;;  %v2533_v56 = vld [vmem:[#allocation2 + $0x121] sm:$0xff] }
 0x2d2   :  { %1524 = vrot.lane.b32.xlu0 %v2529_v32, %s8378_s0  ;;  %8136 = vmatprep.mubr.msk.bf16.mxu1 %vm4569_vm14, %v4505_v29 }
 0x2d3   :  { %v1515_v60 = vpop.permute.xlu1 %1514 }
 0x2d4   :  { %v1898_v61 = vpop.permute.xlu0 %1897  ;;  %1692 = vst.msk [vmem:[#allocation3 + $0x78] sm:$0xff] %vm1676_vm5, %v1515_v60 }
 0x2d5   :  { %2076 = vst.msk [vmem:[#allocation3 + $0x70] sm:$0xff] %vm2061_vm6, %v1898_v61  ;;  %4214 = vrot.lane.b32.xlu1 %v10684_v6, %s8385_s16  ;;  %v2534_v61 = vld [vmem:[#allocation2 + $0x129] sm:$0xff] }
 0x2d6   :  { %4216 = vrot.lane.b32.xlu0 %v4070_v49, %s8385_s16 }
 0x2d7   :  { %v1896_v5 = vpop.permute.xlu1 %1895  ;;  %v4448_v10 = vld [vmem:[#allocation3 + $0x58] sm:$0xff] }
 0x2d8   :  { %v2279_v43 = vpop.permute.xlu0 %2278  ;;  %2075 = vst.msk [vmem:[#allocation3 + $0x68] sm:$0xff] %vm2061_vm6, %v1896_v5  ;;  %v4506_v32 = vpack.c.bf16 %v4448_v10, %v4447_v50  ;;  %v10767_v5 = vld [vmem:[#allocation2 + $0x122] sm:$0xff] }
 0x2d9   :  { %2459 = vst.msk [vmem:[#allocation3 + $0x60] sm:$0xff] %vm2446_vm8, %v2279_v43  ;;  %1526 = vrot.lane.b32.xlu1 %v2530_v55, %s8378_s0  ;;  %v10778_v43 = vld [vmem:[#allocation2 + $0x12a] sm:$0xff] }
 0x2da   :  { %1528 = vrot.lane.b32.xlu0 %v10698_v37, %s8378_s0  ;;  %8137 = vmatmul.mubr.msk.bf16.gmra.mxu1 %vm4569_vm14, %v4506_v32 }
 0x2db   :  { %v1900_v12 = vpop.permute.xlu1 %1899 }
 0x2dc   :  { %v2283_v22 = vpop.permute.xlu0 %2282  ;;  %2077 = vst.msk [vmem:[#allocation3 + $0x78] sm:$0xff] %vm2061_vm6, %v1900_v12 }
 0x2dd   :  { %2461 = vst.msk [vmem:[#allocation3 + $0x70] sm:$0xff] %vm2446_vm8, %v2283_v22  ;;  %4218 = vrot.lane.b32.xlu1 %v4071_v31, %s8385_s16 }
 0x2de   :  { %1909 = vrot.lane.b32.xlu0 %v10673_v8, %s8379_s20 }
 0x2df   :  { %v2281_v11 = vpop.permute.xlu1 %2280 }
 0x2e0   :  { %v2664_v1 = vpop.permute.xlu0 %2663  ;;  %2460 = vst.msk [vmem:[#allocation3 + $0x68] sm:$0xff] %vm2446_vm8, %v2281_v11 }
 0x2e1   :  { %2844 = vst.msk [vmem:[#allocation3 + $0x60] sm:$0xff] %vm2831_vm9, %v2664_v1  ;;  %1530 = vrot.lane.b32.xlu1 %v10710_v23, %s8378_s0 }
 0x2e2   :  { %1913 = vrot.lane.b32.xlu0 %v4070_v49, %s8379_s20 }
 0x2e3   :  { %v2285_v55 = vpop.permute.xlu1 %2284 }
 0x2e4   :  { %v2668_v19 = vpop.permute.xlu0 %2667  ;;  %2462 = vst.msk [vmem:[#allocation3 + $0x78] sm:$0xff] %vm2446_vm8, %v2285_v55 }
 0x2e5   :  { %2846 = vst.msk [vmem:[#allocation3 + $0x70] sm:$0xff] %vm2831_vm9, %v2668_v19  ;;  %1911 = vrot.lane.b32.xlu1 %v10684_v6, %s8379_s20 }
 0x2e6   :  { %2294 = vrot.lane.b32.xlu0 %v10171_v2, %s8380_s2 }
 0x2e7   :  { %v2666_v8 = vpop.permute.xlu1 %2665 }
 0x2e8   :  { %v3049_v20 = vpop.permute.xlu0 %3048  ;;  %2845 = vst.msk [vmem:[#allocation3 + $0x68] sm:$0xff] %vm2831_vm9, %v2666_v8 }
 0x2e9   :  { %3229 = vst.msk [vmem:[#allocation3 + $0x60] sm:$0xff] %vm3216_vm10, %v3049_v20  ;;  %1915 = vrot.lane.b32.xlu1 %v4071_v31, %s8379_s20  ;;  %v10804_v20 = vld [vmem:[#allocation2 + $0x141] sm:$0xff] }
 0x2ea   :  { %2298 = vrot.lane.b32.xlu0 %v10181_v42, %s8380_s2 }
 0x2eb   :  { %v2670_v38 = vpop.permute.xlu1 %2669 }
 0x2ec   :  { %v3053_v21 = vpop.permute.xlu0 %3052  ;;  %2847 = vst.msk [vmem:[#allocation3 + $0x78] sm:$0xff] %vm2831_vm9, %v2670_v38 }
 0x2ed   :  { %3231 = vst.msk [vmem:[#allocation3 + $0x70] sm:$0xff] %vm3216_vm10, %v3053_v21  ;;  %2296 = vrot.lane.b32.xlu1 %v10175_v13, %s8380_s2 }
 0x2ee   :  { %2679 = vrot.lane.b32.xlu0 %v10698_v37, %s8381_s3 }
 0x2ef   :  { %v3051_v2 = vpop.permute.xlu1 %3050 }
 0x2f0   :  { %v3435_v6 = vpop.permute.xlu0 %3434  ;;  %3230 = vst.msk [vmem:[#allocation3 + $0x68] sm:$0xff] %vm3216_vm10, %v3051_v2 }
 0x2f1   :  { %3615 = vst.msk [vmem:[#allocation3 + $0x60] sm:$0xff] %vm3602_vm11, %v3435_v6  ;;  %2300 = vrot.lane.b32.xlu1 %v10189_v54, %s8380_s2  ;;  %v4074_v6 = vld [vmem:[#allocation2 + $0x13a] sm:$0xff] }
 0x2f2   :  { %2683 = vrot.lane.b32.xlu0 %v2533_v56, %s8381_s3 }
 0x2f3   :  { %v3055_v29 = vpop.permute.xlu1 %3054 }
 0x2f4   :  { %v3439_v60 = vpop.permute.xlu0 %3438  ;;  %3232 = vst.msk [vmem:[#allocation3 + $0x78] sm:$0xff] %vm3216_vm10, %v3055_v29 }
 0x2f5   :  { %3617 = vst.msk [vmem:[#allocation3 + $0x70] sm:$0xff] %vm3602_vm11, %v3439_v60  ;;  %2681 = vrot.lane.b32.xlu1 %v10710_v23, %s8381_s3 }
 0x2f6   :  { %3064 = vrot.lane.b32.xlu0 %v4070_v49, %s8382_s25 }
 0x2f7   :  { %v3437_v13 = vpop.permute.xlu1 %3436 }
 0x2f8   :  { %v3820_v37 = vpop.permute.xlu0 %3819  ;;  %3616 = vst.msk [vmem:[#allocation3 + $0x68] sm:$0xff] %vm3602_vm11, %v3437_v13 }
 0x2f9   :  { %4000 = vst.msk [vmem:[#allocation3 + $0x60] sm:$0xff] %vm3987_vm12, %v3820_v37  ;;  %2685 = vrot.lane.b32.xlu1 %v2534_v61, %s8381_s3 }
 0x2fa   :  { %3068 = vrot.lane.b32.xlu0 %v10767_v5, %s8382_s25 }
 0x2fb   :  { %v3441_v50 = vpop.permute.xlu1 %3440 }
 0x2fc   :  { %v3824_v10 = vpop.permute.xlu0 %3823  ;;  %3618 = vst.msk [vmem:[#allocation3 + $0x78] sm:$0xff] %vm3602_vm11, %v3441_v50 }
 0x2fd   :  { %4002 = vst.msk [vmem:[#allocation3 + $0x70] sm:$0xff] %vm3987_vm12, %v3824_v10  ;;  %3066 = vrot.lane.b32.xlu1 %v4071_v31, %s8382_s25  ;;  %v10792_v31 = vld [vmem:[#allocation2 + $0x139] sm:$0xff] }
 0x2fe   :  { %3450 = vrot.lane.b32.xlu0 %v10181_v42, %s8383_s1 }
 0x2ff   :  { %v3822_v23 = vpop.permute.xlu1 %3821 }
 0x300   :  { %v4205_v49 = vpop.permute.xlu0 %4204  ;;  %4001 = vst.msk [vmem:[#allocation3 + $0x68] sm:$0xff] %vm3987_vm12, %v3822_v23  ;;  %v4075_v23 = vld [vmem:[#allocation2 + $0x142] sm:$0xff] }
 0x301   :  { %4385 = vst.msk [vmem:[#allocation3 + $0x60] sm:$0xff] %vm4372_vm13, %v4205_v49  ;;  %3070 = vrot.lane.b32.xlu1 %v10778_v43, %s8382_s25 }
 0x302   :  { %3454 = vrot.lane.b32.xlu0 %v10195_v36, %s8383_s1 }
 0x303   :  { %v3826_v32 = vpop.permute.xlu1 %3825 }
 0x304   :  { %v1517_v12 = vpop.permute.xlu0 %1516  ;;  %4003 = vst.msk [vmem:[#allocation3 + $0x78] sm:$0xff] %vm3987_vm12, %v3826_v32 }
 0x305   :  { %1693 = vst.msk [vmem:[#allocation3 + $0x80] sm:$0xff] %vm1676_vm5, %v1517_v12  ;;  %3452 = vrot.lane.b32.xlu1 %v10189_v54, %s8383_s1 }
 0x306   :  { %3835 = vrot.lane.b32.xlu0 %v2533_v56, %s8384_s26 }
 0x307   :  { %v4207_v42 = vpop.permute.xlu1 %4206 }
 0x308   :  { %v4209_v22 = vpop.permute.xlu0 %4208  ;;  %4386 = vst.msk [vmem:[#allocation3 + $0x68] sm:$0xff] %vm4372_vm13, %v4207_v42  ;;  %v4449_v55 = vld [vmem:[#allocation3 + $0x60] sm:$0xff] }
 0x309   :  { %4387 = vst.msk [vmem:[#allocation3 + $0x70] sm:$0xff] %vm4372_vm13, %v4209_v22  ;;  %3456 = vrot.lane.b32.xlu1 %v10199_v30, %s8383_s1 }
 0x30a   :  { %3839 = vrot.lane.b32.xlu0 %v10792_v31, %s8384_s26 }
 0x30b   :  { %v1519_v11 = vpop.permute.xlu1 %1518 }
 0x30c   :  { %v1521_v1 = vpop.permute.xlu0 %1520  ;;  %1694 = vst.msk [vmem:[#allocation3 + $0x88] sm:$0xff] %vm1676_vm5, %v1519_v11 }
 0x30d   :  { %1695 = vst.msk [vmem:[#allocation3 + $0x90] sm:$0xff] %vm1676_vm5, %v1521_v1  ;;  %3837 = vrot.lane.b32.xlu1 %v2534_v61, %s8384_s26  ;;  %v2537_v1 = vld [vmem:[#allocation2 + $0x151] sm:$0xff] }
 0x30e   :  { %4220 = vrot.lane.b32.xlu0 %v10767_v5, %s8385_s16 }
 0x30f   :  { %v4211_v54 = vpop.permute.xlu1 %4210  ;;  %v4450_v19 = vld [vmem:[#allocation3 + $0x68] sm:$0xff] }
 0x310   :  { %v1902_v8 = vpop.permute.xlu0 %1901  ;;  %4388 = vst.msk [vmem:[#allocation3 + $0x78] sm:$0xff] %vm4372_vm13, %v4211_v54  ;;  %v4507_v38 = vpack.c.bf16 %v4450_v19, %v4449_v55  ;;  %v4451_v60 = vld [vmem:[#allocation3 + $0x70] sm:$0xff]  ;;  %v2538_v19 = vld [vmem:[#allocation2 + $0x159] sm:$0xff] }
 0x311   :  { %2078 = vst.msk [vmem:[#allocation3 + $0x80] sm:$0xff] %vm2061_vm6, %v1902_v8  ;;  %3841 = vrot.lane.b32.xlu1 %v10804_v20, %s8384_s26  ;;  %v10861_v8 = vld [vmem:[#allocation2 + $0x152] sm:$0xff] }
 0x312   :  { %1532 = vrot.lane.b32.xlu0 %v2533_v56, %s8378_s0  ;;  %8140 = vmatprep.mubr.msk.bf16.mxu1 %vm4569_vm14, %v4507_v38 }
 0x313   :  { %v1523_v21 = vpop.permute.xlu1 %1522 }
 0x314   :  { %v1906_v2 = vpop.permute.xlu0 %1905  ;;  %1696 = vst.msk [vmem:[#allocation3 + $0x98] sm:$0xff] %vm1676_vm5, %v1523_v21 }
 0x315   :  { %2080 = vst.msk [vmem:[#allocation3 + $0x90] sm:$0xff] %vm2061_vm6, %v1906_v2  ;;  %4222 = vrot.lane.b32.xlu1 %v10778_v43, %s8385_s16 }
 0x316   :  { %4224 = vrot.lane.b32.xlu0 %v4074_v6, %s8385_s16 }
 0x317   :  { %v1904_v29 = vpop.permute.xlu1 %1903  ;;  %v4452_v13 = vld [vmem:[#allocation3 + $0x78] sm:$0xff] }
 0x318   :  { %v2287_v37 = vpop.permute.xlu0 %2286  ;;  %2079 = vst.msk [vmem:[#allocation3 + $0x88] sm:$0xff] %vm2061_vm6, %v1904_v29  ;;  %v4508_v56 = vpack.c.bf16 %v4452_v13, %v4451_v60 }
 0x319   :  { %2463 = vst.msk [vmem:[#allocation3 + $0x80] sm:$0xff] %vm2446_vm8, %v2287_v37  ;;  %1534 = vrot.lane.b32.xlu1 %v2534_v61, %s8378_s0  ;;  %v10886_v37 = vld [vmem:[#allocation2 + $0x169] sm:$0xff] }
 0x31a   :  { %1536 = vrot.lane.b32.xlu0 %v10792_v31, %s8378_s0  ;;  %8141 = vmatmul.mubr.msk.bf16.gmra.mxu1 %vm4569_vm14, %v4508_v56 }
 0x31b   :  { %v1908_v50 = vpop.permute.xlu1 %1907 }
 0x31c   :  { %v2291_v10 = vpop.permute.xlu0 %2290  ;;  %2081 = vst.msk [vmem:[#allocation3 + $0x98] sm:$0xff] %vm2061_vm6, %v1908_v50 }
 0x31d   :  { %2465 = vst.msk [vmem:[#allocation3 + $0x90] sm:$0xff] %vm2446_vm8, %v2291_v10  ;;  %4226 = vrot.lane.b32.xlu1 %v4075_v23, %s8385_s16 }
 0x31e   :  { %1917 = vrot.lane.b32.xlu0 %v10767_v5, %s8379_s20 }
 0x31f   :  { %v2289_v49 = vpop.permute.xlu1 %2288 }
 0x320   :  { %v2672_v32 = vpop.permute.xlu0 %2671  ;;  %2464 = vst.msk [vmem:[#allocation3 + $0x88] sm:$0xff] %vm2446_vm8, %v2289_v49 }
 0x321   :  { %2848 = vst.msk [vmem:[#allocation3 + $0x80] sm:$0xff] %vm2831_vm9, %v2672_v32  ;;  %1538 = vrot.lane.b32.xlu1 %v10804_v20, %s8378_s0  ;;  %v10898_v32 = vld [vmem:[#allocation2 + $0x171] sm:$0xff] }
 0x322   :  { %1921 = vrot.lane.b32.xlu0 %v4074_v6, %s8379_s20 }
 0x323   :  { %v2293_v61 = vpop.permute.xlu1 %2292 }
 0x324   :  { %v2676_v12 = vpop.permute.xlu0 %2675  ;;  %2466 = vst.msk [vmem:[#allocation3 + $0x98] sm:$0xff] %vm2446_vm8, %v2293_v61 }
 0x325   :  { %2850 = vst.msk [vmem:[#allocation3 + $0x90] sm:$0xff] %vm2831_vm9, %v2676_v12  ;;  %1919 = vrot.lane.b32.xlu1 %v10778_v43, %s8379_s20 }
 0x326   :  { %2302 = vrot.lane.b32.xlu0 %v10195_v36, %s8380_s2 }
 0x327   :  { %v2674_v5 = vpop.permute.xlu1 %2673 }
 0x328   :  { %v3057_v42 = vpop.permute.xlu0 %3056  ;;  %2849 = vst.msk [vmem:[#allocation3 + $0x88] sm:$0xff] %vm2831_vm9, %v2674_v5 }
 0x329   :  { %3233 = vst.msk [vmem:[#allocation3 + $0x80] sm:$0xff] %vm3216_vm10, %v3057_v42  ;;  %1923 = vrot.lane.b32.xlu1 %v4075_v23, %s8379_s20  ;;  %v4078_v42 = vld [vmem:[#allocation2 + $0x16a] sm:$0xff] }
 0x32a   :  { %2306 = vrot.lane.b32.xlu0 %v10203_v59, %s8380_s2 }
 0x32b   :  { %v2678_v22 = vpop.permute.xlu1 %2677 }
 0x32c   :  { %v3061_v11 = vpop.permute.xlu0 %3060  ;;  %2851 = vst.msk [vmem:[#allocation3 + $0x98] sm:$0xff] %vm2831_vm9, %v2678_v22 }
 0x32d   :  { %3235 = vst.msk [vmem:[#allocation3 + $0x90] sm:$0xff] %vm3216_vm10, %v3061_v11  ;;  %2304 = vrot.lane.b32.xlu1 %v10199_v30, %s8380_s2 }
 0x32e   :  { %2687 = vrot.lane.b32.xlu0 %v10792_v31, %s8381_s3 }
 0x32f   :  { %v3059_v36 = vpop.permute.xlu1 %3058 }
 0x330   :  { %v3443_v43 = vpop.permute.xlu0 %3442  ;;  %3234 = vst.msk [vmem:[#allocation3 + $0x88] sm:$0xff] %vm3216_vm10, %v3059_v36 }
 0x331   :  { %3619 = vst.msk [vmem:[#allocation3 + $0x80] sm:$0xff] %vm3602_vm11, %v3443_v43  ;;  %2308 = vrot.lane.b32.xlu1 %v10209_v26, %s8380_s2 }
 0x332   :  { %2691 = vrot.lane.b32.xlu0 %v2537_v1, %s8381_s3 }
 0x333   :  { %v3063_v54 = vpop.permute.xlu1 %3062 }
 0x334   :  { %v3447_v55 = vpop.permute.xlu0 %3446  ;;  %3236 = vst.msk [vmem:[#allocation3 + $0x98] sm:$0xff] %vm3216_vm10, %v3063_v54 }
 0x335   :  { %3621 = vst.msk [vmem:[#allocation3 + $0x90] sm:$0xff] %vm3602_vm11, %v3447_v55  ;;  %2689 = vrot.lane.b32.xlu1 %v10804_v20, %s8381_s3 }
 0x336   :  { %3072 = vrot.lane.b32.xlu0 %v4074_v6, %s8382_s25  ;;  %v10872_v6 = vld [vmem:[#allocation2 + $0x15a] sm:$0xff] }
 0x337   :  { %v3445_v30 = vpop.permute.xlu1 %3444 }
 0x338   :  { %v3828_v31 = vpop.permute.xlu0 %3827  ;;  %3620 = vst.msk [vmem:[#allocation3 + $0x88] sm:$0xff] %vm3602_vm11, %v3445_v30  ;;  %v4079_v30 = vld [vmem:[#allocation2 + $0x172] sm:$0xff] }
 0x339   :  { %4004 = vst.msk [vmem:[#allocation3 + $0x80] sm:$0xff] %vm3987_vm12, %v3828_v31  ;;  %2693 = vrot.lane.b32.xlu1 %v2538_v19, %s8381_s3 }
 0x33a   :  { %3076 = vrot.lane.b32.xlu0 %v10861_v8, %s8382_s25 }
 0x33b   :  { %v3449_v38 = vpop.permute.xlu1 %3448 }
 0x33c   :  { %v3832_v21 = vpop.permute.xlu0 %3831  ;;  %3622 = vst.msk [vmem:[#allocation3 + $0x98] sm:$0xff] %vm3602_vm11, %v3449_v38 }
 0x33d   :  { %4006 = vst.msk [vmem:[#allocation3 + $0x90] sm:$0xff] %vm3987_vm12, %v3832_v21  ;;  %3074 = vrot.lane.b32.xlu1 %v4075_v23, %s8382_s25 }
 0x33e   :  { %3458 = vrot.lane.b32.xlu0 %v10203_v59, %s8383_s1 }
 0x33f   :  { %v3830_v20 = vpop.permute.xlu1 %3829 }
 0x340   :  { %v4213_v2 = vpop.permute.xlu0 %4212  ;;  %4005 = vst.msk [vmem:[#allocation3 + $0x88] sm:$0xff] %vm3987_vm12, %v3830_v20 }
 0x341   :  { %4389 = vst.msk [vmem:[#allocation3 + $0x80] sm:$0xff] %vm4372_vm13, %v4213_v2  ;;  %3078 = vrot.lane.b32.xlu1 %v10872_v6, %s8382_s25  ;;  %v2156_v2 = vld [vmem:[#allocation2 + $0x180] sm:$0xff] }
 0x342   :  { %3462 = vrot.lane.b32.xlu0 %v10215_v14, %s8383_s1 }
 0x343   :  { %v3834_v29 = vpop.permute.xlu1 %3833 }
 0x344   :  { %v1525_v60 = vpop.permute.xlu0 %1524  ;;  %4007 = vst.msk [vmem:[#allocation3 + $0x98] sm:$0xff] %vm3987_vm12, %v3834_v29 }
 0x345   :  { %1697 = vst.msk [vmem:[#allocation3 + $0xa0] sm:$0xff] %vm1676_vm5, %v1525_v60  ;;  %3460 = vrot.lane.b32.xlu1 %v10209_v26, %s8383_s1 }
 0x346   :  { %3843 = vrot.lane.b32.xlu0 %v2537_v1, %s8384_s26 }
 0x347   :  { %v4215_v59 = vpop.permute.xlu1 %4214 }
 0x348   :  { %v4217_v13 = vpop.permute.xlu0 %4216  ;;  %4390 = vst.msk [vmem:[#allocation3 + $0x88] sm:$0xff] %vm4372_vm13, %v4215_v59  ;;  %v4453_v10 = vld [vmem:[#allocation3 + $0x80] sm:$0xff]  ;;  %v2157_v59 = vld [vmem:[#allocation2 + $0x188] sm:$0xff] }
 0x349   :  { %4391 = vst.msk [vmem:[#allocation3 + $0x90] sm:$0xff] %vm4372_vm13, %v4217_v13  ;;  %3464 = vrot.lane.b32.xlu1 %v10219_v7, %s8383_s1  ;;  %v2541_v13 = vld [vmem:[#allocation2 + $0x181] sm:$0xff] }
 0x34a   :  { %3847 = vrot.lane.b32.xlu0 %v10886_v37, %s8384_s26 }
 0x34b   :  { %v1527_v56 = vpop.permute.xlu1 %1526 }
 0x34c   :  { %v1529_v50 = vpop.permute.xlu0 %1528  ;;  %1698 = vst.msk [vmem:[#allocation3 + $0xa8] sm:$0xff] %vm1676_vm5, %v1527_v56 }
 0x34d   :  { %1699 = vst.msk [vmem:[#allocation3 + $0xb0] sm:$0xff] %vm1676_vm5, %v1529_v50  ;;  %3845 = vrot.lane.b32.xlu1 %v2538_v19, %s8384_s26 }
 0x34e   :  { %4228 = vrot.lane.b32.xlu0 %v10861_v8, %s8385_s16 }
 0x34f   :  { %v4219_v26 = vpop.permute.xlu1 %4218  ;;  %v4454_v23 = vld [vmem:[#allocation3 + $0x88] sm:$0xff] }
 0x350   :  { %v1910_v49 = vpop.permute.xlu0 %1909  ;;  %4392 = vst.msk [vmem:[#allocation3 + $0x98] sm:$0xff] %vm4372_vm13, %v4219_v26  ;;  %v4509_v61 = vpack.c.bf16 %v4454_v23, %v4453_v10  ;;  %v4455_v11 = vld [vmem:[#allocation3 + $0x90] sm:$0xff]  ;;  %v2926_v10 = vld [vmem:[#allocation2 + $0x182] sm:$0xff] }
 0x351   :  { %2082 = vst.msk [vmem:[#allocation3 + $0xa0] sm:$0xff] %vm2061_vm6, %v1910_v49  ;;  %3849 = vrot.lane.b32.xlu1 %v10898_v32, %s8384_s26  ;;  %v2542_v26 = vld [vmem:[#allocation2 + $0x189] sm:$0xff] }
 0x352   :  { %1540 = vrot.lane.b32.xlu0 %v2537_v1, %s8378_s0  ;;  %8144 = vmatprep.mubr.msk.bf16.mxu1 %vm4569_vm14, %v4509_v61  ;;  %v3312_v61 = vld [vmem:[#allocation2 + $0x198] sm:$0xff] }
 0x353   :  { %v1531_v12 = vpop.permute.xlu1 %1530 }
 0x354   :  { %v1914_v5 = vpop.permute.xlu0 %1913  ;;  %1700 = vst.msk [vmem:[#allocation3 + $0xb8] sm:$0xff] %vm1676_vm5, %v1531_v12 }
 0x355   :  { %2084 = vst.msk [vmem:[#allocation3 + $0xb0] sm:$0xff] %vm2061_vm6, %v1914_v5  ;;  %4230 = vrot.lane.b32.xlu1 %v10872_v6, %s8385_s16  ;;  %v2927_v5 = vld [vmem:[#allocation2 + $0x18a] sm:$0xff] }
 0x356   :  { %4232 = vrot.lane.b32.xlu0 %v4078_v42, %s8385_s16 }
 0x357   :  { %v1912_v22 = vpop.permute.xlu1 %1911  ;;  %v4456_v36 = vld [vmem:[#allocation3 + $0x98] sm:$0xff] }
 0x358   :  { %v2295_v43 = vpop.permute.xlu0 %2294  ;;  %2083 = vst.msk [vmem:[#allocation3 + $0xa8] sm:$0xff] %vm2061_vm6, %v1912_v22  ;;  %v4510_v1 = vpack.c.bf16 %v4456_v36, %v4455_v11  ;;  %v3313_v36 = vld [vmem:[#allocation2 + $0x1a0] sm:$0xff] }
 0x359   :  { %2467 = vst.msk [vmem:[#allocation3 + $0xa0] sm:$0xff] %vm2446_vm8, %v2295_v43  ;;  %1542 = vrot.lane.b32.xlu1 %v2538_v19, %s8378_s0 }
 0x35a   :  { %1544 = vrot.lane.b32.xlu0 %v10886_v37, %s8378_s0  ;;  %8145 = vmatmul.mubr.msk.bf16.gmra.mxu1 %vm4569_vm14, %v4510_v1  ;;  %v3697_v1 = vld [vmem:[#allocation2 + $0x199] sm:$0xff] }
 0x35b   :  { %v1916_v54 = vpop.permute.xlu1 %1915 }
 0x35c   :  { %v2299_v55 = vpop.permute.xlu0 %2298  ;;  %2085 = vst.msk [vmem:[#allocation3 + $0xb8] sm:$0xff] %vm2061_vm6, %v1916_v54 }
 0x35d   :  { %2469 = vst.msk [vmem:[#allocation3 + $0xb0] sm:$0xff] %vm2446_vm8, %v2299_v55  ;;  %4234 = vrot.lane.b32.xlu1 %v4079_v30, %s8385_s16 }
 0x35e   :  { %1925 = vrot.lane.b32.xlu0 %v10861_v8, %s8379_s20 }
 0x35f   :  { %v2297_v31 = vpop.permute.xlu1 %2296 }
 0x360   :  { %v2680_v38 = vpop.permute.xlu0 %2679  ;;  %2468 = vst.msk [vmem:[#allocation3 + $0xa8] sm:$0xff] %vm2446_vm8, %v2297_v31  ;;  %v1261_v31 = vld [vmem:[#allocation2 + $0x1b8] sm:$0xff] }
 0x361   :  { %2852 = vst.msk [vmem:[#allocation3 + $0xa0] sm:$0xff] %vm2831_vm9, %v2680_v38  ;;  %1546 = vrot.lane.b32.xlu1 %v10898_v32, %s8378_s0  ;;  %v3698_v38 = vld [vmem:[#allocation2 + $0x1a1] sm:$0xff] }
 0x362   :  { %1929 = vrot.lane.b32.xlu0 %v4078_v42, %s8379_s20  ;;  %1325 = vst.msk [vmem:[#allocation3 + $0x108] sm:$0xff] %vm538_vm2, %v1261_v31 }
 0x363   :  { %v2301_v19 = vpop.permute.xlu1 %2300 }
 0x364   :  { %v2684_v21 = vpop.permute.xlu0 %2683  ;;  %2470 = vst.msk [vmem:[#allocation3 + $0xb8] sm:$0xff] %vm2446_vm8, %v2301_v19 }
 0x365   :  { %2854 = vst.msk [vmem:[#allocation3 + $0xb0] sm:$0xff] %vm2831_vm9, %v2684_v21  ;;  %1927 = vrot.lane.b32.xlu1 %v10872_v6, %s8379_s20  ;;  %v1388_v21 = vld [vmem:[#allocation2 + $0x1b1] sm:$0xff] }
 0x366   :  { %2310 = vrot.lane.b32.xlu0 %v10215_v14, %s8380_s2 }
 0x367   :  { %v2682_v8 = vpop.permute.xlu1 %2681 }
 0x368   :  { %v3065_v20 = vpop.permute.xlu0 %3064  ;;  %2853 = vst.msk [vmem:[#allocation3 + $0xa8] sm:$0xff] %vm2831_vm9, %v2682_v8 }
 0x369   :  { %3237 = vst.msk [vmem:[#allocation3 + $0xa0] sm:$0xff] %vm3216_vm10, %v3065_v20  ;;  %1931 = vrot.lane.b32.xlu1 %v4079_v30, %s8379_s20 }
 0x36a   :  { %2314 = vrot.lane.b32.xlu0 %v2156_v2, %s8380_s2 }
 0x36b   :  { %v2686_v29 = vpop.permute.xlu1 %2685 }
 0x36c   :  { %v3069_v60 = vpop.permute.xlu0 %3068  ;;  %2855 = vst.msk [vmem:[#allocation3 + $0xb8] sm:$0xff] %vm2831_vm9, %v2686_v29 }
 0x36d   :  { %3239 = vst.msk [vmem:[#allocation3 + $0xb0] sm:$0xff] %vm3216_vm10, %v3069_v60  ;;  %2312 = vrot.lane.b32.xlu1 %v10219_v7, %s8380_s2 }
 0x36e   :  { %2695 = vrot.lane.b32.xlu0 %v10886_v37, %s8381_s3 }
 0x36f   :  { %v3067_v14 = vpop.permute.xlu1 %3066 }
 0x370   :  { %v3451_v6 = vpop.permute.xlu0 %3450  ;;  %3238 = vst.msk [vmem:[#allocation3 + $0xa8] sm:$0xff] %vm3216_vm10, %v3067_v14  ;;  %v4082_v14 = vld [vmem:[#allocation2 + $0x19a] sm:$0xff] }
 0x371   :  { %3623 = vst.msk [vmem:[#allocation3 + $0xa0] sm:$0xff] %vm3602_vm11, %v3451_v6  ;;  %2316 = vrot.lane.b32.xlu1 %v2157_v59, %s8380_s2 }
 0x372   :  { %2699 = vrot.lane.b32.xlu0 %v2541_v13, %s8381_s3 }
 0x373   :  { %v3071_v56 = vpop.permute.xlu1 %3070 }
 0x374   :  { %v3455_v50 = vpop.permute.xlu0 %3454  ;;  %3240 = vst.msk [vmem:[#allocation3 + $0xb8] sm:$0xff] %vm3216_vm10, %v3071_v56 }
 0x375   :  { %3625 = vst.msk [vmem:[#allocation3 + $0xb0] sm:$0xff] %vm3602_vm11, %v3455_v50  ;;  %2697 = vrot.lane.b32.xlu1 %v10898_v32, %s8381_s3 }
 0x376   :  { %3080 = vrot.lane.b32.xlu0 %v4078_v42, %s8382_s25  ;;  %v1260_v42 = vld [vmem:[#allocation2 + $0x1b0] sm:$0xff] }
 0x377   :  { %v3453_v7 = vpop.permute.xlu1 %3452  ;;  %1324 = vst.msk [vmem:[#allocation3 + $0x100] sm:$0xff] %vm538_vm2, %v1260_v42  ;;  %v1775_v42 = vld [vmem:[#allocation2 + $0x1ca] sm:$0xff] }
 0x378   :  { %v3836_v37 = vpop.permute.xlu0 %3835  ;;  %3624 = vst.msk [vmem:[#allocation3 + $0xa8] sm:$0xff] %vm3602_vm11, %v3453_v7 }
 0x379   :  { %4008 = vst.msk [vmem:[#allocation3 + $0xa0] sm:$0xff] %vm3987_vm12, %v3836_v37  ;;  %2701 = vrot.lane.b32.xlu1 %v2542_v26, %s8381_s3 }
 0x37a   :  { %3084 = vrot.lane.b32.xlu0 %v2926_v10, %s8382_s25 }
 0x37b   :  { %v3457_v23 = vpop.permute.xlu1 %3456 }
 0x37c   :  { %v3840_v49 = vpop.permute.xlu0 %3839  ;;  %3626 = vst.msk [vmem:[#allocation3 + $0xb8] sm:$0xff] %vm3602_vm11, %v3457_v23 }
 0x37d   :  { %4010 = vst.msk [vmem:[#allocation3 + $0xb0] sm:$0xff] %vm3987_vm12, %v3840_v49  ;;  %3082 = vrot.lane.b32.xlu1 %v4079_v30, %s8382_s25  ;;  %v1773_v49 = vld [vmem:[#allocation2 + $0x1b2] sm:$0xff] }
 0x37e   :  { %3466 = vrot.lane.b32.xlu0 %v2156_v2, %s8383_s1 }
 0x37f   :  { %v3838_v32 = vpop.permute.xlu1 %3837 }
 0x380   :  { %v4221_v12 = vpop.permute.xlu0 %4220  ;;  %4009 = vst.msk [vmem:[#allocation3 + $0xa8] sm:$0xff] %vm3987_vm12, %v3838_v32 }
 0x381   :  { %4393 = vst.msk [vmem:[#allocation3 + $0xa0] sm:$0xff] %vm4372_vm13, %v4221_v12  ;;  %3086 = vrot.lane.b32.xlu1 %v2927_v5, %s8382_s25 }
 0x382   :  { %3470 = vrot.lane.b32.xlu0 %v3312_v61, %s8383_s1 }
 0x383   :  { %v3842_v22 = vpop.permute.xlu1 %3841 }
 0x384   :  { %v1533_v11 = vpop.permute.xlu0 %1532  ;;  %4011 = vst.msk [vmem:[#allocation3 + $0xb8] sm:$0xff] %vm3987_vm12, %v3842_v22  ;;  %v1774_v22 = vld [vmem:[#allocation2 + $0x1ba] sm:$0xff] }
 0x385   :  { %1701 = vst.msk [vmem:[#allocation3 + $0xc0] sm:$0xff] %vm1676_vm5, %v1533_v11  ;;  %3468 = vrot.lane.b32.xlu1 %v2157_v59, %s8383_s1  ;;  %v1389_v59 = vld [vmem:[#allocation2 + $0x1b9] sm:$0xff] }
 0x386   :  { %3851 = vrot.lane.b32.xlu0 %v2541_v13, %s8384_s26 }
 0x387   :  { %v4223_v43 = vpop.permute.xlu1 %4222 }
 0x388   :  { %v4225_v54 = vpop.permute.xlu0 %4224  ;;  %4394 = vst.msk [vmem:[#allocation3 + $0xa8] sm:$0xff] %vm4372_vm13, %v4223_v43  ;;  %v4457_v8 = vld [vmem:[#allocation3 + $0xa0] sm:$0xff] }
 0x389   :  { %4395 = vst.msk [vmem:[#allocation3 + $0xb0] sm:$0xff] %vm4372_vm13, %v4225_v54  ;;  %3472 = vrot.lane.b32.xlu1 %v3313_v36, %s8383_s1  ;;  %v1776_v54 = vld [vmem:[#allocation2 + $0x1d2] sm:$0xff] }
 0x38a   :  { %3855 = vrot.lane.b32.xlu0 %v3697_v1, %s8384_s26 }
 0x38b   :  { %v1535_v55 = vpop.permute.xlu1 %1534 }
 0x38c   :  { %v1537_v30 = vpop.permute.xlu0 %1536  ;;  %1702 = vst.msk [vmem:[#allocation3 + $0xc8] sm:$0xff] %vm1676_vm5, %v1535_v55 }
 0x38d   :  { %1703 = vst.msk [vmem:[#allocation3 + $0xd0] sm:$0xff] %vm1676_vm5, %v1537_v30  ;;  %3853 = vrot.lane.b32.xlu1 %v2542_v26, %s8384_s26  ;;  %v1390_v26 = vld [vmem:[#allocation2 + $0x1c9] sm:$0xff] }
 0x38e   :  { %4236 = vrot.lane.b32.xlu0 %v2926_v10, %s8385_s16  ;;  %v4083_v10 = vld [vmem:[#allocation2 + $0x1a2] sm:$0xff] }
 0x38f   :  { %v4227_v19 = vpop.permute.xlu1 %4226  ;;  %v4458_v20 = vld [vmem:[#allocation3 + $0xa8] sm:$0xff] }
 0x390   :  { %v1918_v2 = vpop.permute.xlu0 %1917  ;;  %4396 = vst.msk [vmem:[#allocation3 + $0xb8] sm:$0xff] %vm4372_vm13, %v4227_v19  ;;  %v4511_v29 = vpack.c.bf16 %v4458_v20, %v4457_v8  ;;  %v4459_v56 = vld [vmem:[#allocation3 + $0xb0] sm:$0xff] }
 0x391   :  { %2086 = vst.msk [vmem:[#allocation3 + $0xc0] sm:$0xff] %vm2061_vm6, %v1918_v2  ;;  %3857 = vrot.lane.b32.xlu1 %v3698_v38, %s8384_s26  ;;  %v2545_v38 = vld [vmem:[#allocation2 + $0x1e1] sm:$0xff]  ;;  %v2546_v20 = vld [vmem:[#allocation2 + $0x1e9] sm:$0xff] }
 0x392   :  { %1548 = vrot.lane.b32.xlu0 %v1388_v21, %s8378_s0  ;;  %8148 = vmatprep.mubr.msk.bf16.mxu1 %vm4569_vm14, %v4511_v29  ;;  %v11025_v2 = vld [vmem:[#allocation2 + $0x1e2] sm:$0xff] }
 0x393   :  { %v1539_v60 = vpop.permute.xlu1 %1538 }
 0x394   :  { %v1922_v6 = vpop.permute.xlu0 %1921  ;;  %1704 = vst.msk [vmem:[#allocation3 + $0xd8] sm:$0xff] %vm1676_vm5, %v1539_v60 }
 0x395   :  { %2088 = vst.msk [vmem:[#allocation3 + $0xd0] sm:$0xff] %vm2061_vm6, %v1922_v6  ;;  %4238 = vrot.lane.b32.xlu1 %v2927_v5, %s8385_s16  ;;  %v1391_v5 = vld [vmem:[#allocation2 + $0x1d1] sm:$0xff] }
 0x396   :  { %4240 = vrot.lane.b32.xlu0 %v4082_v14, %s8385_s16 }
 0x397   :  { %v1920_v13 = vpop.permute.xlu1 %1919  ;;  %v4460_v50 = vld [vmem:[#allocation3 + $0xb8] sm:$0xff] }
 0x398   :  { %v2303_v7 = vpop.permute.xlu0 %2302  ;;  %2087 = vst.msk [vmem:[#allocation3 + $0xc8] sm:$0xff] %vm2061_vm6, %v1920_v13  ;;  %v4512_v37 = vpack.c.bf16 %v4460_v50, %v4459_v56 }
 0x399   :  { %2471 = vst.msk [vmem:[#allocation3 + $0xc0] sm:$0xff] %vm2446_vm8, %v2303_v7  ;;  %1550 = vrot.lane.b32.xlu1 %v1389_v59, %s8378_s0  ;;  %v11036_v59 = vld [vmem:[#allocation2 + $0x1ea] sm:$0xff]  ;;  %v11050_v7 = vld [vmem:[#allocation2 + $0x1f9] sm:$0xff] }
 0x39a   :  { %1552 = vrot.lane.b32.xlu0 %v1390_v26, %s8378_s0  ;;  %8149 = vmatmul.mubr.msk.bf16.gmra.mxu1 %vm4569_vm14, %v4512_v37 }
 0x39b   :  { %v1924_v23 = vpop.permute.xlu1 %1923 }
 0x39c   :  { %v2307_v32 = vpop.permute.xlu0 %2306  ;;  %2089 = vst.msk [vmem:[#allocation3 + $0xd8] sm:$0xff] %vm2061_vm6, %v1924_v23 }
 0x39d   :  { %2473 = vst.msk [vmem:[#allocation3 + $0xd0] sm:$0xff] %vm2446_vm8, %v2307_v32  ;;  %4242 = vrot.lane.b32.xlu1 %v4083_v10, %s8385_s16  ;;  %v11062_v32 = vld [vmem:[#allocation2 + $0x201] sm:$0xff] }
 0x39e   :  { %1933 = vrot.lane.b32.xlu0 %v1773_v49, %s8379_s20 }
 0x39f   :  { %v2305_v61 = vpop.permute.xlu1 %2304 }
 0x3a0   :  { %v2688_v12 = vpop.permute.xlu0 %2687  ;;  %2472 = vst.msk [vmem:[#allocation3 + $0xc8] sm:$0xff] %vm2446_vm8, %v2305_v61 }
 0x3a1   :  { %2856 = vst.msk [vmem:[#allocation3 + $0xc0] sm:$0xff] %vm2831_vm9, %v2688_v12  ;;  %1554 = vrot.lane.b32.xlu1 %v1391_v5, %s8378_s0 }
 0x3a2   :  { %1937 = vrot.lane.b32.xlu0 %v1775_v42, %s8379_s20 }
 0x3a3   :  { %v2309_v11 = vpop.permute.xlu1 %2308 }
 0x3a4   :  { %v2692_v36 = vpop.permute.xlu0 %2691  ;;  %2474 = vst.msk [vmem:[#allocation3 + $0xd8] sm:$0xff] %vm2446_vm8, %v2309_v11 }
 0x3a5   :  { %2858 = vst.msk [vmem:[#allocation3 + $0xd0] sm:$0xff] %vm2831_vm9, %v2692_v36  ;;  %1935 = vrot.lane.b32.xlu1 %v1774_v22, %s8379_s20 }
 0x3a6   :  { %2318 = vrot.lane.b32.xlu0 %v10231_v47, %s8380_s2 }
 0x3a7   :  { %v2690_v43 = vpop.permute.xlu1 %2689 }
 0x3a8   :  { %v3073_v1 = vpop.permute.xlu0 %3072  ;;  %2857 = vst.msk [vmem:[#allocation3 + $0xc8] sm:$0xff] %vm2831_vm9, %v2690_v43 }
 0x3a9   :  { %3241 = vst.msk [vmem:[#allocation3 + $0xc0] sm:$0xff] %vm3216_vm10, %v3073_v1  ;;  %1939 = vrot.lane.b32.xlu1 %v1776_v54, %s8379_s20 }
 0x3aa   :  { %2322 = vrot.lane.b32.xlu0 %v10233_v63, %s8380_s2 }
 0x3ab   :  { %v2694_v55 = vpop.permute.xlu1 %2693 }
 0x3ac   :  { %v3077_v30 = vpop.permute.xlu0 %3076  ;;  %2859 = vst.msk [vmem:[#allocation3 + $0xd8] sm:$0xff] %vm2831_vm9, %v2694_v55 }
 0x3ad   :  { %3243 = vst.msk [vmem:[#allocation3 + $0xd0] sm:$0xff] %vm3216_vm10, %v3077_v30  ;;  %2320 = vrot.lane.b32.xlu1 %v10235_v52, %s8380_s2  ;;  %v4087_v30 = vld [vmem:[#allocation2 + $0x202] sm:$0xff] }
 0x3ae   :  { %2703 = vrot.lane.b32.xlu0 %v1390_v26, %s8381_s3 }
 0x3af   :  { %v3075_v47 = vpop.permute.xlu1 %3074 }
 0x3b0   :  { %v3459_v31 = vpop.permute.xlu0 %3458  ;;  %3242 = vst.msk [vmem:[#allocation3 + $0xc8] sm:$0xff] %vm3216_vm10, %v3075_v47 }
 0x3b1   :  { %3627 = vst.msk [vmem:[#allocation3 + $0xc0] sm:$0xff] %vm3602_vm11, %v3459_v31  ;;  %2324 = vrot.lane.b32.xlu1 %v10243_v58, %s8380_s2 }
 0x3b2   :  { %2707 = vrot.lane.b32.xlu0 %v2545_v38, %s8381_s3 }
 0x3b3   :  { %v3079_v19 = vpop.permute.xlu1 %3078 }
 0x3b4   :  { %v3463_v21 = vpop.permute.xlu0 %3462  ;;  %3244 = vst.msk [vmem:[#allocation3 + $0xd8] sm:$0xff] %vm3216_vm10, %v3079_v19 }
 0x3b5   :  { %3629 = vst.msk [vmem:[#allocation3 + $0xd0] sm:$0xff] %vm3602_vm11, %v3463_v21  ;;  %2705 = vrot.lane.b32.xlu1 %v1391_v5, %s8381_s3 }
 0x3b6   :  { %3088 = vrot.lane.b32.xlu0 %v1775_v42, %s8382_s25  ;;  %v4086_v42 = vld [vmem:[#allocation2 + $0x1fa] sm:$0xff] }
 0x3b7   :  { %v3461_v52 = vpop.permute.xlu1 %3460 }
 0x3b8   :  { %v3844_v8 = vpop.permute.xlu0 %3843  ;;  %3628 = vst.msk [vmem:[#allocation3 + $0xc8] sm:$0xff] %vm3602_vm11, %v3461_v52 }
 0x3b9   :  { %4012 = vst.msk [vmem:[#allocation3 + $0xc0] sm:$0xff] %vm3987_vm12, %v3844_v8  ;;  %2709 = vrot.lane.b32.xlu1 %v2546_v20, %s8381_s3 }
 0x3ba   :  { %3092 = vrot.lane.b32.xlu0 %v11025_v2, %s8382_s25 }
 0x3bb   :  { %v3465_v29 = vpop.permute.xlu1 %3464 }
 0x3bc   :  { %v3848_v60 = vpop.permute.xlu0 %3847  ;;  %3630 = vst.msk [vmem:[#allocation3 + $0xd8] sm:$0xff] %vm3602_vm11, %v3465_v29  ;;  %v2549_v29 = vld [vmem:[#allocation2 + $0x211] sm:$0xff] }
 0x3bd   :  { %4014 = vst.msk [vmem:[#allocation3 + $0xd0] sm:$0xff] %vm3987_vm12, %v3848_v60  ;;  %3090 = vrot.lane.b32.xlu1 %v1776_v54, %s8382_s25 }
 0x3be   :  { %3474 = vrot.lane.b32.xlu0 %v10233_v63, %s8383_s1 }
 0x3bf   :  { %v3846_v14 = vpop.permute.xlu1 %3845 }
 0x3c0   :  { %v4229_v6 = vpop.permute.xlu0 %4228  ;;  %4013 = vst.msk [vmem:[#allocation3 + $0xc8] sm:$0xff] %vm3987_vm12, %v3846_v14 }
 0x3c1   :  { %4397 = vst.msk [vmem:[#allocation3 + $0xc0] sm:$0xff] %vm4372_vm13, %v4229_v6  ;;  %3094 = vrot.lane.b32.xlu1 %v11036_v59, %s8382_s25 }
 0x3c2   :  { %3478 = vrot.lane.b32.xlu0 %v10249_v57, %s8383_s1 }
 0x3c3   :  { %v3850_v13 = vpop.permute.xlu1 %3849 }
 0x3c4   :  { %v1541_v56 = vpop.permute.xlu0 %1540  ;;  %4015 = vst.msk [vmem:[#allocation3 + $0xd8] sm:$0xff] %vm3987_vm12, %v3850_v13  ;;  %v11119_v13 = vld [vmem:[#allocation2 + $0x212] sm:$0xff] }
 0x3c5   :  { %1705 = vst.msk [vmem:[#allocation3 + $0xe0] sm:$0xff] %vm1676_vm5, %v1541_v56  ;;  %3476 = vrot.lane.b32.xlu1 %v10243_v58, %s8383_s1 }
 0x3c6   :  { %3859 = vrot.lane.b32.xlu0 %v2545_v38, %s8384_s26 }
 0x3c7   :  { %v4231_v63 = vpop.permute.xlu1 %4230 }
 0x3c8   :  { %v4233_v50 = vpop.permute.xlu0 %4232  ;;  %4398 = vst.msk [vmem:[#allocation3 + $0xc8] sm:$0xff] %vm4372_vm13, %v4231_v63  ;;  %v4461_v10 = vld [vmem:[#allocation3 + $0xc0] sm:$0xff] }
 0x3c9   :  { %4399 = vst.msk [vmem:[#allocation3 + $0xd0] sm:$0xff] %vm4372_vm13, %v4233_v50  ;;  %3480 = vrot.lane.b32.xlu1 %v10264_v51, %s8383_s1 }
 0x3ca   :  { %3863 = vrot.lane.b32.xlu0 %v11050_v7, %s8384_s26 }
 0x3cb   :  { %v1543_v37 = vpop.permute.xlu1 %1542 }
 0x3cc   :  { %v1545_v26 = vpop.permute.xlu0 %1544  ;;  %1706 = vst.msk [vmem:[#allocation3 + $0xe8] sm:$0xff] %vm1676_vm5, %v1543_v37  ;;  %v11130_v37 = vld [vmem:[#allocation2 + $0x21a] sm:$0xff] }
 0x3cd   :  { %1707 = vst.msk [vmem:[#allocation3 + $0xf0] sm:$0xff] %vm1676_vm5, %v1545_v26  ;;  %3861 = vrot.lane.b32.xlu1 %v2546_v20, %s8384_s26 }
 0x3ce   :  { %4244 = vrot.lane.b32.xlu0 %v11025_v2, %s8385_s16 }
 0x3cf   :  { %v4235_v58 = vpop.permute.xlu1 %4234  ;;  %v4462_v23 = vld [vmem:[#allocation3 + $0xc8] sm:$0xff] }
 0x3d0   :  { %v1926_v49 = vpop.permute.xlu0 %1925  ;;  %4400 = vst.msk [vmem:[#allocation3 + $0xd8] sm:$0xff] %vm4372_vm13, %v4235_v58  ;;  %v4513_v61 = vpack.c.bf16 %v4462_v23, %v4461_v10  ;;  %v4463_v11 = vld [vmem:[#allocation3 + $0xd0] sm:$0xff] }
 0x3d1   :  { %2090 = vst.msk [vmem:[#allocation3 + $0xe0] sm:$0xff] %vm2061_vm6, %v1926_v49  ;;  %3865 = vrot.lane.b32.xlu1 %v11062_v32, %s8384_s26  ;;  %v11144_v23 = vld [vmem:[#allocation2 + $0x229] sm:$0xff] }
 0x3d2   :  { %1556 = vrot.lane.b32.xlu0 %v2545_v38, %s8378_s0  ;;  %8152 = vmatprep.mubr.msk.bf16.mxu1 %vm4569_vm14, %v4513_v61 }
 0x3d3   :  { %v1547_v12 = vpop.permute.xlu1 %1546 }
 0x3d4   :  { %v1930_v5 = vpop.permute.xlu0 %1929  ;;  %1708 = vst.msk [vmem:[#allocation3 + $0xf8] sm:$0xff] %vm1676_vm5, %v1547_v12 }
 0x3d5   :  { %2092 = vst.msk [vmem:[#allocation3 + $0xf0] sm:$0xff] %vm2061_vm6, %v1930_v5  ;;  %4246 = vrot.lane.b32.xlu1 %v11036_v59, %s8385_s16 }
 0x3d6   :  { %4248 = vrot.lane.b32.xlu0 %v4086_v42, %s8385_s16 }
 0x3d7   :  { %v1928_v22 = vpop.permute.xlu1 %1927  ;;  %v4464_v36 = vld [vmem:[#allocation3 + $0xd8] sm:$0xff] }
 0x3d8   :  { %v2311_v43 = vpop.permute.xlu0 %2310  ;;  %2091 = vst.msk [vmem:[#allocation3 + $0xe8] sm:$0xff] %vm2061_vm6, %v1928_v22  ;;  %v4514_v1 = vpack.c.bf16 %v4464_v36, %v4463_v11 }
 0x3d9   :  { %2475 = vst.msk [vmem:[#allocation3 + $0xe0] sm:$0xff] %vm2446_vm8, %v2311_v43  ;;  %1558 = vrot.lane.b32.xlu1 %v2546_v20, %s8378_s0  ;;  %v4090_v43 = vld [vmem:[#allocation2 + $0x22a] sm:$0xff] }
 0x3da   :  { %1560 = vrot.lane.b32.xlu0 %v11050_v7, %s8378_s0  ;;  %8153 = vmatmul.mubr.msk.bf16.gmra.mxu1 %vm4569_vm14, %v4514_v1 }
 0x3db   :  { %v1932_v54 = vpop.permute.xlu1 %1931 }
 0x3dc   :  { %v2315_v55 = vpop.permute.xlu0 %2314  ;;  %2093 = vst.msk [vmem:[#allocation3 + $0xf8] sm:$0xff] %vm2061_vm6, %v1932_v54 }
 0x3dd   :  { %2477 = vst.msk [vmem:[#allocation3 + $0xf0] sm:$0xff] %vm2446_vm8, %v2315_v55  ;;  %4250 = vrot.lane.b32.xlu1 %v4087_v30, %s8385_s16 }
 0x3de   :  { %1941 = vrot.lane.b32.xlu0 %v11025_v2, %s8379_s20 }
 0x3df   :  { %v2313_v47 = vpop.permute.xlu1 %2312 }
 0x3e0   :  { %v2696_v31 = vpop.permute.xlu0 %2695  ;;  %2476 = vst.msk [vmem:[#allocation3 + $0xe8] sm:$0xff] %vm2446_vm8, %v2313_v47 }
 0x3e1   :  { %2860 = vst.msk [vmem:[#allocation3 + $0xe0] sm:$0xff] %vm2831_vm9, %v2696_v31  ;;  %1562 = vrot.lane.b32.xlu1 %v11062_v32, %s8378_s0 }
 0x3e2   :  { %1945 = vrot.lane.b32.xlu0 %v4086_v42, %s8379_s20 }
 0x3e3   :  { %v2317_v38 = vpop.permute.xlu1 %2316 }
 0x3e4   :  { %v2700_v19 = vpop.permute.xlu0 %2699  ;;  %2478 = vst.msk [vmem:[#allocation3 + $0xf8] sm:$0xff] %vm2446_vm8, %v2317_v38 }
 0x3e5   :  { %2862 = vst.msk [vmem:[#allocation3 + $0xf0] sm:$0xff] %vm2831_vm9, %v2700_v19  ;;  %1943 = vrot.lane.b32.xlu1 %v11036_v59, %s8379_s20  ;;  %v2550_v59 = vld [vmem:[#allocation2 + $0x219] sm:$0xff] }
 0x3e6   :  { %2326 = vrot.lane.b32.xlu0 %v10249_v57, %s8380_s2  ;;  %v4091_v19 = vld [vmem:[#allocation2 + $0x232] sm:$0xff] }
 0x3e7   :  { %v2698_v21 = vpop.permute.xlu1 %2697 }
 0x3e8   :  { %v3081_v52 = vpop.permute.xlu0 %3080  ;;  %2861 = vst.msk [vmem:[#allocation3 + $0xe8] sm:$0xff] %vm2831_vm9, %v2698_v21 }
 0x3e9   :  { %3245 = vst.msk [vmem:[#allocation3 + $0xe0] sm:$0xff] %vm3216_vm10, %v3081_v52  ;;  %1947 = vrot.lane.b32.xlu1 %v4087_v30, %s8379_s20 }
 0x3ea   :  { %2330 = vrot.lane.b32.xlu0 %v10274_v27, %s8380_s2 }
 0x3eb   :  { %v2702_v8 = vpop.permute.xlu1 %2701 }
 0x3ec   :  { %v3085_v20 = vpop.permute.xlu0 %3084  ;;  %2863 = vst.msk [vmem:[#allocation3 + $0xf8] sm:$0xff] %vm2831_vm9, %v2702_v8 }
 0x3ed   :  { %3247 = vst.msk [vmem:[#allocation3 + $0xf0] sm:$0xff] %vm3216_vm10, %v3085_v20  ;;  %2328 = vrot.lane.b32.xlu1 %v10264_v51, %s8380_s2 }
 0x3ee   :  { %2711 = vrot.lane.b32.xlu0 %v11050_v7, %s8381_s3 }
 0x3ef   :  { %v3083_v57 = vpop.permute.xlu1 %3082 }
 0x3f0   :  { %v3467_v2 = vpop.permute.xlu0 %3466  ;;  %3246 = vst.msk [vmem:[#allocation3 + $0xe8] sm:$0xff] %vm3216_vm10, %v3083_v57 }
 0x3f1   :  { %3631 = vst.msk [vmem:[#allocation3 + $0xe0] sm:$0xff] %vm3602_vm11, %v3467_v2  ;;  %2332 = vrot.lane.b32.xlu1 %v10276_v28, %s8380_s2 }
 0x3f2   :  { %2715 = vrot.lane.b32.xlu0 %v2549_v29, %s8381_s3 }
 0x3f3   :  { %v3087_v60 = vpop.permute.xlu1 %3086 }
 0x3f4   :  { %v3471_v14 = vpop.permute.xlu0 %3470  ;;  %3248 = vst.msk [vmem:[#allocation3 + $0xf8] sm:$0xff] %vm3216_vm10, %v3087_v60 }
 0x3f5   :  { %3633 = vst.msk [vmem:[#allocation3 + $0xf0] sm:$0xff] %vm3602_vm11, %v3471_v14  ;;  %2713 = vrot.lane.b32.xlu1 %v11062_v32, %s8381_s3 }
 0x3f6   :  { %3096 = vrot.lane.b32.xlu0 %v4086_v42, %s8382_s25  ;;  %v11156_v42 = vld [vmem:[#allocation2 + $0x231] sm:$0xff] }
 0x3f7   :  { %v3469_v51 = vpop.permute.xlu1 %3468 }
 0x3f8   :  { %v3852_v6 = vpop.permute.xlu0 %3851  ;;  %3632 = vst.msk [vmem:[#allocation3 + $0xe8] sm:$0xff] %vm3602_vm11, %v3469_v51  ;;  %v2553_v51 = vld [vmem:[#allocation2 + $0x241] sm:$0xff] }
 0x3f9   :  { %4016 = vst.msk [vmem:[#allocation3 + $0xe0] sm:$0xff] %vm3987_vm12, %v3852_v6  ;;  %2717 = vrot.lane.b32.xlu1 %v2550_v59, %s8381_s3 }
 0x3fa   :  { %3100 = vrot.lane.b32.xlu0 %v11119_v13, %s8382_s25 }
 0x3fb   :  { %v3473_v56 = vpop.permute.xlu1 %3472 }
 0x3fc   :  { %v3856_v63 = vpop.permute.xlu0 %3855  ;;  %3634 = vst.msk [vmem:[#allocation3 + $0xf8] sm:$0xff] %vm3602_vm11, %v3473_v56  ;;  %v2554_v56 = vld [vmem:[#allocation2 + $0x249] sm:$0xff] }
 0x3fd   :  { %4018 = vst.msk [vmem:[#allocation3 + $0xf0] sm:$0xff] %vm3987_vm12, %v3856_v63  ;;  %3098 = vrot.lane.b32.xlu1 %v4087_v30, %s8382_s25  ;;  %v11213_v63 = vld [vmem:[#allocation2 + $0x242] sm:$0xff] }
 0x3fe   :  { %3482 = vrot.lane.b32.xlu0 %v10274_v27, %s8383_s1 }
 0x3ff   :  { %v3854_v50 = vpop.permute.xlu1 %3853 }
 0x400   :  { %v4237_v7 = vpop.permute.xlu0 %4236  ;;  %4017 = vst.msk [vmem:[#allocation3 + $0xe8] sm:$0xff] %vm3987_vm12, %v3854_v50 }
 0x401   :  { %4401 = vst.msk [vmem:[#allocation3 + $0xe0] sm:$0xff] %vm4372_vm13, %v4237_v7  ;;  %3102 = vrot.lane.b32.xlu1 %v11130_v37, %s8382_s25 }
 0x402   :  { %3486 = vrot.lane.b32.xlu0 %v10280_v41, %s8383_s1 }
 0x403   :  { %v3858_v26 = vpop.permute.xlu1 %3857 }
 0x404   :  { %v1549_v58 = vpop.permute.xlu0 %1548  ;;  %4019 = vst.msk [vmem:[#allocation3 + $0xf8] sm:$0xff] %vm3987_vm12, %v3858_v26 }
 0x405   :  { %1709 = vst.msk [vmem:[#allocation3 + $0x100] sm:$0xff] %vm1676_vm5, %v1549_v58  ;;  %3484 = vrot.lane.b32.xlu1 %v10276_v28, %s8383_s1  ;;  %v11224_v58 = vld [vmem:[#allocation2 + $0x24a] sm:$0xff] }
 0x406   :  { %3867 = vrot.lane.b32.xlu0 %v2549_v29, %s8384_s26 }
 0x407   :  { %v4239_v27 = vpop.permute.xlu1 %4238 }
 0x408   :  { %v4241_v10 = vpop.permute.xlu0 %4240  ;;  %4402 = vst.msk [vmem:[#allocation3 + $0xe8] sm:$0xff] %vm4372_vm13, %v4239_v27  ;;  %v4465_v61 = vld [vmem:[#allocation3 + $0xe0] sm:$0xff] }
 0x409   :  { %4403 = vst.msk [vmem:[#allocation3 + $0xf0] sm:$0xff] %vm4372_vm13, %v4241_v10  ;;  %3488 = vrot.lane.b32.xlu1 %v10293_v24, %s8383_s1 }
 0x40a   :  { %3871 = vrot.lane.b32.xlu0 %v11144_v23, %s8384_s26 }
 0x40b   :  { %v1551_v49 = vpop.permute.xlu1 %1550 }
 0x40c   :  { %v1553_v32 = vpop.permute.xlu0 %1552  ;;  %1710 = vst.msk [vmem:[#allocation3 + $0x108] sm:$0xff] %vm1676_vm5, %v1551_v49  ;;  %v11238_v49 = vld [vmem:[#allocation2 + $0x259] sm:$0xff] }
 0x40d   :  { %1711 = vst.msk [vmem:[#allocation3 + $0x110] sm:$0xff] %vm1676_vm5, %v1553_v32  ;;  %3869 = vrot.lane.b32.xlu1 %v2550_v59, %s8384_s26 }
 0x40e   :  { %4252 = vrot.lane.b32.xlu0 %v11119_v13, %s8385_s16 }
 0x40f   :  { %v4243_v28 = vpop.permute.xlu1 %4242  ;;  %v4466_v12 = vld [vmem:[#allocation3 + $0xe8] sm:$0xff] }
 0x410   :  { %v1934_v5 = vpop.permute.xlu0 %1933  ;;  %4404 = vst.msk [vmem:[#allocation3 + $0xf8] sm:$0xff] %vm4372_vm13, %v4243_v28  ;;  %v4515_v22 = vpack.c.bf16 %v4466_v12, %v4465_v61  ;;  %v4467_v1 = vld [vmem:[#allocation3 + $0xf0] sm:$0xff] }
 0x411   :  { %2094 = vst.msk [vmem:[#allocation3 + $0x100] sm:$0xff] %vm2061_vm6, %v1934_v5  ;;  %3873 = vrot.lane.b32.xlu1 %v11156_v42, %s8384_s26 }
 0x412   :  { %1564 = vrot.lane.b32.xlu0 %v2549_v29, %s8378_s0  ;;  %8156 = vmatprep.mubr.msk.bf16.mxu1 %vm4569_vm14, %v4515_v22 }
 0x413   :  { %v1555_v11 = vpop.permute.xlu1 %1554 }
 0x414   :  { %v1938_v36 = vpop.permute.xlu0 %1937  ;;  %1712 = vst.msk [vmem:[#allocation3 + $0x118] sm:$0xff] %vm1676_vm5, %v1555_v11 }
 0x415   :  { %2096 = vst.msk [vmem:[#allocation3 + $0x110] sm:$0xff] %vm2061_vm6, %v1938_v36  ;;  %4254 = vrot.lane.b32.xlu1 %v11130_v37, %s8385_s16 }
 0x416   :  { %4256 = vrot.lane.b32.xlu0 %v4090_v43, %s8385_s16 }
 0x417   :  { %v1936_v54 = vpop.permute.xlu1 %1935  ;;  %v4468_v55 = vld [vmem:[#allocation3 + $0xf8] sm:$0xff] }
 0x418   :  { %v2319_v30 = vpop.permute.xlu0 %2318  ;;  %2095 = vst.msk [vmem:[#allocation3 + $0x108] sm:$0xff] %vm2061_vm6, %v1936_v54  ;;  %v4516_v47 = vpack.c.bf16 %v4468_v55, %v4467_v1 }
 0x419   :  { %2479 = vst.msk [vmem:[#allocation3 + $0x100] sm:$0xff] %vm2446_vm8, %v2319_v30  ;;  %1566 = vrot.lane.b32.xlu1 %v2550_v59, %s8378_s0 }
 0x41a   :  { %1568 = vrot.lane.b32.xlu0 %v11144_v23, %s8378_s0  ;;  %8157 = vmatmul.mubr.msk.bf16.gmra.mxu1 %vm4569_vm14, %v4516_v47 }
 0x41b   :  { %v1940_v31 = vpop.permute.xlu1 %1939 }
 0x41c   :  { %v2323_v38 = vpop.permute.xlu0 %2322  ;;  %2097 = vst.msk [vmem:[#allocation3 + $0x118] sm:$0xff] %vm2061_vm6, %v1940_v31 }
 0x41d   :  { %2481 = vst.msk [vmem:[#allocation3 + $0x110] sm:$0xff] %vm2446_vm8, %v2323_v38  ;;  %4258 = vrot.lane.b32.xlu1 %v4091_v19, %s8385_s16 }
 0x41e   :  { %1949 = vrot.lane.b32.xlu0 %v11119_v13, %s8379_s20 }
 0x41f   :  { %v2321_v21 = vpop.permute.xlu1 %2320 }
 0x420   :  { %v2704_v52 = vpop.permute.xlu0 %2703  ;;  %2480 = vst.msk [vmem:[#allocation3 + $0x108] sm:$0xff] %vm2446_vm8, %v2321_v21 }
 0x421   :  { %2864 = vst.msk [vmem:[#allocation3 + $0x100] sm:$0xff] %vm2831_vm9, %v2704_v52  ;;  %1570 = vrot.lane.b32.xlu1 %v11156_v42, %s8378_s0 }
 0x422   :  { %1953 = vrot.lane.b32.xlu0 %v4090_v43, %s8379_s20 }
 0x423   :  { %v2325_v8 = vpop.permute.xlu1 %2324 }
 0x424   :  { %v2708_v20 = vpop.permute.xlu0 %2707  ;;  %2482 = vst.msk [vmem:[#allocation3 + $0x118] sm:$0xff] %vm2446_vm8, %v2325_v8 }
 0x425   :  { %2866 = vst.msk [vmem:[#allocation3 + $0x110] sm:$0xff] %vm2831_vm9, %v2708_v20  ;;  %1951 = vrot.lane.b32.xlu1 %v11130_v37, %s8379_s20 }
 0x426   :  { %2334 = vrot.lane.b32.xlu0 %v10280_v41, %s8380_s2 }
 0x427   :  { %v2706_v57 = vpop.permute.xlu1 %2705 }
 0x428   :  { %v3089_v2 = vpop.permute.xlu0 %3088  ;;  %2865 = vst.msk [vmem:[#allocation3 + $0x108] sm:$0xff] %vm2831_vm9, %v2706_v57 }
 0x429   :  { %3249 = vst.msk [vmem:[#allocation3 + $0x100] sm:$0xff] %vm3216_vm10, %v3089_v2  ;;  %1955 = vrot.lane.b32.xlu1 %v4091_v19, %s8379_s20 }
 0x42a   :  { %2338 = vrot.lane.b32.xlu0 %v10297_v35, %s8380_s2 }
 0x42b   :  { %v2710_v29 = vpop.permute.xlu1 %2709 }
 0x42c   :  { %v3093_v60 = vpop.permute.xlu0 %3092  ;;  %2867 = vst.msk [vmem:[#allocation3 + $0x118] sm:$0xff] %vm2831_vm9, %v2710_v29 }
 0x42d   :  { %3251 = vst.msk [vmem:[#allocation3 + $0x110] sm:$0xff] %vm3216_vm10, %v3093_v60  ;;  %2336 = vrot.lane.b32.xlu1 %v10293_v24, %s8380_s2 }
 0x42e   :  { %2719 = vrot.lane.b32.xlu0 %v11144_v23, %s8381_s3 }
 0x42f   :  { %v3091_v41 = vpop.permute.xlu1 %3090 }
 0x430   :  { %v3475_v14 = vpop.permute.xlu0 %3474  ;;  %3250 = vst.msk [vmem:[#allocation3 + $0x108] sm:$0xff] %vm3216_vm10, %v3091_v41 }
 0x431   :  { %3635 = vst.msk [vmem:[#allocation3 + $0x100] sm:$0xff] %vm3602_vm11, %v3475_v14  ;;  %2340 = vrot.lane.b32.xlu1 %v10303_v4, %s8380_s2  ;;  %v2557_v14 = vld [vmem:[#allocation2 + $0x271] sm:$0xff] }
 0x432   :  { %2723 = vrot.lane.b32.xlu0 %v2553_v51, %s8381_s3 }
 0x433   :  { %v3095_v6 = vpop.permute.xlu1 %3094 }
 0x434   :  { %v3479_v59 = vpop.permute.xlu0 %3478  ;;  %3252 = vst.msk [vmem:[#allocation3 + $0x118] sm:$0xff] %vm3216_vm10, %v3095_v6 }
 0x435   :  { %3637 = vst.msk [vmem:[#allocation3 + $0x110] sm:$0xff] %vm3602_vm11, %v3479_v59  ;;  %2721 = vrot.lane.b32.xlu1 %v11156_v42, %s8381_s3  ;;  %v11250_v42 = vld [vmem:[#allocation2 + $0x261] sm:$0xff] }
 0x436   :  { %3104 = vrot.lane.b32.xlu0 %v4090_v43, %s8382_s25  ;;  %v4094_v43 = vld [vmem:[#allocation2 + $0x25a] sm:$0xff] }
 0x437   :  { %v3477_v24 = vpop.permute.xlu1 %3476 }
 0x438   :  { %v3860_v13 = vpop.permute.xlu0 %3859  ;;  %3636 = vst.msk [vmem:[#allocation3 + $0x108] sm:$0xff] %vm3602_vm11, %v3477_v24  ;;  %v2558_v24 = vld [vmem:[#allocation2 + $0x279] sm:$0xff] }
 0x439   :  { %4020 = vst.msk [vmem:[#allocation3 + $0x100] sm:$0xff] %vm3987_vm12, %v3860_v13  ;;  %2725 = vrot.lane.b32.xlu1 %v2554_v56, %s8381_s3  ;;  %v11307_v13 = vld [vmem:[#allocation2 + $0x272] sm:$0xff] }
 0x43a   :  { %3108 = vrot.lane.b32.xlu0 %v11213_v63, %s8382_s25 }
 0x43b   :  { %v3481_v50 = vpop.permute.xlu1 %3480 }
 0x43c   :  { %v3864_v7 = vpop.permute.xlu0 %3863  ;;  %3638 = vst.msk [vmem:[#allocation3 + $0x118] sm:$0xff] %vm3602_vm11, %v3481_v50 }
 0x43d   :  { %4022 = vst.msk [vmem:[#allocation3 + $0x110] sm:$0xff] %vm3987_vm12, %v3864_v7  ;;  %3106 = vrot.lane.b32.xlu1 %v4091_v19, %s8382_s25  ;;  %v4095_v19 = vld [vmem:[#allocation2 + $0x262] sm:$0xff] }
 0x43e   :  { %3490 = vrot.lane.b32.xlu0 %v10297_v35, %s8383_s1 }
 0x43f   :  { %v3862_v37 = vpop.permute.xlu1 %3861 }
 0x440   :  { %v4245_v26 = vpop.permute.xlu0 %4244  ;;  %4021 = vst.msk [vmem:[#allocation3 + $0x108] sm:$0xff] %vm3987_vm12, %v3862_v37  ;;  %v11318_v37 = vld [vmem:[#allocation2 + $0x27a] sm:$0xff] }
 0x441   :  { %4405 = vst.msk [vmem:[#allocation3 + $0x100] sm:$0xff] %vm4372_vm13, %v4245_v26  ;;  %3110 = vrot.lane.b32.xlu1 %v11224_v58, %s8382_s25 }
 0x442   :  { %3494 = vrot.lane.b32.xlu0 %v10312_v45, %s8383_s1 }
 0x443   :  { %v3866_v27 = vpop.permute.xlu1 %3865 }
 0x444   :  { %v1557_v10 = vpop.permute.xlu0 %1556  ;;  %4023 = vst.msk [vmem:[#allocation3 + $0x118] sm:$0xff] %vm3987_vm12, %v3866_v27 }
 0x445   :  { %1713 = vst.msk [vmem:[#allocation3 + $0x120] sm:$0xff] %vm1676_vm5, %v1557_v10  ;;  %3492 = vrot.lane.b32.xlu1 %v10303_v4, %s8383_s1  ;;  %v11332_v10 = vld [vmem:[#allocation2 + $0x289] sm:$0xff] }
 0x446   :  { %3875 = vrot.lane.b32.xlu0 %v2553_v51, %s8384_s26 }
 0x447   :  { %v4247_v35 = vpop.permute.xlu1 %4246 }
 0x448   :  { %v4249_v23 = vpop.permute.xlu0 %4248  ;;  %4406 = vst.msk [vmem:[#allocation3 + $0x108] sm:$0xff] %vm4372_vm13, %v4247_v35  ;;  %v4469_v61 = vld [vmem:[#allocation3 + $0x100] sm:$0xff] }
 0x449   :  { %4407 = vst.msk [vmem:[#allocation3 + $0x110] sm:$0xff] %vm4372_vm13, %v4249_v23  ;;  %3496 = vrot.lane.b32.xlu1 %v10316_v16, %s8383_s1 }
 0x44a   :  { %3879 = vrot.lane.b32.xlu0 %v11238_v49, %s8384_s26 }
 0x44b   :  { %v1559_v32 = vpop.permute.xlu1 %1558 }
 0x44c   :  { %v1561_v28 = vpop.permute.xlu0 %1560  ;;  %1714 = vst.msk [vmem:[#allocation3 + $0x128] sm:$0xff] %vm1676_vm5, %v1559_v32 }
 0x44d   :  { %1715 = vst.msk [vmem:[#allocation3 + $0x130] sm:$0xff] %vm1676_vm5, %v1561_v28  ;;  %3877 = vrot.lane.b32.xlu1 %v2554_v56, %s8384_s26 }
 0x44e   :  { %4260 = vrot.lane.b32.xlu0 %v11213_v63, %s8385_s16 }
 0x44f   :  { %v4251_v4 = vpop.permute.xlu1 %4250  ;;  %v4470_v12 = vld [vmem:[#allocation3 + $0x108] sm:$0xff] }
 0x450   :  { %v1942_v5 = vpop.permute.xlu0 %1941  ;;  %4408 = vst.msk [vmem:[#allocation3 + $0x118] sm:$0xff] %vm4372_vm13, %v4251_v4  ;;  %v4517_v22 = vpack.c.bf16 %v4470_v12, %v4469_v61  ;;  %v4471_v54 = vld [vmem:[#allocation3 + $0x110] sm:$0xff] }
 0x451   :  { %2098 = vst.msk [vmem:[#allocation3 + $0x120] sm:$0xff] %vm2061_vm6, %v1942_v5  ;;  %3881 = vrot.lane.b32.xlu1 %v11250_v42, %s8384_s26  ;;  %v11344_v4 = vld [vmem:[#allocation2 + $0x291] sm:$0xff] }
 0x452   :  { %1572 = vrot.lane.b32.xlu0 %v2553_v51, %s8378_s0  ;;  %8160 = vmatprep.mubr.msk.bf16.mxu1 %vm4569_vm14, %v4517_v22 }
 0x453   :  { %v1563_v11 = vpop.permute.xlu1 %1562 }
 0x454   :  { %v1946_v36 = vpop.permute.xlu0 %1945  ;;  %1716 = vst.msk [vmem:[#allocation3 + $0x138] sm:$0xff] %vm1676_vm5, %v1563_v11 }
 0x455   :  { %2100 = vst.msk [vmem:[#allocation3 + $0x130] sm:$0xff] %vm2061_vm6, %v1946_v36  ;;  %4262 = vrot.lane.b32.xlu1 %v11224_v58, %s8385_s16 }
 0x456   :  { %4264 = vrot.lane.b32.xlu0 %v4094_v43, %s8385_s16 }
 0x457   :  { %v1944_v1 = vpop.permute.xlu1 %1943  ;;  %v4472_v55 = vld [vmem:[#allocation3 + $0x118] sm:$0xff] }
 0x458   :  { %v2327_v30 = vpop.permute.xlu0 %2326  ;;  %2099 = vst.msk [vmem:[#allocation3 + $0x128] sm:$0xff] %vm2061_vm6, %v1944_v1  ;;  %v4518_v47 = vpack.c.bf16 %v4472_v55, %v4471_v54 }
 0x459   :  { %2483 = vst.msk [vmem:[#allocation3 + $0x120] sm:$0xff] %vm2446_vm8, %v2327_v30  ;;  %1574 = vrot.lane.b32.xlu1 %v2554_v56, %s8378_s0  ;;  %v4099_v30 = vld [vmem:[#allocation2 + $0x292] sm:$0xff] }
 0x45a   :  { %1576 = vrot.lane.b32.xlu0 %v11238_v49, %s8378_s0  ;;  %8161 = vmatmul.mubr.msk.bf16.gmra.mxu1 %vm4569_vm14, %v4518_v47 }
 0x45b   :  { %v1948_v31 = vpop.permute.xlu1 %1947 }
 0x45c   :  { %v2331_v38 = vpop.permute.xlu0 %2330  ;;  %2101 = vst.msk [vmem:[#allocation3 + $0x138] sm:$0xff] %vm2061_vm6, %v1948_v31 }
 0x45d   :  { %2485 = vst.msk [vmem:[#allocation3 + $0x130] sm:$0xff] %vm2446_vm8, %v2331_v38  ;;  %4266 = vrot.lane.b32.xlu1 %v4095_v19, %s8385_s16 }
 0x45e   :  { %1957 = vrot.lane.b32.xlu0 %v11213_v63, %s8379_s20 }
 0x45f   :  { %v2329_v21 = vpop.permute.xlu1 %2328 }
 0x460   :  { %v2712_v52 = vpop.permute.xlu0 %2711  ;;  %2484 = vst.msk [vmem:[#allocation3 + $0x128] sm:$0xff] %vm2446_vm8, %v2329_v21 }
 0x461   :  { %2868 = vst.msk [vmem:[#allocation3 + $0x120] sm:$0xff] %vm2831_vm9, %v2712_v52  ;;  %1578 = vrot.lane.b32.xlu1 %v11250_v42, %s8378_s0 }
 0x462   :  { %1961 = vrot.lane.b32.xlu0 %v4094_v43, %s8379_s20 }
 0x463   :  { %v2333_v8 = vpop.permute.xlu1 %2332 }
 0x464   :  { %v2716_v20 = vpop.permute.xlu0 %2715  ;;  %2486 = vst.msk [vmem:[#allocation3 + $0x138] sm:$0xff] %vm2446_vm8, %v2333_v8 }
 0x465   :  { %2870 = vst.msk [vmem:[#allocation3 + $0x130] sm:$0xff] %vm2831_vm9, %v2716_v20  ;;  %1959 = vrot.lane.b32.xlu1 %v11224_v58, %s8379_s20 }
 0x466   :  { %2342 = vrot.lane.b32.xlu0 %v10312_v45, %s8380_s2 }
 0x467   :  { %v2714_v57 = vpop.permute.xlu1 %2713 }
 0x468   :  { %v3097_v2 = vpop.permute.xlu0 %3096  ;;  %2869 = vst.msk [vmem:[#allocation3 + $0x128] sm:$0xff] %vm2831_vm9, %v2714_v57 }
 0x469   :  { %3253 = vst.msk [vmem:[#allocation3 + $0x120] sm:$0xff] %vm3216_vm10, %v3097_v2  ;;  %1963 = vrot.lane.b32.xlu1 %v4095_v19, %s8379_s20  ;;  %v2561_v2 = vld [vmem:[#allocation2 + $0x2a1] sm:$0xff] }
 0x46a   :  { %2346 = vrot.lane.b32.xlu0 %v10320_v40, %s8380_s2 }
 0x46b   :  { %v2718_v29 = vpop.permute.xlu1 %2717 }
 0x46c   :  { %v3101_v60 = vpop.permute.xlu0 %3100  ;;  %2871 = vst.msk [vmem:[#allocation3 + $0x138] sm:$0xff] %vm2831_vm9, %v2718_v29 }
 0x46d   :  { %3255 = vst.msk [vmem:[#allocation3 + $0x130] sm:$0xff] %vm3216_vm10, %v3101_v60  ;;  %2344 = vrot.lane.b32.xlu1 %v10316_v16, %s8380_s2 }
 0x46e   :  { %2727 = vrot.lane.b32.xlu0 %v11238_v49, %s8381_s3 }
 0x46f   :  { %v3099_v45 = vpop.permute.xlu1 %3098 }
 0x470   :  { %v3483_v41 = vpop.permute.xlu0 %3482  ;;  %3254 = vst.msk [vmem:[#allocation3 + $0x128] sm:$0xff] %vm3216_vm10, %v3099_v45 }
 0x471   :  { %3639 = vst.msk [vmem:[#allocation3 + $0x120] sm:$0xff] %vm3602_vm11, %v3483_v41  ;;  %2348 = vrot.lane.b32.xlu1 %v10326_v62, %s8380_s2  ;;  %v2562_v41 = vld [vmem:[#allocation2 + $0x2a9] sm:$0xff] }
 0x472   :  { %2731 = vrot.lane.b32.xlu0 %v2557_v14, %s8381_s3 }
 0x473   :  { %v3103_v51 = vpop.permute.xlu1 %3102 }
 0x474   :  { %v3487_v6 = vpop.permute.xlu0 %3486  ;;  %3256 = vst.msk [vmem:[#allocation3 + $0x138] sm:$0xff] %vm3216_vm10, %v3103_v51 }
 0x475   :  { %3641 = vst.msk [vmem:[#allocation3 + $0x130] sm:$0xff] %vm3602_vm11, %v3487_v6  ;;  %2729 = vrot.lane.b32.xlu1 %v11250_v42, %s8381_s3  ;;  %v4098_v42 = vld [vmem:[#allocation2 + $0x28a] sm:$0xff] }
 0x476   :  { %3112 = vrot.lane.b32.xlu0 %v4094_v43, %s8382_s25 }
 0x477   :  { %v3485_v16 = vpop.permute.xlu1 %3484 }
 0x478   :  { %v3868_v59 = vpop.permute.xlu0 %3867  ;;  %3640 = vst.msk [vmem:[#allocation3 + $0x128] sm:$0xff] %vm3602_vm11, %v3485_v16 }
 0x479   :  { %4024 = vst.msk [vmem:[#allocation3 + $0x120] sm:$0xff] %vm3987_vm12, %v3868_v59  ;;  %2733 = vrot.lane.b32.xlu1 %v2558_v24, %s8381_s3 }
 0x47a   :  { %3116 = vrot.lane.b32.xlu0 %v11307_v13, %s8382_s25 }
 0x47b   :  { %v3489_v56 = vpop.permute.xlu1 %3488 }
 0x47c   :  { %v3872_v63 = vpop.permute.xlu0 %3871  ;;  %3642 = vst.msk [vmem:[#allocation3 + $0x138] sm:$0xff] %vm3602_vm11, %v3489_v56 }
 0x47d   :  { %4026 = vst.msk [vmem:[#allocation3 + $0x130] sm:$0xff] %vm3987_vm12, %v3872_v63  ;;  %3114 = vrot.lane.b32.xlu1 %v4095_v19, %s8382_s25 }
 0x47e   :  { %3498 = vrot.lane.b32.xlu0 %v10320_v40, %s8383_s1 }
 0x47f   :  { %v3870_v50 = vpop.permute.xlu1 %3869 }
 0x480   :  { %v4253_v7 = vpop.permute.xlu0 %4252  ;;  %4025 = vst.msk [vmem:[#allocation3 + $0x128] sm:$0xff] %vm3987_vm12, %v3870_v50  ;;  %v11426_v50 = vld [vmem:[#allocation2 + $0x2b9] sm:$0xff] }
 0x481   :  { %4409 = vst.msk [vmem:[#allocation3 + $0x120] sm:$0xff] %vm4372_vm13, %v4253_v7  ;;  %3118 = vrot.lane.b32.xlu1 %v11318_v37, %s8382_s25 }
 0x482   :  { %3502 = vrot.lane.b32.xlu0 %v10334_v3, %s8383_s1 }
 0x483   :  { %v3874_v26 = vpop.permute.xlu1 %3873 }
 0x484   :  { %v1565_v58 = vpop.permute.xlu0 %1564  ;;  %4027 = vst.msk [vmem:[#allocation3 + $0x138] sm:$0xff] %vm3987_vm12, %v3874_v26 }
 0x485   :  { %1717 = vst.msk [vmem:[#allocation3 + $0x140] sm:$0xff] %vm1676_vm5, %v1565_v58  ;;  %3500 = vrot.lane.b32.xlu1 %v10326_v62, %s8383_s1 }
 0x486   :  { %3883 = vrot.lane.b32.xlu0 %v2557_v14, %s8384_s26 }
 0x487   :  { %v4255_v40 = vpop.permute.xlu1 %4254 }
 0x488   :  { %v4257_v27 = vpop.permute.xlu0 %4256  ;;  %4410 = vst.msk [vmem:[#allocation3 + $0x128] sm:$0xff] %vm4372_vm13, %v4255_v40  ;;  %v4473_v49 = vld [vmem:[#allocation3 + $0x120] sm:$0xff] }
 0x489   :  { %4411 = vst.msk [vmem:[#allocation3 + $0x130] sm:$0xff] %vm4372_vm13, %v4257_v27  ;;  %3504 = vrot.lane.b32.xlu1 %v10338_v34, %s8383_s1  ;;  %v11438_v27 = vld [vmem:[#allocation2 + $0x2c1] sm:$0xff] }
 0x48a   :  { %3887 = vrot.lane.b32.xlu0 %v11332_v10, %s8384_s26 }
 0x48b   :  { %v1567_v35 = vpop.permute.xlu1 %1566 }
 0x48c   :  { %v1569_v23 = vpop.permute.xlu0 %1568  ;;  %1718 = vst.msk [vmem:[#allocation3 + $0x148] sm:$0xff] %vm1676_vm5, %v1567_v35 }
 0x48d   :  { %1719 = vst.msk [vmem:[#allocation3 + $0x150] sm:$0xff] %vm1676_vm5, %v1569_v23  ;;  %3885 = vrot.lane.b32.xlu1 %v2558_v24, %s8384_s26 }
 0x48e   :  { %4268 = vrot.lane.b32.xlu0 %v11307_v13, %s8385_s16 }
 0x48f   :  { %v4259_v62 = vpop.permute.xlu1 %4258  ;;  %v4474_v32 = vld [vmem:[#allocation3 + $0x128] sm:$0xff] }
 0x490   :  { %v1950_v28 = vpop.permute.xlu0 %1949  ;;  %4412 = vst.msk [vmem:[#allocation3 + $0x138] sm:$0xff] %vm4372_vm13, %v4259_v62  ;;  %v4519_v61 = vpack.c.bf16 %v4474_v32, %v4473_v49  ;;  %v4475_v11 = vld [vmem:[#allocation3 + $0x130] sm:$0xff]  ;;  %v4102_v62 = vld [vmem:[#allocation2 + $0x2ba] sm:$0xff] }
 0x491   :  { %2102 = vst.msk [vmem:[#allocation3 + $0x140] sm:$0xff] %vm2061_vm6, %v1950_v28  ;;  %3889 = vrot.lane.b32.xlu1 %v11344_v4, %s8384_s26 }
 0x492   :  { %1580 = vrot.lane.b32.xlu0 %v2557_v14, %s8378_s0  ;;  %8164 = vmatprep.mubr.msk.bf16.mxu1 %vm4569_vm14, %v4519_v61  ;;  %v11401_v14 = vld [vmem:[#allocation2 + $0x2a2] sm:$0xff] }
 0x493   :  { %v1571_v12 = vpop.permute.xlu1 %1570 }
 0x494   :  { %v1954_v5 = vpop.permute.xlu0 %1953  ;;  %1720 = vst.msk [vmem:[#allocation3 + $0x158] sm:$0xff] %vm1676_vm5, %v1571_v12 }
 0x495   :  { %2104 = vst.msk [vmem:[#allocation3 + $0x150] sm:$0xff] %vm2061_vm6, %v1954_v5  ;;  %4270 = vrot.lane.b32.xlu1 %v11318_v37, %s8385_s16 }
 0x496   :  { %4272 = vrot.lane.b32.xlu0 %v4098_v42, %s8385_s16 }
 0x497   :  { %v1952_v22 = vpop.permute.xlu1 %1951  ;;  %v4476_v36 = vld [vmem:[#allocation3 + $0x138] sm:$0xff] }
 0x498   :  { %v2335_v43 = vpop.permute.xlu0 %2334  ;;  %2103 = vst.msk [vmem:[#allocation3 + $0x148] sm:$0xff] %vm2061_vm6, %v1952_v22  ;;  %v4520_v1 = vpack.c.bf16 %v4476_v36, %v4475_v11 }
 0x499   :  { %2487 = vst.msk [vmem:[#allocation3 + $0x140] sm:$0xff] %vm2446_vm8, %v2335_v43  ;;  %1582 = vrot.lane.b32.xlu1 %v2558_v24, %s8378_s0  ;;  %v11412_v24 = vld [vmem:[#allocation2 + $0x2aa] sm:$0xff] }
 0x49a   :  { %1584 = vrot.lane.b32.xlu0 %v11332_v10, %s8378_s0  ;;  %8165 = vmatmul.mubr.msk.bf16.gmra.mxu1 %vm4569_vm14, %v4520_v1 }
 0x49b   :  { %v1956_v54 = vpop.permute.xlu1 %1955 }
 0x49c   :  { %v2339_v55 = vpop.permute.xlu0 %2338  ;;  %2105 = vst.msk [vmem:[#allocation3 + $0x158] sm:$0xff] %vm2061_vm6, %v1956_v54 }
 0x49d   :  { %2489 = vst.msk [vmem:[#allocation3 + $0x150] sm:$0xff] %vm2446_vm8, %v2339_v55  ;;  %4274 = vrot.lane.b32.xlu1 %v4099_v30, %s8385_s16 }
 0x49e   :  { %1965 = vrot.lane.b32.xlu0 %v11307_v13, %s8379_s20 }
 0x49f   :  { %v2337_v47 = vpop.permute.xlu1 %2336 }
 0x4a0   :  { %v2720_v31 = vpop.permute.xlu0 %2719  ;;  %2488 = vst.msk [vmem:[#allocation3 + $0x148] sm:$0xff] %vm2446_vm8, %v2337_v47 }
 0x4a1   :  { %2872 = vst.msk [vmem:[#allocation3 + $0x140] sm:$0xff] %vm2831_vm9, %v2720_v31  ;;  %1586 = vrot.lane.b32.xlu1 %v11344_v4, %s8378_s0  ;;  %v2565_v31 = vld [vmem:[#allocation2 + $0x2d1] sm:$0xff] }
 0x4a2   :  { %1969 = vrot.lane.b32.xlu0 %v4098_v42, %s8379_s20 }
 0x4a3   :  { %v2341_v38 = vpop.permute.xlu1 %2340 }
 0x4a4   :  { %v2724_v19 = vpop.permute.xlu0 %2723  ;;  %2490 = vst.msk [vmem:[#allocation3 + $0x158] sm:$0xff] %vm2446_vm8, %v2341_v38 }
 0x4a5   :  { %2874 = vst.msk [vmem:[#allocation3 + $0x150] sm:$0xff] %vm2831_vm9, %v2724_v19  ;;  %1967 = vrot.lane.b32.xlu1 %v11318_v37, %s8379_s20 }
 0x4a6   :  { %2350 = vrot.lane.b32.xlu0 %v10334_v3, %s8380_s2 }
 0x4a7   :  { %v2722_v21 = vpop.permute.xlu1 %2721 }
 0x4a8   :  { %v3105_v52 = vpop.permute.xlu0 %3104  ;;  %2873 = vst.msk [vmem:[#allocation3 + $0x148] sm:$0xff] %vm2831_vm9, %v2722_v21 }
 0x4a9   :  { %3257 = vst.msk [vmem:[#allocation3 + $0x140] sm:$0xff] %vm3216_vm10, %v3105_v52  ;;  %1971 = vrot.lane.b32.xlu1 %v4099_v30, %s8379_s20  ;;  %v2566_v52 = vld [vmem:[#allocation2 + $0x2d9] sm:$0xff] }
 0x4aa   :  { %2354 = vrot.lane.b32.xlu0 %v10346_v17, %s8380_s2 }
 0x4ab   :  { %v2726_v8 = vpop.permute.xlu1 %2725 }
 0x4ac   :  { %v3109_v20 = vpop.permute.xlu0 %3108  ;;  %2875 = vst.msk [vmem:[#allocation3 + $0x158] sm:$0xff] %vm2831_vm9, %v2726_v8  ;;  %v11495_v8 = vld [vmem:[#allocation2 + $0x2d2] sm:$0xff] }
 0x4ad   :  { %3259 = vst.msk [vmem:[#allocation3 + $0x150] sm:$0xff] %vm3216_vm10, %v3109_v20  ;;  %2352 = vrot.lane.b32.xlu1 %v10338_v34, %s8380_s2 }
 0x4ae   :  { %2735 = vrot.lane.b32.xlu0 %v11332_v10, %s8381_s3 }
 0x4af   :  { %v3107_v3 = vpop.permute.xlu1 %3106 }
 0x4b0   :  { %v3491_v57 = vpop.permute.xlu0 %3490  ;;  %3258 = vst.msk [vmem:[#allocation3 + $0x148] sm:$0xff] %vm3216_vm10, %v3107_v3 }
 0x4b1   :  { %3643 = vst.msk [vmem:[#allocation3 + $0x140] sm:$0xff] %vm3602_vm11, %v3491_v57  ;;  %2356 = vrot.lane.b32.xlu1 %v10348_v18, %s8380_s2 }
 0x4b2   :  { %2739 = vrot.lane.b32.xlu0 %v2561_v2, %s8381_s3 }
 0x4b3   :  { %v3111_v29 = vpop.permute.xlu1 %3110 }
 0x4b4   :  { %v3495_v60 = vpop.permute.xlu0 %3494  ;;  %3260 = vst.msk [vmem:[#allocation3 + $0x158] sm:$0xff] %vm3216_vm10, %v3111_v29  ;;  %v11506_v29 = vld [vmem:[#allocation2 + $0x2da] sm:$0xff] }
 0x4b5   :  { %3645 = vst.msk [vmem:[#allocation3 + $0x150] sm:$0xff] %vm3602_vm11, %v3495_v60  ;;  %2737 = vrot.lane.b32.xlu1 %v11344_v4, %s8381_s3 }
 0x4b6   :  { %3120 = vrot.lane.b32.xlu0 %v4098_v42, %s8382_s25  ;;  %v4103_v42 = vld [vmem:[#allocation2 + $0x2c2] sm:$0xff] }
 0x4b7   :  { %v3493_v34 = vpop.permute.xlu1 %3492 }
 0x4b8   :  { %v3876_v45 = vpop.permute.xlu0 %3875  ;;  %3644 = vst.msk [vmem:[#allocation3 + $0x148] sm:$0xff] %vm3602_vm11, %v3493_v34 }
 0x4b9   :  { %4028 = vst.msk [vmem:[#allocation3 + $0x140] sm:$0xff] %vm3987_vm12, %v3876_v45  ;;  %2741 = vrot.lane.b32.xlu1 %v2562_v41, %s8381_s3 }
 0x4ba   :  { %3124 = vrot.lane.b32.xlu0 %v11401_v14, %s8382_s25 }
 0x4bb   :  { %v3497_v51 = vpop.permute.xlu1 %3496 }
 0x4bc   :  { %v3880_v6 = vpop.permute.xlu0 %3879  ;;  %3646 = vst.msk [vmem:[#allocation3 + $0x158] sm:$0xff] %vm3602_vm11, %v3497_v51 }
 0x4bd   :  { %4030 = vst.msk [vmem:[#allocation3 + $0x150] sm:$0xff] %vm3987_vm12, %v3880_v6  ;;  %3122 = vrot.lane.b32.xlu1 %v4099_v30, %s8382_s25 }
 0x4be   :  { %3506 = vrot.lane.b32.xlu0 %v10346_v17, %s8383_s1 }
 0x4bf   :  { %v3878_v16 = vpop.permute.xlu1 %3877 }
 0x4c0   :  { %v4261_v59 = vpop.permute.xlu0 %4260  ;;  %4029 = vst.msk [vmem:[#allocation3 + $0x148] sm:$0xff] %vm3987_vm12, %v3878_v16 }
 0x4c1   :  { %4413 = vst.msk [vmem:[#allocation3 + $0x140] sm:$0xff] %vm4372_vm13, %v4261_v59  ;;  %3126 = vrot.lane.b32.xlu1 %v11412_v24, %s8382_s25 }
 0x4c2   :  { %3510 = vrot.lane.b32.xlu0 %v10352_v39, %s8383_s1 }
 0x4c3   :  { %v3882_v13 = vpop.permute.xlu1 %3881 }
 0x4c4   :  { %v1573_v56 = vpop.permute.xlu0 %1572  ;;  %4031 = vst.msk [vmem:[#allocation3 + $0x158] sm:$0xff] %vm3987_vm12, %v3882_v13 }
 0x4c5   :  { %1721 = vst.msk [vmem:[#allocation3 + $0x160] sm:$0xff] %vm1676_vm5, %v1573_v56  ;;  %3508 = vrot.lane.b32.xlu1 %v10348_v18, %s8383_s1 }
 0x4c6   :  { %3891 = vrot.lane.b32.xlu0 %v2561_v2, %s8384_s26 }
 0x4c7   :  { %v4263_v17 = vpop.permute.xlu1 %4262 }
 0x4c8   :  { %v4265_v63 = vpop.permute.xlu0 %4264  ;;  %4414 = vst.msk [vmem:[#allocation3 + $0x148] sm:$0xff] %vm4372_vm13, %v4263_v17  ;;  %v4477_v26 = vld [vmem:[#allocation3 + $0x140] sm:$0xff] }
 0x4c9   :  { %4415 = vst.msk [vmem:[#allocation3 + $0x150] sm:$0xff] %vm4372_vm13, %v4265_v63  ;;  %3512 = vrot.lane.b32.xlu1 %v10358_v25, %s8383_s1  ;;  %v4106_v63 = vld [vmem:[#allocation2 + $0x2ea] sm:$0xff] }
 0x4ca   :  { %3895 = vrot.lane.b32.xlu0 %v11426_v50, %s8384_s26 }
 0x4cb   :  { %v1575_v7 = vpop.permute.xlu1 %1574 }
 0x4cc   :  { %v1577_v37 = vpop.permute.xlu0 %1576  ;;  %1722 = vst.msk [vmem:[#allocation3 + $0x168] sm:$0xff] %vm1676_vm5, %v1575_v7 }
 0x4cd   :  { %1723 = vst.msk [vmem:[#allocation3 + $0x170] sm:$0xff] %vm1676_vm5, %v1577_v37  ;;  %3893 = vrot.lane.b32.xlu1 %v2562_v41, %s8384_s26 }
 0x4ce   :  { %4276 = vrot.lane.b32.xlu0 %v11401_v14, %s8385_s16 }
 0x4cf   :  { %v4267_v18 = vpop.permute.xlu1 %4266  ;;  %v4478_v58 = vld [vmem:[#allocation3 + $0x148] sm:$0xff] }
 0x4d0   :  { %v1958_v40 = vpop.permute.xlu0 %1957  ;;  %4416 = vst.msk [vmem:[#allocation3 + $0x158] sm:$0xff] %vm4372_vm13, %v4267_v18  ;;  %v4521_v10 = vpack.c.bf16 %v4478_v58, %v4477_v26  ;;  %v4479_v32 = vld [vmem:[#allocation3 + $0x150] sm:$0xff] }
 0x4d1   :  { %2106 = vst.msk [vmem:[#allocation3 + $0x160] sm:$0xff] %vm2061_vm6, %v1958_v40  ;;  %3897 = vrot.lane.b32.xlu1 %v11438_v27, %s8384_s26 }
 0x4d2   :  { %1588 = vrot.lane.b32.xlu0 %v2561_v2, %s8378_s0  ;;  %8168 = vmatprep.mubr.msk.bf16.mxu1 %vm4569_vm14, %v4521_v10 }
 0x4d3   :  { %v1579_v35 = vpop.permute.xlu1 %1578 }
 0x4d4   :  { %v1962_v23 = vpop.permute.xlu0 %1961  ;;  %1724 = vst.msk [vmem:[#allocation3 + $0x178] sm:$0xff] %vm1676_vm5, %v1579_v35 }
 0x4d5   :  { %2108 = vst.msk [vmem:[#allocation3 + $0x170] sm:$0xff] %vm2061_vm6, %v1962_v23  ;;  %4278 = vrot.lane.b32.xlu1 %v11412_v24, %s8385_s16 }
 0x4d6   :  { %4280 = vrot.lane.b32.xlu0 %v4102_v62, %s8385_s16 }
 0x4d7   :  { %v1960_v49 = vpop.permute.xlu1 %1959  ;;  %v4480_v28 = vld [vmem:[#allocation3 + $0x158] sm:$0xff] }
 0x4d8   :  { %v2343_v4 = vpop.permute.xlu0 %2342  ;;  %2107 = vst.msk [vmem:[#allocation3 + $0x168] sm:$0xff] %vm2061_vm6, %v1960_v49  ;;  %v4522_v61 = vpack.c.bf16 %v4480_v28, %v4479_v32 }
 0x4d9   :  { %2491 = vst.msk [vmem:[#allocation3 + $0x160] sm:$0xff] %vm2446_vm8, %v2343_v4  ;;  %1590 = vrot.lane.b32.xlu1 %v2562_v41, %s8378_s0  ;;  %v11520_v41 = vld [vmem:[#allocation2 + $0x2e9] sm:$0xff] }
 0x4da   :  { %1592 = vrot.lane.b32.xlu0 %v11426_v50, %s8378_s0  ;;  %8169 = vmatmul.mubr.msk.bf16.gmra.mxu1 %vm4569_vm14, %v4522_v61 }
 0x4db   :  { %v1964_v12 = vpop.permute.xlu1 %1963 }
 0x4dc   :  { %v2347_v5 = vpop.permute.xlu0 %2346  ;;  %2109 = vst.msk [vmem:[#allocation3 + $0x178] sm:$0xff] %vm2061_vm6, %v1964_v12  ;;  %v2569_v12 = vld [vmem:[#allocation2 + $0x301] sm:$0xff] }
 0x4dd   :  { %2493 = vst.msk [vmem:[#allocation3 + $0x170] sm:$0xff] %vm2446_vm8, %v2347_v5  ;;  %4282 = vrot.lane.b32.xlu1 %v4103_v42, %s8385_s16 }
 0x4de   :  { %1973 = vrot.lane.b32.xlu0 %v11401_v14, %s8379_s20 }
 0x4df   :  { %v2345_v22 = vpop.permute.xlu1 %2344 }
 0x4e0   :  { %v2728_v11 = vpop.permute.xlu0 %2727  ;;  %2492 = vst.msk [vmem:[#allocation3 + $0x168] sm:$0xff] %vm2446_vm8, %v2345_v22 }
 0x4e1   :  { %2876 = vst.msk [vmem:[#allocation3 + $0x160] sm:$0xff] %vm2831_vm9, %v2728_v11  ;;  %1594 = vrot.lane.b32.xlu1 %v11438_v27, %s8378_s0  ;;  %v2570_v11 = vld [vmem:[#allocation2 + $0x309] sm:$0xff] }
 0x4e2   :  { %1977 = vrot.lane.b32.xlu0 %v4102_v62, %s8379_s20 }
 0x4e3   :  { %v2349_v36 = vpop.permute.xlu1 %2348 }
 0x4e4   :  { %v2732_v43 = vpop.permute.xlu0 %2731  ;;  %2494 = vst.msk [vmem:[#allocation3 + $0x178] sm:$0xff] %vm2446_vm8, %v2349_v36  ;;  %v11589_v36 = vld [vmem:[#allocation2 + $0x302] sm:$0xff] }
 0x4e5   :  { %2878 = vst.msk [vmem:[#allocation3 + $0x170] sm:$0xff] %vm2831_vm9, %v2732_v43  ;;  %1975 = vrot.lane.b32.xlu1 %v11412_v24, %s8379_s20  ;;  %v11532_v24 = vld [vmem:[#allocation2 + $0x2f1] sm:$0xff] }
 0x4e6   :  { %2358 = vrot.lane.b32.xlu0 %v10352_v39, %s8380_s2 }
 0x4e7   :  { %v2730_v1 = vpop.permute.xlu1 %2729 }
 0x4e8   :  { %v3113_v54 = vpop.permute.xlu0 %3112  ;;  %2877 = vst.msk [vmem:[#allocation3 + $0x168] sm:$0xff] %vm2831_vm9, %v2730_v1 }
 0x4e9   :  { %3261 = vst.msk [vmem:[#allocation3 + $0x160] sm:$0xff] %vm3216_vm10, %v3113_v54  ;;  %1979 = vrot.lane.b32.xlu1 %v4103_v42, %s8379_s20 }
 0x4ea   :  { %2362 = vrot.lane.b32.xlu0 %v10365_v33, %s8380_s2 }
 0x4eb   :  { %v2734_v55 = vpop.permute.xlu1 %2733 }
 0x4ec   :  { %v3117_v30 = vpop.permute.xlu0 %3116  ;;  %2879 = vst.msk [vmem:[#allocation3 + $0x178] sm:$0xff] %vm2831_vm9, %v2734_v55 }
 0x4ed   :  { %3263 = vst.msk [vmem:[#allocation3 + $0x170] sm:$0xff] %vm3216_vm10, %v3117_v30  ;;  %2360 = vrot.lane.b32.xlu1 %v10358_v25, %s8380_s2  ;;  %v11600_v30 = vld [vmem:[#allocation2 + $0x30a] sm:$0xff] }
 0x4ee   :  { %2743 = vrot.lane.b32.xlu0 %v11426_v50, %s8381_s3 }
 0x4ef   :  { %v3115_v39 = vpop.permute.xlu1 %3114 }
 0x4f0   :  { %v3499_v47 = vpop.permute.xlu0 %3498  ;;  %3262 = vst.msk [vmem:[#allocation3 + $0x168] sm:$0xff] %vm3216_vm10, %v3115_v39 }
 0x4f1   :  { %3647 = vst.msk [vmem:[#allocation3 + $0x160] sm:$0xff] %vm3602_vm11, %v3499_v47  ;;  %2364 = vrot.lane.b32.xlu1 %v10367_v53, %s8380_s2 }
 0x4f2   :  { %2747 = vrot.lane.b32.xlu0 %v2565_v31, %s8381_s3 }
 0x4f3   :  { %v3119_v38 = vpop.permute.xlu1 %3118 }
 0x4f4   :  { %v3503_v19 = vpop.permute.xlu0 %3502  ;;  %3264 = vst.msk [vmem:[#allocation3 + $0x178] sm:$0xff] %vm3216_vm10, %v3119_v38  ;;  %v11614_v38 = vld [vmem:[#allocation2 + $0x319] sm:$0xff] }
 0x4f5   :  { %3649 = vst.msk [vmem:[#allocation3 + $0x170] sm:$0xff] %vm3602_vm11, %v3503_v19  ;;  %2745 = vrot.lane.b32.xlu1 %v11438_v27, %s8381_s3  ;;  %v4107_v27 = vld [vmem:[#allocation2 + $0x2f2] sm:$0xff] }
 0x4f6   :  { %3128 = vrot.lane.b32.xlu0 %v4102_v62, %s8382_s25 }
 0x4f7   :  { %v3501_v25 = vpop.permute.xlu1 %3500 }
 0x4f8   :  { %v3884_v21 = vpop.permute.xlu0 %3883  ;;  %3648 = vst.msk [vmem:[#allocation3 + $0x168] sm:$0xff] %vm3602_vm11, %v3501_v25 }
 0x4f9   :  { %4032 = vst.msk [vmem:[#allocation3 + $0x160] sm:$0xff] %vm3987_vm12, %v3884_v21  ;;  %2749 = vrot.lane.b32.xlu1 %v2566_v52, %s8381_s3 }
 0x4fa   :  { %3132 = vrot.lane.b32.xlu0 %v11495_v8, %s8382_s25 }
 0x4fb   :  { %v3505_v20 = vpop.permute.xlu1 %3504 }
 0x4fc   :  { %v3888_v3 = vpop.permute.xlu0 %3887  ;;  %3650 = vst.msk [vmem:[#allocation3 + $0x178] sm:$0xff] %vm3602_vm11, %v3505_v20  ;;  %v11626_v20 = vld [vmem:[#allocation2 + $0x321] sm:$0xff] }
 0x4fd   :  { %4034 = vst.msk [vmem:[#allocation3 + $0x170] sm:$0xff] %vm3987_vm12, %v3888_v3  ;;  %3130 = vrot.lane.b32.xlu1 %v4103_v42, %s8382_s25 }
 0x4fe   :  { %3514 = vrot.lane.b32.xlu0 %v10365_v33, %s8383_s1 }
 0x4ff   :  { %v3886_v57 = vpop.permute.xlu1 %3885 }
 0x500   :  { %v4269_v2 = vpop.permute.xlu0 %4268  ;;  %4033 = vst.msk [vmem:[#allocation3 + $0x168] sm:$0xff] %vm3987_vm12, %v3886_v57 }
 0x501   :  { %4417 = vst.msk [vmem:[#allocation3 + $0x160] sm:$0xff] %vm4372_vm13, %v4269_v2  ;;  %3134 = vrot.lane.b32.xlu1 %v11506_v29, %s8382_s25 }
 0x502   :  { %3518 = vrot.lane.b32.xlu0 %v10372_v48, %s8383_s1 }
 0x503   :  { %v3890_v60 = vpop.permute.xlu1 %3889 }
 0x504   :  { %v1581_v34 = vpop.permute.xlu0 %1580  ;;  %4035 = vst.msk [vmem:[#allocation3 + $0x178] sm:$0xff] %vm3987_vm12, %v3890_v60 }
 0x505   :  { %1725 = vst.msk [vmem:[#allocation3 + $0x180] sm:$0xff] %vm1676_vm5, %v1581_v34  ;;  %3516 = vrot.lane.b32.xlu1 %v10367_v53, %s8383_s1 }
 0x506   :  { %3899 = vrot.lane.b32.xlu0 %v2565_v31, %s8384_s26 }
 0x507   :  { %v4271_v33 = vpop.permute.xlu1 %4270 }
 0x508   :  { %v4273_v45 = vpop.permute.xlu0 %4272  ;;  %4418 = vst.msk [vmem:[#allocation3 + $0x168] sm:$0xff] %vm4372_vm13, %v4271_v33  ;;  %v4481_v6 = vld [vmem:[#allocation3 + $0x160] sm:$0xff] }
 0x509   :  { %4419 = vst.msk [vmem:[#allocation3 + $0x170] sm:$0xff] %vm4372_vm13, %v4273_v45  ;;  %3520 = vrot.lane.b32.xlu1 %v10378_v46, %s8383_s1 }
 0x50a   :  { %3903 = vrot.lane.b32.xlu0 %v11520_v41, %s8384_s26 }
 0x50b   :  { %v1583_v14 = vpop.permute.xlu1 %1582 }
 0x50c   :  { %v1585_v51 = vpop.permute.xlu0 %1584  ;;  %1726 = vst.msk [vmem:[#allocation3 + $0x188] sm:$0xff] %vm1676_vm5, %v1583_v14 }
 0x50d   :  { %1727 = vst.msk [vmem:[#allocation3 + $0x190] sm:$0xff] %vm1676_vm5, %v1585_v51  ;;  %3901 = vrot.lane.b32.xlu1 %v2566_v52, %s8384_s26 }
 0x50e   :  { %4284 = vrot.lane.b32.xlu0 %v11495_v8, %s8385_s16 }
 0x50f   :  { %v4275_v53 = vpop.permute.xlu1 %4274  ;;  %v4482_v16 = vld [vmem:[#allocation3 + $0x168] sm:$0xff] }
 0x510   :  { %v1966_v59 = vpop.permute.xlu0 %1965  ;;  %4420 = vst.msk [vmem:[#allocation3 + $0x178] sm:$0xff] %vm4372_vm13, %v4275_v53  ;;  %v4523_v13 = vpack.c.bf16 %v4482_v16, %v4481_v6  ;;  %v4483_v7 = vld [vmem:[#allocation3 + $0x170] sm:$0xff]  ;;  %v4111_v53 = vld [vmem:[#allocation2 + $0x322] sm:$0xff] }
 0x511   :  { %2110 = vst.msk [vmem:[#allocation3 + $0x180] sm:$0xff] %vm2061_vm6, %v1966_v59  ;;  %3905 = vrot.lane.b32.xlu1 %v11532_v24, %s8384_s26 }
 0x512   :  { %1596 = vrot.lane.b32.xlu0 %v2565_v31, %s8378_s0  ;;  %8172 = vmatprep.mubr.msk.bf16.mxu1 %vm4569_vm14, %v4523_v13 }
 0x513   :  { %v1587_v56 = vpop.permute.xlu1 %1586 }
 0x514   :  { %v1970_v17 = vpop.permute.xlu0 %1969  ;;  %1728 = vst.msk [vmem:[#allocation3 + $0x198] sm:$0xff] %vm1676_vm5, %v1587_v56 }
 0x515   :  { %2112 = vst.msk [vmem:[#allocation3 + $0x190] sm:$0xff] %vm2061_vm6, %v1970_v17  ;;  %4286 = vrot.lane.b32.xlu1 %v11506_v29, %s8385_s16  ;;  %v2188_v17 = vld [vmem:[#allocation2 + $0x330] sm:$0xff] }
 0x516   :  { %4288 = vrot.lane.b32.xlu0 %v4106_v63, %s8385_s16 }
 0x517   :  { %v1968_v50 = vpop.permute.xlu1 %1967  ;;  %v4484_v37 = vld [vmem:[#allocation3 + $0x178] sm:$0xff] }
 0x518   :  { %v2351_v18 = vpop.permute.xlu0 %2350  ;;  %2111 = vst.msk [vmem:[#allocation3 + $0x188] sm:$0xff] %vm2061_vm6, %v1968_v50  ;;  %v4524_v26 = vpack.c.bf16 %v4484_v37, %v4483_v7  ;;  %v2189_v37 = vld [vmem:[#allocation2 + $0x338] sm:$0xff] }
 0x519   :  { %2495 = vst.msk [vmem:[#allocation3 + $0x180] sm:$0xff] %vm2446_vm8, %v2351_v18  ;;  %1598 = vrot.lane.b32.xlu1 %v2566_v52, %s8378_s0  ;;  %v2573_v18 = vld [vmem:[#allocation2 + $0x331] sm:$0xff] }
 0x51a   :  { %1600 = vrot.lane.b32.xlu0 %v11520_v41, %s8378_s0  ;;  %8173 = vmatmul.mubr.msk.bf16.gmra.mxu1 %vm4569_vm14, %v4524_v26 }
 0x51b   :  { %v1972_v58 = vpop.permute.xlu1 %1971 }
 0x51c   :  { %v2355_v40 = vpop.permute.xlu0 %2354  ;;  %2113 = vst.msk [vmem:[#allocation3 + $0x198] sm:$0xff] %vm2061_vm6, %v1972_v58 }
 0x51d   :  { %2497 = vst.msk [vmem:[#allocation3 + $0x190] sm:$0xff] %vm2446_vm8, %v2355_v40  ;;  %4290 = vrot.lane.b32.xlu1 %v4107_v27, %s8385_s16 }
 0x51e   :  { %1981 = vrot.lane.b32.xlu0 %v11495_v8, %s8379_s20 }
 0x51f   :  { %v2353_v10 = vpop.permute.xlu1 %2352 }
 0x520   :  { %v2736_v35 = vpop.permute.xlu0 %2735  ;;  %2496 = vst.msk [vmem:[#allocation3 + $0x188] sm:$0xff] %vm2446_vm8, %v2353_v10  ;;  %v2958_v10 = vld [vmem:[#allocation2 + $0x332] sm:$0xff] }
 0x521   :  { %2880 = vst.msk [vmem:[#allocation3 + $0x180] sm:$0xff] %vm2831_vm9, %v2736_v35  ;;  %1602 = vrot.lane.b32.xlu1 %v11532_v24, %s8378_s0 }
 0x522   :  { %1985 = vrot.lane.b32.xlu0 %v4106_v63, %s8379_s20 }
 0x523   :  { %v2357_v23 = vpop.permute.xlu1 %2356 }
 0x524   :  { %v2740_v62 = vpop.permute.xlu0 %2739  ;;  %2498 = vst.msk [vmem:[#allocation3 + $0x198] sm:$0xff] %vm2446_vm8, %v2357_v23 }
 0x525   :  { %2882 = vst.msk [vmem:[#allocation3 + $0x190] sm:$0xff] %vm2831_vm9, %v2740_v62  ;;  %1983 = vrot.lane.b32.xlu1 %v11506_v29, %s8379_s20  ;;  %v4110_v29 = vld [vmem:[#allocation2 + $0x31a] sm:$0xff] }
 0x526   :  { %2366 = vrot.lane.b32.xlu0 %v10372_v48, %s8380_s2 }
 0x527   :  { %v2738_v49 = vpop.permute.xlu1 %2737 }
 0x528   :  { %v3121_v32 = vpop.permute.xlu0 %3120  ;;  %2881 = vst.msk [vmem:[#allocation3 + $0x188] sm:$0xff] %vm2831_vm9, %v2738_v49  ;;  %v3344_v49 = vld [vmem:[#allocation2 + $0x348] sm:$0xff] }
 0x529   :  { %3265 = vst.msk [vmem:[#allocation3 + $0x180] sm:$0xff] %vm3216_vm10, %v3121_v32  ;;  %1987 = vrot.lane.b32.xlu1 %v4107_v27, %s8379_s20 }
 0x52a   :  { %2370 = vrot.lane.b32.xlu0 %v10386_v44, %s8380_s2 }
 0x52b   :  { %v2742_v28 = vpop.permute.xlu1 %2741 }
 0x52c   :  { %v3125_v4 = vpop.permute.xlu0 %3124  ;;  %2883 = vst.msk [vmem:[#allocation3 + $0x198] sm:$0xff] %vm2831_vm9, %v2742_v28  ;;  %v2959_v28 = vld [vmem:[#allocation2 + $0x33a] sm:$0xff] }
 0x52d   :  { %3267 = vst.msk [vmem:[#allocation3 + $0x190] sm:$0xff] %vm3216_vm10, %v3125_v4  ;;  %2368 = vrot.lane.b32.xlu1 %v10378_v46, %s8380_s2 }
 0x52e   :  { %2751 = vrot.lane.b32.xlu0 %v11520_v41, %s8381_s3 }
 0x52f   :  { %v3123_v48 = vpop.permute.xlu1 %3122 }
 0x530   :  { %v3507_v61 = vpop.permute.xlu0 %3506  ;;  %3266 = vst.msk [vmem:[#allocation3 + $0x188] sm:$0xff] %vm3216_vm10, %v3123_v48 }
 0x531   :  { %3651 = vst.msk [vmem:[#allocation3 + $0x180] sm:$0xff] %vm3602_vm11, %v3507_v61  ;;  %2372 = vrot.lane.b32.xlu1 %v10388_v9, %s8380_s2  ;;  %v3345_v61 = vld [vmem:[#allocation2 + $0x350] sm:$0xff] }
 0x532   :  { %2755 = vrot.lane.b32.xlu0 %v2569_v12, %s8381_s3 }
 0x533   :  { %v3127_v5 = vpop.permute.xlu1 %3126 }
 0x534   :  { %v3511_v42 = vpop.permute.xlu0 %3510  ;;  %3268 = vst.msk [vmem:[#allocation3 + $0x198] sm:$0xff] %vm3216_vm10, %v3127_v5  ;;  %v3729_v5 = vld [vmem:[#allocation2 + $0x349] sm:$0xff] }
 0x535   :  { %3653 = vst.msk [vmem:[#allocation3 + $0x190] sm:$0xff] %vm3602_vm11, %v3511_v42  ;;  %2753 = vrot.lane.b32.xlu1 %v11532_v24, %s8381_s3 }
 0x536   :  { %3136 = vrot.lane.b32.xlu0 %v4106_v63, %s8382_s25 }
 0x537   :  { %v3509_v46 = vpop.permute.xlu1 %3508 }
 0x538   :  { %v3892_v22 = vpop.permute.xlu0 %3891  ;;  %3652 = vst.msk [vmem:[#allocation3 + $0x188] sm:$0xff] %vm3602_vm11, %v3509_v46 }
 0x539   :  { %4036 = vst.msk [vmem:[#allocation3 + $0x180] sm:$0xff] %vm3987_vm12, %v3892_v22  ;;  %2757 = vrot.lane.b32.xlu1 %v2570_v11, %s8381_s3 }
 0x53a   :  { %3140 = vrot.lane.b32.xlu0 %v11589_v36, %s8382_s25 }
 0x53b   :  { %v3513_v43 = vpop.permute.xlu1 %3512 }
 0x53c   :  { %v3896_v1 = vpop.permute.xlu0 %3895  ;;  %3654 = vst.msk [vmem:[#allocation3 + $0x198] sm:$0xff] %vm3602_vm11, %v3513_v43 }
 0x53d   :  { %4038 = vst.msk [vmem:[#allocation3 + $0x190] sm:$0xff] %vm3987_vm12, %v3896_v1  ;;  %3138 = vrot.lane.b32.xlu1 %v4107_v27, %s8382_s25  ;;  %v2574_v27 = vld [vmem:[#allocation2 + $0x339] sm:$0xff] }
 0x53e   :  { %3522 = vrot.lane.b32.xlu0 %v10386_v44, %s8383_s1 }
 0x53f   :  { %v3894_v54 = vpop.permute.xlu1 %3893 }
 0x540   :  { %v4277_v55 = vpop.permute.xlu0 %4276  ;;  %4037 = vst.msk [vmem:[#allocation3 + $0x188] sm:$0xff] %vm3987_vm12, %v3894_v54  ;;  %v4114_v54 = vld [vmem:[#allocation2 + $0x34a] sm:$0xff] }
 0x541   :  { %4421 = vst.msk [vmem:[#allocation3 + $0x180] sm:$0xff] %vm4372_vm13, %v4277_v55  ;;  %3142 = vrot.lane.b32.xlu1 %v11600_v30, %s8382_s25 }
 0x542   :  { %3526 = vrot.lane.b32.xlu0 %v10391_v15, %s8383_s1 }
 0x543   :  { %v3898_v39 = vpop.permute.xlu1 %3897 }
 0x544   :  { %v1589_v47 = vpop.permute.xlu0 %1588  ;;  %4039 = vst.msk [vmem:[#allocation3 + $0x198] sm:$0xff] %vm3987_vm12, %v3898_v39 }
 0x545   :  { %1729 = vst.msk [vmem:[#allocation3 + $0x1a0] sm:$0xff] %vm1676_vm5, %v1589_v47  ;;  %3524 = vrot.lane.b32.xlu1 %v10388_v9, %s8383_s1 }
 0x546   :  { %3907 = vrot.lane.b32.xlu0 %v2569_v12, %s8384_s26 }
 0x547   :  { %v4279_v44 = vpop.permute.xlu1 %4278 }
 0x548   :  { %v4281_v31 = vpop.permute.xlu0 %4280  ;;  %4422 = vst.msk [vmem:[#allocation3 + $0x188] sm:$0xff] %vm4372_vm13, %v4279_v44  ;;  %v4485_v21 = vld [vmem:[#allocation3 + $0x180] sm:$0xff]  ;;  %v4115_v44 = vld [vmem:[#allocation2 + $0x352] sm:$0xff] }
 0x549   :  { %4423 = vst.msk [vmem:[#allocation3 + $0x190] sm:$0xff] %vm4372_vm13, %v4281_v31  ;;  %3528 = vrot.lane.b32.xlu1 %v10397_v0, %s8383_s1 }
 0x54a   :  { %3911 = vrot.lane.b32.xlu0 %v11614_v38, %s8384_s26 }
 0x54b   :  { %v1591_v19 = vpop.permute.xlu1 %1590 }
 0x54c   :  { %v1593_v25 = vpop.permute.xlu0 %1592  ;;  %1730 = vst.msk [vmem:[#allocation3 + $0x1a8] sm:$0xff] %vm1676_vm5, %v1591_v19 }
 0x54d   :  { %1731 = vst.msk [vmem:[#allocation3 + $0x1b0] sm:$0xff] %vm1676_vm5, %v1593_v25  ;;  %3909 = vrot.lane.b32.xlu1 %v2570_v11, %s8384_s26 }
 0x54e   :  { %4292 = vrot.lane.b32.xlu0 %v11589_v36, %s8385_s16 }
 0x54f   :  { %v4283_v9 = vpop.permute.xlu1 %4282  ;;  %v4486_v52 = vld [vmem:[#allocation3 + $0x188] sm:$0xff] }
 0x550   :  { %v1974_v8 = vpop.permute.xlu0 %1973  ;;  %4424 = vst.msk [vmem:[#allocation3 + $0x198] sm:$0xff] %vm4372_vm13, %v4283_v9  ;;  %v4525_v3 = vpack.c.bf16 %v4486_v52, %v4485_v21  ;;  %v4487_v34 = vld [vmem:[#allocation3 + $0x190] sm:$0xff] }
 0x551   :  { %2114 = vst.msk [vmem:[#allocation3 + $0x1a0] sm:$0xff] %vm2061_vm6, %v1974_v8  ;;  %3913 = vrot.lane.b32.xlu1 %v11626_v20, %s8384_s26 }
 0x552   :  { %1604 = vrot.lane.b32.xlu0 %v2569_v12, %s8378_s0  ;;  %8176 = vmatprep.mubr.msk.bf16.mxu1 %vm4569_vm14, %v4525_v3 }
 0x553   :  { %v1595_v57 = vpop.permute.xlu1 %1594 }
 0x554   :  { %v1978_v2 = vpop.permute.xlu0 %1977  ;;  %1732 = vst.msk [vmem:[#allocation3 + $0x1b8] sm:$0xff] %vm1676_vm5, %v1595_v57 }
 0x555   :  { %2116 = vst.msk [vmem:[#allocation3 + $0x1b0] sm:$0xff] %vm2061_vm6, %v1978_v2  ;;  %4294 = vrot.lane.b32.xlu1 %v11600_v30, %s8385_s16 }
 0x556   :  { %4296 = vrot.lane.b32.xlu0 %v4110_v29, %s8385_s16 }
 0x557   :  { %v1976_v60 = vpop.permute.xlu1 %1975  ;;  %v4488_v33 = vld [vmem:[#allocation3 + $0x198] sm:$0xff] }
 0x558   :  { %v2359_v45 = vpop.permute.xlu0 %2358  ;;  %2115 = vst.msk [vmem:[#allocation3 + $0x1a8] sm:$0xff] %vm2061_vm6, %v1976_v60  ;;  %v4526_v41 = vpack.c.bf16 %v4488_v33, %v4487_v34 }
 0x559   :  { %2499 = vst.msk [vmem:[#allocation3 + $0x1a0] sm:$0xff] %vm2446_vm8, %v2359_v45  ;;  %1606 = vrot.lane.b32.xlu1 %v2570_v11, %s8378_s0  ;;  %v3730_v11 = vld [vmem:[#allocation2 + $0x351] sm:$0xff] }
 0x55a   :  { %1608 = vrot.lane.b32.xlu0 %v11614_v38, %s8378_s0  ;;  %8177 = vmatmul.mubr.msk.bf16.gmra.mxu1 %vm4569_vm14, %v4526_v41 }
 0x55b   :  { %v1980_v14 = vpop.permute.xlu1 %1979 }
 0x55c   :  { %v2363_v51 = vpop.permute.xlu0 %2362  ;;  %2117 = vst.msk [vmem:[#allocation3 + $0x1b8] sm:$0xff] %vm2061_vm6, %v1980_v14 }
 0x55d   :  { %2501 = vst.msk [vmem:[#allocation3 + $0x1b0] sm:$0xff] %vm2446_vm8, %v2363_v51  ;;  %4298 = vrot.lane.b32.xlu1 %v4111_v53, %s8385_s16 }
 0x55e   :  { %1989 = vrot.lane.b32.xlu0 %v11589_v36, %s8379_s20 }
 0x55f   :  { %v2361_v6 = vpop.permute.xlu1 %2360 }
 0x560   :  { %v2744_v16 = vpop.permute.xlu0 %2743  ;;  %2500 = vst.msk [vmem:[#allocation3 + $0x1a8] sm:$0xff] %vm2446_vm8, %v2361_v6 }
 0x561   :  { %2884 = vst.msk [vmem:[#allocation3 + $0x1a0] sm:$0xff] %vm2831_vm9, %v2744_v16  ;;  %1610 = vrot.lane.b32.xlu1 %v11626_v20, %s8378_s0 }
 0x562   :  { %1993 = vrot.lane.b32.xlu0 %v4110_v29, %s8379_s20 }
 0x563   :  { %v2365_v59 = vpop.permute.xlu1 %2364 }
 0x564   :  { %v2748_v24 = vpop.permute.xlu0 %2747  ;;  %2502 = vst.msk [vmem:[#allocation3 + $0x1b8] sm:$0xff] %vm2446_vm8, %v2365_v59 }
 0x565   :  { %2886 = vst.msk [vmem:[#allocation3 + $0x1b0] sm:$0xff] %vm2831_vm9, %v2748_v24  ;;  %1991 = vrot.lane.b32.xlu1 %v11600_v30, %s8379_s20 }
 0x566   :  { %2374 = vrot.lane.b32.xlu0 %v10391_v15, %s8380_s2 }
 0x567   :  { %v2746_v13 = vpop.permute.xlu1 %2745 }
 0x568   :  { %v3129_v56 = vpop.permute.xlu0 %3128  ;;  %2885 = vst.msk [vmem:[#allocation3 + $0x1a8] sm:$0xff] %vm2831_vm9, %v2746_v13 }
 0x569   :  { %3269 = vst.msk [vmem:[#allocation3 + $0x1a0] sm:$0xff] %vm3216_vm10, %v3129_v56  ;;  %1995 = vrot.lane.b32.xlu1 %v4111_v53, %s8379_s20 }
 0x56a   :  { %2378 = vrot.lane.b32.xlu0 %v2188_v17, %s8380_s2 }
 0x56b   :  { %v2750_v63 = vpop.permute.xlu1 %2749 }
 0x56c   :  { %v3133_v50 = vpop.permute.xlu0 %3132  ;;  %2887 = vst.msk [vmem:[#allocation3 + $0x1b8] sm:$0xff] %vm2831_vm9, %v2750_v63 }
 0x56d   :  { %3271 = vst.msk [vmem:[#allocation3 + $0x1b0] sm:$0xff] %vm3216_vm10, %v3133_v50  ;;  %2376 = vrot.lane.b32.xlu1 %v10397_v0, %s8380_s2 }
 0x56e   :  { %2759 = vrot.lane.b32.xlu0 %v11614_v38, %s8381_s3 }
 0x56f   :  { %v3131_v15 = vpop.permute.xlu1 %3130 }
 0x570   :  { %v3515_v7 = vpop.permute.xlu0 %3514  ;;  %3270 = vst.msk [vmem:[#allocation3 + $0x1a8] sm:$0xff] %vm3216_vm10, %v3131_v15 }
 0x571   :  { %3655 = vst.msk [vmem:[#allocation3 + $0x1a0] sm:$0xff] %vm3602_vm11, %v3515_v7  ;;  %2380 = vrot.lane.b32.xlu1 %v2189_v37, %s8380_s2 }
 0x572   :  { %2763 = vrot.lane.b32.xlu0 %v2573_v18, %s8381_s3 }
 0x573   :  { %v3135_v26 = vpop.permute.xlu1 %3134 }
 0x574   :  { %v3519_v58 = vpop.permute.xlu0 %3518  ;;  %3272 = vst.msk [vmem:[#allocation3 + $0x1b8] sm:$0xff] %vm3216_vm10, %v3135_v26 }
 0x575   :  { %3657 = vst.msk [vmem:[#allocation3 + $0x1b0] sm:$0xff] %vm3602_vm11, %v3519_v58  ;;  %2761 = vrot.lane.b32.xlu1 %v11626_v20, %s8381_s3 }
 0x576   :  { %3144 = vrot.lane.b32.xlu0 %v4110_v29, %s8382_s25 }
 0x577   :  { %v3517_v0 = vpop.permute.xlu1 %3516 }
 0x578   :  { %v3900_v40 = vpop.permute.xlu0 %3899  ;;  %3656 = vst.msk [vmem:[#allocation3 + $0x1a8] sm:$0xff] %vm3602_vm11, %v3517_v0 }
 0x579   :  { %4040 = vst.msk [vmem:[#allocation3 + $0x1a0] sm:$0xff] %vm3987_vm12, %v3900_v40  ;;  %2765 = vrot.lane.b32.xlu1 %v2574_v27, %s8381_s3 }
 0x57a   :  { %3148 = vrot.lane.b32.xlu0 %v2958_v10, %s8382_s25 }
 0x57b   :  { %v3521_v35 = vpop.permute.xlu1 %3520 }
 0x57c   :  { %v3904_v23 = vpop.permute.xlu0 %3903  ;;  %3658 = vst.msk [vmem:[#allocation3 + $0x1b8] sm:$0xff] %vm3602_vm11, %v3521_v35 }
 0x57d   :  { %4042 = vst.msk [vmem:[#allocation3 + $0x1b0] sm:$0xff] %vm3987_vm12, %v3904_v23  ;;  %3146 = vrot.lane.b32.xlu1 %v4111_v53, %s8382_s25 }
 0x57e   :  { %3530 = vrot.lane.b32.xlu0 %v2188_v17, %s8383_s1 }
 0x57f   :  { %v3902_v62 = vpop.permute.xlu1 %3901 }
 0x580   :  { %v4285_v32 = vpop.permute.xlu0 %4284  ;;  %4041 = vst.msk [vmem:[#allocation3 + $0x1a8] sm:$0xff] %vm3987_vm12, %v3902_v62 }
 0x581   :  { %4425 = vst.msk [vmem:[#allocation3 + $0x1a0] sm:$0xff] %vm4372_vm13, %v4285_v32  ;;  %3150 = vrot.lane.b32.xlu1 %v2959_v28, %s8382_s25 }
 0x582   :  { %3534 = vrot.lane.b32.xlu0 %v3344_v49, %s8383_s1 }
 0x583   :  { %v3906_v4 = vpop.permute.xlu1 %3905 }
 0x584   :  { %v1597_v48 = vpop.permute.xlu0 %1596  ;;  %4043 = vst.msk [vmem:[#allocation3 + $0x1b8] sm:$0xff] %vm3987_vm12, %v3906_v4 }
 0x585   :  { %1733 = vst.msk [vmem:[#allocation3 + $0x1c0] sm:$0xff] %vm1676_vm5, %v1597_v48  ;;  %3532 = vrot.lane.b32.xlu1 %v2189_v37, %s8383_s1 }
 0x586   :  { %3915 = vrot.lane.b32.xlu0 %v2573_v18, %s8384_s26 }
 0x587   :  { %v4287_v12 = vpop.permute.xlu1 %4286 }
 0x588   :  { %v4289_v42 = vpop.permute.xlu0 %4288  ;;  %4426 = vst.msk [vmem:[#allocation3 + $0x1a8] sm:$0xff] %vm4372_vm13, %v4287_v12  ;;  %v4489_v43 = vld [vmem:[#allocation3 + $0x1a0] sm:$0xff] }
 0x589   :  { %4427 = vst.msk [vmem:[#allocation3 + $0x1b0] sm:$0xff] %vm4372_vm13, %v4289_v42  ;;  %3536 = vrot.lane.b32.xlu1 %v3345_v61, %s8383_s1 }
 0x58a   :  { %3919 = vrot.lane.b32.xlu0 %v3729_v5, %s8384_s26 }
 0x58b   :  { %v1599_v46 = vpop.permute.xlu1 %1598 }
 0x58c   :  { %v1601_v22 = vpop.permute.xlu0 %1600  ;;  %1734 = vst.msk [vmem:[#allocation3 + $0x1c8] sm:$0xff] %vm1676_vm5, %v1599_v46 }
 0x58d   :  { %1735 = vst.msk [vmem:[#allocation3 + $0x1d0] sm:$0xff] %vm1676_vm5, %v1601_v22  ;;  %3917 = vrot.lane.b32.xlu1 %v2574_v27, %s8384_s26 }
 0x58e   :  { %4300 = vrot.lane.b32.xlu0 %v2958_v10, %s8385_s16 }
 0x58f   :  { %v4291_v36 = vpop.permute.xlu1 %4290  ;;  %v4490_v1 = vld [vmem:[#allocation3 + $0x1a8] sm:$0xff] }
 0x590   :  { %v1982_v55 = vpop.permute.xlu0 %1981  ;;  %4428 = vst.msk [vmem:[#allocation3 + $0x1b8] sm:$0xff] %vm4372_vm13, %v4291_v36  ;;  %v4527_v30 = vpack.c.bf16 %v4490_v1, %v4489_v43  ;;  %v4491_v38 = vld [vmem:[#allocation3 + $0x1b0] sm:$0xff] }
 0x591   :  { %2118 = vst.msk [vmem:[#allocation3 + $0x1c0] sm:$0xff] %vm2061_vm6, %v1982_v55  ;;  %3921 = vrot.lane.b32.xlu1 %v3730_v11, %s8384_s26 }
 0x592   :  { %8180 = vmatprep.mubr.msk.bf16.mxu1 %vm4569_vm14, %v4527_v30  ;;  %4304 = vrot.lane.b32.xlu0 %v4114_v54, %s8385_s16 }
 0x593   :  { %v1603_v39 = vpop.permute.xlu1 %1602 }
 0x594   :  { %v1986_v47 = vpop.permute.xlu0 %1985  ;;  %1736 = vst.msk [vmem:[#allocation3 + $0x1d8] sm:$0xff] %vm1676_vm5, %v1603_v39 }
 0x595   :  { %2120 = vst.msk [vmem:[#allocation3 + $0x1d0] sm:$0xff] %vm2061_vm6, %v1986_v47  ;;  %4302 = vrot.lane.b32.xlu1 %v2959_v28, %s8385_s16 }
 0x597   :  { %v1984_v31 = vpop.permute.xlu1 %1983  ;;  %v4492_v19 = vld [vmem:[#allocation3 + $0x1b8] sm:$0xff] }
 0x598   :  { %v2367_v25 = vpop.permute.xlu0 %2366  ;;  %2119 = vst.msk [vmem:[#allocation3 + $0x1c8] sm:$0xff] %vm2061_vm6, %v1984_v31  ;;  %v4528_v9 = vpack.c.bf16 %v4492_v19, %v4491_v38  ;;  %v11771_v19 = vpop.f32.mrf.mxu1 }
 0x599   :  { %2503 = vst.msk [vmem:[#allocation3 + $0x1c0] sm:$0xff] %vm2446_vm8, %v2367_v25  ;;  %4306 = vrot.lane.b32.xlu1 %v4115_v44, %s8385_s16 }
 0x59a   :  { %8181 = vmatmul.mubr.msk.bf16.gmra.mxu1 %vm4569_vm14, %v4528_v9  ;;  %v11774_v9 = vpop.f32.mrf.mxu1 }
 0x59b   :  { %v1988_v21 = vpop.permute.xlu1 %1987 }
 0x59c   :  { %v2371_v52 = vpop.permute.xlu0 %2370  ;;  %2121 = vst.msk [vmem:[#allocation3 + $0x1d8] sm:$0xff] %vm2061_vm6, %v1988_v21 }
 0x59d   :  { %2505 = vst.msk [vmem:[#allocation3 + $0x1d0] sm:$0xff] %vm2446_vm8, %v2371_v52 }
 0x59f   :  { %v2369_v8 = vpop.permute.xlu1 %2368 }
 0x5a0   :  { %v2752_v20 = vpop.permute.xlu0 %2751  ;;  %2504 = vst.msk [vmem:[#allocation3 + $0x1c8] sm:$0xff] %vm2446_vm8, %v2369_v8  ;;  %v11777_v8 = vpop.f32.mrf.mxu1 }
 0x5a1   :  { %2888 = vst.msk [vmem:[#allocation3 + $0x1c0] sm:$0xff] %vm2831_vm9, %v2752_v20 }
 0x5a3   :  { %v2373_v3 = vpop.permute.xlu1 %2372 }
 0x5a4   :  { %v2756_v57 = vpop.permute.xlu0 %2755  ;;  %2506 = vst.msk [vmem:[#allocation3 + $0x1d8] sm:$0xff] %vm2446_vm8, %v2373_v3 }
 0x5a5   :  { %2890 = vst.msk [vmem:[#allocation3 + $0x1d0] sm:$0xff] %vm2831_vm9, %v2756_v57 }
 0x5a7   :  { %v2754_v2 = vpop.permute.xlu1 %2753 }
 0x5a8   :  { %v3137_v29 = vpop.permute.xlu0 %3136  ;;  %2889 = vst.msk [vmem:[#allocation3 + $0x1c8] sm:$0xff] %vm2831_vm9, %v2754_v2  ;;  %v11780_v2 = vpop.f32.mrf.mxu1 }
 0x5a9   :  { %3273 = vst.msk [vmem:[#allocation3 + $0x1c0] sm:$0xff] %vm3216_vm10, %v3137_v29 }
 0x5ab   :  { %v2758_v60 = vpop.permute.xlu1 %2757 }
 0x5ac   :  { %v3141_v34 = vpop.permute.xlu0 %3140  ;;  %2891 = vst.msk [vmem:[#allocation3 + $0x1d8] sm:$0xff] %vm2831_vm9, %v2758_v60  ;;  %v11782_v60 = vpop.f32.mrf.mxu0 }
 0x5ad   :  { %3275 = vst.msk [vmem:[#allocation3 + $0x1d0] sm:$0xff] %vm3216_vm10, %v3141_v34  ;;  %v11784_v34 = vpop.f32.mrf.mxu1 }
 0x5ae   :  { %15689 = vst [vmem:[#allocation54_spill] sm:$0xff] %v11784_v34 }
 0x5af   :  { %v3139_v33 = vpop.permute.xlu1 %3138 }
 0x5b0   :  { %v3523_v45 = vpop.permute.xlu0 %3522  ;;  %3274 = vst.msk [vmem:[#allocation3 + $0x1c8] sm:$0xff] %vm3216_vm10, %v3139_v33  ;;  %v11787_v33 = vpop.f32.mrf.mxu0 }
 0x5b1   :  { %3659 = vst.msk [vmem:[#allocation3 + $0x1c0] sm:$0xff] %vm3602_vm11, %v3523_v45  ;;  %v11789_v45 = vpop.f32.mrf.mxu1 }
 0x5b3   :  { %v3143_v41 = vpop.permute.xlu1 %3142 }
 0x5b4   :  { %v3527_v14 = vpop.permute.xlu0 %3526  ;;  %3276 = vst.msk [vmem:[#allocation3 + $0x1d8] sm:$0xff] %vm3216_vm10, %v3143_v41  ;;  %v11791_v41 = vpop.f32.mrf.mxu0 }
 0x5b5   :  { %3661 = vst.msk [vmem:[#allocation3 + $0x1d0] sm:$0xff] %vm3602_vm11, %v3527_v14  ;;  %v11793_v14 = vpop.f32.mrf.mxu1 }
 0x5b6   :  { %15690 = vst [vmem:[#allocation56_spill] sm:$0xff] %v11793_v14 }
 0x5b7   :  { %v3525_v51 = vpop.permute.xlu1 %3524 }
 0x5b8   :  { %v3908_v53 = vpop.permute.xlu0 %3907  ;;  %3660 = vst.msk [vmem:[#allocation3 + $0x1c8] sm:$0xff] %vm3602_vm11, %v3525_v51  ;;  %v11795_v51 = vpop.f32.mrf.mxu0 }
 0x5b9   :  { %4044 = vst.msk [vmem:[#allocation3 + $0x1c0] sm:$0xff] %vm3987_vm12, %v3908_v53  ;;  %v11797_v53 = vpop.f32.mrf.mxu1 }
 0x5bb   :  { %v3529_v6 = vpop.permute.xlu1 %3528 }
 0x5bc   :  { %v3912_v16 = vpop.permute.xlu0 %3911  ;;  %3662 = vst.msk [vmem:[#allocation3 + $0x1d8] sm:$0xff] %vm3602_vm11, %v3529_v6  ;;  %v11799_v6 = vpop.f32.mrf.mxu1 }
 0x5bd   :  { %4046 = vst.msk [vmem:[#allocation3 + $0x1d0] sm:$0xff] %vm3987_vm12, %v3912_v16  ;;  %15691 = vst [vmem:[#allocation53_spill] sm:$0xff] %v11799_v6  ;;  %v5094_v16 = vmul.f32 %v11795_v51, %v11795_v51 }
 0x5bf   :  { %v3910_v59 = vpop.permute.xlu1 %3909 }
 0x5c0   :  { %v4293_v24 = vpop.permute.xlu0 %4292  ;;  %4045 = vst.msk [vmem:[#allocation3 + $0x1c8] sm:$0xff] %vm3987_vm12, %v3910_v59  ;;  %v5093_v59 = vmul.f32 %v11787_v33, %v11787_v33 }
 0x5c1   :  { %4429 = vst.msk [vmem:[#allocation3 + $0x1c0] sm:$0xff] %vm4372_vm13, %v4293_v24  ;;  %v4960_v24 = vsel %vm538_vm2, %v11795_v51, 0.0 }
 0x5c3   :  { %v3914_v13 = vpop.permute.xlu1 %3913 }
 0x5c4   :  { %v1605_v56 = vpop.permute.xlu0 %1604  ;;  %4047 = vst.msk [vmem:[#allocation3 + $0x1d8] sm:$0xff] %vm3987_vm12, %v3914_v13  ;;  %v11807_v13 = vpop.f32.mrf.mxu1 }
 0x5c5   :  { %1737 = vst.msk [vmem:[#allocation3 + $0x1e0] sm:$0xff] %vm1676_vm5, %v1605_v56  ;;  %15692 = vst [vmem:[#allocation55_spill] sm:$0xff] %v11807_v13  ;;  %v4959_v56 = vsel %vm538_vm2, %v11787_v33, 0.0 }
 0x5c7   :  { %v4295_v17 = vpop.permute.xlu1 %4294 }
 0x5c8   :  { %v4297_v63 = vpop.permute.xlu0 %4296  ;;  %4430 = vst.msk [vmem:[#allocation3 + $0x1c8] sm:$0xff] %vm4372_vm13, %v4295_v17  ;;  %v4493_v37 = vld [vmem:[#allocation3 + $0x1c0] sm:$0xff]  ;;  %v5158_v17 = vsel %vm538_vm2, %v5094_v16, 0.0 }
 0x5c9   :  { %4431 = vst.msk [vmem:[#allocation3 + $0x1d0] sm:$0xff] %vm4372_vm13, %v4297_v63  ;;  %v4961_v63 = vadd.f32 %v4960_v24, %v4959_v56 }
 0x5cb   :  { %v1607_v50 = vpop.permute.xlu1 %1606 }
 0x5cc   :  { %v1609_v15 = vpop.permute.xlu0 %1608  ;;  %1738 = vst.msk [vmem:[#allocation3 + $0x1e8] sm:$0xff] %vm1676_vm5, %v1607_v50  ;;  %v5095_v50 = vmul.f32 %v11782_v60, %v11782_v60 }
 0x5cd   :  { %1739 = vst.msk [vmem:[#allocation3 + $0x1f0] sm:$0xff] %vm1676_vm5, %v1609_v15  ;;  %v5157_v15 = vsel %vm538_vm2, %v5093_v59, 0.0 }
 0x5cf   :  { %v4299_v7 = vpop.permute.xlu1 %4298  ;;  %v4494_v18 = vld [vmem:[#allocation3 + $0x1c8] sm:$0xff] }
 0x5d0   :  { %v1990_v26 = vpop.permute.xlu0 %1989  ;;  %4432 = vst.msk [vmem:[#allocation3 + $0x1d8] sm:$0xff] %vm4372_vm13, %v4299_v7  ;;  %v4529_v58 = vpack.c.bf16 %v4494_v18, %v4493_v37  ;;  %v4495_v10 = vld [vmem:[#allocation3 + $0x1d0] sm:$0xff]  ;;  %v5159_v7 = vadd.f32 %v5158_v17, %v5157_v15  ;;  %v11815_v37 = vpop.f32.mrf.mxu1  ;;  %v4962_v18 = vsel %vm538_vm2, %v11782_v60, 0.0  ;;  %v5103_v17 = vmul.f32 %v11784_v34, %v11784_v34 }
 0x5d1   :  { %2122 = vst.msk [vmem:[#allocation3 + $0x1e0] sm:$0xff] %vm2061_vm6, %v1990_v26  ;;  %15693 = vst [vmem:[#allocation58_spill] sm:$0xff] %v11815_v37  ;;  %v4963_v26 = vadd.f32 %v4962_v18, %v4961_v63  ;;  %v4978_v15 = vsel %vm538_vm2, %v11784_v34, 0.0 }
 0x5d2   :  { %8184 = vmatprep.mubr.msk.bf16.mxu1 %vm4569_vm14, %v4529_v58  ;;  %v5160_v58 = vsel %vm538_vm2, %v5095_v50, 0.0  ;;  %v5176_v18 = vsel %vm538_vm2, %v5103_v17, 0.0 }
 0x5d3   :  { %v1611_v0 = vpop.permute.xlu1 %1610 }
 0x5d4   :  { %v1994_v40 = vpop.permute.xlu0 %1993  ;;  %1740 = vst.msk [vmem:[#allocation3 + $0x1f8] sm:$0xff] %vm1676_vm5, %v1611_v0  ;;  %v5096_v0 = vmul.f32 %v11791_v41, %v11791_v41 }
 0x5d5   :  { %2124 = vst.msk [vmem:[#allocation3 + $0x1f0] sm:$0xff] %vm2061_vm6, %v1994_v40  ;;  %v5097_v40 = vmul.f32 %v11774_v9, %v11774_v9 }
 0x5d7   :  { %v1992_v27 = vpop.permute.xlu1 %1991  ;;  %v4496_v35 = vld [vmem:[#allocation3 + $0x1d8] sm:$0xff] }
 0x5d8   :  { %v2375_v23 = vpop.permute.xlu0 %2374  ;;  %2123 = vst.msk [vmem:[#allocation3 + $0x1e8] sm:$0xff] %vm2061_vm6, %v1992_v27  ;;  %v4530_v62 = vpack.c.bf16 %v4496_v35, %v4495_v10  ;;  %v5161_v27 = vadd.f32 %v5160_v58, %v5159_v7  ;;  %v11824_v10 = vpop.f32.mrf.mxu1  ;;  %v4964_v35 = vsel %vm538_vm2, %v11791_v41, 0.0  ;;  %v5105_v58 = vmul.f32 %v11807_v13, %v11807_v13 }
 0x5d9   :  { %2507 = vst.msk [vmem:[#allocation3 + $0x1e0] sm:$0xff] %vm2446_vm8, %v2375_v23  ;;  %15694 = vst [vmem:[#allocation57_spill] sm:$0xff] %v11824_v10  ;;  %v4966_v23 = vsel %vm538_vm2, %v11774_v9, 0.0 }
 0x5da   :  { %8185 = vmatmul.mubr.msk.bf16.gmra.mxu1 %vm4569_vm14, %v4530_v62  ;;  %v5098_v62 = vmul.f32 %v11780_v2, %v11780_v2 }
 0x5db   :  { %v1996_v49 = vpop.permute.xlu1 %1995 }
 0x5dc   :  { %v2379_v32 = vpop.permute.xlu0 %2378  ;;  %2125 = vst.msk [vmem:[#allocation3 + $0x1f8] sm:$0xff] %vm2061_vm6, %v1996_v49  ;;  %v4965_v49 = vadd.f32 %v4964_v35, %v4963_v26  ;;  %v5104_v26 = vmul.f32 %v11793_v14, %v11793_v14  ;;  %v4982_v35 = vsel %vm538_vm2, %v11807_v13, 0.0 }
 0x5dd   :  { %2509 = vst.msk [vmem:[#allocation3 + $0x1f0] sm:$0xff] %vm2446_vm8, %v2379_v32  ;;  %v11832_v32 = vpop.f32.mrf.mxu1 }
 0x5de   :  { %15695 = vst [vmem:[#allocation59_spill] sm:$0xff] %v11832_v32 }
 0x5df   :  { %v2377_v28 = vpop.permute.xlu1 %2376 }
 0x5e0   :  { %v2760_v4 = vpop.permute.xlu0 %2759  ;;  %2508 = vst.msk [vmem:[#allocation3 + $0x1e8] sm:$0xff] %vm2446_vm8, %v2377_v28  ;;  %v5162_v28 = vsel %vm538_vm2, %v5096_v0, 0.0 }
 0x5e1   :  { %2892 = vst.msk [vmem:[#allocation3 + $0x1e0] sm:$0xff] %vm2831_vm9, %v2760_v4  ;;  %v5164_v4 = vsel %vm538_vm2, %v5097_v40, 0.0 }
 0x5e3   :  { %v2381_v48 = vpop.permute.xlu1 %2380 }
 0x5e4   :  { %v2764_v61 = vpop.permute.xlu0 %2763  ;;  %2510 = vst.msk [vmem:[#allocation3 + $0x1f8] sm:$0xff] %vm2446_vm8, %v2381_v48  ;;  %v4968_v48 = vsel %vm538_vm2, %v11780_v2, 0.0 }
 0x5e5   :  { %2894 = vst.msk [vmem:[#allocation3 + $0x1f0] sm:$0xff] %vm2831_vm9, %v2764_v61  ;;  %v4967_v61 = vadd.f32 %v4966_v23, %v4965_v49  ;;  %v5106_v23 = vmul.f32 %v11824_v10, %v11824_v10  ;;  %v5178_v49 = vsel %vm538_vm2, %v5104_v26, 0.0 }
 0x5e7   :  { %v2762_v12 = vpop.permute.xlu1 %2761 }
 0x5e8   :  { %v3145_v5 = vpop.permute.xlu0 %3144  ;;  %2893 = vst.msk [vmem:[#allocation3 + $0x1e8] sm:$0xff] %vm2831_vm9, %v2762_v12  ;;  %v5163_v12 = vadd.f32 %v5162_v28, %v5161_v27  ;;  %v4980_v27 = vsel %vm538_vm2, %v11793_v14, 0.0  ;;  %v5180_v28 = vsel %vm538_vm2, %v5105_v58, 0.0 }
 0x5e9   :  { %3277 = vst.msk [vmem:[#allocation3 + $0x1e0] sm:$0xff] %vm3216_vm10, %v3145_v5  ;;  %v5166_v5 = vsel %vm538_vm2, %v5098_v62, 0.0 }
 0x5eb   :  { %v2766_v42 = vpop.permute.xlu1 %2765 }
 0x5ec   :  { %v3149_v46 = vpop.permute.xlu0 %3148  ;;  %2895 = vst.msk [vmem:[#allocation3 + $0x1f8] sm:$0xff] %vm2831_vm9, %v2766_v42  ;;  %v4969_v42 = vadd.f32 %v4968_v48, %v4967_v61 }
 0x5ed   :  { %3279 = vst.msk [vmem:[#allocation3 + $0x1f0] sm:$0xff] %vm3216_vm10, %v3149_v46  ;;  %v5165_v46 = vadd.f32 %v5164_v4, %v5163_v12  ;;  %v4984_v4 = vsel %vm538_vm2, %v11824_v10, 0.0 }
 0x5ef   :  { %v3147_v22 = vpop.permute.xlu1 %3146 }
 0x5f0   :  { %v3531_v11 = vpop.permute.xlu0 %3530  ;;  %3278 = vst.msk [vmem:[#allocation3 + $0x1e8] sm:$0xff] %vm3216_vm10, %v3147_v22  ;;  %v11839_v22 = vpop.f32.mrf.mxu1 }
 0x5f1   :  { %3663 = vst.msk [vmem:[#allocation3 + $0x1e0] sm:$0xff] %vm3602_vm11, %v3531_v11  ;;  %15696 = vst [vmem:[#allocation36_spill] sm:$0xff] %v11839_v22  ;;  %v5099_v11 = vmul.f32 %v11771_v19, %v11771_v19 }
 0x5f3   :  { %v3151_v36 = vpop.permute.xlu1 %3150 }
 0x5f4   :  { %v3535_v43 = vpop.permute.xlu0 %3534  ;;  %3280 = vst.msk [vmem:[#allocation3 + $0x1f8] sm:$0xff] %vm3216_vm10, %v3151_v36  ;;  %v5167_v36 = vadd.f32 %v5166_v5, %v5165_v46  ;;  %v5182_v5 = vsel %vm538_vm2, %v5106_v23, 0.0 }
 0x5f5   :  { %3665 = vst.msk [vmem:[#allocation3 + $0x1f0] sm:$0xff] %vm3602_vm11, %v3535_v43  ;;  %v4970_v43 = vsel %vm538_vm2, %v11771_v19, 0.0 }
 0x5f7   :  { %v3533_v1 = vpop.permute.xlu1 %3532 }
 0x5f8   :  { %v3916_v54 = vpop.permute.xlu0 %3915  ;;  %3664 = vst.msk [vmem:[#allocation3 + $0x1e8] sm:$0xff] %vm3602_vm11, %v3533_v1  ;;  %v4971_v1 = vadd.f32 %v4970_v43, %v4969_v42 }
 0x5f9   :  { %4048 = vst.msk [vmem:[#allocation3 + $0x1e0] sm:$0xff] %vm3987_vm12, %v3916_v54  ;;  %v11845_v54 = vpop.f32.mrf.mxu1 }
 0x5fa   :  { %15697 = vst [vmem:[#allocation38_spill] sm:$0xff] %v11845_v54  ;;  %v5112_v23 = vmul.f32 %v11845_v54, %v11845_v54 }
 0x5fb   :  { %v3537_v55 = vpop.permute.xlu1 %3536 }
 0x5fc   :  { %v3920_v30 = vpop.permute.xlu0 %3919  ;;  %3666 = vst.msk [vmem:[#allocation3 + $0x1f8] sm:$0xff] %vm3602_vm11, %v3537_v55  ;;  %v5168_v55 = vsel %vm538_vm2, %v5099_v11, 0.0 }
 0x5fd   :  { %4050 = vst.msk [vmem:[#allocation3 + $0x1f0] sm:$0xff] %vm3987_vm12, %v3920_v30  ;;  %v5100_v30 = vmul.f32 %v11777_v8, %v11777_v8 }
 0x5ff   :  { %v3918_v39 = vpop.permute.xlu1 %3917 }
 0x600   :  { %v4301_v47 = vpop.permute.xlu0 %4300  ;;  %4049 = vst.msk [vmem:[#allocation3 + $0x1e8] sm:$0xff] %vm3987_vm12, %v3918_v39  ;;  %v5101_v39 = vmul.f32 %v11789_v45, %v11789_v45 }
 0x601   :  { %4433 = vst.msk [vmem:[#allocation3 + $0x1e0] sm:$0xff] %vm4372_vm13, %v4301_v47  ;;  %v5169_v47 = vadd.f32 %v5168_v55, %v5167_v36  ;;  %v5107_v36 = vmul.f32 %v11799_v6, %v11799_v6 }
 0x603   :  { %v3922_v44 = vpop.permute.xlu1 %3921 }
 0x604   :  { %4051 = vst.msk [vmem:[#allocation3 + $0x1f8] sm:$0xff] %vm3987_vm12, %v3922_v44  ;;  %v4305_v31 = vpop.permute.xlu0 %4304  ;;  %v4972_v44 = vsel %vm538_vm2, %v11777_v8, 0.0 }
 0x605   :  { %4435 = vst.msk [vmem:[#allocation3 + $0x1f0] sm:$0xff] %vm4372_vm13, %v4305_v31  ;;  %v4974_v31 = vsel %vm538_vm2, %v11789_v45, 0.0 }
 0x607   :  { %v4303_v38 = vpop.permute.xlu1 %4302 }
 0x608   :  { %4434 = vst.msk [vmem:[#allocation3 + $0x1e8] sm:$0xff] %vm4372_vm13, %v4303_v38  ;;  %v4497_v21 = vld [vmem:[#allocation3 + $0x1e0] sm:$0xff]  ;;  %v5102_v38 = vmul.f32 %v11797_v53, %v11797_v53 }
 0x60a   :  { %v5174_v59 = vsel %vm538_vm2, %v5102_v38, 0.0  ;;  %v4988_v38 = vsel %vm538_vm2, %v11815_v37, 0.0 }
 0x60b   :  { %v4307_v25 = vpop.permute.xlu1 %4306 }
 0x60c   :  { %4436 = vst.msk [vmem:[#allocation3 + $0x1f8] sm:$0xff] %vm4372_vm13, %v4307_v25  ;;  %v4499_v3 = vld [vmem:[#allocation3 + $0x1f0] sm:$0xff]  ;;  %v4973_v25 = vadd.f32 %v4972_v44, %v4971_v1  ;;  %v4986_v1 = vsel %vm538_vm2, %v11799_v6, 0.0  ;;  %v5109_v44 = vmul.f32 %v11839_v22, %v11839_v22 }
 0x60f   :  { %v4498_v52 = vld [vmem:[#allocation3 + $0x1e8] sm:$0xff] }
 0x610   :  { %v4531_v20 = vpack.c.bf16 %v4498_v52, %v4497_v21  ;;  %v11858_v21 = vpop.f32.mrf.mxu1  ;;  %v5170_v52 = vsel %vm538_vm2, %v5100_v30, 0.0 }
 0x611   :  { %15698 = vst [vmem:[#allocation40_spill] sm:$0xff] %v11858_v21 }
 0x612   :  { %8188 = vmatprep.mubr.msk.bf16.mxu1 %vm4569_vm14, %v4531_v20  ;;  %v5172_v20 = vsel %vm538_vm2, %v5101_v39, 0.0  ;;  %v11864_v16 = vpop.f32.mrf.mxu1  ;;  %v5184_v39 = vsel %vm538_vm2, %v5107_v36, 0.0 }
 0x613   :  { %v4500_v57 = vld [vmem:[#allocation3 + $0x1f8] sm:$0xff]  ;;  %15699 = vst [vmem:[#allocation37_spill] sm:$0xff] %v11864_v16 }
 0x614   :  { %v4532_v29 = vpack.c.bf16 %v4500_v57, %v4499_v3  ;;  %v4976_v3 = vsel %vm538_vm2, %v11797_v53, 0.0  ;;  %v4975_v57 = vadd.f32 %v4974_v31, %v4973_v25  ;;  %v11869_v50 = vpop.f32.mrf.mxu1  ;;  %v4990_v25 = vsel %vm538_vm2, %v11839_v22, 0.0 }
 0x615   :  { %15700 = vst [vmem:[#allocation39_spill] sm:$0xff] %v11869_v50 }
 0x616   :  { %8189 = vmatmul.mubr.msk.bf16.gmra.mxu1 %vm4569_vm14, %v4532_v29  ;;  %v5171_v29 = vadd.f32 %v5170_v52, %v5169_v47  ;;  %v4977_v24 = vadd.f32 %v4976_v3, %v4975_v57  ;;  %v11878_v40 = vpop.f32.mrf.mxu1  ;;  %v5108_v47 = vmul.f32 %v11815_v37, %v11815_v37  ;;  %v5110_v52 = vmul.f32 %v11858_v21, %v11858_v21 }
 0x617   :  { %15701 = vst [vmem:[#allocation42_spill] sm:$0xff] %v11878_v40 }
 0x618   :  { %v5173_v56 = vadd.f32 %v5172_v20, %v5171_v29  ;;  %v4979_v7 = vadd.f32 %v4978_v15, %v4977_v24  ;;  %v11890_v12 = vpop.f32.mrf.mxu1  ;;  %v5186_v57 = vsel %vm538_vm2, %v5108_v47, 0.0  ;;  %v5188_v29 = vsel %vm538_vm2, %v5109_v44, 0.0 }
 0x619   :  { %15702 = vst [vmem:[#allocation44_spill] sm:$0xff] %v11890_v12  ;;  %v5190_v17 = vsel %vm538_vm2, %v5110_v52, 0.0  ;;  %v5000_v36 = vsel %vm538_vm2, %v11890_v12, 0.0  ;;  %v5002_v52 = vsel %vm538_vm2, %v11864_v16, 0.0 }
 0x61a   :  { %v5175_v63 = vadd.f32 %v5174_v59, %v5173_v56  ;;  %v4981_v62 = vadd.f32 %v4980_v27, %v4979_v7  ;;  %v11893_v11 = vpop.f32.mrf.mxu1  ;;  %v4992_v59 = vsel %vm538_vm2, %v11858_v21, 0.0 }
 0x61b   :  { %15703 = vst [vmem:[#allocation41_spill] sm:$0xff] %v11893_v11 }
 0x61c   :  { %v5177_v0 = vadd.f32 %v5176_v18, %v5175_v63  ;;  %v4983_v48 = vadd.f32 %v4982_v35, %v4981_v62  ;;  %v11899_v30 = vpop.f32.mrf.mxu1  ;;  %v5111_v18 = vmul.f32 %v11832_v32, %v11832_v32  ;;  %v5113_v62 = vmul.f32 %v11869_v50, %v11869_v50 }
 0x61d   :  { %15704 = vst [vmem:[#allocation43_spill] sm:$0xff] %v11899_v30 }
 0x61e   :  { %v5179_v61 = vadd.f32 %v5178_v49, %v5177_v0  ;;  %v4985_v42 = vadd.f32 %v4984_v4, %v4983_v48  ;;  %v11912_v3 = vpop.f32.mrf.mxu1  ;;  %v4994_v0 = vsel %vm538_vm2, %v11832_v32, 0.0  ;;  %v5192_v35 = vsel %vm538_vm2, %v5111_v18, 0.0 }
 0x61f   :  { %15705 = vst [vmem:[#allocation46_spill] sm:$0xff] %v11912_v3  ;;  %v4996_v4 = vsel %vm538_vm2, %v11845_v54, 0.0  ;;  %v4998_v48 = vsel %vm538_vm2, %v11869_v50, 0.0 }
 0x620   :  { %v5181_v46 = vadd.f32 %v5180_v28, %v5179_v61  ;;  %v4987_v55 = vadd.f32 %v4986_v1, %v4985_v42  ;;  %v11919_v7 = vpop.f32.mrf.mxu1  ;;  %v5114_v61 = vmul.f32 %v11890_v12, %v11890_v12  ;;  %v5194_v42 = vsel %vm538_vm2, %v5112_v23, 0.0 }
 0x621   :  { %15706 = vst [vmem:[#allocation48_spill] sm:$0xff] %v11919_v7 }
 0x622   :  { %v5183_v43 = vadd.f32 %v5182_v5, %v5181_v46  ;;  %v4989_v20 = vadd.f32 %v4988_v38, %v4987_v55  ;;  %v11923_v58 = vpop.f32.mrf.mxu1  ;;  %v5196_v46 = vsel %vm538_vm2, %v5113_v62, 0.0 }
 0x623   :  { %15707 = vst [vmem:[#allocation45_spill] sm:$0xff] %v11923_v58 }
 0x624   :  { %v5185_v31 = vadd.f32 %v5184_v39, %v5183_v43  ;;  %v4991_v24 = vadd.f32 %v4990_v25, %v4989_v20  ;;  %v11932_v28 = vpop.f32.mrf.mxu1  ;;  %v5198_v39 = vsel %vm538_vm2, %v5114_v61, 0.0 }
 0x625   :  { %15708 = vst [vmem:[#allocation47_spill] sm:$0xff] %v11932_v28 }
 0x626   :  { %v5187_v56 = vadd.f32 %v5186_v57, %v5185_v31  ;;  %v4993_v63 = vadd.f32 %v4992_v59, %v4991_v24  ;;  %v11944_v55 = vpop.f32.mrf.mxu1  ;;  %v5115_v31 = vmul.f32 %v11864_v16, %v11864_v16  ;;  %v5116_v59 = vmul.f32 %v11878_v40, %v11878_v40 }
 0x627   :  { %15709 = vst [vmem:[#allocation50_spill] sm:$0xff] %v11944_v55  ;;  %v5117_v24 = vmul.f32 %v11899_v30, %v11899_v30 }
 0x628   :  { %v5189_v15 = vadd.f32 %v5188_v29, %v5187_v56  ;;  %v4995_v27 = vadd.f32 %v4994_v0, %v4993_v63  ;;  %v11949_v25 = vpop.f32.mrf.mxu1  ;;  %v5200_v29 = vsel %vm538_vm2, %v5115_v31, 0.0  ;;  %v5006_v63 = vsel %vm538_vm2, %v11899_v30, 0.0 }
 0x629   :  { %15710 = vst [vmem:[#allocation52_spill] sm:$0xff] %v11949_v25  ;;  %v5202_v0 = vsel %vm538_vm2, %v5116_v59, 0.0 }
 0x62a   :  { %v5191_v26 = vadd.f32 %v5190_v17, %v5189_v15  ;;  %v4997_v5 = vadd.f32 %v4996_v4, %v4995_v27  ;;  %v11953_v57 = vpop.f32.mrf.mxu1  ;;  %v5004_v17 = vsel %vm538_vm2, %v11878_v40, 0.0  ;;  %v5118_v15 = vmul.f32 %v11919_v7, %v11919_v7 }
 0x62b   :  { %v5204_v27 = vsel %vm538_vm2, %v5117_v24, 0.0 }
 0x62c   :  { %v5193_v49 = vadd.f32 %v5192_v35, %v5191_v26  ;;  %v4999_v43 = vadd.f32 %v4998_v48, %v4997_v5  ;;  %v11966_v26 = vpop.f32.mrf.mxu1  ;;  %v5008_v35 = vsel %vm538_vm2, %v11919_v7, 0.0  ;;  %v5119_v5 = vmul.f32 %v11893_v11, %v11893_v11 }
 0x62d   :  { %15711 = vst [vmem:[#allocation49_spill] sm:$0xff] %v11966_v26 }
 0x62e   :  { %v5195_v1 = vadd.f32 %v5194_v42, %v5193_v49  ;;  %v5001_v44 = vadd.f32 %v5000_v36, %v4999_v43  ;;  %v5206_v49 = vsel %vm538_vm2, %v5118_v15, 0.0  ;;  %v11973_v61 = vpop.f32.mrf.mxu1 }
 0x630   :  { %v5197_v47 = vadd.f32 %v5196_v46, %v5195_v1  ;;  %v5003_v20 = vadd.f32 %v5002_v52, %v5001_v44  ;;  %v5010_v46 = vsel %vm538_vm2, %v11893_v11, 0.0  ;;  %v11979_v43 = vpop.f32.mrf.mxu1  ;;  %v5208_v1 = vsel %vm538_vm2, %v5119_v5, 0.0 }
 0x631   :  { %15712 = vst [vmem:[#allocation51_spill] sm:$0xff] %v11979_v43  ;;  %v5014_v52 = vsel %vm538_vm2, %v11932_v28, 0.0  ;;  %v5124_v5 = vmul.f32 %v11944_v55, %v11944_v55 }
 0x632   :  { %v5199_v38 = vadd.f32 %v5198_v39, %v5197_v47  ;;  %v5005_v18 = vadd.f32 %v5004_v17, %v5003_v20  ;;  %v5120_v39 = vmul.f32 %v11912_v3, %v11912_v3  ;;  %v5121_v47 = vmul.f32 %v11932_v28, %v11932_v28  ;;  %v11986_v31 = vpop.f32.mrf.mxu1 }
 0x633   :  { %v5122_v20 = vmul.f32 %v11949_v25, %v11949_v25 }
 0x634   :  { %v5201_v56 = vadd.f32 %v5200_v29, %v5199_v38  ;;  %v5007_v23 = vadd.f32 %v5006_v63, %v5005_v18  ;;  %v5012_v38 = vsel %vm538_vm2, %v11912_v3, 0.0  ;;  %v5210_v59 = vsel %vm538_vm2, %v5120_v39, 0.0  ;;  %v11998_v15 = vpop.f32.mrf.mxu1 }
 0x635   :  { %v5212_v24 = vsel %vm538_vm2, %v5121_v47, 0.0  ;;  %v5214_v18 = vsel %vm538_vm2, %v5122_v20, 0.0  ;;  %v5022_v39 = vsel %vm538_vm2, %v11966_v26, 0.0  ;;  %v5126_v47 = vmul.f32 %v11979_v43, %v11979_v43 }
 0x636   :  { %v5203_v62 = vadd.f32 %v5202_v0, %v5201_v56  ;;  %v5009_v48 = vadd.f32 %v5008_v35, %v5007_v23  ;;  %v5016_v56 = vsel %vm538_vm2, %v11949_v25, 0.0  ;;  %v5123_v35 = vmul.f32 %v11923_v58, %v11923_v58 }
 0x638   :  { %v5205_v4 = vadd.f32 %v5204_v27, %v5203_v62  ;;  %v5011_v36 = vadd.f32 %v5010_v46, %v5009_v48  ;;  %v12003_v62 = vpop.f32.mrf.mxu1  ;;  %v5216_v48 = vsel %vm538_vm2, %v5123_v35, 0.0  ;;  %v5026_v35 = vsel %vm538_vm2, %v11953_v57, 0.0 }
 0x63a   :  { %v5207_v42 = vadd.f32 %v5206_v49, %v5205_v4  ;;  %v5013_v29 = vadd.f32 %v5012_v38, %v5011_v36  ;;  %v5018_v49 = vsel %vm538_vm2, %v11923_v58, 0.0  ;;  %v12012_v36 = vpop.f32.mrf.mxu1 }
 0x63c   :  { %v5209_v44 = vadd.f32 %v5208_v1, %v5207_v42  ;;  %v5015_v17 = vadd.f32 %v5014_v52, %v5013_v29  ;;  %v5125_v42 = vmul.f32 %v11966_v26, %v11966_v26  ;;  %v5020_v1 = vsel %vm538_vm2, %v11944_v55, 0.0  ;;  %v12020_v38 = vpop.f32.mrf.mxu1 }
 0x63d   :  { %v5218_v52 = vsel %vm538_vm2, %v5124_v5, 0.0  ;;  %v5024_v29 = vsel %vm538_vm2, %v11979_v43, 0.0  ;;  %v5129_v5 = vmul.f32 %v11998_v15, %v11998_v15 }
 0x63e   :  { %v5211_v63 = vadd.f32 %v5210_v59, %v5209_v44  ;;  %v5017_v27 = vadd.f32 %v5016_v56, %v5015_v17  ;;  %v5220_v20 = vsel %vm538_vm2, %v5125_v42, 0.0  ;;  %v5222_v56 = vsel %vm538_vm2, %v5126_v47, 0.0 }
 0x640   :  { %v5213_v0 = vadd.f32 %v5212_v24, %v5211_v63  ;;  %v5019_v4 = vadd.f32 %v5018_v49, %v5017_v27 }
 0x642   :  { %v5215_v23 = vadd.f32 %v5214_v18, %v5213_v0  ;;  %v5021_v44 = vadd.f32 %v5020_v1, %v5019_v4  ;;  %v12027_v18 = vpop.f32.mrf.mxu1  ;;  %v5127_v0 = vmul.f32 %v11953_v57, %v11953_v57  ;;  %v5030_v1 = vsel %vm538_vm2, %v11998_v15, 0.0 }
 0x644   :  { %v5217_v46 = vadd.f32 %v5216_v48, %v5215_v23  ;;  %v5023_v59 = vadd.f32 %v5022_v39, %v5021_v44  ;;  %v12033_v49 = vpop.f32.mrf.mxu1  ;;  %v5224_v4 = vsel %vm538_vm2, %v5127_v0, 0.0  ;;  %v5128_v48 = vmul.f32 %v11973_v61, %v11973_v61 }
 0x645   :  { %v5130_v39 = vmul.f32 %v12012_v36, %v12012_v36 }
 0x646   :  { %v5219_v24 = vadd.f32 %v5218_v52, %v5217_v46  ;;  %v5025_v63 = vadd.f32 %v5024_v29, %v5023_v59  ;;  %v5028_v46 = vsel %vm538_vm2, %v11973_v61, 0.0  ;;  %v12046_v44 = vpop.f32.mrf.mxu1  ;;  %v5226_v52 = vsel %vm538_vm2, %v5128_v48, 0.0 }
 0x647   :  { %v5032_v29 = vsel %vm538_vm2, %v12012_v36, 0.0 }
 0x648   :  { %v5221_v17 = vadd.f32 %v5220_v20, %v5219_v24  ;;  %v5027_v23 = vadd.f32 %v5026_v35, %v5025_v63  ;;  %v5228_v20 = vsel %vm538_vm2, %v5129_v5, 0.0 }
 0x64a   :  { %v5223_v27 = vadd.f32 %v5222_v56, %v5221_v17  ;;  %v5029_v47 = vadd.f32 %v5028_v46, %v5027_v23  ;;  %v12052_v56 = vpop.f32.mrf.mxu1  ;;  %v5230_v17 = vsel %vm538_vm2, %v5130_v39, 0.0  ;;  %v5133_v46 = vmul.f32 %v12027_v18, %v12027_v18 }
 0x64c   :  { %v5225_v42 = vadd.f32 %v5224_v4, %v5223_v27  ;;  %v5031_v59 = vadd.f32 %v5030_v1, %v5029_v47  ;;  %v5131_v27 = vmul.f32 %v11986_v31, %v11986_v31  ;;  %v12057_v23 = vpop.f32.mrf.mxu1  ;;  %v5034_v4 = vsel %vm538_vm2, %v11986_v31, 0.0 }
 0x64d   :  { %v5036_v47 = vsel %vm538_vm2, %v12003_v62, 0.0 }
 0x64e   :  { %v5227_v24 = vadd.f32 %v5226_v52, %v5225_v42  ;;  %v5033_v0 = vadd.f32 %v5032_v29, %v5031_v59  ;;  %v5232_v5 = vsel %vm538_vm2, %v5131_v27, 0.0  ;;  %v5132_v42 = vmul.f32 %v12003_v62, %v12003_v62  ;;  %v12066_v39 = vpop.f32.mrf.mxu1 }
 0x64f   :  { %v5038_v52 = vsel %vm538_vm2, %v12027_v18, 0.0 }
 0x650   :  { %v5229_v63 = vadd.f32 %v5228_v20, %v5227_v24  ;;  %v5035_v48 = vadd.f32 %v5034_v4, %v5033_v0  ;;  %v5134_v20 = vmul.f32 %v12046_v44, %v12046_v44  ;;  %v5234_v59 = vsel %vm538_vm2, %v5132_v42, 0.0  ;;  %v12078_v27 = vpop.f32.mrf.mxu1 }
 0x651   :  { %v5236_v24 = vsel %vm538_vm2, %v5133_v46, 0.0  ;;  %v5042_v42 = vsel %vm538_vm2, %v12020_v38, 0.0 }
 0x652   :  { %v5231_v35 = vadd.f32 %v5230_v17, %v5229_v63  ;;  %v5037_v29 = vadd.f32 %v5036_v47, %v5035_v48  ;;  %v5040_v17 = vsel %vm538_vm2, %v12046_v44, 0.0  ;;  %v12081_v43 = vpop.f32.mrf.mxu1  ;;  %v5135_v48 = vmul.f32 %v12020_v38, %v12020_v38 }
 0x653   :  { %v5143_v11 = vmul.f32 %v12081_v43, %v12081_v43 }
 0x654   :  { %v5233_v1 = vadd.f32 %v5232_v5, %v5231_v35  ;;  %v5039_v63 = vadd.f32 %v5038_v52, %v5037_v29  ;;  %v5238_v35 = vsel %vm538_vm2, %v5134_v20, 0.0  ;;  %v12087_v26 = vpop.f32.mrf.mxu1  ;;  %v5136_v52 = vmul.f32 %v12033_v49, %v12033_v49 }
 0x655   :  { %v5137_v20 = vmul.f32 %v12057_v23, %v12057_v23 }
 0x656   :  { %v5235_v0 = vadd.f32 %v5234_v59, %v5233_v1  ;;  %v5041_v5 = vadd.f32 %v5040_v17, %v5039_v63  ;;  %v5240_v1 = vsel %vm538_vm2, %v5135_v48, 0.0  ;;  %v5044_v59 = vsel %vm538_vm2, %v12033_v49, 0.0 }
 0x657   :  { %v5138_v17 = vmul.f32 %v12078_v27, %v12078_v27 }
 0x658   :  { %v5237_v4 = vadd.f32 %v5236_v24, %v5235_v0  ;;  %v5043_v46 = vadd.f32 %v5042_v42, %v5041_v5  ;;  %v5046_v24 = vsel %vm538_vm2, %v12057_v23, 0.0  ;;  %v12100_v0 = vpop.f32.mrf.mxu1  ;;  %v5048_v5 = vsel %vm538_vm2, %v12078_v27, 0.0 }
 0x659   :  { %v5246_v42 = vsel %vm538_vm2, %v5138_v17, 0.0 }
 0x65a   :  { %v5239_v47 = vadd.f32 %v5238_v35, %v5237_v4  ;;  %v5045_v63 = vadd.f32 %v5044_v59, %v5043_v46  ;;  %v5242_v35 = vsel %vm538_vm2, %v5136_v52, 0.0  ;;  %v5244_v4 = vsel %vm538_vm2, %v5137_v20, 0.0  ;;  %v12107_v58 = vpop.f32.mrf.mxu1 }
 0x65b   :  { %v5139_v46 = vmul.f32 %v12052_v56, %v12052_v56  ;;  %v5050_v52 = vsel %vm538_vm2, %v12052_v56, 0.0 }
 0x65c   :  { %v5241_v29 = vadd.f32 %v5240_v1, %v5239_v47  ;;  %v5047_v48 = vadd.f32 %v5046_v24, %v5045_v63  ;;  %v12111_v25 = vpop.f32.mrf.mxu1  ;;  %v5141_v24 = vmul.f32 %v12087_v26, %v12087_v26 }
 0x65d   :  { %v5248_v28 = vsel %vm538_vm2, %v5139_v46, 0.0 }
 0x65e   :  { %v5243_v47 = vadd.f32 %v5242_v35, %v5241_v29  ;;  %v5049_v55 = vadd.f32 %v5048_v5, %v5047_v48  ;;  %v5140_v29 = vmul.f32 %v12066_v39, %v12066_v39  ;;  %v12120_v63 = vpop.f32.mrf.mxu1  ;;  %v5052_v35 = vsel %vm538_vm2, %v12066_v39, 0.0 }
 0x660   :  { %v5245_v1 = vadd.f32 %v5244_v4, %v5243_v47  ;;  %v5051_v20 = vadd.f32 %v5050_v52, %v5049_v55  ;;  %v5054_v4 = vsel %vm538_vm2, %v12087_v26, 0.0  ;;  %v5142_v55 = vmul.f32 %v12107_v58, %v12107_v58  ;;  %v12132_v46 = vpop.f32.mrf.mxu1 }
 0x661   :  { %v5250_v48 = vsel %vm538_vm2, %v5140_v29, 0.0  ;;  %v5252_v47 = vsel %vm538_vm2, %v5141_v24, 0.0  ;;  %v5536_v29 = vld [vmem:[%s15359_s7] sm:$0xf]  ;;  %v5058_v24 = vsel %vm538_vm2, %v12081_v43, 0.0 }
 0x662   :  { %v5247_v59 = vadd.f32 %v5246_v42, %v5245_v1  ;;  %v5053_v5 = vadd.f32 %v5052_v35, %v5051_v20  ;;  %v5056_v42 = vsel %vm538_vm2, %v12107_v58, 0.0  ;;  %v12137_v20 = vpop.f32.mrf.mxu1  ;;  %8347 = vmatprep.subr.msk.bf16.mxu0 %vm4666_vm7, %v5536_v29 }
 0x664   :  { %v5249_v17 = vadd.f32 %v5248_v28, %v5247_v59  ;;  %v5055_v28 = vadd.f32 %v5054_v4, %v5053_v5  ;;  %v5254_v59 = vsel %vm538_vm2, %v5142_v55, 0.0  ;;  %v5256_v55 = vsel %vm538_vm2, %v5143_v11, 0.0 }
 0x665   :  { %v5144_v5 = vmul.f32 %v12100_v0, %v12100_v0 }
 0x666   :  { %v5251_v1 = vadd.f32 %v5250_v48, %v5249_v17  ;;  %v5057_v3 = vadd.f32 %v5056_v42, %v5055_v28  ;;  %v5634_v17 = vsel %vm4666_vm7, %v5536_v29, 0  ;;  %v5145_v48 = vmul.f32 %v12120_v63, %v12120_v63 }
 0x667   :  { %8193 = vmatpush3.bf16.msra.mxu0 %v5634_v17  ;;  %v5060_v28 = vsel %vm538_vm2, %v12100_v0, 0.0 }
 0x668   :  { %v5253_v52 = vadd.f32 %v5252_v47, %v5251_v1  ;;  %v5059_v35 = vadd.f32 %v5058_v24, %v5057_v3  ;;  %v15713_v47 = vmov 0.0   ;;  %v5062_v3 = vsel %vm538_vm2, %v12120_v63, 0.0 }
 0x669   :  { %8258 = vmatprep.subr.mxu0 %v15713_v47  ;;  %v5146_v1 = vmul.f32 %v12137_v20, %v12137_v20  ;;  %v5260_v29 = vsel %vm538_vm2, %v5145_v48, 0.0  ;;  %v5064_v24 = vsel %vm538_vm2, %v12137_v20, 0.0 }
 0x66a   :  { %v5255_v7 = vadd.f32 %v5254_v59, %v5253_v52  ;;  %v5061_v59 = vadd.f32 %v5060_v28, %v5059_v35  ;;  %v5258_v52 = vsel %vm538_vm2, %v5144_v5, 0.0  ;;  %v5147_v35 = vmul.f32 %v12111_v25, %v12111_v25 }
 0x66b   :  { %v5066_v5 = vsel %vm538_vm2, %v12111_v25, 0.0 }
 0x66c   :  { %v5257_v42 = vadd.f32 %v5256_v55, %v5255_v7  ;;  %v5063_v7 = vadd.f32 %v5062_v3, %v5061_v59  ;;  %v5262_v55 = vsel %vm538_vm2, %v5146_v1, 0.0  ;;  %v5264_v12 = vsel %vm538_vm2, %v5147_v35, 0.0 }
 0x66d   :  { %v5068_v59 = vsel %vm538_vm2, %v12132_v46, 0.0 }
 0x66e   :  { %v5259_v17 = vadd.f32 %v5258_v52, %v5257_v42  ;;  %v5065_v30 = vadd.f32 %v5064_v24, %v5063_v7  ;;  %v5148_v42 = vmul.f32 %v12132_v46, %v12132_v46 }
 0x670   :  { %v5261_v47 = vadd.f32 %v5260_v29, %v5259_v17  ;;  %v5067_v16 = vadd.f32 %v5066_v5, %v5065_v30  ;;  %v5266_v29 = vsel %vm538_vm2, %v5148_v42, 0.0 }
 0x672   :  { %v5263_v28 = vadd.f32 %v5262_v55, %v5261_v47  ;;  %v5069_v52 = vadd.f32 %v5068_v59, %v5067_v16 }
 0x674   :  { %v5265_v1 = vadd.f32 %v5264_v12, %v5263_v28 }
 0x676   :  { %v5267_v55 = vadd.f32 %v5266_v29, %v5265_v1 }
 0x69a   :  { %v12146_v4 = vpop.f32.mrf.mxu1 }
 0x69b   :  { %v5151_v5 = vmul.f32 %v12146_v4, %v12146_v4  ;;  %v5074_v16 = vsel %vm538_vm2, %v12146_v4, 0.0 }
 0x69c   :  { %v12160_v11 = vpop.f32.mrf.mxu1 }
 0x69d   :  { %v5149_v3 = vmul.f32 %v12160_v11, %v12160_v11  ;;  %v5070_v47 = vsel %vm538_vm2, %v12160_v11, 0.0 }
 0x69e   :  { %v12167_v40 = vpop.f32.mrf.mxu1  ;;  %v5071_v17 = vadd.f32 %v5070_v47, %v5069_v52 }
 0x69f   :  { %v5268_v24 = vsel %vm538_vm2, %v5149_v3, 0.0  ;;  %v5272_v3 = vsel %vm538_vm2, %v5151_v5, 0.0  ;;  %v5152_v47 = vmul.f32 %v12167_v40, %v12167_v40 }
 0x6a0   :  { %v12173_v48 = vpop.f32.mrf.mxu1  ;;  %v5269_v35 = vadd.f32 %v5268_v24, %v5267_v55 }
 0x6a1   :  { %v5150_v30 = vmul.f32 %v12173_v48, %v12173_v48  ;;  %v5072_v7 = vsel %vm538_vm2, %v12173_v48, 0.0  ;;  %v5274_v55 = vsel %vm538_vm2, %v5152_v47, 0.0 }
 0x6a2   :  { %v5073_v28 = vadd.f32 %v5072_v7, %v5071_v17 }
 0x6a3   :  { %v5270_v12 = vsel %vm538_vm2, %v5150_v30, 0.0  ;;  %v5076_v30 = vsel %vm538_vm2, %v12167_v40, 0.0 }
 0x6a4   :  { %v5271_v50 = vadd.f32 %v5270_v12, %v5269_v35  ;;  %v5075_v59 = vadd.f32 %v5074_v16, %v5073_v28 }
 0x6a6   :  { %v5273_v1 = vadd.f32 %v5272_v3, %v5271_v50  ;;  %v5077_v7 = vadd.f32 %v5076_v30, %v5075_v59 }
 0x6a8   :  { %v5275_v28 = vadd.f32 %v5274_v55, %v5273_v1 }
 0x6d6   :  { %v12195_v42 = vpop.f32.mrf.mxu1 }
 0x6d7   :  { %v5155_v5 = vmul.f32 %v12195_v42, %v12195_v42  ;;  %v5082_v21 = vsel %vm538_vm2, %v12195_v42, 0.0 }
 0x6d8   :  { %v12200_v52 = vpop.f32.mrf.mxu1 }
 0x6d9   :  { %v5078_v29 = vsel %vm538_vm2, %v12200_v52, 0.0  ;;  %v5153_v24 = vmul.f32 %v12200_v52, %v12200_v52 }
 0x6da   :  { %v8191_v17 = vpop.f32.mrf.mxu1  ;;  %v5079_v35 = vadd.f32 %v5078_v29, %v5077_v7  ;;  %v5280_v29 = vsel %vm538_vm2, %v5155_v5, 0.0 }
 0x6db   :  { %v5276_v12 = vsel %vm538_vm2, %v5153_v24, 0.0  ;;  %v5156_v59 = vmul.f32 %v8191_v17, %v8191_v17  ;;  %v5084_v1 = vsel %vm538_vm2, %v8191_v17, 0.0 }
 0x6dc   :  { %v4947_v50 = vpop.f32.mrf.mxu1  ;;  %v5277_v54 = vadd.f32 %v5276_v12, %v5275_v28 }
 0x6dd   :  { %v5080_v16 = vsel %vm538_vm2, %v4947_v50, 0.0  ;;  %v5154_v3 = vmul.f32 %v4947_v50, %v4947_v50  ;;  %v5282_v55 = vsel %vm538_vm2, %v5156_v59, 0.0 }
 0x6de   :  { %v5081_v32 = vadd.f32 %v5080_v16, %v5079_v35 }
 0x6df   :  { %v5278_v30 = vsel %vm538_vm2, %v5154_v3, 0.0 }
 0x6e0   :  { %v5083_v47 = vadd.f32 %v5082_v21, %v5081_v32  ;;  %v5279_v22 = vadd.f32 %v5278_v30, %v5277_v54 }
 0x6e2   :  { %v5085_v24 = vadd.f32 %v5084_v1, %v5083_v47  ;;  %v5281_v7 = vadd.f32 %v5280_v29, %v5279_v22 }
 0x6e4   :  { %v5086_v37 = vrot.slane %v5085_v24, 4  ;;  %v5283_v6 = vadd.f32 %v5282_v55, %v5281_v7 }
 0x6e6   :  { %v5087_v12 = vadd.f32 %v5086_v37, %v5085_v24  ;;  %v5284_v35 = vrot.slane %v5283_v6, 4  ;;  %v5293_v37 = vld [vmem:[%s15360_s5] sm:$0x1] }
 0x6e8   :  { %v5088_v28 = vrot.slane %v5087_v12, 2  ;;  %v5285_v16 = vadd.f32 %v5284_v35, %v5283_v6  ;;  %v5297_v6 = vld [vmem:[%s15361_s6] sm:$0x1] }
 0x6ea   :  { %v5089_v10 = vadd.f32 %v5088_v28, %v5087_v12  ;;  %v5286_v13 = vrot.slane %v5285_v16, 2 }
 0x6ec   :  { %v5090_v14 = vrot.slane %v5089_v10, 1  ;;  %v5287_v3 = vadd.f32 %v5286_v13, %v5285_v16 }
 0x6ee   :  { %v5091_v32 = vadd.f32 %v5090_v14, %v5089_v10  ;;  %v5288_v54 = vrot.slane %v5287_v3, 1  ;;  %v15714_v14 = vld [vmem:[#allocation61_spill] sm:$0xff] }
 0x6f0   :  { %v5092_v21 = vmul.f32 0.001953125, %v5091_v32  ;;  %v5289_v5 = vadd.f32 %v5288_v54, %v5287_v3 }
 0x6f2   :  { %v5290_v30 = vmul.f32 0.001953125, %v5289_v5  ;;  %v5291_v34 = vmul.f32 %v5092_v21, %v5092_v21 }
 0x6f4   :  { %v5292_v47 = vsub.f32 %v5290_v30, %v5291_v34 }
 0x6f6   :  { %v5294_v22 = vadd.f32 1e-05, %v5292_v47 }
 0x6f8   :  { %8367 = vrsqrt.f32 %v5294_v22 }
 0x705   :  { %v8368_v59 = vpop.eup %8367 }
 0x706   :  { %v5296_v29 = vmul.f32 %v8368_v59, %v5293_v37 }
 0x708   :  { %v5298_v13 = vmul.f32 %v5296_v29, %v5092_v21  ;;  %v12226_v10 = vrot.slane %v5296_v29, %v15714_v14 }
 0x70a   :  { %v5299_v1 = vsub.f32 %v5297_v6, %v5298_v13  ;;  %v5367_v24 = vmul.f32 %v12226_v10, %v4947_v50  ;;  %v5369_v55 = vmul.f32 %v8191_v17, %v12226_v10  ;;  %v5340_v12 = vmul.f32 %v11953_v57, %v12226_v10 }
 0x70b   :  { %v5341_v35 = vmul.f32 %v11973_v61, %v12226_v10  ;;  %v5342_v28 = vmul.f32 %v12226_v10, %v11998_v15  ;;  %v5343_v50 = vmul.f32 %v12226_v10, %v12012_v36  ;;  %v5344_v16 = vmul.f32 %v11986_v31, %v12226_v10 }
 0x70c   :  { %v12230_v34 = vrot.slane %v5299_v1, %v15714_v14  ;;  %v5345_v3 = vmul.f32 %v12003_v62, %v12226_v10  ;;  %v5346_v17 = vmul.f32 %v12226_v10, %v12027_v18  ;;  %v5347_v57 = vmul.f32 %v12226_v10, %v12046_v44 }
 0x70d   :  { %v5348_v61 = vmul.f32 %v12020_v38, %v12226_v10  ;;  %v5349_v15 = vmul.f32 %v12033_v49, %v12226_v10  ;;  %v5350_v36 = vmul.f32 %v12226_v10, %v12057_v23  ;;  %v5351_v31 = vmul.f32 %v12226_v10, %v12078_v27 }
 0x70e   :  { %v12233_v7 = vadd.f32 %v12230_v34, %v5367_v24  ;;  %v5352_v62 = vmul.f32 %v12052_v56, %v12226_v10  ;;  %v5353_v18 = vmul.f32 %v12066_v39, %v12226_v10  ;;  %v5354_v44 = vmul.f32 %v12226_v10, %v12087_v26 }
 0x70f   :  { %v5355_v38 = vmul.f32 %v12226_v10, %v12107_v58  ;;  %v5356_v49 = vmul.f32 %v12081_v43, %v12226_v10  ;;  %v5357_v23 = vmul.f32 %v12100_v0, %v12226_v10  ;;  %v5358_v27 = vmul.f32 %v12226_v10, %v12120_v63 }
 0x710   :  { %v5359_v56 = vmul.f32 %v12226_v10, %v12137_v20  ;;  %v5360_v39 = vmul.f32 %v12111_v25, %v12226_v10  ;;  %v5361_v26 = vmul.f32 %v12132_v46, %v12226_v10  ;;  %v5362_v58 = vmul.f32 %v12226_v10, %v12160_v11 }
 0x711   :  { %v5363_v43 = vmul.f32 %v12226_v10, %v12173_v48  ;;  %v5364_v0 = vmul.f32 %v12146_v4, %v12226_v10  ;;  %v5365_v63 = vmul.f32 %v12167_v40, %v12226_v10  ;;  %v5366_v20 = vmul.f32 %v12226_v10, %v12200_v52 }
 0x712   :  { %v5368_v25 = vmul.f32 %v12195_v42, %v12226_v10  ;;  %v12293_v46 = vadd.f32 %v12230_v34, %v5340_v12  ;;  %v12296_v11 = vadd.f32 %v12230_v34, %v5341_v35  ;;  %v12299_v48 = vadd.f32 %v12230_v34, %v5342_v28 }
 0x713   :  { %v12302_v4 = vadd.f32 %v12230_v34, %v5343_v50  ;;  %v12305_v40 = vadd.f32 %v12230_v34, %v5344_v16  ;;  %v12308_v52 = vadd.f32 %v12230_v34, %v5345_v3  ;;  %v12311_v42 = vadd.f32 %v12230_v34, %v5346_v17 }
 0x714   :  { %v12314_v32 = vadd.f32 %v12230_v34, %v5347_v57  ;;  %v12317_v54 = vadd.f32 %v12230_v34, %v5348_v61  ;;  %v12320_v21 = vadd.f32 %v12230_v34, %v5349_v15  ;;  %v12323_v5 = vadd.f32 %v12230_v34, %v5350_v36 }
 0x715   :  { %v12326_v30 = vadd.f32 %v12230_v34, %v5351_v31  ;;  %v12329_v47 = vadd.f32 %v12230_v34, %v5352_v62  ;;  %v12332_v22 = vadd.f32 %v12230_v34, %v5353_v18  ;;  %v12335_v37 = vadd.f32 %v12230_v34, %v5354_v44 }
 0x716   :  { %v12338_v59 = vadd.f32 %v12230_v34, %v5355_v38  ;;  %v5426_v29 = vadd.f32 %v12230_v34, %v5356_v49  ;;  %v5427_v6 = vadd.f32 %v12230_v34, %v5357_v23  ;;  %v12343_v13 = vadd.f32 %v12230_v34, %v5358_v27 }
 0x717   :  { %v12346_v1 = vadd.f32 %v12230_v34, %v5359_v56  ;;  %v5430_v24 = vadd.f32 %v12230_v34, %v5360_v39  ;;  %v5431_v12 = vadd.f32 %v12230_v34, %v5361_v26  ;;  %v12351_v35 = vadd.f32 %v12230_v34, %v5362_v58 }
 0x718   :  { %v12354_v28 = vadd.f32 %v12230_v34, %v5363_v43  ;;  %v5434_v50 = vadd.f32 %v12230_v34, %v5364_v0  ;;  %v5435_v16 = vadd.f32 %v12230_v34, %v5365_v63  ;;  %v12359_v3 = vadd.f32 %v12230_v34, %v5366_v20 }
 0x719   :  { %v5438_v17 = vadd.f32 %v12230_v34, %v5368_v25  ;;  %v5439_v57 = vadd.f32 %v12230_v34, %v5369_v55  ;;  %v5306_v61 = vmul.f32 %v12226_v10, %v11787_v33  ;;  %v5307_v15 = vmul.f32 %v12226_v10, %v11795_v51 }
 0x71a   :  { %v5308_v36 = vmul.f32 %v11782_v60, %v12226_v10  ;;  %v5309_v31 = vmul.f32 %v11791_v41, %v12226_v10  ;;  %v5310_v62 = vmul.f32 %v12226_v10, %v11774_v9  ;;  %v5311_v18 = vmul.f32 %v12226_v10, %v11780_v2 }
 0x71b   :  { %v5312_v55 = vmul.f32 %v11771_v19, %v12226_v10  ;;  %v5313_v33 = vmul.f32 %v11777_v8, %v12226_v10  ;;  %v5376_v51 = vadd.f32 %v12230_v34, %v5306_v61  ;;  %v5377_v44 = vadd.f32 %v12230_v34, %v5307_v15 }
 0x71c   :  { %v5378_v60 = vadd.f32 %v12230_v34, %v5308_v36  ;;  %v5379_v41 = vadd.f32 %v12230_v34, %v5309_v31  ;;  %v5314_v9 = vmul.f32 %v12226_v10, %v11789_v45  ;;  %v5315_v2 = vmul.f32 %v12226_v10, %v11797_v53 }
 0x71d   :  { %v5380_v38 = vadd.f32 %v12230_v34, %v5310_v62  ;;  %v5381_v19 = vadd.f32 %v12230_v34, %v5311_v18  ;;  %v12390_v8 = vadd.f32 %v12230_v34, %v5312_v55  ;;  %v12393_v49 = vadd.f32 %v12230_v34, %v5313_v33 }
 0x71e   :  { %v12396_v23 = vadd.f32 %v12230_v34, %v5314_v9  ;;  %v12399_v27 = vadd.f32 %v12230_v34, %v5315_v2  ;;  %v5440_v45 = vmax.f32 %v5376_v51, 0.0  ;;  %v5441_v56 = vmax.f32 %v5377_v44, 0.0 }
 0x71f   :  { %v5442_v39 = vmax.f32 %v5378_v60, 0.0  ;;  %v5443_v53 = vmax.f32 %v5379_v41, 0.0  ;;  %v5444_v26 = vmax.f32 %v5380_v38, 0.0  ;;  %v5445_v58 = vmax.f32 %v5381_v19, 0.0  ;;  %v15715_v19 = vld [vmem:[#allocation54_spill] sm:$0xff] }
 0x720   :  { %v5474_v43 = vmax.f32 %v12293_v46, 0.0  ;;  %v5475_v0 = vmax.f32 %v12296_v11, 0.0  ;;  %v5476_v63 = vmax.f32 %v12299_v48, 0.0  ;;  %v5477_v20 = vmax.f32 %v12302_v4, 0.0 }
 0x721   :  { %v5486_v25 = vmax.f32 %v12329_v47, 0.0  ;;  %v5487_v61 = vmax.f32 %v12332_v22, 0.0  ;;  %v5478_v15 = vmax.f32 %v12305_v40, 0.0  ;;  %v5479_v36 = vmax.f32 %v12308_v52, 0.0 }
 0x722   :  { %v5490_v31 = vmax.f32 %v5426_v29, 0.0  ;;  %v5491_v62 = vmax.f32 %v5427_v6, 0.0  ;;  %v5480_v18 = vmax.f32 %v12311_v42, 0.0  ;;  %v5481_v46 = vmax.f32 %v12314_v32, 0.0 }
 0x723   :  { %v5494_v55 = vmax.f32 %v5430_v24, 0.0  ;;  %v5495_v11 = vmax.f32 %v5431_v12, 0.0  ;;  %v5482_v48 = vmax.f32 %v12317_v54, 0.0  ;;  %v5483_v4 = vmax.f32 %v12320_v21, 0.0 }
 0x724   :  { %v5498_v33 = vmax.f32 %v5434_v50, 0.0  ;;  %v5499_v47 = vmax.f32 %v5435_v16, 0.0  ;;  %v5502_v51 = vmax.f32 %v5438_v17, 0.0  ;;  %v5503_v22 = vmax.f32 %v5439_v57, 0.0 }
 0x725   :  { %v5505_v44 = vpack.c.bf16 %v5443_v53, %v5442_v39  ;;  %v12413_v40 = vpack.c.bf16 %v5487_v61, %v5486_v25  ;;  %v12415_v52 = vpack.c.bf16 %v5491_v62, %v5490_v31  ;;  %v12417_v29 = vpack.c.bf16 %v5495_v11, %v5494_v55  ;;  %v15718_v53 = vld [vmem:[#allocation57_spill] sm:$0xff]  ;;  %v15721_v11 = vld [vmem:[#allocation36_spill] sm:$0xff] }
 0x726   :  { %v12419_v42 = vpack.c.bf16 %v5499_v47, %v5498_v33  ;;  %v5504_v32 = vpack.c.bf16 %v5441_v56, %v5440_v45  ;;  %v5484_v6 = vmax.f32 %v12323_v5, 0.0  ;;  %v5485_v54 = vmax.f32 %v12326_v30, 0.0  ;;  %v15717_v56 = vld [vmem:[#allocation55_spill] sm:$0xff]  ;;  %v15719_v62 = vld [vmem:[#allocation53_spill] sm:$0xff] }
 0x727   :  { %v5488_v21 = vmax.f32 %v12335_v37, 0.0  ;;  %v12424_v24 = vpack.c.bf16 %v5503_v22, %v5502_v51  ;;  %v5489_v12 = vmax.f32 %v12338_v59, 0.0  ;;  %v5492_v50 = vmax.f32 %v12343_v13, 0.0 }
 0x728   :  { %v5493_v16 = vmax.f32 %v12346_v1, 0.0  ;;  %8194 = vmatprep.mubr.msk.bf16.mxu0 %vm538_vm2, %v5504_v32  ;;  %v5506_v17 = vpack.c.bf16 %v5445_v58, %v5444_v26  ;;  %v5501_v57 = vmax.f32 %v12233_v7, 0.0  ;;  %v5496_v60 = vmax.f32 %v12351_v35, 0.0 }
 0x729   :  { %v5497_v5 = vmax.f32 %v12354_v28, 0.0  ;;  %v5500_v30 = vmax.f32 %v12359_v3, 0.0  ;;  %8195 = vmatmul.mubr.msk.bf16.vlgmr.msra.gmra.mxu0 %vm538_vm2, %v5505_v44  ;;  %v5446_v37 = vmax.f32 %v12390_v8, 0.0  ;;  %v5447_v59 = vmax.f32 %v12393_v49, 0.0  ;;  %v15716_v49 = vld [vmem:[#allocation56_spill] sm:$0xff] }
 0x72a   :  { %v5448_v13 = vmax.f32 %v12396_v23, 0.0  ;;  %v5449_v1 = vmax.f32 %v12399_v27, 0.0  ;;  %8198 = vmatprep.mubr.msk.bf16.mxu0 %vm538_vm2, %v5506_v17  ;;  %v12440_v41 = vpack.c.bf16 %v5475_v0, %v5474_v43  ;;  %v12442_v7 = vpack.c.bf16 %v5477_v20, %v5476_v63 }
 0x72b   :  { %v12444_v35 = vpack.c.bf16 %v5479_v36, %v5478_v15  ;;  %v12446_v28 = vpack.c.bf16 %v5481_v46, %v5480_v18  ;;  %v12448_v3 = vpack.c.bf16 %v5483_v4, %v5482_v48  ;;  %v12450_v9 = vpack.c.bf16 %v5485_v54, %v5484_v6  ;;  %v15720_v46 = vld [vmem:[#allocation58_spill] sm:$0xff]  ;;  %v15722_v4 = vld [vmem:[#allocation40_spill] sm:$0xff] }
 0x72c   :  { %v12452_v2 = vpack.c.bf16 %v5489_v12, %v5488_v21  ;;  %v12454_v38 = vpack.c.bf16 %v5493_v16, %v5492_v50  ;;  %v5316_v8 = vmul.f32 %v15715_v19, %v12226_v10  ;;  %v5317_v23 = vmul.f32 %v15716_v49, %v12226_v10  ;;  %v15723_v16 = vld [vmem:[#allocation59_spill] sm:$0xff] }
 0x72d   :  { %v12460_v27 = vpack.c.bf16 %v5497_v5, %v5496_v60  ;;  %v12462_v45 = vpack.c.bf16 %v5501_v57, %v5500_v30  ;;  %v5318_v39 = vmul.f32 %v12226_v10, %v15717_v56  ;;  %v5319_v26 = vmul.f32 %v12226_v10, %v15718_v53  ;;  %v15724_v57 = vld [vmem:[#allocation38_spill] sm:$0xff]  ;;  %v15725_v5 = vld [vmem:[#allocation39_spill] sm:$0xff] }
 0x72e   :  { %v5386_v58 = vadd.f32 %v12230_v34, %v5316_v8  ;;  %v5387_v43 = vadd.f32 %v12230_v34, %v5317_v23  ;;  %v5507_v0 = vpack.c.bf16 %v5447_v59, %v5446_v37  ;;  %v5508_v25 = vpack.c.bf16 %v5449_v1, %v5448_v13  ;;  %v15726_v37 = vld [vmem:[#allocation44_spill] sm:$0xff] }
 0x72f   :  { %v5388_v63 = vadd.f32 %v12230_v34, %v5318_v39  ;;  %v5389_v20 = vadd.f32 %v12230_v34, %v5319_v26  ;;  %v5320_v18 = vmul.f32 %v15719_v62, %v12226_v10  ;;  %v5321_v55 = vmul.f32 %v15720_v46, %v12226_v10 }
 0x730   :  { %v5450_v61 = vmax.f32 %v5386_v58, 0.0  ;;  %v5451_v15 = vmax.f32 %v5387_v43, 0.0  ;;  %v5322_v48 = vmul.f32 %v12226_v10, %v15721_v11  ;;  %v5323_v33 = vmul.f32 %v12226_v10, %v15722_v4  ;;  %v15727_v58 = vld [vmem:[#allocation37_spill] sm:$0xff] }
 0x731   :  { %8199 = vmatmul.mubr.msk.bf16.gmra.mxu0 %vm538_vm2, %v5507_v0  ;;  %v5452_v36 = vmax.f32 %v5388_v63, 0.0  ;;  %v5453_v31 = vmax.f32 %v5389_v20, 0.0  ;;  %v5390_v47 = vadd.f32 %v12230_v34, %v5320_v18  ;;  %v5391_v51 = vadd.f32 %v12230_v34, %v5321_v55  ;;  %v15728_v0 = vld [vmem:[#allocation42_spill] sm:$0xff]  ;;  %v15729_v20 = vld [vmem:[#allocation43_spill] sm:$0xff] }
 0x732   :  { %8202 = vmatprep.mubr.msk.bf16.mxu0 %vm538_vm2, %v5508_v25  ;;  %v5509_v22 = vpack.c.bf16 %v5451_v15, %v5450_v61  ;;  %v5392_v44 = vadd.f32 %v12230_v34, %v5322_v48  ;;  %v5393_v32 = vadd.f32 %v12230_v34, %v5323_v33  ;;  %v5324_v17 = vmul.f32 %v15723_v16, %v12226_v10  ;;  %v15730_v61 = vld [vmem:[#allocation48_spill] sm:$0xff] }
 0x733   :  { %v5510_v6 = vpack.c.bf16 %v5453_v31, %v5452_v36  ;;  %v5454_v54 = vmax.f32 %v5390_v47, 0.0  ;;  %v5455_v21 = vmax.f32 %v5391_v51, 0.0  ;;  %v5325_v60 = vmul.f32 %v15724_v57, %v12226_v10  ;;  %v15731_v47 = vld [vmem:[#allocation41_spill] sm:$0xff] }
 0x734   :  { %v5456_v12 = vmax.f32 %v5392_v44, 0.0  ;;  %v5457_v50 = vmax.f32 %v5393_v32, 0.0  ;;  %v5326_v30 = vmul.f32 %v12226_v10, %v15725_v5  ;;  %v5327_v59 = vmul.f32 %v12226_v10, %v15726_v37  ;;  %v15733_v32 = vld [vmem:[#allocation47_spill] sm:$0xff] }
 0x735   :  { %v5394_v13 = vadd.f32 %v12230_v34, %v5324_v17  ;;  %v5395_v1 = vadd.f32 %v12230_v34, %v5325_v60  ;;  %v5511_v19 = vpack.c.bf16 %v5455_v21, %v5454_v54  ;;  %v5328_v43 = vmul.f32 %v15727_v58, %v12226_v10  ;;  %v15734_v54 = vld [vmem:[#allocation52_spill] sm:$0xff] }
 0x736   :  { %v5396_v8 = vadd.f32 %v12230_v34, %v5326_v30  ;;  %v5397_v49 = vadd.f32 %v12230_v34, %v5327_v59  ;;  %v5512_v23 = vpack.c.bf16 %v5457_v50, %v5456_v12  ;;  %v5329_v63 = vmul.f32 %v15728_v0, %v12226_v10 }
 0x737   :  { %v5458_v56 = vmax.f32 %v5394_v13, 0.0  ;;  %v5459_v39 = vmax.f32 %v5395_v1, 0.0  ;;  %v5330_v25 = vmul.f32 %v12226_v10, %v15729_v20  ;;  %v5331_v15 = vmul.f32 %v12226_v10, %v15730_v61  ;;  %v15735_v13 = vld [vmem:[#allocation45_spill] sm:$0xff] }
 0x738   :  { %v5460_v53 = vmax.f32 %v5396_v8, 0.0  ;;  %v5461_v26 = vmax.f32 %v5397_v49, 0.0  ;;  %v5398_v36 = vadd.f32 %v12230_v34, %v5328_v43  ;;  %v5399_v31 = vadd.f32 %v12230_v34, %v5329_v63  ;;  %v15737_v49 = vld [vmem:[#allocation49_spill] sm:$0xff] }
 0x739   :  { %8203 = vmatmul.mubr.msk.bf16.gmra.mxu0 %vm538_vm2, %v5509_v22  ;;  %v5513_v62 = vpack.c.bf16 %v5459_v39, %v5458_v56  ;;  %v5400_v18 = vadd.f32 %v12230_v34, %v5330_v25  ;;  %v5401_v46 = vadd.f32 %v12230_v34, %v5331_v15  ;;  %v5332_v51 = vmul.f32 %v15731_v47, %v12226_v10  ;;  %v15732_v22 = vld [vmem:[#allocation46_spill] sm:$0xff]  ;;  %v15738_v56 = vld [vmem:[#allocation51_spill] sm:$0xff] }
 0x73a   :  { %8206 = vmatprep.mubr.msk.bf16.mxu0 %vm538_vm2, %v5510_v6  ;;  %v5514_v55 = vpack.c.bf16 %v5461_v26, %v5460_v53  ;;  %v5462_v11 = vmax.f32 %v5398_v36, 0.0  ;;  %v5463_v48 = vmax.f32 %v5399_v31, 0.0  ;;  %v5333_v44 = vmul.f32 %v15732_v22, %v12226_v10 }
 0x73b   :  { %v5464_v4 = vmax.f32 %v5400_v18, 0.0  ;;  %v5465_v33 = vmax.f32 %v5401_v46, 0.0  ;;  %v5334_v6 = vmul.f32 %v12226_v10, %v15733_v32  ;;  %v5335_v21 = vmul.f32 %v12226_v10, %v15734_v54 }
 0x73c   :  { %v5402_v12 = vadd.f32 %v12230_v34, %v5332_v51  ;;  %v5403_v50 = vadd.f32 %v12230_v34, %v5333_v44  ;;  %v5515_v16 = vpack.c.bf16 %v5463_v48, %v5462_v11  ;;  %v5336_v1 = vmul.f32 %v15735_v13, %v12226_v10 }
 0x73d   :  { %v5404_v17 = vadd.f32 %v12230_v34, %v5334_v6  ;;  %v5405_v57 = vadd.f32 %v12230_v34, %v5335_v21  ;;  %v5516_v60 = vpack.c.bf16 %v5465_v33, %v5464_v4  ;;  %v5339_v39 = vmul.f32 %v12226_v10, %v15738_v56 }
 0x73e   :  { %v5466_v5 = vmax.f32 %v5402_v12, 0.0  ;;  %v5467_v30 = vmax.f32 %v5403_v50, 0.0  ;;  %v5406_v53 = vadd.f32 %v12230_v34, %v5336_v1 }
 0x73f   :  { %v5468_v37 = vmax.f32 %v5404_v17, 0.0  ;;  %v5469_v59 = vmax.f32 %v5405_v57, 0.0  ;;  %v5409_v0 = vadd.f32 %v12230_v34, %v5339_v39 }
 0x740   :  { %v5517_v58 = vpack.c.bf16 %v5467_v30, %v5466_v5  ;;  %v5470_v20 = vmax.f32 %v5406_v53, 0.0 }
 0x741   :  { %8207 = vmatmul.mubr.msk.bf16.gmra.mxu0 %vm538_vm2, %v5511_v19  ;;  %v15736_v19 = vld [vmem:[#allocation50_spill] sm:$0xff]  ;;  %v5518_v63 = vpack.c.bf16 %v5469_v59, %v5468_v37  ;;  %v5473_v15 = vmax.f32 %v5409_v0, 0.0 }
 0x742   :  { %8210 = vmatprep.mubr.msk.bf16.mxu0 %vm538_vm2, %v5512_v23  ;;  %v5337_v8 = vmul.f32 %v15736_v19, %v12226_v10  ;;  %v5338_v23 = vmul.f32 %v12226_v10, %v15737_v49 }
 0x744   :  { %v5407_v26 = vadd.f32 %v12230_v34, %v5337_v8  ;;  %v5408_v43 = vadd.f32 %v12230_v34, %v5338_v23 }
 0x746   :  { %v5471_v25 = vmax.f32 %v5407_v26, 0.0  ;;  %v5472_v61 = vmax.f32 %v5408_v43, 0.0 }
 0x748   :  { %v5519_v36 = vpack.c.bf16 %v5471_v25, %v5470_v20  ;;  %v5520_v10 = vpack.c.bf16 %v5473_v15, %v5472_v61 }
 0x749   :  { %8211 = vmatmul.mubr.msk.bf16.gmra.mxu0 %vm538_vm2, %v5513_v62 }
 0x74a   :  { %8214 = vmatprep.mubr.msk.bf16.mxu0 %vm538_vm2, %v5514_v55 }
 0x751   :  { %8215 = vmatmul.mubr.msk.bf16.gmra.mxu0 %vm538_vm2, %v5515_v16 }
 0x752   :  { %8218 = vmatprep.mubr.msk.bf16.mxu0 %vm538_vm2, %v5516_v60 }
 0x759   :  { %8219 = vmatmul.mubr.msk.bf16.gmra.mxu0 %vm538_vm2, %v5517_v58 }
 0x75a   :  { %8222 = vmatprep.mubr.msk.bf16.mxu0 %vm538_vm2, %v5518_v63 }
 0x761   :  { %8223 = vmatmul.mubr.msk.bf16.gmra.mxu0 %vm538_vm2, %v5519_v36 }
 0x762   :  { %8226 = vmatprep.mubr.msk.bf16.mxu0 %vm538_vm2, %v5520_v10 }
 0x769   :  { %8227 = vmatmul.mubr.msk.bf16.gmra.mxu0 %vm538_vm2, %v12440_v41 }
 0x76a   :  { %8230 = vmatprep.mubr.msk.bf16.mxu0 %vm538_vm2, %v12442_v7 }
 0x771   :  { %8231 = vmatmul.mubr.msk.bf16.gmra.mxu0 %vm538_vm2, %v12444_v35 }
 0x772   :  { %8234 = vmatprep.mubr.msk.bf16.mxu0 %vm538_vm2, %v12446_v28 }
 0x779   :  { %8235 = vmatmul.mubr.msk.bf16.gmra.mxu0 %vm538_vm2, %v12448_v3 }
 0x77a   :  { %8238 = vmatprep.mubr.msk.bf16.mxu0 %vm538_vm2, %v12450_v9 }
 0x781   :  { %8239 = vmatmul.mubr.msk.bf16.gmra.mxu0 %vm538_vm2, %v12413_v40 }
 0x782   :  { %8242 = vmatprep.mubr.msk.bf16.mxu0 %vm538_vm2, %v12452_v2 }
 0x789   :  { %8243 = vmatmul.mubr.msk.bf16.gmra.mxu0 %vm538_vm2, %v12415_v52 }
 0x78a   :  { %8246 = vmatprep.mubr.msk.bf16.mxu0 %vm538_vm2, %v12454_v38 }
 0x791   :  { %8247 = vmatmul.mubr.msk.bf16.gmra.mxu0 %vm538_vm2, %v12417_v29 }
 0x792   :  { %8250 = vmatprep.mubr.msk.bf16.mxu0 %vm538_vm2, %v12460_v27 }
 0x799   :  { %8251 = vmatmul.mubr.msk.bf16.gmra.mxu0 %vm538_vm2, %v12419_v42 }
 0x79a   :  { %8254 = vmatprep.mubr.msk.bf16.mxu0 %vm538_vm2, %v12462_v45 }
 0x7a1   :  { %8255 = vmatmul.mubr.msk.bf16.gmra.mxu0 %vm538_vm2, %v12424_v24 }
 0x7e9   :  { %v12576_v34 = vpop.f32.mrf.mxu0 }
 0x7ea   :  { %v6061_v42 = vmul.f32 %v12576_v34, %v12576_v34  ;;  %v5928_v9 = vsel %vm538_vm2, %v12576_v34, 0.0 }
 0x7eb   :  { %v12578_v40 = vpop.f32.mrf.mxu0 }
 0x7ec   :  { %v6059_v29 = vmul.f32 %v12578_v40, %v12578_v40  ;;  %v5925_v7 = vsel %vm538_vm2, %v12578_v40, 0.0  ;;  %v6126_v18 = vsel %vm538_vm2, %v6061_v42, 0.0 }
 0x7ed   :  { %v12580_v52 = vpop.f32.mrf.mxu0 }
 0x7ee   :  { %v6123_v2 = vsel %vm538_vm2, %v6059_v29, 0.0  ;;  %v6062_v38 = vmul.f32 %v12580_v52, %v12580_v52  ;;  %v5930_v46 = vsel %vm538_vm2, %v12580_v52, 0.0 }
 0x7ef   :  { %v12584_v41 = vpop.f32.mrf.mxu0 }
 0x7f0   :  { %v5926_v24 = vsel %vm538_vm2, %v12584_v41, 0.0  ;;  %v6060_v35 = vmul.f32 %v12584_v41, %v12584_v41  ;;  %v6128_v33 = vsel %vm538_vm2, %v6062_v38, 0.0 }
 0x7f1   :  { %v5927_v28 = vadd.f32 %v5926_v24, %v5925_v7  ;;  %v12594_v3 = vpop.f32.mrf.mxu0 }
 0x7f2   :  { %v6124_v27 = vsel %vm538_vm2, %v6060_v35, 0.0  ;;  %v6065_v32 = vmul.f32 %v12594_v3, %v12594_v3  ;;  %v5936_v17 = vsel %vm538_vm2, %v12594_v3, 0.0 }
 0x7f3   :  { %v5929_v45 = vadd.f32 %v5928_v9, %v5927_v28  ;;  %v6125_v31 = vadd.f32 %v6124_v27, %v6123_v2  ;;  %v12602_v62 = vpop.f32.mrf.mxu0 }
 0x7f4   :  { %v6063_v55 = vmul.f32 %v12602_v62, %v12602_v62  ;;  %v5932_v47 = vsel %vm538_vm2, %v12602_v62, 0.0  ;;  %v6134_v59 = vsel %vm538_vm2, %v6065_v32, 0.0 }
 0x7f5   :  { %v6127_v11 = vadd.f32 %v6126_v18, %v6125_v31  ;;  %v5931_v48 = vadd.f32 %v5930_v46, %v5929_v45  ;;  %v12609_v4 = vpop.f32.mrf.mxu0 }
 0x7f6   :  { %v6130_v6 = vsel %vm538_vm2, %v6063_v55, 0.0  ;;  %v6066_v57 = vmul.f32 %v12609_v4, %v12609_v4  ;;  %v5938_v13 = vsel %vm538_vm2, %v12609_v4, 0.0 }
 0x7f7   :  { %v5933_v51 = vadd.f32 %v5932_v47, %v5931_v48  ;;  %v6129_v22 = vadd.f32 %v6128_v33, %v6127_v11  ;;  %v12614_v44 = vpop.f32.mrf.mxu0 }
 0x7f8   :  { %v5934_v54 = vsel %vm538_vm2, %v12614_v44, 0.0  ;;  %v6064_v21 = vmul.f32 %v12614_v44, %v12614_v44  ;;  %v6136_v23 = vsel %vm538_vm2, %v6066_v57, 0.0 }
 0x7f9   :  { %v6131_v12 = vadd.f32 %v6130_v6, %v6129_v22  ;;  %v5935_v50 = vadd.f32 %v5934_v54, %v5933_v51  ;;  %v12623_v16 = vpop.f32.mrf.mxu0 }
 0x7fa   :  { %v6132_v60 = vsel %vm538_vm2, %v6064_v21, 0.0  ;;  %v6069_v58 = vmul.f32 %v12623_v16, %v12623_v16  ;;  %v5944_v15 = vsel %vm538_vm2, %v12623_v16, 0.0 }
 0x7fb   :  { %v5937_v5 = vadd.f32 %v5936_v17, %v5935_v50  ;;  %v6133_v30 = vadd.f32 %v6132_v60, %v6131_v12  ;;  %v12630_v37 = vpop.f32.mrf.mxu0 }
 0x7fc   :  { %v6067_v1 = vmul.f32 %v12630_v37, %v12630_v37  ;;  %v5940_v56 = vsel %vm538_vm2, %v12630_v37, 0.0  ;;  %v6142_v24 = vsel %vm538_vm2, %v6069_v58, 0.0 }
 0x7fd   :  { %v6135_v19 = vadd.f32 %v6134_v59, %v6133_v30  ;;  %v5939_v8 = vadd.f32 %v5938_v13, %v5937_v5  ;;  %v12637_v49 = vpop.f32.mrf.mxu0 }
 0x7fe   :  { %v6138_v43 = vsel %vm538_vm2, %v6067_v1, 0.0  ;;  %v6070_v36 = vmul.f32 %v12637_v49, %v12637_v49  ;;  %v5946_v35 = vsel %vm538_vm2, %v12637_v49, 0.0 }
 0x7ff   :  { %v5941_v39 = vadd.f32 %v5940_v56, %v5939_v8  ;;  %v6137_v53 = vadd.f32 %v6136_v23, %v6135_v19  ;;  %v12642_v26 = vpop.f32.mrf.mxu0 }
 0x800   :  { %v5942_v0 = vsel %vm538_vm2, %v12642_v26, 0.0  ;;  %v6068_v63 = vmul.f32 %v12642_v26, %v12642_v26  ;;  %v6144_v27 = vsel %vm538_vm2, %v6070_v36, 0.0 }
 0x801   :  { %v6139_v20 = vadd.f32 %v6138_v43, %v6137_v53  ;;  %v5943_v25 = vadd.f32 %v5942_v0, %v5941_v39  ;;  %v12651_v61 = vpop.f32.mrf.mxu0 }
 0x802   :  { %15739 = vst [vmem:[#allocation61_spill] sm:$0xff] %v12651_v61  ;;  %v6140_v10 = vsel %vm538_vm2, %v6068_v63, 0.0  ;;  %v6073_v55 = vmul.f32 %v12651_v61, %v12651_v61  ;;  %v5952_v32 = vsel %vm538_vm2, %v12651_v61, 0.0 }
 0x803   :  { %v5945_v29 = vadd.f32 %v5944_v15, %v5943_v25  ;;  %v6141_v42 = vadd.f32 %v6140_v10, %v6139_v20  ;;  %v12658_v7 = vpop.f32.mrf.mxu0 }
 0x804   :  { %v6071_v28 = vmul.f32 %v12658_v7, %v12658_v7  ;;  %v5948_v45 = vsel %vm538_vm2, %v12658_v7, 0.0  ;;  %v6150_v17 = vsel %vm538_vm2, %v6073_v55, 0.0 }
 0x805   :  { %v6143_v9 = vadd.f32 %v6142_v24, %v6141_v42  ;;  %v5947_v2 = vadd.f32 %v5946_v35, %v5945_v29  ;;  %v12665_v38 = vpop.f32.mrf.mxu0 }
 0x806   :  { %15740 = vst [vmem:[#allocation54_spill] sm:$0xff] %v12665_v38  ;;  %v6146_v11 = vsel %vm538_vm2, %v6071_v28, 0.0  ;;  %v6074_v6 = vmul.f32 %v12665_v38, %v12665_v38  ;;  %v5954_v57 = vsel %vm538_vm2, %v12665_v38, 0.0 }
 0x807   :  { %v5949_v31 = vadd.f32 %v5948_v45, %v5947_v2  ;;  %v6145_v18 = vadd.f32 %v6144_v27, %v6143_v9  ;;  %v12670_v46 = vpop.f32.mrf.mxu0 }
 0x808   :  { %15741 = vst [vmem:[#allocation56_spill] sm:$0xff] %v12670_v46  ;;  %v5950_v48 = vsel %vm538_vm2, %v12670_v46, 0.0  ;;  %v6072_v33 = vmul.f32 %v12670_v46, %v12670_v46  ;;  %v6152_v13 = vsel %vm538_vm2, %v6074_v6, 0.0 }
 0x809   :  { %v6147_v47 = vadd.f32 %v6146_v11, %v6145_v18  ;;  %v5951_v51 = vadd.f32 %v5950_v48, %v5949_v31  ;;  %v12679_v22 = vpop.f32.mrf.mxu0 }
 0x80a   :  { %15742 = vst [vmem:[#allocation55_spill] sm:$0xff] %v12679_v22  ;;  %v6148_v54 = vsel %vm538_vm2, %v6072_v33, 0.0  ;;  %v6077_v56 = vmul.f32 %v12679_v22, %v12679_v22  ;;  %v5960_v20 = vsel %vm538_vm2, %v12679_v22, 0.0 }
 0x80b   :  { %v5953_v21 = vadd.f32 %v5952_v32, %v5951_v51  ;;  %v6149_v12 = vadd.f32 %v6148_v54, %v6147_v47  ;;  %v12686_v50 = vpop.f32.mrf.mxu0 }
 0x80c   :  { %15743 = vst [vmem:[#allocation57_spill] sm:$0xff] %v12686_v50  ;;  %v6075_v60 = vmul.f32 %v12686_v50, %v12686_v50  ;;  %v5956_v1 = vsel %vm538_vm2, %v12686_v50, 0.0  ;;  %v6158_v42 = vsel %vm538_vm2, %v6077_v56, 0.0 }
 0x80d   :  { %v6151_v5 = vadd.f32 %v6150_v17, %v6149_v12  ;;  %v5955_v30 = vadd.f32 %v5954_v57, %v5953_v21  ;;  %v12693_v59 = vpop.f32.mrf.mxu0 }
 0x80e   :  { %15744 = vst [vmem:[#allocation53_spill] sm:$0xff] %v12693_v59  ;;  %v6154_v39 = vsel %vm538_vm2, %v6075_v60, 0.0  ;;  %v6078_v25 = vmul.f32 %v12693_v59, %v12693_v59  ;;  %v5962_v24 = vsel %vm538_vm2, %v12693_v59, 0.0 }
 0x80f   :  { %v5957_v19 = vadd.f32 %v5956_v1, %v5955_v30  ;;  %v6153_v8 = vadd.f32 %v6152_v13, %v6151_v5  ;;  %v12698_v23 = vpop.f32.mrf.mxu0 }
 0x810   :  { %15745 = vst [vmem:[#allocation58_spill] sm:$0xff] %v12698_v23  ;;  %v5958_v53 = vsel %vm538_vm2, %v12698_v23, 0.0  ;;  %v6076_v58 = vmul.f32 %v12698_v23, %v12698_v23  ;;  %v6160_v27 = vsel %vm538_vm2, %v6078_v25, 0.0 }
 0x811   :  { %v6155_v43 = vadd.f32 %v6154_v39, %v6153_v8  ;;  %v5959_v0 = vadd.f32 %v5958_v53, %v5957_v19  ;;  %v12707_v63 = vpop.f32.mrf.mxu0 }
 0x812   :  { %15746 = vst [vmem:[#allocation36_spill] sm:$0xff] %v12707_v63  ;;  %v6156_v15 = vsel %vm538_vm2, %v6076_v58, 0.0  ;;  %v6081_v11 = vmul.f32 %v12707_v63, %v12707_v63  ;;  %v5968_v54 = vsel %vm538_vm2, %v12707_v63, 0.0 }
 0x813   :  { %v5961_v36 = vadd.f32 %v5960_v20, %v5959_v0  ;;  %v6157_v10 = vadd.f32 %v6156_v15, %v6155_v43  ;;  %v12714_v29 = vpop.f32.mrf.mxu0 }
 0x814   :  { %15747 = vst [vmem:[#allocation40_spill] sm:$0xff] %v12714_v29  ;;  %v6079_v35 = vmul.f32 %v12714_v29, %v12714_v29  ;;  %v5964_v45 = vsel %vm538_vm2, %v12714_v29, 0.0  ;;  %v6166_v5 = vsel %vm538_vm2, %v6081_v11, 0.0 }
 0x815   :  { %v6159_v28 = vadd.f32 %v6158_v42, %v6157_v10  ;;  %v5963_v9 = vadd.f32 %v5962_v24, %v5961_v36  ;;  %v12721_v2 = vpop.f32.mrf.mxu0 }
 0x816   :  { %15748 = vst [vmem:[#allocation59_spill] sm:$0xff] %v12721_v2  ;;  %v6162_v48 = vsel %vm538_vm2, %v6079_v35, 0.0  ;;  %v6082_v21 = vmul.f32 %v12721_v2, %v12721_v2  ;;  %v5970_v30 = vsel %vm538_vm2, %v12721_v2, 0.0 }
 0x817   :  { %v5965_v31 = vadd.f32 %v5964_v45, %v5963_v9  ;;  %v6161_v18 = vadd.f32 %v6160_v27, %v6159_v28  ;;  %v12726_v55 = vpop.f32.mrf.mxu0 }
 0x818   :  { %15749 = vst [vmem:[#allocation38_spill] sm:$0xff] %v12726_v55  ;;  %v5966_v33 = vsel %vm538_vm2, %v12726_v55, 0.0  ;;  %v6080_v47 = vmul.f32 %v12726_v55, %v12726_v55  ;;  %v6168_v56 = vsel %vm538_vm2, %v6082_v21, 0.0 }
 0x819   :  { %v6163_v51 = vadd.f32 %v6162_v48, %v6161_v18  ;;  %v5967_v32 = vadd.f32 %v5966_v33, %v5965_v31  ;;  %v12735_v6 = vpop.f32.mrf.mxu0 }
 0x81a   :  { %15750 = vst [vmem:[#allocation39_spill] sm:$0xff] %v12735_v6  ;;  %v6164_v12 = vsel %vm538_vm2, %v6080_v47, 0.0  ;;  %v6085_v0 = vmul.f32 %v12735_v6, %v12735_v6  ;;  %v5976_v24 = vsel %vm538_vm2, %v12735_v6, 0.0 }
 0x81b   :  { %v5969_v17 = vadd.f32 %v5968_v54, %v5967_v32  ;;  %v6165_v57 = vadd.f32 %v6164_v12, %v6163_v51  ;;  %v12742_v60 = vpop.f32.mrf.mxu0 }
 0x81c   :  { %15751 = vst [vmem:[#allocation44_spill] sm:$0xff] %v12742_v60  ;;  %v6083_v13 = vmul.f32 %v12742_v60, %v12742_v60  ;;  %v5972_v39 = vsel %vm538_vm2, %v12742_v60, 0.0  ;;  %v6174_v31 = vsel %vm538_vm2, %v6085_v0, 0.0 }
 0x81d   :  { %v6167_v1 = vadd.f32 %v6166_v5, %v6165_v57  ;;  %v5971_v19 = vadd.f32 %v5970_v30, %v5969_v17  ;;  %v12749_v8 = vpop.f32.mrf.mxu0 }
 0x81e   :  { %15752 = vst [vmem:[#allocation37_spill] sm:$0xff] %v12749_v8  ;;  %v6170_v20 = vsel %vm538_vm2, %v6083_v13, 0.0  ;;  %v6086_v35 = vmul.f32 %v12749_v8, %v12749_v8  ;;  %v5978_v18 = vsel %vm538_vm2, %v12749_v8, 0.0 }
 0x81f   :  { %v5973_v53 = vadd.f32 %v5972_v39, %v5971_v19  ;;  %v6169_v58 = vadd.f32 %v6168_v56, %v6167_v1  ;;  %v12754_v43 = vpop.f32.mrf.mxu0 }
 0x820   :  { %15753 = vst [vmem:[#allocation42_spill] sm:$0xff] %v12754_v43  ;;  %v5974_v25 = vsel %vm538_vm2, %v12754_v43, 0.0  ;;  %v6084_v15 = vmul.f32 %v12754_v43, %v12754_v43  ;;  %v6176_v51 = vsel %vm538_vm2, %v6086_v35, 0.0 }
 0x821   :  { %v6171_v36 = vadd.f32 %v6170_v20, %v6169_v58  ;;  %v5975_v10 = vadd.f32 %v5974_v25, %v5973_v53  ;;  %v12763_v42 = vpop.f32.mrf.mxu0 }
 0x822   :  { %15754 = vst [vmem:[#allocation43_spill] sm:$0xff] %v12763_v42  ;;  %v6172_v28 = vsel %vm538_vm2, %v6084_v15, 0.0  ;;  %v6089_v17 = vmul.f32 %v12763_v42, %v12763_v42  ;;  %v5984_v56 = vsel %vm538_vm2, %v12763_v42, 0.0 }
 0x823   :  { %v5977_v9 = vadd.f32 %v5976_v24, %v5975_v10  ;;  %v6173_v27 = vadd.f32 %v6172_v28, %v6171_v36  ;;  %v12770_v45 = vpop.f32.mrf.mxu0 }
 0x824   :  { %15755 = vst [vmem:[#allocation48_spill] sm:$0xff] %v12770_v45  ;;  %v6087_v11 = vmul.f32 %v12770_v45, %v12770_v45  ;;  %v5980_v32 = vsel %vm538_vm2, %v12770_v45, 0.0  ;;  %v6182_v25 = vsel %vm538_vm2, %v6089_v17, 0.0 }
 0x825   :  { %v6175_v48 = vadd.f32 %v6174_v31, %v6173_v27  ;;  %v5979_v33 = vadd.f32 %v5978_v18, %v5977_v9  ;;  %v12777_v47 = vpop.f32.mrf.mxu0 }
 0x826   :  { %15756 = vst [vmem:[#allocation41_spill] sm:$0xff] %v12777_v47  ;;  %v6178_v57 = vsel %vm538_vm2, %v6087_v11, 0.0  ;;  %v6090_v39 = vmul.f32 %v12777_v47, %v12777_v47  ;;  %v5986_v15 = vsel %vm538_vm2, %v12777_v47, 0.0 }
 0x827   :  { %v5981_v54 = vadd.f32 %v5980_v32, %v5979_v33  ;;  %v6177_v21 = vadd.f32 %v6176_v51, %v6175_v48  ;;  %v12782_v12 = vpop.f32.mrf.mxu0 }
 0x828   :  { %15757 = vst [vmem:[#allocation46_spill] sm:$0xff] %v12782_v12  ;;  %v5982_v5 = vsel %vm538_vm2, %v12782_v12, 0.0  ;;  %v6088_v30 = vmul.f32 %v12782_v12, %v12782_v12  ;;  %v6184_v28 = vsel %vm538_vm2, %v6090_v39, 0.0 }
 0x829   :  { %v6179_v13 = vadd.f32 %v6178_v57, %v6177_v21  ;;  %v5983_v1 = vadd.f32 %v5982_v5, %v5981_v54  ;;  %v12791_v19 = vpop.f32.mrf.mxu0 }
 0x82a   :  { %v6180_v53 = vsel %vm538_vm2, %v6088_v30, 0.0  ;;  %v6093_v11 = vmul.f32 %v12791_v19, %v12791_v19  ;;  %v5992_v17 = vsel %vm538_vm2, %v12791_v19, 0.0 }
 0x82b   :  { %v5985_v58 = vadd.f32 %v5984_v56, %v5983_v1  ;;  %v6181_v0 = vadd.f32 %v6180_v53, %v6179_v13  ;;  %v12798_v20 = vpop.f32.mrf.mxu0 }
 0x82c   :  { %v6091_v36 = vmul.f32 %v12798_v20, %v12798_v20  ;;  %v5988_v9 = vsel %vm538_vm2, %v12798_v20, 0.0  ;;  %v6190_v56 = vsel %vm538_vm2, %v6093_v11, 0.0 }
 0x82d   :  { %v6183_v10 = vadd.f32 %v6182_v25, %v6181_v0  ;;  %v5987_v24 = vadd.f32 %v5986_v15, %v5985_v58  ;;  %v12805_v35 = vpop.f32.mrf.mxu0 }
 0x82e   :  { %v6186_v48 = vsel %vm538_vm2, %v6091_v36, 0.0  ;;  %v6094_v57 = vmul.f32 %v12805_v35, %v12805_v35  ;;  %v5994_v39 = vsel %vm538_vm2, %v12805_v35, 0.0 }
 0x82f   :  { %v5989_v27 = vadd.f32 %v5988_v9, %v5987_v24  ;;  %v6185_v31 = vadd.f32 %v6184_v28, %v6183_v10  ;;  %v12810_v18 = vpop.f32.mrf.mxu0 }
 0x830   :  { %v5990_v33 = vsel %vm538_vm2, %v12810_v18, 0.0  ;;  %v6092_v51 = vmul.f32 %v12810_v18, %v12810_v18  ;;  %v6192_v15 = vsel %vm538_vm2, %v6094_v57, 0.0 }
 0x831   :  { %v6187_v32 = vadd.f32 %v6186_v48, %v6185_v31  ;;  %v5991_v54 = vadd.f32 %v5990_v33, %v5989_v27  ;;  %v12819_v21 = vpop.f32.mrf.mxu0 }
 0x832   :  { %v6188_v5 = vsel %vm538_vm2, %v6092_v51, 0.0  ;;  %v6097_v9 = vmul.f32 %v12819_v21, %v12819_v21 }
 0x833   :  { %v5993_v30 = vadd.f32 %v5992_v17, %v5991_v54  ;;  %v6189_v13 = vadd.f32 %v6188_v5, %v6187_v32  ;;  %v12826_v1 = vpop.f32.mrf.mxu0  ;;  %v6000_v32 = vsel %vm538_vm2, %v12819_v21, 0.0 }
 0x834   :  { %v6095_v53 = vmul.f32 %v12826_v1, %v12826_v1  ;;  %v5996_v36 = vsel %vm538_vm2, %v12826_v1, 0.0 }
 0x835   :  { %v6191_v58 = vadd.f32 %v6190_v56, %v6189_v13  ;;  %v5995_v0 = vadd.f32 %v5994_v39, %v5993_v30  ;;  %v12833_v25 = vpop.f32.mrf.mxu0  ;;  %v6198_v13 = vsel %vm538_vm2, %v6097_v9, 0.0 }
 0x836   :  { %v6194_v27 = vsel %vm538_vm2, %v6095_v53, 0.0  ;;  %v6098_v54 = vmul.f32 %v12833_v25, %v12833_v25  ;;  %v6002_v56 = vsel %vm538_vm2, %v12833_v25, 0.0 }
 0x837   :  { %v5997_v10 = vadd.f32 %v5996_v36, %v5995_v0  ;;  %v6193_v24 = vadd.f32 %v6192_v15, %v6191_v58  ;;  %v12838_v28 = vpop.f32.mrf.mxu0 }
 0x838   :  { %v5998_v31 = vsel %vm538_vm2, %v12838_v28, 0.0  ;;  %v6096_v11 = vmul.f32 %v12838_v28, %v12838_v28  ;;  %v6200_v15 = vsel %vm538_vm2, %v6098_v54, 0.0 }
 0x839   :  { %v6195_v48 = vadd.f32 %v6194_v27, %v6193_v24  ;;  %v5999_v33 = vadd.f32 %v5998_v31, %v5997_v10  ;;  %v12847_v51 = vpop.f32.mrf.mxu0 }
 0x83a   :  { %v6196_v17 = vsel %vm538_vm2, %v6096_v11, 0.0  ;;  %v6101_v9 = vmul.f32 %v12847_v51, %v12847_v51 }
 0x83b   :  { %v6001_v57 = vadd.f32 %v6000_v32, %v5999_v33  ;;  %v6197_v5 = vadd.f32 %v6196_v17, %v6195_v48  ;;  %v12854_v30 = vpop.f32.mrf.mxu0  ;;  %v6008_v17 = vsel %vm538_vm2, %v12847_v51, 0.0 }
 0x83c   :  { %v6099_v39 = vmul.f32 %v12854_v30, %v12854_v30  ;;  %v6004_v36 = vsel %vm538_vm2, %v12854_v30, 0.0 }
 0x83d   :  { %v6199_v53 = vadd.f32 %v6198_v13, %v6197_v5  ;;  %v6003_v58 = vadd.f32 %v6002_v56, %v6001_v57  ;;  %v12861_v0 = vpop.f32.mrf.mxu0 }
 0x83e   :  { %v6202_v31 = vsel %vm538_vm2, %v6099_v39, 0.0  ;;  %v6102_v57 = vmul.f32 %v12861_v0, %v12861_v0 }
 0x83f   :  { %v6005_v10 = vadd.f32 %v6004_v36, %v6003_v58  ;;  %v6201_v24 = vadd.f32 %v6200_v15, %v6199_v53  ;;  %v12866_v27 = vpop.f32.mrf.mxu0  ;;  %v6206_v53 = vsel %vm538_vm2, %v6101_v9, 0.0  ;;  %v6010_v58 = vsel %vm538_vm2, %v12861_v0, 0.0 }
 0x840   :  { %v6006_v11 = vsel %vm538_vm2, %v12866_v27, 0.0  ;;  %v6100_v48 = vmul.f32 %v12866_v27, %v12866_v27 }
 0x841   :  { %v6203_v33 = vadd.f32 %v6202_v31, %v6201_v24  ;;  %v6007_v32 = vadd.f32 %v6006_v11, %v6005_v10  ;;  %v12875_v54 = vpop.f32.mrf.mxu0  ;;  %v6208_v31 = vsel %vm538_vm2, %v6102_v57, 0.0 }
 0x842   :  { %v6204_v5 = vsel %vm538_vm2, %v6100_v48, 0.0  ;;  %v6105_v9 = vmul.f32 %v12875_v54, %v12875_v54 }
 0x843   :  { %v6009_v13 = vadd.f32 %v6008_v17, %v6007_v32  ;;  %v6205_v56 = vadd.f32 %v6204_v5, %v6203_v33  ;;  %v12882_v39 = vpop.f32.mrf.mxu0 }
 0x844   :  { %v6103_v15 = vmul.f32 %v12882_v39, %v12882_v39  ;;  %v6012_v11 = vsel %vm538_vm2, %v12882_v39, 0.0  ;;  %v6214_v47 = vsel %vm538_vm2, %v6105_v9, 0.0 }
 0x845   :  { %v6207_v36 = vadd.f32 %v6206_v53, %v6205_v56  ;;  %v6011_v10 = vadd.f32 %v6010_v58, %v6009_v13  ;;  %v12889_v24 = vpop.f32.mrf.mxu0  ;;  %v6016_v58 = vsel %vm538_vm2, %v12875_v54, 0.0 }
 0x846   :  { %v6210_v17 = vsel %vm538_vm2, %v6103_v15, 0.0 }
 0x847   :  { %v6013_v48 = vadd.f32 %v6012_v11, %v6011_v10  ;;  %v6209_v33 = vadd.f32 %v6208_v31, %v6207_v36  ;;  %v12894_v32 = vpop.f32.mrf.mxu0  ;;  %v6106_v36 = vmul.f32 %v12889_v24, %v12889_v24 }
 0x848   :  { %v6014_v5 = vsel %vm538_vm2, %v12894_v32, 0.0  ;;  %v6104_v13 = vmul.f32 %v12894_v32, %v12894_v32 }
 0x849   :  { %v6211_v56 = vadd.f32 %v6210_v17, %v6209_v33  ;;  %v6015_v57 = vadd.f32 %v6014_v5, %v6013_v48  ;;  %v12903_v53 = vpop.f32.mrf.mxu0  ;;  %v6018_v33 = vsel %vm538_vm2, %v12889_v24, 0.0  ;;  %v6216_v12 = vsel %vm538_vm2, %v6106_v36, 0.0 }
 0x84a   :  { %v6212_v10 = vsel %vm538_vm2, %v6104_v13, 0.0  ;;  %v6109_v9 = vmul.f32 %v12903_v53, %v12903_v53 }
 0x84b   :  { %v6017_v31 = vadd.f32 %v6016_v58, %v6015_v57  ;;  %v6213_v15 = vadd.f32 %v6212_v10, %v6211_v56  ;;  %v12910_v11 = vpop.f32.mrf.mxu0 }
 0x84c   :  { %v6107_v48 = vmul.f32 %v12910_v11, %v12910_v11  ;;  %v6020_v13 = vsel %vm538_vm2, %v12910_v11, 0.0  ;;  %v6222_v8 = vsel %vm538_vm2, %v6109_v9, 0.0 }
 0x84d   :  { %v6215_v17 = vadd.f32 %v6214_v47, %v6213_v15  ;;  %v6019_v5 = vadd.f32 %v6018_v33, %v6017_v31  ;;  %v12917_v42 = vpop.f32.mrf.mxu0 }
 0x84e   :  { %v6218_v10 = vsel %vm538_vm2, %v6107_v48, 0.0 }
 0x84f   :  { %v6021_v56 = vadd.f32 %v6020_v13, %v6019_v5  ;;  %v6217_v57 = vadd.f32 %v6216_v12, %v6215_v17  ;;  %v12922_v58 = vpop.f32.mrf.mxu0  ;;  %v6024_v12 = vsel %vm538_vm2, %v12903_v53, 0.0  ;;  %v6110_v17 = vmul.f32 %v12917_v42, %v12917_v42 }
 0x850   :  { %v6022_v47 = vsel %vm538_vm2, %v12922_v58, 0.0  ;;  %v6108_v31 = vmul.f32 %v12922_v58, %v12922_v58 }
 0x851   :  { %v6219_v15 = vadd.f32 %v6218_v10, %v6217_v57  ;;  %v6023_v36 = vadd.f32 %v6022_v47, %v6021_v56  ;;  %v12931_v33 = vpop.f32.mrf.mxu0  ;;  %v6026_v57 = vsel %vm538_vm2, %v12917_v42, 0.0  ;;  %v6224_v43 = vsel %vm538_vm2, %v6110_v17, 0.0 }
 0x852   :  { %v6220_v5 = vsel %vm538_vm2, %v6108_v31, 0.0  ;;  %v6113_v9 = vmul.f32 %v12931_v33, %v12931_v33 }
 0x853   :  { %v6025_v13 = vadd.f32 %v6024_v12, %v6023_v36  ;;  %v6221_v48 = vadd.f32 %v6220_v5, %v6219_v15  ;;  %v12938_v45 = vpop.f32.mrf.mxu0 }
 0x854   :  { %v6111_v56 = vmul.f32 %v12938_v45, %v12938_v45  ;;  %v6028_v31 = vsel %vm538_vm2, %v12938_v45, 0.0  ;;  %v6230_v2 = vsel %vm538_vm2, %v6113_v9, 0.0 }
 0x855   :  { %v6223_v10 = vadd.f32 %v6222_v8, %v6221_v48  ;;  %v6027_v47 = vadd.f32 %v6026_v57, %v6025_v13  ;;  %v12945_v6 = vpop.f32.mrf.mxu0 }
 0x856   :  { %v6226_v5 = vsel %vm538_vm2, %v6111_v56, 0.0 }
 0x857   :  { %v6029_v15 = vadd.f32 %v6028_v31, %v6027_v47  ;;  %v6225_v36 = vadd.f32 %v6224_v43, %v6223_v10  ;;  %v12950_v12 = vpop.f32.mrf.mxu0  ;;  %v6032_v43 = vsel %vm538_vm2, %v12931_v33, 0.0  ;;  %v6114_v10 = vmul.f32 %v12945_v6, %v12945_v6 }
 0x858   :  { %v6030_v8 = vsel %vm538_vm2, %v12950_v12, 0.0  ;;  %v6112_v13 = vmul.f32 %v12950_v12, %v12950_v12 }
 0x859   :  { %v6227_v48 = vadd.f32 %v6226_v5, %v6225_v36  ;;  %v6031_v17 = vadd.f32 %v6030_v8, %v6029_v15  ;;  %v12959_v57 = vpop.f32.mrf.mxu0  ;;  %v6034_v36 = vsel %vm538_vm2, %v12945_v6, 0.0  ;;  %v6232_v55 = vsel %vm538_vm2, %v6114_v10, 0.0 }
 0x85a   :  { %15758 = vst [vmem:[#allocation47_spill] sm:$0xff] %v12959_v57  ;;  %v6228_v47 = vsel %vm538_vm2, %v6112_v13, 0.0  ;;  %v6117_v9 = vmul.f32 %v12959_v57, %v12959_v57 }
 0x85b   :  { %v6033_v31 = vadd.f32 %v6032_v43, %v6031_v17  ;;  %v6229_v56 = vadd.f32 %v6228_v47, %v6227_v48  ;;  %v12966_v60 = vpop.f32.mrf.mxu0 }
 0x85c   :  { %v6115_v15 = vmul.f32 %v12966_v60, %v12966_v60  ;;  %v6036_v13 = vsel %vm538_vm2, %v12966_v60, 0.0  ;;  %v6238_v59 = vsel %vm538_vm2, %v6117_v9, 0.0 }
 0x85d   :  { %v6231_v5 = vadd.f32 %v6230_v2, %v6229_v56  ;;  %v6035_v8 = vadd.f32 %v6034_v36, %v6033_v31  ;;  %v12973_v63 = vpop.f32.mrf.mxu0 }
 0x85e   :  { %15759 = vst [vmem:[#allocation52_spill] sm:$0xff] %v12973_v63  ;;  %v6234_v47 = vsel %vm538_vm2, %v6115_v15, 0.0 }
 0x85f   :  { %v6037_v48 = vadd.f32 %v6036_v13, %v6035_v8  ;;  %v6233_v17 = vadd.f32 %v6232_v55, %v6231_v5  ;;  %v12978_v43 = vpop.f32.mrf.mxu0  ;;  %v6040_v55 = vsel %vm538_vm2, %v12959_v57, 0.0  ;;  %v6118_v5 = vmul.f32 %v12973_v63, %v12973_v63 }
 0x860   :  { %v6038_v2 = vsel %vm538_vm2, %v12978_v43, 0.0  ;;  %v6116_v31 = vmul.f32 %v12978_v43, %v12978_v43 }
 0x861   :  { %v6235_v56 = vadd.f32 %v6234_v47, %v6233_v17  ;;  %v6039_v10 = vadd.f32 %v6038_v2, %v6037_v48  ;;  %v12987_v36 = vpop.f32.mrf.mxu0  ;;  %v6042_v17 = vsel %vm538_vm2, %v12973_v63, 0.0  ;;  %v6240_v23 = vsel %vm538_vm2, %v6118_v5, 0.0 }
 0x862   :  { %15760 = vst [vmem:[#allocation45_spill] sm:$0xff] %v12987_v36  ;;  %v6236_v8 = vsel %vm538_vm2, %v6116_v31, 0.0  ;;  %v6121_v9 = vmul.f32 %v12987_v36, %v12987_v36 }
 0x863   :  { %v6041_v13 = vadd.f32 %v6040_v55, %v6039_v10  ;;  %v6237_v15 = vadd.f32 %v6236_v8, %v6235_v56  ;;  %v12994_v29 = vpop.f32.mrf.mxu0 }
 0x864   :  { %15761 = vst [vmem:[#allocation50_spill] sm:$0xff] %v12994_v29  ;;  %v6119_v48 = vmul.f32 %v12994_v29, %v12994_v29  ;;  %v6044_v31 = vsel %vm538_vm2, %v12994_v29, 0.0 }
 0x865   :  { %v6239_v47 = vadd.f32 %v6238_v59, %v6237_v15  ;;  %v6043_v2 = vadd.f32 %v6042_v17, %v6041_v13  ;;  %v13001_v22 = vpop.f32.mrf.mxu0  ;;  %v6048_v17 = vsel %vm538_vm2, %v12987_v36, 0.0 }
 0x866   :  { %15762 = vst [vmem:[#allocation49_spill] sm:$0xff] %v13001_v22  ;;  %v6242_v8 = vsel %vm538_vm2, %v6119_v48, 0.0  ;;  %v6246_v48 = vsel %vm538_vm2, %v6121_v9, 0.0  ;;  %v6050_v29 = vsel %vm538_vm2, %v13001_v22, 0.0 }
 0x867   :  { %v6045_v56 = vadd.f32 %v6044_v31, %v6043_v2  ;;  %v6241_v10 = vadd.f32 %v6240_v23, %v6239_v47  ;;  %v13006_v55 = vpop.f32.mrf.mxu0  ;;  %v6122_v23 = vmul.f32 %v13001_v22, %v13001_v22 }
 0x868   :  { %15763 = vst [vmem:[#allocation51_spill] sm:$0xff] %v13006_v55  ;;  %v6046_v59 = vsel %vm538_vm2, %v13006_v55, 0.0  ;;  %v6120_v13 = vmul.f32 %v13006_v55, %v13006_v55 }
 0x869   :  { %v6243_v15 = vadd.f32 %v6242_v8, %v6241_v10  ;;  %v6047_v5 = vadd.f32 %v6046_v59, %v6045_v56  ;;  %v6248_v10 = vsel %vm538_vm2, %v6122_v23, 0.0 }
 0x86a   :  { %v6244_v47 = vsel %vm538_vm2, %v6120_v13, 0.0 }
 0x86b   :  { %v6049_v2 = vadd.f32 %v6048_v17, %v6047_v5  ;;  %v6245_v31 = vadd.f32 %v6244_v47, %v6243_v15 }
 0x86d   :  { %v6051_v50 = vadd.f32 %v6050_v29, %v6049_v2  ;;  %v6247_v38 = vadd.f32 %v6246_v48, %v6245_v31 }
 0x86f   :  { %v6052_v56 = vrot.slane %v6051_v50, 4  ;;  %v6249_v8 = vadd.f32 %v6248_v10, %v6247_v38  ;;  %v6547_v38 = vld [vmem:[%s15362_s10] sm:$0xff] }
 0x870   :  { %8259 = vmatpush3.msra.mxu0 %v6547_v38 }
 0x871   :  { %v6053_v59 = vadd.f32 %v6052_v56, %v6051_v50  ;;  %v6250_v36 = vrot.slane %v6249_v8, 4  ;;  %v15764_v50 = vmov 0.0  }
 0x872   :  { %8260 = vmatprep.mubr.msk.f32.mxu0 %vm8386_vm15, %v15764_v50  ;;  %8265 = vmatprep.mubr.msk.f32.mxu1 %vm8386_vm15, %v15764_v50 }
 0x873   :  { %v6054_v55 = vrot.slane %v6053_v59, 2  ;;  %v6251_v63 = vadd.f32 %v6250_v36, %v6249_v8  ;;  %v6263_v36 = vld [vmem:[%s15365_s9] sm:$0x1] }
 0x875   :  { %v6055_v61 = vadd.f32 %v6054_v55, %v6053_v59  ;;  %v6252_v46 = vrot.slane %v6251_v63, 2 }
 0x877   :  { %v6056_v13 = vrot.slane %v6055_v61, 1  ;;  %v6253_v5 = vadd.f32 %v6252_v46, %v6251_v63 }
 0x879   :  { %v6057_v15 = vadd.f32 %v6056_v13, %v6055_v61  ;;  %v6254_v17 = vrot.slane %v6253_v5, 1  ;;  %v6259_v61 = vld [vmem:[%s15363_s8] sm:$0x1] }
 0x87b   :  { %v6058_v9 = vmul.f32 0.001953125, %v6057_v15  ;;  %v6255_v47 = vadd.f32 %v6254_v17, %v6253_v5 }
 0x87d   :  { %v6256_v57 = vmul.f32 0.001953125, %v6255_v47  ;;  %v6257_v22 = vmul.f32 %v6058_v9, %v6058_v9 }
 0x87f   :  { %v6258_v29 = vsub.f32 %v6256_v57, %v6257_v22  ;;  %v6625_v22 = vld [vmem:[%s15364_s11] sm:$0x3] }
 0x880   :  { %8264 = vmatpush3.msk.msra.mxu1 %vm245_vm0, %v6625_v22 }
 0x881   :  { %v6260_v2 = vadd.f32 1e-05, %v6258_v29 }
 0x883   :  { %8369 = vrsqrt.f32 %v6260_v2 }
 0x890   :  { %v8370_v46 = vpop.eup %8369 }
 0x891   :  { %v6262_v63 = vmul.f32 %v8370_v46, %v6259_v61 }
 0x893   :  { %v6264_v57 = vmul.f32 %v6262_v63, %v6058_v9  ;;  %v13040_v23 = vrot.slane %v6262_v63, %v15714_v14 }
 0x895   :  { %v6265_v55 = vsub.f32 %v6263_v36, %v6264_v57  ;;  %v6304_v48 = vmul.f32 %v13040_v23, %v12798_v20  ;;  %v6305_v10 = vmul.f32 %v13040_v23, %v12810_v18  ;;  %v6306_v56 = vmul.f32 %v12791_v19, %v13040_v23 }
 0x896   :  { %v6307_v13 = vmul.f32 %v12805_v35, %v13040_v23  ;;  %v6308_v20 = vmul.f32 %v13040_v23, %v12826_v1  ;;  %v6309_v9 = vmul.f32 %v13040_v23, %v12838_v28  ;;  %v6310_v29 = vmul.f32 %v12819_v21, %v13040_v23 }
 0x897   :  { %v13043_v31 = vrot.slane %v6265_v55, %v15714_v14  ;;  %v6311_v28 = vmul.f32 %v12833_v25, %v13040_v23  ;;  %v6312_v21 = vmul.f32 %v13040_v23, %v12854_v30  ;;  %v6313_v25 = vmul.f32 %v13040_v23, %v12866_v27 }
 0x898   :  { %v6314_v30 = vmul.f32 %v12847_v51, %v13040_v23  ;;  %v6315_v27 = vmul.f32 %v12861_v0, %v13040_v23  ;;  %v6316_v51 = vmul.f32 %v13040_v23, %v12882_v39  ;;  %v6317_v0 = vmul.f32 %v13040_v23, %v12894_v32 }
 0x899   :  { %v13052_v8 = vadd.f32 %v13043_v31, %v6304_v48  ;;  %v13055_v59 = vadd.f32 %v13043_v31, %v6305_v10  ;;  %v13060_v5 = vadd.f32 %v13043_v31, %v6306_v56  ;;  %v13065_v18 = vadd.f32 %v13043_v31, %v6307_v13 }
 0x89a   :  { %v13074_v35 = vadd.f32 %v13043_v31, %v6308_v20  ;;  %v13081_v2 = vadd.f32 %v13043_v31, %v6309_v9  ;;  %v13088_v46 = vadd.f32 %v13043_v31, %v6310_v29  ;;  %v13095_v63 = vadd.f32 %v13043_v31, %v6311_v28 }
 0x89b   :  { %15765 = vst [vmem:[#allocation62_spill] sm:$0xff] %v13060_v5  ;;  %15766 = vst [vmem:[#allocation63_spill] sm:$0xff] %v13065_v18  ;;  %v6475_v19 = vsel %vm538_vm2, %v13052_v8, 0.0  ;;  %v6476_v15 = vsel %vm538_vm2, %v13055_v59, 0.0  ;;  %v6478_v47 = vsel %vm538_vm2, %v13060_v5, 0.0  ;;  %v6480_v38 = vsel %vm538_vm2, %v13065_v18, 0.0 }
 0x89c   :  { %v6477_v17 = vadd.f32 %v6476_v15, %v6475_v19  ;;  %15767 = vst [vmem:[#allocation64_spill] sm:$0xff] %v13074_v35  ;;  %15768 = vst [vmem:[#allocation65_spill] sm:$0xff] %v13081_v2  ;;  %v6482_v61 = vsel %vm538_vm2, %v13074_v35, 0.0  ;;  %v6484_v57 = vsel %vm538_vm2, %v13081_v2, 0.0  ;;  %v13102_v55 = vadd.f32 %v13043_v31, %v6312_v21 }
 0x89d   :  { %15769 = vst [vmem:[#allocation66_spill] sm:$0xff] %v13088_v46  ;;  %15770 = vst [vmem:[#allocation67_spill] sm:$0xff] %v13095_v63  ;;  %v6486_v48 = vsel %vm538_vm2, %v13088_v46, 0.0  ;;  %v13109_v56 = vadd.f32 %v13043_v31, %v6313_v25  ;;  %v6488_v13 = vsel %vm538_vm2, %v13095_v63, 0.0  ;;  %v13116_v19 = vadd.f32 %v13043_v31, %v6314_v30 }
 0x89e   :  { %v6479_v1 = vadd.f32 %v6478_v47, %v6477_v17  ;;  %15771 = vst [vmem:[#allocation68_spill] sm:$0xff] %v13102_v55  ;;  %v6490_v15 = vsel %vm538_vm2, %v13102_v55, 0.0  ;;  %v13123_v9 = vadd.f32 %v13043_v31, %v6315_v27  ;;  %v13130_v29 = vadd.f32 %v13043_v31, %v6316_v51 }
 0x89f   :  { %15772 = vst [vmem:[#allocation69_spill] sm:$0xff] %v13109_v56  ;;  %15773 = vst [vmem:[#allocation70_spill] sm:$0xff] %v13116_v19  ;;  %v6492_v47 = vsel %vm538_vm2, %v13109_v56, 0.0  ;;  %v6272_v39 = vmul.f32 %v13040_v23, %v12578_v40  ;;  %v6318_v28 = vmul.f32 %v12875_v54, %v13040_v23  ;;  %v6273_v32 = vmul.f32 %v13040_v23, %v12584_v41 }
 0x8a0   :  { %v6481_v50 = vadd.f32 %v6480_v38, %v6479_v1  ;;  %15774 = vst [vmem:[#allocation71_spill] sm:$0xff] %v13123_v9  ;;  %15775 = vst [vmem:[#allocation72_spill] sm:$0xff] %v13130_v29  ;;  %v6494_v38 = vsel %vm538_vm2, %v13116_v19, 0.0  ;;  %v6319_v21 = vmul.f32 %v12889_v24, %v13040_v23  ;;  %v6498_v54 = vsel %vm538_vm2, %v13130_v29, 0.0 }
 0x8a1   :  { %v13151_v40 = vadd.f32 %v13043_v31, %v6318_v28  ;;  %v6274_v25 = vmul.f32 %v12576_v34, %v13040_v23  ;;  %v6320_v41 = vmul.f32 %v13040_v23, %v12910_v11  ;;  %v6321_v34 = vmul.f32 %v13040_v23, %v12922_v58 }
 0x8a2   :  { %v6483_v22 = vadd.f32 %v6482_v61, %v6481_v50  ;;  %v13139_v61 = vadd.f32 %v13043_v31, %v6317_v0  ;;  %v6276_v11 = vmul.f32 %v13040_v23, %v12602_v62  ;;  %v6322_v58 = vmul.f32 %v12903_v53, %v13040_v23 }
 0x8a3   :  { %15777 = vst [vmem:[#allocation74_spill] sm:$0xff] %v13151_v40  ;;  %v6502_v51 = vsel %vm538_vm2, %v13151_v40, 0.0  ;;  %v6277_v62 = vmul.f32 %v13040_v23, %v12614_v44  ;;  %v6323_v53 = vmul.f32 %v12917_v42, %v13040_v23  ;;  %v6324_v42 = vmul.f32 %v13040_v23, %v12938_v45 }
 0x8a4   :  { %v6485_v36 = vadd.f32 %v6484_v57, %v6483_v22  ;;  %15776 = vst [vmem:[#allocation73_spill] sm:$0xff] %v13139_v61  ;;  %v6496_v22 = vsel %vm538_vm2, %v13123_v9, 0.0  ;;  %v6500_v30 = vsel %vm538_vm2, %v13139_v61, 0.0  ;;  %v6325_v45 = vmul.f32 %v13040_v23, %v12950_v12 }
 0x8a5   :  { %v6326_v12 = vmul.f32 %v12931_v33, %v13040_v23  ;;  %v6327_v33 = vmul.f32 %v12945_v6, %v13040_v23  ;;  %v6328_v6 = vmul.f32 %v13040_v23, %v12966_v60  ;;  %v6329_v60 = vmul.f32 %v13040_v23, %v12978_v43 }
 0x8a6   :  { %v6487_v10 = vadd.f32 %v6486_v48, %v6485_v36  ;;  %v13148_v36 = vadd.f32 %v13043_v31, %v6272_v39  ;;  %v13158_v48 = vadd.f32 %v13043_v31, %v6273_v32  ;;  %v13198_v39 = vadd.f32 %v13043_v31, %v6276_v11 }
 0x8a7   :  { %v13233_v11 = vadd.f32 %v13043_v31, %v6324_v42 }
 0x8a8   :  { %v6489_v20 = vadd.f32 %v6488_v13, %v6487_v10  ;;  %v13163_v10 = vadd.f32 %v13043_v31, %v6319_v21  ;;  %v6275_v13 = vmul.f32 %v12580_v52, %v13040_v23 }
 0x8a9   :  { %15783 = vst [vmem:[#allocation80_spill] sm:$0xff] %v13233_v11 }
 0x8aa   :  { %v6491_v17 = vadd.f32 %v6490_v15, %v6489_v20  ;;  %15778 = vst [vmem:[#allocation75_spill] sm:$0xff] %v13163_v10  ;;  %v13170_v20 = vadd.f32 %v13043_v31, %v6274_v25  ;;  %v6406_v15 = vsel %vm538_vm2, %v13148_v36, 0.0  ;;  %v13184_v52 = vadd.f32 %v13043_v31, %v6275_v13 }
 0x8ac   :  { %v6493_v1 = vadd.f32 %v6492_v47, %v6491_v17  ;;  %v13179_v17 = vadd.f32 %v13043_v31, %v6320_v41  ;;  %v6407_v47 = vsel %vm538_vm2, %v13158_v48, 0.0  ;;  %v6409_v28 = vsel %vm538_vm2, %v13170_v20, 0.0 }
 0x8ad   :  { %v6408_v0 = vadd.f32 %v6407_v47, %v6406_v15  ;;  %v6411_v25 = vsel %vm538_vm2, %v13184_v52, 0.0  ;;  %v13219_v41 = vadd.f32 %v13043_v31, %v6323_v53 }
 0x8ae   :  { %v6495_v50 = vadd.f32 %v6494_v38, %v6493_v1  ;;  %15779 = vst [vmem:[#allocation76_spill] sm:$0xff] %v13179_v17  ;;  %v13193_v38 = vadd.f32 %v13043_v31, %v6321_v34  ;;  %v6506_v21 = vsel %vm538_vm2, %v13179_v17, 0.0 }
 0x8af   :  { %v6410_v32 = vadd.f32 %v6409_v28, %v6408_v0  ;;  %15782 = vst [vmem:[#allocation79_spill] sm:$0xff] %v13219_v41  ;;  %v6512_v28 = vsel %vm538_vm2, %v13219_v41, 0.0 }
 0x8b0   :  { %v6497_v57 = vadd.f32 %v6496_v22, %v6495_v50  ;;  %15780 = vst [vmem:[#allocation77_spill] sm:$0xff] %v13193_v38  ;;  %v6504_v50 = vsel %vm538_vm2, %v13163_v10, 0.0  ;;  %v13205_v22 = vadd.f32 %v13043_v31, %v6322_v58  ;;  %v6508_v13 = vsel %vm538_vm2, %v13193_v38, 0.0 }
 0x8b2   :  { %v6499_v24 = vadd.f32 %v6498_v54, %v6497_v57  ;;  %15781 = vst [vmem:[#allocation78_spill] sm:$0xff] %v13205_v22  ;;  %v6278_v57 = vmul.f32 %v12594_v3, %v13040_v23  ;;  %v13212_v54 = vadd.f32 %v13043_v31, %v6277_v62  ;;  %v6279_v3 = vmul.f32 %v12609_v4, %v13040_v23 }
 0x8b3   :  { %v6510_v47 = vsel %vm538_vm2, %v13205_v22, 0.0  ;;  %v6280_v4 = vmul.f32 %v13040_v23, %v12630_v37  ;;  %v13247_v62 = vadd.f32 %v13043_v31, %v6325_v45  ;;  %v6281_v37 = vmul.f32 %v13040_v23, %v12642_v26 }
 0x8b4   :  { %v6501_v27 = vadd.f32 %v6500_v30, %v6499_v24  ;;  %v6412_v30 = vadd.f32 %v6411_v25, %v6410_v32  ;;  %v13226_v34 = vadd.f32 %v13043_v31, %v6278_v57  ;;  %v13240_v58 = vadd.f32 %v13043_v31, %v6279_v3 }
 0x8b5   :  { %15784 = vst [vmem:[#allocation81_spill] sm:$0xff] %v13247_v62  ;;  %v13254_v53 = vadd.f32 %v13043_v31, %v6280_v4  ;;  %v13261_v32 = vadd.f32 %v13043_v31, %v6326_v12  ;;  %v6514_v25 = vsel %vm538_vm2, %v13233_v11, 0.0  ;;  %v6282_v26 = vmul.f32 %v12623_v16, %v13040_v23 }
 0x8b6   :  { %v6503_v1 = vadd.f32 %v6502_v51, %v6501_v27  ;;  %v6413_v27 = vsel %vm538_vm2, %v13198_v39, 0.0  ;;  %v13268_v42 = vadd.f32 %v13043_v31, %v6281_v37  ;;  %v6283_v16 = vmul.f32 %v12637_v49, %v13040_v23 }
 0x8b7   :  { %v6414_v51 = vadd.f32 %v6413_v27, %v6412_v30  ;;  %15785 = vst [vmem:[#allocation82_spill] sm:$0xff] %v13261_v32  ;;  %v13275_v30 = vadd.f32 %v13043_v31, %v6327_v33  ;;  %v6516_v27 = vsel %vm538_vm2, %v13247_v62, 0.0  ;;  %v13282_v45 = vadd.f32 %v13043_v31, %v6282_v26  ;;  %v15812_v62 = vld [vmem:[#allocation44_spill] sm:$0xff] }
 0x8b8   :  { %v6505_v44 = vadd.f32 %v6504_v50, %v6503_v1  ;;  %v6415_v1 = vsel %vm538_vm2, %v13212_v54, 0.0  ;;  %v6284_v49 = vmul.f32 %v13040_v23, %v12658_v7  ;;  %v13296_v12 = vadd.f32 %v13043_v31, %v6283_v16 }
 0x8b9   :  { %v6416_v50 = vadd.f32 %v6415_v1, %v6414_v51  ;;  %15786 = vst [vmem:[#allocation83_spill] sm:$0xff] %v13275_v30  ;;  %v13289_v51 = vadd.f32 %v13043_v31, %v6328_v6  ;;  %v6518_v1 = vsel %vm538_vm2, %v13261_v32, 0.0  ;;  %v6520_v33 = vsel %vm538_vm2, %v13275_v30, 0.0 }
 0x8ba   :  { %v6507_v24 = vadd.f32 %v6506_v21, %v6505_v44  ;;  %v6417_v44 = vsel %vm538_vm2, %v13226_v34, 0.0 }
 0x8bb   :  { %v6418_v57 = vadd.f32 %v6417_v44, %v6416_v50  ;;  %15787 = vst [vmem:[#allocation84_spill] sm:$0xff] %v13289_v51  ;;  %v15788_v50 = vld [vmem:[#allocation47_spill] sm:$0xff] }
 0x8bc   :  { %v6509_v15 = vadd.f32 %v6508_v13, %v6507_v24  ;;  %v6419_v24 = vsel %vm538_vm2, %v13240_v58, 0.0  ;;  %v6330_v43 = vmul.f32 %v15788_v50, %v13040_v23 }
 0x8bd   :  { %v6420_v3 = vadd.f32 %v6419_v24, %v6418_v57  ;;  %v13310_v57 = vadd.f32 %v13043_v31, %v6284_v49 }
 0x8be   :  { %v6511_v0 = vadd.f32 %v6510_v47, %v6509_v15  ;;  %v6421_v15 = vsel %vm538_vm2, %v13254_v53, 0.0  ;;  %v13315_v26 = vadd.f32 %v13043_v31, %v6330_v43 }
 0x8bf   :  { %v6422_v4 = vadd.f32 %v6421_v15, %v6420_v3  ;;  %v15792_v3 = vld [vmem:[#allocation61_spill] sm:$0xff]  ;;  %v6427_v15 = vsel %vm538_vm2, %v13296_v12, 0.0 }
 0x8c0   :  { %v6513_v21 = vadd.f32 %v6512_v28, %v6511_v0  ;;  %v6423_v0 = vsel %vm538_vm2, %v13268_v42, 0.0  ;;  %v13303_v28 = vadd.f32 %v13043_v31, %v6329_v60  ;;  %v15793_v60 = vld [vmem:[#allocation52_spill] sm:$0xff] }
 0x8c1   :  { %v6424_v44 = vadd.f32 %v6423_v0, %v6422_v4  ;;  %v15794_v0 = vld [vmem:[#allocation54_spill] sm:$0xff] }
 0x8c2   :  { %v6515_v13 = vadd.f32 %v6514_v25, %v6513_v21  ;;  %15789 = vst [vmem:[#allocation47_spill] sm:$0xff] %v13303_v28  ;;  %v15790_v21 = vld [vmem:[#allocation56_spill] sm:$0xff]  ;;  %v6425_v25 = vsel %vm538_vm2, %v13282_v45, 0.0  ;;  %v6524_v49 = vsel %vm538_vm2, %v13303_v28, 0.0  ;;  %v6287_v50 = vmul.f32 %v15794_v0, %v13040_v23 }
 0x8c3   :  { %v6285_v7 = vmul.f32 %v13040_v23, %v15790_v21  ;;  %15791 = vst [vmem:[#allocation56_spill] sm:$0xff] %v13315_v26  ;;  %v6426_v6 = vadd.f32 %v6425_v25, %v6424_v44  ;;  %v15796_v25 = vld [vmem:[#allocation57_spill] sm:$0xff]  ;;  %v15804_v28 = vld [vmem:[#allocation40_spill] sm:$0xff] }
 0x8c4   :  { %v6517_v47 = vadd.f32 %v6516_v27, %v6515_v13  ;;  %v6522_v13 = vsel %vm538_vm2, %v13289_v51, 0.0  ;;  %v6286_v27 = vmul.f32 %v15792_v3, %v13040_v23  ;;  %v15797_v3 = vld [vmem:[#allocation50_spill] sm:$0xff] }
 0x8c5   :  { %v13322_v16 = vadd.f32 %v13043_v31, %v6285_v7  ;;  %v6526_v7 = vsel %vm538_vm2, %v13315_v26, 0.0 }
 0x8c6   :  { %v6519_v37 = vadd.f32 %v6518_v1, %v6517_v47  ;;  %v6331_v47 = vmul.f32 %v15793_v60, %v13040_v23  ;;  %v6428_v1 = vadd.f32 %v6427_v15, %v6426_v6  ;;  %v13333_v43 = vadd.f32 %v13043_v31, %v6286_v27 }
 0x8c7   :  { %v13345_v6 = vadd.f32 %v13043_v31, %v6287_v50  ;;  %v6332_v27 = vmul.f32 %v13040_v23, %v15797_v3 }
 0x8c8   :  { %v6521_v24 = vadd.f32 %v6520_v33, %v6519_v37  ;;  %v6429_v37 = vsel %vm538_vm2, %v13310_v57, 0.0  ;;  %v13338_v44 = vadd.f32 %v13043_v31, %v6331_v47  ;;  %v15798_v47 = vld [vmem:[#allocation58_spill] sm:$0xff] }
 0x8c9   :  { %v6430_v21 = vadd.f32 %v6429_v37, %v6428_v1  ;;  %v13359_v0 = vadd.f32 %v13043_v31, %v6332_v27  ;;  %v15802_v27 = vld [vmem:[#allocation53_spill] sm:$0xff] }
 0x8ca   :  { %v6523_v4 = vadd.f32 %v6522_v13, %v6521_v24  ;;  %15795 = vst [vmem:[#allocation61_spill] sm:$0xff] %v13338_v44  ;;  %v6288_v24 = vmul.f32 %v13040_v23, %v15796_v25  ;;  %v6431_v13 = vsel %vm538_vm2, %v13322_v16, 0.0  ;;  %v6528_v37 = vsel %vm538_vm2, %v13338_v44, 0.0  ;;  %v15800_v25 = vld [vmem:[#allocation55_spill] sm:$0xff] }
 0x8cb   :  { %v6432_v60 = vadd.f32 %v6431_v13, %v6430_v21  ;;  %15799 = vst [vmem:[#allocation52_spill] sm:$0xff] %v13359_v0  ;;  %v6530_v26 = vsel %vm538_vm2, %v13359_v0, 0.0 }
 0x8cc   :  { %v6525_v33 = vadd.f32 %v6524_v49, %v6523_v4  ;;  %v6289_v4 = vmul.f32 %v13040_v23, %v15798_v47  ;;  %v13354_v1 = vadd.f32 %v13043_v31, %v6288_v24  ;;  %v6433_v49 = vsel %vm538_vm2, %v13333_v43, 0.0  ;;  %v15801_v24 = vld [vmem:[#allocation51_spill] sm:$0xff] }
 0x8cd   :  { %v6434_v50 = vadd.f32 %v6433_v49, %v6432_v60  ;;  %v6333_v13 = vmul.f32 %v13040_v23, %v15801_v24  ;;  %v6291_v60 = vmul.f32 %v15802_v27, %v13040_v23 }
 0x8ce   :  { %v6527_v15 = vadd.f32 %v6526_v7, %v6525_v33  ;;  %v6290_v33 = vmul.f32 %v15800_v25, %v13040_v23  ;;  %v13366_v21 = vadd.f32 %v13043_v31, %v6289_v4  ;;  %v6435_v7 = vsel %vm538_vm2, %v13345_v6, 0.0 }
 0x8cf   :  { %v6436_v47 = vadd.f32 %v6435_v7, %v6434_v50  ;;  %v6437_v25 = vsel %vm538_vm2, %v13354_v1, 0.0  ;;  %v13380_v4 = vadd.f32 %v13043_v31, %v6333_v13  ;;  %v13387_v50 = vadd.f32 %v13043_v31, %v6291_v60  ;;  %v15806_v13 = vld [vmem:[#allocation38_spill] sm:$0xff] }
 0x8d0   :  { %v6529_v3 = vadd.f32 %v6528_v37, %v6527_v15  ;;  %v13375_v49 = vadd.f32 %v13043_v31, %v6290_v33  ;;  %v6292_v15 = vmul.f32 %v13040_v23, %v15804_v28  ;;  %v6439_v37 = vsel %vm538_vm2, %v13366_v21, 0.0  ;;  %v15805_v33 = vld [vmem:[#allocation45_spill] sm:$0xff] }
 0x8d1   :  { %15803 = vst [vmem:[#allocation54_spill] sm:$0xff] %v13380_v4  ;;  %v6438_v44 = vadd.f32 %v6437_v25, %v6436_v47  ;;  %v6334_v7 = vmul.f32 %v15805_v33, %v13040_v23  ;;  %v6293_v47 = vmul.f32 %v13040_v23, %v15806_v13  ;;  %v6532_v51 = vsel %vm538_vm2, %v13380_v4, 0.0  ;;  %v15808_v33 = vld [vmem:[#allocation36_spill] sm:$0xff] }
 0x8d2   :  { %v6531_v24 = vadd.f32 %v6530_v26, %v6529_v3  ;;  %v13396_v25 = vadd.f32 %v13043_v31, %v6292_v15  ;;  %v6441_v28 = vsel %vm538_vm2, %v13375_v49, 0.0  ;;  %v6294_v26 = vmul.f32 %v15808_v33, %v13040_v23  ;;  %v15809_v15 = vld [vmem:[#allocation49_spill] sm:$0xff] }
 0x8d3   :  { %v6440_v27 = vadd.f32 %v6439_v37, %v6438_v44  ;;  %v13401_v60 = vadd.f32 %v13043_v31, %v6334_v7  ;;  %v13408_v44 = vadd.f32 %v13043_v31, %v6293_v47  ;;  %v6443_v3 = vsel %vm538_vm2, %v13387_v50, 0.0  ;;  %v15810_v7 = vld [vmem:[#allocation59_spill] sm:$0xff] }
 0x8d4   :  { %v6335_v37 = vmul.f32 %v15809_v15, %v13040_v23  ;;  %v6533_v13 = vadd.f32 %v6532_v51, %v6531_v24  ;;  %v6445_v33 = vsel %vm538_vm2, %v13396_v25, 0.0  ;;  %v6296_v51 = vmul.f32 %v13040_v23, %v15812_v62  ;;  %v15813_v15 = vld [vmem:[#allocation42_spill] sm:$0xff] }
 0x8d5   :  { %15807 = vst [vmem:[#allocation57_spill] sm:$0xff] %v13401_v60  ;;  %v6442_v0 = vadd.f32 %v6441_v28, %v6440_v27  ;;  %v6295_v27 = vmul.f32 %v15810_v7, %v13040_v23  ;;  %v13417_v28 = vadd.f32 %v13043_v31, %v6294_v26  ;;  %v6534_v32 = vsel %vm538_vm2, %v13401_v60, 0.0 }
 0x8d6   :  { %v13422_v47 = vadd.f32 %v13043_v31, %v6335_v37  ;;  %v6447_v24 = vsel %vm538_vm2, %v13408_v44, 0.0  ;;  %v6535_v26 = vadd.f32 %v6534_v32, %v6533_v13  ;;  %v6297_v7 = vmul.f32 %v13040_v23, %v15813_v15 }
 0x8d7   :  { %v6444_v30 = vadd.f32 %v6443_v3, %v6442_v0  ;;  %v13429_v0 = vadd.f32 %v13043_v31, %v6295_v27  ;;  %v13436_v37 = vadd.f32 %v13043_v31, %v6296_v51  ;;  %v15814_v27 = vld [vmem:[#allocation39_spill] sm:$0xff]  ;;  %v15815_v51 = vld [vmem:[#allocation37_spill] sm:$0xff] }
 0x8d8   :  { %15811 = vst [vmem:[#allocation50_spill] sm:$0xff] %v13422_v47  ;;  %v6536_v62 = vsel %vm538_vm2, %v13422_v47, 0.0  ;;  %v6298_v60 = vmul.f32 %v15814_v27, %v13040_v23  ;;  %v13445_v11 = vadd.f32 %v13043_v31, %v6297_v7  ;;  %v15816_v47 = vld [vmem:[#allocation48_spill] sm:$0xff] }
 0x8d9   :  { %v6446_v4 = vadd.f32 %v6445_v33, %v6444_v30  ;;  %v6449_v30 = vsel %vm538_vm2, %v13417_v28, 0.0  ;;  %v6451_v32 = vsel %vm538_vm2, %v13429_v0, 0.0  ;;  %v6300_v27 = vmul.f32 %v13040_v23, %v15816_v47  ;;  %v15818_v47 = vld [vmem:[#allocation43_spill] sm:$0xff] }
 0x8da   :  { %v13452_v15 = vadd.f32 %v13043_v31, %v6298_v60  ;;  %v6302_v41 = vmul.f32 %v15818_v47, %v13040_v23 }
 0x8db   :  { %v6448_v3 = vadd.f32 %v6447_v24, %v6446_v4  ;;  %v6537_v4 = vadd.f32 %v6536_v62, %v6535_v26  ;;  %v6299_v24 = vmul.f32 %v15815_v51, %v13040_v23  ;;  %v6455_v26 = vsel %vm538_vm2, %v13445_v11, 0.0 }
 0x8dc   :  { %v13466_v60 = vadd.f32 %v13043_v31, %v6300_v27  ;;  %v13480_v27 = vadd.f32 %v13043_v31, %v6302_v41 }
 0x8dd   :  { %v6450_v33 = vadd.f32 %v6449_v30, %v6448_v3  ;;  %v6453_v3 = vsel %vm538_vm2, %v13436_v37, 0.0  ;;  %v13459_v7 = vadd.f32 %v13043_v31, %v6299_v24 }
 0x8df   :  { %v6452_v13 = vadd.f32 %v6451_v32, %v6450_v33  ;;  %v6538_v33 = vrot.slane %v6537_v4, 4  ;;  %v15817_v32 = vld [vmem:[#allocation46_spill] sm:$0xff]  ;;  %v6459_v22 = vsel %vm538_vm2, %v13459_v7, 0.0 }
 0x8e0   :  { %v6301_v51 = vmul.f32 %v13040_v23, %v15817_v32  ;;  %v15819_v32 = vld [vmem:[#allocation41_spill] sm:$0xff] }
 0x8e1   :  { %v6454_v30 = vadd.f32 %v6453_v3, %v6452_v13  ;;  %v6457_v13 = vsel %vm538_vm2, %v13452_v15, 0.0  ;;  %v6303_v38 = vmul.f32 %v15819_v32, %v13040_v23 }
 0x8e2   :  { %v13473_v24 = vadd.f32 %v13043_v31, %v6301_v51 }
 0x8e3   :  { %v6456_v62 = vadd.f32 %v6455_v26, %v6454_v30  ;;  %v6539_v30 = vadd.f32 %v6538_v33, %v6537_v4  ;;  %v13485_v47 = vadd.f32 %v13043_v31, %v6303_v38 }
 0x8e4   :  { %v6463_v51 = vsel %vm538_vm2, %v13473_v24, 0.0 }
 0x8e5   :  { %v6458_v3 = vadd.f32 %v6457_v13, %v6456_v62  ;;  %v6461_v62 = vsel %vm538_vm2, %v13466_v60, 0.0  ;;  %v6540_v17 = vrot.slane %v6539_v30, 2  ;;  %v6467_v23 = vsel %vm538_vm2, %v13485_v47, 0.0 }
 0x8e7   :  { %v6460_v26 = vadd.f32 %v6459_v22, %v6458_v3  ;;  %v6465_v22 = vsel %vm538_vm2, %v13480_v27, 0.0  ;;  %v6541_v41 = vadd.f32 %v6540_v17, %v6539_v30 }
 0x8e9   :  { %v6462_v13 = vadd.f32 %v6461_v62, %v6460_v26  ;;  %v6542_v32 = vrot.slane %v6541_v41, 1 }
 0x8eb   :  { %v6464_v10 = vadd.f32 %v6463_v51, %v6462_v13  ;;  %v6543_v38 = vadd.f32 %v6542_v32, %v6541_v41  ;;  %v15824_v41 = vld [vmem:[#allocation8_spill] sm:$0xff]  ;;  %v15827_v32 = vld [vmem:[#allocation11_spill] sm:$0xff] }
 0x8ed   :  { %v6466_v4 = vadd.f32 %v6465_v22, %v6464_v10  ;;  %v6546_v29 = vmul.f32 0.00390625, %v6543_v38  ;;  %v6806_v10 = vld [vmem:[%s15366_s12] sm:$0x3]  ;;  %v15831_v38 = vld [vmem:[#allocation15_spill] sm:$0xff] }
 0x8ee   :  { %8348 = vmatprep.subr.msk.bf16.mxu1 %vm245_vm0, %v6806_v10  ;;  %v6808_v22 = vsel %vm245_vm0, %v6806_v10, 0  ;;  %v15834_v10 = vld [vmem:[#allocation18_spill] sm:$0xff] }
 0x8ef   :  { %v6468_v33 = vadd.f32 %v6467_v23, %v6466_v4  ;;  %v15823_v23 = vld [vmem:[#allocation7_spill] sm:$0xff] }
 0x8f1   :  { %v6469_v3 = vrot.slane %v6468_v33, 4 }
 0x8f3   :  { %v6470_v26 = vadd.f32 %v6469_v3, %v6468_v33  ;;  %v15825_v33 = vld [vmem:[#allocation9_spill] sm:$0xff]  ;;  %v15826_v3 = vld [vmem:[#allocation10_spill] sm:$0xff] }
 0x8f5   :  { %v6471_v62 = vrot.slane %v6470_v26, 2 }
 0x8f7   :  { %v6472_v31 = vadd.f32 %v6471_v62, %v6470_v26  ;;  %v15828_v26 = vld [vmem:[#allocation12_spill] sm:$0xff]  ;;  %v15829_v62 = vld [vmem:[#allocation13_spill] sm:$0xff] }
 0x8f9   :  { %v6473_v40 = vrot.slane %v6472_v31, 1 }
 0x8fb   :  { %v6474_v61 = vadd.f32 %v6473_v40, %v6472_v31  ;;  %v15820_v40 = vld [vmem:[#allocation4_spill] sm:$0xff]  ;;  %v15830_v31 = vld [vmem:[#allocation14_spill] sm:$0xff] }
 0x8fd   :  { %v6545_v13 = vmul.f32 0.00390625, %v6474_v61  ;;  %v15822_v61 = vld [vmem:[#allocation6_spill] sm:$0xff] }
 0x8ff   :  { %v6551_v51 = vsel %vm6550_vm3, %v6546_v29, %v6545_v13  ;;  %v15821_v29 = vld [vmem:[#allocation5_spill] sm:$0xff]  ;;  %v15832_v13 = vld [vmem:[#allocation16_spill] sm:$0xff] }
 0x900   :  { %8261 = vmatmul.mubr.msk.f32.vlgmr.msra.gmra.mxu0 %vm538_vm2, %v6551_v51  ;;  %v15833_v51 = vld [vmem:[#allocation17_spill] sm:$0xff] }
 0x9c0   :  { %v6620_v17 = vpop.f32.mrf.mxu0 }
 0x9c1   :  { %v6624_v30 = vmax.f32 %v6620_v17, 0.0  ;;  %v15835_v17 = vld [vmem:[#allocation19_spill] sm:$0xff] }
 0x9c2   :  { %v8262_v4 = vpop.f32.mrf.mxu0 }
 0x9c3   :  { %8266 = vmatmul.mubr.msk.f32.vlgmr.msra.gmra.mxu1 %vm6626_vm4, %v6624_v30  ;;  %v15836_v30 = vld [vmem:[#allocation20_spill] sm:$0xff]  ;;  %v15838_v4 = vld [vmem:[#allocation22_spill] sm:$0xff] }
 0x9c4   :  { %8269 = vmatpush3.bf16.msra.mxu1 %v6808_v22  ;;  %8270 = vmatprep.mubr.msk.bf16.mxu1 %vm148_vm1, %v15820_v40  ;;  %v15837_v22 = vld [vmem:[#allocation21_spill] sm:$0xff]  ;;  %v15839_v40 = vld [vmem:[#allocation23_spill] sm:$0xff] }
 0x9c7   :  { %8271 = vmatmul.mubr.msk.bf16.vlgmr.msra.gmra.mxu1 %vm148_vm1, %v15821_v29  ;;  %v15840_v29 = vld [vmem:[#allocation24_spill] sm:$0xff] }
 0x9c8   :  { %8274 = vmatprep.mubr.msk.bf16.mxu1 %vm148_vm1, %v15822_v61  ;;  %v15841_v61 = vld [vmem:[#allocation25_spill] sm:$0xff] }
 0x9cf   :  { %8275 = vmatmul.mubr.msk.bf16.gmra.mxu1 %vm148_vm1, %v15823_v23  ;;  %v15842_v23 = vld [vmem:[#allocation26_spill] sm:$0xff] }
 0x9d0   :  { %8278 = vmatprep.mubr.msk.bf16.mxu1 %vm148_vm1, %v15824_v41  ;;  %v15843_v41 = vld [vmem:[#allocation27_spill] sm:$0xff] }
 0x9d7   :  { %8279 = vmatmul.mubr.msk.bf16.gmra.mxu1 %vm148_vm1, %v15825_v33  ;;  %v15844_v33 = vld [vmem:[#allocation28_spill] sm:$0xff] }
 0x9d8   :  { %8282 = vmatprep.mubr.msk.bf16.mxu1 %vm148_vm1, %v15826_v3  ;;  %v15845_v3 = vld [vmem:[#allocation29_spill] sm:$0xff] }
 0x9df   :  { %8283 = vmatmul.mubr.msk.bf16.gmra.mxu1 %vm148_vm1, %v15827_v32  ;;  %v15846_v32 = vld [vmem:[#allocation30_spill] sm:$0xff] }
 0x9e0   :  { %8286 = vmatprep.mubr.msk.bf16.mxu1 %vm148_vm1, %v15828_v26  ;;  %v15847_v26 = vld [vmem:[#allocation31_spill] sm:$0xff] }
 0x9e7   :  { %8287 = vmatmul.mubr.msk.bf16.gmra.mxu1 %vm148_vm1, %v15829_v62  ;;  %v15848_v62 = vld [vmem:[#allocation32_spill] sm:$0xff] }
 0x9e8   :  { %8290 = vmatprep.mubr.msk.bf16.mxu1 %vm148_vm1, %v15830_v31  ;;  %v15849_v31 = vld [vmem:[#allocation33_spill] sm:$0xff] }
 0x9ef   :  { %8291 = vmatmul.mubr.msk.bf16.gmra.mxu1 %vm148_vm1, %v15831_v38  ;;  %v15850_v38 = vld [vmem:[#allocation34_spill] sm:$0xff] }
 0x9f0   :  { %8294 = vmatprep.mubr.msk.bf16.mxu1 %vm148_vm1, %v15832_v13  ;;  %v15851_v13 = vld [vmem:[#allocation35_spill] sm:$0xff] }
 0x9f7   :  { %8295 = vmatmul.mubr.msk.bf16.gmra.mxu1 %vm148_vm1, %v15833_v51 }
 0x9f8   :  { %8298 = vmatprep.mubr.msk.bf16.mxu1 %vm148_vm1, %v15834_v10 }
 0x9ff   :  { %8299 = vmatmul.mubr.msk.bf16.gmra.mxu1 %vm148_vm1, %v15835_v17 }
 0xa00   :  { %8302 = vmatprep.mubr.msk.bf16.mxu1 %vm148_vm1, %v15836_v30 }
 0xa07   :  { %8303 = vmatmul.mubr.msk.bf16.gmra.mxu1 %vm148_vm1, %v15837_v22 }
 0xa08   :  { %8306 = vmatprep.mubr.msk.bf16.mxu1 %vm148_vm1, %v15838_v4 }
 0xa0f   :  { %8307 = vmatmul.mubr.msk.bf16.gmra.mxu1 %vm148_vm1, %v15839_v40 }
 0xa10   :  { %8310 = vmatprep.mubr.msk.bf16.mxu1 %vm148_vm1, %v15840_v29 }
 0xa17   :  { %8311 = vmatmul.mubr.msk.bf16.gmra.mxu1 %vm148_vm1, %v15841_v61 }
 0xa18   :  { %8314 = vmatprep.mubr.msk.bf16.mxu1 %vm148_vm1, %v15842_v23 }
 0xa1f   :  { %8315 = vmatmul.mubr.msk.bf16.gmra.mxu1 %vm148_vm1, %v15843_v41 }
 0xa20   :  { %8318 = vmatprep.mubr.msk.bf16.mxu1 %vm148_vm1, %v15844_v33 }
 0xa27   :  { %8319 = vmatmul.mubr.msk.bf16.gmra.mxu1 %vm148_vm1, %v15845_v3 }
 0xa28   :  { %8322 = vmatprep.mubr.msk.bf16.mxu1 %vm148_vm1, %v15846_v32 }
 0xa2f   :  { %8323 = vmatmul.mubr.msk.bf16.gmra.mxu1 %vm148_vm1, %v15847_v26 }
 0xa30   :  { %8326 = vmatprep.mubr.msk.bf16.mxu1 %vm148_vm1, %v15848_v62 }
 0xa37   :  { %8327 = vmatmul.mubr.msk.bf16.gmra.mxu1 %vm148_vm1, %v15849_v31 }
 0xa38   :  { %8330 = vmatprep.mubr.msk.bf16.mxu1 %vm148_vm1, %v15850_v38 }
 0xa3f   :  { %8331 = vmatmul.mubr.msk.bf16.gmra.mxu1 %vm148_vm1, %v15851_v13 }
 0xa83   :  { %v13563_v51 = vpop.f32.mrf.mxu1 }
 0xa85   :  { %v8267_v10 = vpop.f32.mrf.mxu1 }
 0xa87   :  { %v13565_v17 = vpop.f32.mrf.mxu1 }
 0xa88   :  { %15852 = vst [vmem:[#allocation58_spill] sm:$0xff] %v13565_v17  ;;  %v7235_v29 = vmul.f32 %v13565_v17, %v13565_v17  ;;  %v7102_v32 = vsel %vm538_vm2, %v13565_v17, 0.0 }
 0xa89   :  { %v13567_v30 = vpop.f32.mrf.mxu1 }
 0xa8a   :  { %15853 = vst [vmem:[#allocation55_spill] sm:$0xff] %v13567_v30  ;;  %v7233_v4 = vmul.f32 %v13567_v30, %v13567_v30  ;;  %v7099_v61 = vsel %vm538_vm2, %v13567_v30, 0.0  ;;  %v7300_v30 = vsel %vm538_vm2, %v7235_v29, 0.0 }
 0xa8b   :  { %v13569_v22 = vpop.f32.mrf.mxu1 }
 0xa8c   :  { %15854 = vst [vmem:[#allocation51_spill] sm:$0xff] %v13569_v22  ;;  %v7297_v26 = vsel %vm538_vm2, %v7233_v4, 0.0  ;;  %v7236_v62 = vmul.f32 %v13569_v22, %v13569_v22 }
 0xa8d   :  { %v13573_v40 = vpop.f32.mrf.mxu1 }
 0xa8e   :  { %15855 = vst [vmem:[#allocation53_spill] sm:$0xff] %v13573_v40  ;;  %v7100_v23 = vsel %vm538_vm2, %v13573_v40, 0.0  ;;  %v7234_v41 = vmul.f32 %v13573_v40, %v13573_v40  ;;  %v7302_v9 = vsel %vm538_vm2, %v7236_v62, 0.0 }
 0xa8f   :  { %v7101_v33 = vadd.f32 %v7100_v23, %v7099_v61  ;;  %v13583_v3 = vpop.f32.mrf.mxu1  ;;  %v7104_v61 = vsel %vm538_vm2, %v13569_v22, 0.0 }
 0xa90   :  { %15856 = vst [vmem:[#allocation40_spill] sm:$0xff] %v13583_v3  ;;  %v7298_v31 = vsel %vm538_vm2, %v7234_v41, 0.0  ;;  %v7239_v29 = vmul.f32 %v13583_v3, %v13583_v3 }
 0xa91   :  { %v7103_v38 = vadd.f32 %v7102_v32, %v7101_v33  ;;  %v7299_v13 = vadd.f32 %v7298_v31, %v7297_v26  ;;  %v13591_v10 = vpop.f32.mrf.mxu1 }
 0xa92   :  { %15857 = vst [vmem:[#allocation45_spill] sm:$0xff] %v13591_v10  ;;  %v7237_v23 = vmul.f32 %v13591_v10, %v13591_v10  ;;  %v7106_v41 = vsel %vm538_vm2, %v13591_v10, 0.0  ;;  %v7308_v22 = vsel %vm538_vm2, %v7239_v29, 0.0 }
 0xa93   :  { %v7301_v17 = vadd.f32 %v7300_v30, %v7299_v13  ;;  %v7105_v40 = vadd.f32 %v7104_v61, %v7103_v38  ;;  %v13598_v4 = vpop.f32.mrf.mxu1 }
 0xa94   :  { %15858 = vst [vmem:[#allocation38_spill] sm:$0xff] %v13598_v4  ;;  %v7304_v31 = vsel %vm538_vm2, %v7237_v23, 0.0 }
 0xa95   :  { %v7107_v33 = vadd.f32 %v7106_v41, %v7105_v40  ;;  %v7303_v32 = vadd.f32 %v7302_v9, %v7301_v17  ;;  %v13603_v26 = vpop.f32.mrf.mxu1  ;;  %v7110_v9 = vsel %vm538_vm2, %v13583_v3, 0.0  ;;  %v7240_v17 = vmul.f32 %v13598_v4, %v13598_v4 }
 0xa96   :  { %15859 = vst [vmem:[#allocation36_spill] sm:$0xff] %v13603_v26  ;;  %v7108_v30 = vsel %vm538_vm2, %v13603_v26, 0.0  ;;  %v7238_v38 = vmul.f32 %v13603_v26, %v13603_v26 }
 0xa97   :  { %v7305_v13 = vadd.f32 %v7304_v31, %v7303_v32  ;;  %v7109_v62 = vadd.f32 %v7108_v30, %v7107_v33  ;;  %v13612_v61 = vpop.f32.mrf.mxu1  ;;  %v7112_v32 = vsel %vm538_vm2, %v13598_v4, 0.0  ;;  %v7310_v26 = vsel %vm538_vm2, %v7240_v17, 0.0 }
 0xa98   :  { %15860 = vst [vmem:[#allocation49_spill] sm:$0xff] %v13612_v61  ;;  %v7306_v40 = vsel %vm538_vm2, %v7238_v38, 0.0 }
 0xa99   :  { %v7111_v41 = vadd.f32 %v7110_v9, %v7109_v62  ;;  %v7307_v23 = vadd.f32 %v7306_v40, %v7305_v13  ;;  %v13619_v10 = vpop.f32.mrf.mxu1 }
 0xa9a   :  { %15861 = vst [vmem:[#allocation59_spill] sm:$0xff] %v13619_v10  ;;  %v7241_v30 = vmul.f32 %v13619_v10, %v13619_v10  ;;  %v7114_v38 = vsel %vm538_vm2, %v13619_v10, 0.0 }
 0xa9b   :  { %v7309_v33 = vadd.f32 %v7308_v22, %v7307_v23  ;;  %v7113_v31 = vadd.f32 %v7112_v32, %v7111_v41  ;;  %v13626_v3 = vpop.f32.mrf.mxu1 }
 0xa9c   :  { %15862 = vst [vmem:[#allocation44_spill] sm:$0xff] %v13626_v3  ;;  %v7312_v40 = vsel %vm538_vm2, %v7241_v30, 0.0 }
 0xa9d   :  { %v7115_v13 = vadd.f32 %v7114_v38, %v7113_v31  ;;  %v7311_v62 = vadd.f32 %v7310_v26, %v7309_v33  ;;  %v13631_v9 = vpop.f32.mrf.mxu1  ;;  %v7118_v26 = vsel %vm538_vm2, %v13612_v61, 0.0  ;;  %v7243_v33 = vmul.f32 %v13612_v61, %v13612_v61 }
 0xa9e   :  { %15863 = vst [vmem:[#allocation42_spill] sm:$0xff] %v13631_v9  ;;  %v7116_v29 = vsel %vm538_vm2, %v13631_v9, 0.0  ;;  %v7242_v22 = vmul.f32 %v13631_v9, %v13631_v9 }
 0xa9f   :  { %v13638_v41 = vpop.f32.mrf.mxu1  ;;  %v7313_v23 = vadd.f32 %v7312_v40, %v7311_v62  ;;  %v7117_v32 = vadd.f32 %v7116_v29, %v7115_v13  ;;  %v7316_v30 = vsel %vm538_vm2, %v7243_v33, 0.0  ;;  %v7120_v13 = vsel %vm538_vm2, %v13626_v3, 0.0 }
 0xaa0   :  { %15864 = vst [vmem:[#allocation39_spill] sm:$0xff] %v13638_v41  ;;  %v7314_v17 = vsel %vm538_vm2, %v7242_v22, 0.0  ;;  %v7244_v62 = vmul.f32 %v13626_v3, %v13626_v3 }
 0xaa1   :  { %v13641_v4 = vpop.f32.mrf.mxu1  ;;  %v7119_v38 = vadd.f32 %v7118_v26, %v7117_v32  ;;  %v7315_v9 = vadd.f32 %v7314_v17, %v7313_v23 }
 0xaa2   :  { %15865 = vst [vmem:[#allocation37_spill] sm:$0xff] %v13641_v4  ;;  %v7318_v61 = vsel %vm538_vm2, %v7244_v62, 0.0  ;;  %v7122_v23 = vsel %vm538_vm2, %v13641_v4, 0.0  ;;  %v7245_v32 = vmul.f32 %v13641_v4, %v13641_v4 }
 0xaa3   :  { %v13647_v31 = vpop.f32.mrf.mxu1  ;;  %v7317_v22 = vadd.f32 %v7316_v30, %v7315_v9  ;;  %v7121_v40 = vadd.f32 %v7120_v13, %v7119_v38 }
 0xaa4   :  { %15866 = vst [vmem:[#allocation48_spill] sm:$0xff] %v13647_v31  ;;  %v7320_v30 = vsel %vm538_vm2, %v7245_v32, 0.0 }
 0xaa5   :  { %v13649_v10 = vpop.f32.mrf.mxu1  ;;  %v7123_v26 = vadd.f32 %v7122_v23, %v7121_v40  ;;  %v7319_v33 = vadd.f32 %v7318_v61, %v7317_v22  ;;  %v7126_v61 = vsel %vm538_vm2, %v13638_v41, 0.0  ;;  %v7247_v22 = vmul.f32 %v13638_v41, %v13638_v41 }
 0xaa6   :  { %15867 = vst [vmem:[#allocation46_spill] sm:$0xff] %v13649_v10  ;;  %v7124_v3 = vsel %vm538_vm2, %v13649_v10, 0.0  ;;  %v7246_v9 = vmul.f32 %v13649_v10, %v13649_v10 }
 0xaa7   :  { %v13656_v29 = vpop.f32.mrf.mxu1  ;;  %v7321_v62 = vadd.f32 %v7320_v30, %v7319_v33  ;;  %v7125_v56 = vadd.f32 %v7124_v3, %v7123_v26  ;;  %v7324_v32 = vsel %vm538_vm2, %v7247_v22, 0.0  ;;  %v7128_v3 = vsel %vm538_vm2, %v13647_v31, 0.0 }
 0xaa8   :  { %15868 = vst [vmem:[#allocation43_spill] sm:$0xff] %v13656_v29  ;;  %v7322_v4 = vsel %vm538_vm2, %v7246_v9, 0.0  ;;  %v7248_v26 = vmul.f32 %v13647_v31, %v13647_v31  ;;  %v7251_v31 = vmul.f32 %v13656_v29, %v13656_v29 }
 0xaa9   :  { %v13658_v19 = vpop.f32.mrf.mxu1  ;;  %v7127_v23 = vadd.f32 %v7126_v61, %v7125_v56  ;;  %v7323_v10 = vadd.f32 %v7322_v4, %v7321_v62 }
 0xaaa   :  { %15869 = vst [vmem:[#allocation41_spill] sm:$0xff] %v13658_v19  ;;  %v7249_v41 = vmul.f32 %v13658_v19, %v13658_v19  ;;  %v7326_v56 = vsel %vm538_vm2, %v7248_v26, 0.0  ;;  %v7130_v4 = vsel %vm538_vm2, %v13658_v19, 0.0  ;;  %v7134_v19 = vsel %vm538_vm2, %v13656_v29, 0.0 }
 0xaab   :  { %v13665_v17 = vpop.f32.mrf.mxu1  ;;  %v7325_v9 = vadd.f32 %v7324_v32, %v7323_v10  ;;  %v7129_v30 = vadd.f32 %v7128_v3, %v7127_v23  ;;  %v7332_v35 = vsel %vm538_vm2, %v7251_v31, 0.0 }
 0xaac   :  { %15870 = vst [vmem:[#allocation4_spill] sm:$0xff] %v13665_v17  ;;  %v7328_v10 = vsel %vm538_vm2, %v7249_v41, 0.0 }
 0xaad   :  { %v13671_v38 = vpop.f32.mrf.mxu1  ;;  %v7131_v61 = vadd.f32 %v7130_v4, %v7129_v30  ;;  %v7327_v22 = vadd.f32 %v7326_v56, %v7325_v9  ;;  %v7252_v9 = vmul.f32 %v13665_v17, %v13665_v17 }
 0xaae   :  { %15871 = vst [vmem:[#allocation5_spill] sm:$0xff] %v13671_v38  ;;  %v7132_v23 = vsel %vm538_vm2, %v13671_v38, 0.0  ;;  %v7250_v32 = vmul.f32 %v13671_v38, %v13671_v38  ;;  %v7136_v38 = vsel %vm538_vm2, %v13665_v17, 0.0 }
 0xaaf   :  { %v13674_v13 = vpop.f32.mrf.mxu1  ;;  %v7329_v26 = vadd.f32 %v7328_v10, %v7327_v22  ;;  %v7133_v2 = vadd.f32 %v7132_v23, %v7131_v61 }
 0xab0   :  { %15872 = vst [vmem:[#allocation6_spill] sm:$0xff] %v13674_v13  ;;  %v7330_v30 = vsel %vm538_vm2, %v7250_v32, 0.0  ;;  %v7334_v32 = vsel %vm538_vm2, %v7252_v9, 0.0  ;;  %v7255_v17 = vmul.f32 %v13674_v13, %v13674_v13 }
 0xab1   :  { %v13677_v55 = vpop.f32.mrf.mxu1  ;;  %v7135_v41 = vadd.f32 %v7134_v19, %v7133_v2  ;;  %v7331_v4 = vadd.f32 %v7330_v30, %v7329_v26 }
 0xab2   :  { %15873 = vst [vmem:[#allocation7_spill] sm:$0xff] %v13677_v55  ;;  %v7253_v61 = vmul.f32 %v13677_v55, %v13677_v55  ;;  %v7138_v2 = vsel %vm538_vm2, %v13677_v55, 0.0 }
 0xab3   :  { %v13683_v40 = vpop.f32.mrf.mxu1  ;;  %v7333_v23 = vadd.f32 %v7332_v35, %v7331_v4  ;;  %v7137_v29 = vadd.f32 %v7136_v38, %v7135_v41  ;;  %v7142_v4 = vsel %vm538_vm2, %v13674_v13, 0.0 }
 0xab4   :  { %15874 = vst [vmem:[#allocation8_spill] sm:$0xff] %v13683_v40  ;;  %v7336_v18 = vsel %vm538_vm2, %v7253_v61, 0.0  ;;  %v7144_v61 = vsel %vm538_vm2, %v13683_v40, 0.0 }
 0xab5   :  { %v13685_v63 = vpop.f32.mrf.mxu1  ;;  %v7139_v26 = vadd.f32 %v7138_v2, %v7137_v29  ;;  %v7335_v30 = vadd.f32 %v7334_v32, %v7333_v23  ;;  %v7340_v32 = vsel %vm538_vm2, %v7255_v17, 0.0 }
 0xab6   :  { %15875 = vst [vmem:[#allocation9_spill] sm:$0xff] %v13685_v63  ;;  %v7254_v22 = vmul.f32 %v13685_v63, %v13685_v63  ;;  %v7140_v19 = vsel %vm538_vm2, %v13685_v63, 0.0  ;;  %v7256_v63 = vmul.f32 %v13683_v40, %v13683_v40 }
 0xab7   :  { %v13692_v33 = vpop.f32.mrf.mxu1  ;;  %v7337_v9 = vadd.f32 %v7336_v18, %v7335_v30  ;;  %v7141_v41 = vadd.f32 %v7140_v19, %v7139_v26 }
 0xab8   :  { %15876 = vst [vmem:[#allocation10_spill] sm:$0xff] %v13692_v33  ;;  %v7338_v35 = vsel %vm538_vm2, %v7254_v22, 0.0  ;;  %v7342_v30 = vsel %vm538_vm2, %v7256_v63, 0.0  ;;  %v7259_v40 = vmul.f32 %v13692_v33, %v13692_v33 }
 0xab9   :  { %v13696_v46 = vpop.f32.mrf.mxu1  ;;  %v7143_v29 = vadd.f32 %v7142_v4, %v7141_v41  ;;  %v7339_v23 = vadd.f32 %v7338_v35, %v7337_v9 }
 0xaba   :  { %15877 = vst [vmem:[#allocation11_spill] sm:$0xff] %v13696_v46  ;;  %v7257_v22 = vmul.f32 %v13696_v46, %v13696_v46  ;;  %v7146_v35 = vsel %vm538_vm2, %v13696_v46, 0.0 }
 0xabb   :  { %v13701_v62 = vpop.f32.mrf.mxu1  ;;  %v7341_v19 = vadd.f32 %v7340_v32, %v7339_v23  ;;  %v7145_v26 = vadd.f32 %v7144_v61, %v7143_v29  ;;  %v7150_v61 = vsel %vm538_vm2, %v13692_v33, 0.0 }
 0xabc   :  { %15878 = vst [vmem:[#allocation12_spill] sm:$0xff] %v13701_v62  ;;  %v7344_v13 = vsel %vm538_vm2, %v7257_v22, 0.0  ;;  %v7152_v22 = vsel %vm538_vm2, %v13701_v62, 0.0 }
 0xabd   :  { %v13710_v3 = vpop.f32.mrf.mxu1  ;;  %v7147_v41 = vadd.f32 %v7146_v35, %v7145_v26  ;;  %v7343_v4 = vadd.f32 %v7342_v30, %v7341_v19  ;;  %v7348_v30 = vsel %vm538_vm2, %v7259_v40, 0.0 }
 0xabe   :  { %15879 = vst [vmem:[#allocation13_spill] sm:$0xff] %v13710_v3  ;;  %v7258_v18 = vmul.f32 %v13710_v3, %v13710_v3  ;;  %v7148_v17 = vsel %vm538_vm2, %v13710_v3, 0.0  ;;  %v7260_v3 = vmul.f32 %v13701_v62, %v13701_v62 }
 0xabf   :  { %v13717_v56 = vpop.f32.mrf.mxu1  ;;  %v7345_v63 = vadd.f32 %v7344_v13, %v7343_v4  ;;  %v7149_v32 = vadd.f32 %v7148_v17, %v7147_v41 }
 0xac0   :  { %15880 = vst [vmem:[#allocation14_spill] sm:$0xff] %v13717_v56  ;;  %v7346_v23 = vsel %vm538_vm2, %v7258_v18, 0.0  ;;  %v7350_v4 = vsel %vm538_vm2, %v7260_v3, 0.0  ;;  %v7263_v62 = vmul.f32 %v13717_v56, %v13717_v56 }
 0xac1   :  { %v13726_v10 = vpop.f32.mrf.mxu1  ;;  %v7151_v19 = vadd.f32 %v7150_v61, %v7149_v32  ;;  %v7347_v26 = vadd.f32 %v7346_v23, %v7345_v63 }
 0xac2   :  { %15881 = vst [vmem:[#allocation15_spill] sm:$0xff] %v13726_v10  ;;  %v7261_v18 = vmul.f32 %v13726_v10, %v13726_v10  ;;  %v7154_v23 = vsel %vm538_vm2, %v13726_v10, 0.0 }
 0xac3   :  { %v13733_v31 = vpop.f32.mrf.mxu1  ;;  %v7349_v17 = vadd.f32 %v7348_v30, %v7347_v26  ;;  %v7153_v41 = vadd.f32 %v7152_v22, %v7151_v19  ;;  %v7158_v22 = vsel %vm538_vm2, %v13717_v56, 0.0 }
 0xac4   :  { %15882 = vst [vmem:[#allocation16_spill] sm:$0xff] %v13733_v31  ;;  %v7352_v33 = vsel %vm538_vm2, %v7261_v18, 0.0  ;;  %v7160_v18 = vsel %vm538_vm2, %v13733_v31, 0.0 }
 0xac5   :  { %v13739_v38 = vpop.f32.mrf.mxu1  ;;  %v7155_v32 = vadd.f32 %v7154_v23, %v7153_v41  ;;  %v7351_v61 = vadd.f32 %v7350_v4, %v7349_v17  ;;  %v7356_v4 = vsel %vm538_vm2, %v7263_v62, 0.0 }
 0xac6   :  { %15883 = vst [vmem:[#allocation17_spill] sm:$0xff] %v13739_v38  ;;  %v7262_v13 = vmul.f32 %v13739_v38, %v13739_v38  ;;  %v7156_v40 = vsel %vm538_vm2, %v13739_v38, 0.0  ;;  %v7264_v38 = vmul.f32 %v13733_v31, %v13733_v31 }
 0xac7   :  { %v13745_v55 = vpop.f32.mrf.mxu1  ;;  %v7353_v3 = vadd.f32 %v7352_v33, %v7351_v61  ;;  %v7157_v30 = vadd.f32 %v7156_v40, %v7155_v32 }
 0xac8   :  { %15884 = vst [vmem:[#allocation18_spill] sm:$0xff] %v13745_v55  ;;  %v7354_v26 = vsel %vm538_vm2, %v7262_v13, 0.0  ;;  %v7358_v61 = vsel %vm538_vm2, %v7264_v38, 0.0  ;;  %v7267_v31 = vmul.f32 %v13745_v55, %v13745_v55 }
 0xac9   :  { %v13754_v2 = vpop.f32.mrf.mxu1  ;;  %v7159_v17 = vadd.f32 %v7158_v22, %v7157_v30  ;;  %v7355_v41 = vadd.f32 %v7354_v26, %v7353_v3 }
 0xaca   :  { %15885 = vst [vmem:[#allocation19_spill] sm:$0xff] %v13754_v2  ;;  %v7265_v13 = vmul.f32 %v13754_v2, %v13754_v2  ;;  %v7162_v26 = vsel %vm538_vm2, %v13754_v2, 0.0 }
 0xacb   :  { %v13761_v9 = vpop.f32.mrf.mxu1  ;;  %v7357_v40 = vadd.f32 %v7356_v4, %v7355_v41  ;;  %v7161_v32 = vadd.f32 %v7160_v18, %v7159_v17  ;;  %v7166_v18 = vsel %vm538_vm2, %v13745_v55, 0.0 }
 0xacc   :  { %15886 = vst [vmem:[#allocation20_spill] sm:$0xff] %v13761_v9  ;;  %v7360_v56 = vsel %vm538_vm2, %v7265_v13, 0.0  ;;  %v7168_v13 = vsel %vm538_vm2, %v13761_v9, 0.0 }
 0xacd   :  { %v13767_v29 = vpop.f32.mrf.mxu1  ;;  %v7163_v30 = vadd.f32 %v7162_v26, %v7161_v32  ;;  %v7359_v22 = vadd.f32 %v7358_v61, %v7357_v40  ;;  %v7364_v61 = vsel %vm538_vm2, %v7267_v31, 0.0 }
 0xace   :  { %15887 = vst [vmem:[#allocation21_spill] sm:$0xff] %v13767_v29  ;;  %v7266_v33 = vmul.f32 %v13767_v29, %v13767_v29  ;;  %v7164_v62 = vsel %vm538_vm2, %v13767_v29, 0.0  ;;  %v7268_v29 = vmul.f32 %v13761_v9, %v13761_v9 }
 0xacf   :  { %v13773_v46 = vpop.f32.mrf.mxu1  ;;  %v7361_v38 = vadd.f32 %v7360_v56, %v7359_v22  ;;  %v7165_v4 = vadd.f32 %v7164_v62, %v7163_v30 }
 0xad0   :  { %15888 = vst [vmem:[#allocation22_spill] sm:$0xff] %v13773_v46  ;;  %v7362_v41 = vsel %vm538_vm2, %v7266_v33, 0.0  ;;  %v7366_v22 = vsel %vm538_vm2, %v7268_v29, 0.0  ;;  %v7271_v9 = vmul.f32 %v13773_v46, %v13773_v46 }
 0xad1   :  { %v13782_v35 = vpop.f32.mrf.mxu1  ;;  %v7167_v40 = vadd.f32 %v7166_v18, %v7165_v4  ;;  %v7363_v32 = vadd.f32 %v7362_v41, %v7361_v38 }
 0xad2   :  { %15889 = vst [vmem:[#allocation23_spill] sm:$0xff] %v13782_v35  ;;  %v7269_v33 = vmul.f32 %v13782_v35, %v13782_v35  ;;  %v7170_v41 = vsel %vm538_vm2, %v13782_v35, 0.0 }
 0xad3   :  { %v13789_v63 = vpop.f32.mrf.mxu1  ;;  %v7365_v62 = vadd.f32 %v7364_v61, %v7363_v32  ;;  %v7169_v30 = vadd.f32 %v7168_v13, %v7167_v40  ;;  %v7174_v13 = vsel %vm538_vm2, %v13773_v46, 0.0 }
 0xad4   :  { %15890 = vst [vmem:[#allocation24_spill] sm:$0xff] %v13789_v63  ;;  %v7368_v55 = vsel %vm538_vm2, %v7269_v33, 0.0  ;;  %v7176_v33 = vsel %vm538_vm2, %v13789_v63, 0.0 }
 0xad5   :  { %v13795_v19 = vpop.f32.mrf.mxu1  ;;  %v7171_v4 = vadd.f32 %v7170_v41, %v7169_v30  ;;  %v7367_v18 = vadd.f32 %v7366_v22, %v7365_v62  ;;  %v7372_v22 = vsel %vm538_vm2, %v7271_v9, 0.0 }
 0xad6   :  { %15891 = vst [vmem:[#allocation25_spill] sm:$0xff] %v13795_v19  ;;  %v7270_v56 = vmul.f32 %v13795_v19, %v13795_v19  ;;  %v7172_v31 = vsel %vm538_vm2, %v13795_v19, 0.0  ;;  %v7272_v19 = vmul.f32 %v13789_v63, %v13789_v63 }
 0xad7   :  { %v13801_v10 = vpop.f32.mrf.mxu1  ;;  %v7369_v29 = vadd.f32 %v7368_v55, %v7367_v18  ;;  %v7173_v61 = vadd.f32 %v7172_v31, %v7171_v4 }
 0xad8   :  { %15892 = vst [vmem:[#allocation26_spill] sm:$0xff] %v13801_v10  ;;  %v7370_v32 = vsel %vm538_vm2, %v7270_v56, 0.0  ;;  %v7374_v18 = vsel %vm538_vm2, %v7272_v19, 0.0  ;;  %v7275_v63 = vmul.f32 %v13801_v10, %v13801_v10 }
 0xad9   :  { %v13810_v23 = vpop.f32.mrf.mxu1  ;;  %v7175_v62 = vadd.f32 %v7174_v13, %v7173_v61  ;;  %v7371_v30 = vadd.f32 %v7370_v32, %v7369_v29 }
 0xada   :  { %15893 = vst [vmem:[#allocation27_spill] sm:$0xff] %v13810_v23  ;;  %v7273_v56 = vmul.f32 %v13810_v23, %v13810_v23  ;;  %v7178_v32 = vsel %vm538_vm2, %v13810_v23, 0.0 }
 0xadb   :  { %v13817_v3 = vpop.f32.mrf.mxu1  ;;  %v7373_v31 = vadd.f32 %v7372_v22, %v7371_v30  ;;  %v7177_v4 = vadd.f32 %v7176_v33, %v7175_v62  ;;  %v7182_v33 = vsel %vm538_vm2, %v13801_v10, 0.0 }
 0xadc   :  { %15894 = vst [vmem:[#allocation28_spill] sm:$0xff] %v13817_v3  ;;  %v7376_v46 = vsel %vm538_vm2, %v7273_v56, 0.0  ;;  %v7184_v56 = vsel %vm538_vm2, %v13817_v3, 0.0 }
 0xadd   :  { %v13823_v17 = vpop.f32.mrf.mxu1  ;;  %v7179_v61 = vadd.f32 %v7178_v32, %v7177_v4  ;;  %v7375_v13 = vadd.f32 %v7374_v18, %v7373_v31  ;;  %v7380_v18 = vsel %vm538_vm2, %v7275_v63, 0.0 }
 0xade   :  { %15895 = vst [vmem:[#allocation29_spill] sm:$0xff] %v13823_v17  ;;  %v7274_v55 = vmul.f32 %v13823_v17, %v13823_v17  ;;  %v7180_v9 = vsel %vm538_vm2, %v13823_v17, 0.0  ;;  %v7276_v17 = vmul.f32 %v13817_v3, %v13817_v3 }
 0xadf   :  { %v13829_v2 = vpop.f32.mrf.mxu1  ;;  %v7377_v19 = vadd.f32 %v7376_v46, %v7375_v13  ;;  %v7181_v22 = vadd.f32 %v7180_v9, %v7179_v61 }
 0xae0   :  { %15896 = vst [vmem:[#allocation30_spill] sm:$0xff] %v13829_v2  ;;  %v7378_v30 = vsel %vm538_vm2, %v7274_v55, 0.0  ;;  %v7382_v13 = vsel %vm538_vm2, %v7276_v17, 0.0  ;;  %v7279_v3 = vmul.f32 %v13829_v2, %v13829_v2 }
 0xae1   :  { %v13838_v26 = vpop.f32.mrf.mxu1  ;;  %v7183_v31 = vadd.f32 %v7182_v33, %v7181_v22  ;;  %v7379_v4 = vadd.f32 %v7378_v30, %v7377_v19 }
 0xae2   :  { %15897 = vst [vmem:[#allocation31_spill] sm:$0xff] %v13838_v26  ;;  %v7277_v55 = vmul.f32 %v13838_v26, %v13838_v26  ;;  %v7186_v30 = vsel %vm538_vm2, %v13838_v26, 0.0 }
 0xae3   :  { %v13845_v38 = vpop.f32.mrf.mxu1  ;;  %v7381_v9 = vadd.f32 %v7380_v18, %v7379_v4  ;;  %v7185_v61 = vadd.f32 %v7184_v56, %v7183_v31  ;;  %v7190_v56 = vsel %vm538_vm2, %v13829_v2, 0.0 }
 0xae4   :  { %15898 = vst [vmem:[#allocation32_spill] sm:$0xff] %v13845_v38  ;;  %v7384_v10 = vsel %vm538_vm2, %v7277_v55, 0.0  ;;  %v7192_v55 = vsel %vm538_vm2, %v13845_v38, 0.0 }
 0xae5   :  { %v13851_v40 = vpop.f32.mrf.mxu1  ;;  %v7187_v22 = vadd.f32 %v7186_v30, %v7185_v61  ;;  %v7383_v33 = vadd.f32 %v7382_v13, %v7381_v9  ;;  %v7388_v13 = vsel %vm538_vm2, %v7279_v3, 0.0 }
 0xae6   :  { %15899 = vst [vmem:[#allocation33_spill] sm:$0xff] %v13851_v40  ;;  %v7278_v46 = vmul.f32 %v13851_v40, %v13851_v40  ;;  %v7188_v63 = vsel %vm538_vm2, %v13851_v40, 0.0  ;;  %v7280_v40 = vmul.f32 %v13845_v38, %v13845_v38 }
 0xae7   :  { %v13857_v35 = vpop.f32.mrf.mxu1  ;;  %v7385_v17 = vadd.f32 %v7384_v10, %v7383_v33  ;;  %v7189_v18 = vadd.f32 %v7188_v63, %v7187_v22  ;;  %v6703_v63 = vsub.f32 0.0, %v13563_v51 }
 0xae8   :  { %v7386_v4 = vsel %vm538_vm2, %v7278_v46, 0.0  ;;  %v7283_v2 = vmul.f32 %v13857_v35, %v13857_v35 }
 0xae9   :  { %v13866_v41 = vpop.f32.mrf.mxu1  ;;  %v7191_v9 = vadd.f32 %v7190_v56, %v7189_v18  ;;  %v7387_v61 = vadd.f32 %v7386_v4, %v7385_v17  ;;  %v7390_v18 = vsel %vm538_vm2, %v7280_v40, 0.0 }
 0xaea   :  { %v7281_v46 = vmul.f32 %v13866_v41, %v13866_v41  ;;  %v7194_v3 = vsel %vm538_vm2, %v13866_v41, 0.0 }
 0xaeb   :  { %v13873_v29 = vpop.f32.mrf.mxu1  ;;  %v7389_v22 = vadd.f32 %v7388_v13, %v7387_v61  ;;  %v7193_v33 = vadd.f32 %v7192_v55, %v7191_v9  ;;  %v6704_v9 = vmul.f32 1.442695, %v6703_v63  ;;  %v7198_v55 = vsel %vm538_vm2, %v13857_v35, 0.0 }
 0xaec   :  { %v7392_v5 = vsel %vm538_vm2, %v7281_v46, 0.0  ;;  %v7200_v46 = vsel %vm538_vm2, %v13873_v29, 0.0 }
 0xaed   :  { %v13879_v62 = vpop.f32.mrf.mxu1  ;;  %v7195_v56 = vadd.f32 %v7194_v3, %v7193_v33  ;;  %v7391_v38 = vadd.f32 %v7390_v18, %v7389_v22  ;;  %v7396_v18 = vsel %vm538_vm2, %v7283_v2, 0.0  ;;  %8371 = vpow2.f32 %v6704_v9 }
 0xaee   :  { %15900 = vst [vmem:[#allocation34_spill] sm:$0xff] %v13879_v62  ;;  %v7282_v10 = vmul.f32 %v13879_v62, %v13879_v62  ;;  %v7196_v4 = vsel %vm538_vm2, %v13879_v62, 0.0  ;;  %v7284_v62 = vmul.f32 %v13873_v29, %v13873_v29 }
 0xaef   :  { %v13885_v23 = vpop.f32.mrf.mxu1  ;;  %v7393_v61 = vadd.f32 %v7392_v5, %v7391_v38  ;;  %v7197_v40 = vadd.f32 %v7196_v4, %v7195_v56 }
 0xaf0   :  { %15901 = vst [vmem:[#allocation35_spill] sm:$0xff] %v13885_v23  ;;  %v7394_v51 = vsel %vm538_vm2, %v7282_v10, 0.0  ;;  %v7398_v4 = vsel %vm538_vm2, %v7284_v62, 0.0  ;;  %v7206_v62 = vsel %vm538_vm2, %v13885_v23, 0.0 }
 0xaf1   :  { %v13894_v32 = vpop.f32.mrf.mxu1  ;;  %v7199_v33 = vadd.f32 %v7198_v55, %v7197_v40  ;;  %v7395_v22 = vadd.f32 %v7394_v51, %v7393_v61  ;;  %v7287_v40 = vmul.f32 %v13885_v23, %v13885_v23 }
 0xaf2   :  { %v7285_v10 = vmul.f32 %v13894_v32, %v13894_v32  ;;  %v7202_v56 = vsel %vm538_vm2, %v13894_v32, 0.0 }
 0xaf3   :  { %v13901_v19 = vpop.f32.mrf.mxu1  ;;  %v7397_v38 = vadd.f32 %v7396_v18, %v7395_v22  ;;  %v7201_v63 = vadd.f32 %v7200_v46, %v7199_v33 }
 0xaf4   :  { %15902 = vst [vmem:[#allocation85_spill] sm:$0xff] %v13901_v19  ;;  %v7400_v55 = vsel %vm538_vm2, %v7285_v10, 0.0  ;;  %v7288_v46 = vmul.f32 %v13901_v19, %v13901_v19 }
 0xaf5   :  { %v13907_v31 = vpop.f32.mrf.mxu1  ;;  %v7203_v51 = vadd.f32 %v7202_v56, %v7201_v63  ;;  %v7399_v61 = vadd.f32 %v7398_v4, %v7397_v38  ;;  %v7404_v38 = vsel %vm538_vm2, %v7287_v40, 0.0  ;;  %v7208_v4 = vsel %vm538_vm2, %v13901_v19, 0.0 }
 0xaf6   :  { %15903 = vst [vmem:[#allocation86_spill] sm:$0xff] %v13907_v31  ;;  %v7286_v5 = vmul.f32 %v13907_v31, %v13907_v31  ;;  %v7204_v2 = vsel %vm538_vm2, %v13907_v31, 0.0 }
 0xaf7   :  { %v13913_v26 = vpop.f32.mrf.mxu1  ;;  %v7401_v33 = vadd.f32 %v7400_v55, %v7399_v61  ;;  %v7205_v22 = vadd.f32 %v7204_v2, %v7203_v51  ;;  %v7406_v61 = vsel %vm538_vm2, %v7288_v46, 0.0 }
 0xaf8   :  { %15904 = vst [vmem:[#allocation87_spill] sm:$0xff] %v13913_v26  ;;  %v7402_v9 = vsel %vm538_vm2, %v7286_v5, 0.0 }
 0xaf9   :  { %v13922_v30 = vpop.f32.mrf.mxu1  ;;  %v7207_v31 = vadd.f32 %v7206_v62, %v7205_v22  ;;  %v7403_v63 = vadd.f32 %v7402_v9, %v7401_v33  ;;  %v7291_v22 = vmul.f32 %v13913_v26, %v13913_v26 }
 0xafa   :  { %15905 = vst [vmem:[#allocation88_spill] sm:$0xff] %v13922_v30  ;;  %v7289_v10 = vmul.f32 %v13922_v30, %v13922_v30  ;;  %v7210_v55 = vsel %vm538_vm2, %v13922_v30, 0.0  ;;  %v8372_v46 = vpop.eup %8371  ;;  %v7214_v30 = vsel %vm538_vm2, %v13913_v26, 0.0 }
 0xafb   :  { %v13930_v17 = vpop.f32.mrf.mxu1  ;;  %v7405_v56 = vadd.f32 %v7404_v38, %v7403_v63  ;;  %v7209_v2 = vadd.f32 %v7208_v4, %v7207_v31 }
 0xafc   :  { %15906 = vst [vmem:[#allocation89_spill] sm:$0xff] %v13930_v17  ;;  %v7408_v62 = vsel %vm538_vm2, %v7289_v10, 0.0  ;;  %v7216_v10 = vsel %vm538_vm2, %v13930_v17, 0.0 }
 0xafd   :  { %v13936_v13 = vpop.f32.mrf.mxu1  ;;  %v7211_v9 = vadd.f32 %v7210_v55, %v7209_v2  ;;  %v7407_v33 = vadd.f32 %v7406_v61, %v7405_v56  ;;  %v7412_v61 = vsel %vm538_vm2, %v7291_v22, 0.0 }
 0xafe   :  { %15907 = vst [vmem:[#allocation90_spill] sm:$0xff] %v13936_v13  ;;  %v7290_v5 = vmul.f32 %v13936_v13, %v13936_v13  ;;  %v7212_v40 = vsel %vm538_vm2, %v13936_v13, 0.0  ;;  %v7292_v13 = vmul.f32 %v13930_v17, %v13930_v17 }
 0xaff   :  { %v13949_v3 = vpop.f32.mrf.mxu1  ;;  %v7409_v31 = vadd.f32 %v7408_v62, %v7407_v33  ;;  %v7213_v38 = vadd.f32 %v7212_v40, %v7211_v9  ;;  %v6706_v40 = vadd.f32 1.0, %v8372_v46 }
 0xb00   :  { %15908 = vst [vmem:[#allocation91_spill] sm:$0xff] %v13949_v3  ;;  %v7410_v63 = vsel %vm538_vm2, %v7290_v5, 0.0  ;;  %v7414_v62 = vsel %vm538_vm2, %v7292_v13, 0.0  ;;  %v7222_v13 = vsel %vm538_vm2, %v13949_v3, 0.0 }
 0xb01   :  { %v13960_v18 = vpop.f32.mrf.mxu1  ;;  %v7215_v2 = vadd.f32 %v7214_v30, %v7213_v38  ;;  %v7411_v56 = vadd.f32 %v7410_v63, %v7409_v31  ;;  %v7295_v38 = vmul.f32 %v13949_v3, %v13949_v3  ;;  %8373 = vrcp.f32 %v6706_v40 }
 0xb02   :  { %15909 = vst [vmem:[#allocation92_spill] sm:$0xff] %v13960_v18  ;;  %v7293_v5 = vmul.f32 %v13960_v18, %v13960_v18  ;;  %v7218_v30 = vsel %vm538_vm2, %v13960_v18, 0.0 }
 0xb03   :  { %v13973_v51 = vpop.f32.mrf.mxu1  ;;  %v7413_v9 = vadd.f32 %v7412_v61, %v7411_v56  ;;  %v7217_v33 = vadd.f32 %v7216_v10, %v7215_v2 }
 0xb04   :  { %15910 = vst [vmem:[#allocation93_spill] sm:$0xff] %v13973_v51  ;;  %v7416_v17 = vsel %vm538_vm2, %v7293_v5, 0.0  ;;  %v7296_v56 = vmul.f32 %v13973_v51, %v13973_v51 }
 0xb05   :  { %v13984_v4 = vpop.f32.mrf.mxu1  ;;  %v7219_v63 = vadd.f32 %v7218_v30, %v7217_v33  ;;  %v7415_v31 = vadd.f32 %v7414_v62, %v7413_v9  ;;  %v7420_v9 = vsel %vm538_vm2, %v7295_v38, 0.0  ;;  %v7224_v33 = vsel %vm538_vm2, %v13973_v51, 0.0 }
 0xb06   :  { %15911 = vst [vmem:[#allocation94_spill] sm:$0xff] %v13984_v4  ;;  %v7294_v55 = vmul.f32 %v13984_v4, %v13984_v4  ;;  %v7220_v22 = vsel %vm538_vm2, %v13984_v4, 0.0  ;;  %v8387_v62 = vmov 1966171168  }
 0xb07   :  { %v7417_v46 = vadd.f32 %v7416_v17, %v7415_v31  ;;  %v7221_v2 = vadd.f32 %v7220_v22, %v7219_v63  ;;  %v6711_v5 = vunpack.c.l.s4 %v8387_v62  ;;  %v7422_v17 = vsel %vm538_vm2, %v7296_v56, 0.0 }
 0xb08   :  { %v7418_v26 = vsel %vm538_vm2, %v7294_v55, 0.0 }
 0xb09   :  { %v7223_v61 = vadd.f32 %v7222_v13, %v7221_v2  ;;  %v7419_v10 = vadd.f32 %v7418_v26, %v7417_v46  ;;  %v6712_v63 = vunpack.c.0.s8 %v6711_v5  ;;  %v15912_v2 = vld [vmem:[#allocation60_spill] sm:$0xff] }
 0xb0b   :  { %v7225_v30 = vadd.f32 %v7224_v33, %v7223_v61  ;;  %v7421_v55 = vadd.f32 %v7420_v9, %v7419_v10  ;;  %v6715_v26 = vsub.s32 %v6712_v63, %v15912_v2 }
 0xb0d   :  { %v7226_v40 = vrot.slane %v7225_v30, 4  ;;  %v7423_v22 = vadd.f32 %v7422_v17, %v7421_v55 }
 0xb0e   :  { %v8374_v13 = vpop.eup %8373 }
 0xb0f   :  { %v7227_v31 = vadd.f32 %v7226_v40, %v7225_v30  ;;  %v7424_v3 = vrot.slane %v7423_v22, 4  ;;  %v6716_v23 = vrot.slane %v8374_v13, %v6715_v26  ;;  %v15957_v13 = vld [vmem:[#allocation67_spill] sm:$0xff] }
 0xb11   :  { %v7228_v4 = vrot.slane %v7227_v31, 2  ;;  %v7425_v18 = vadd.f32 %v7424_v3, %v7423_v22  ;;  %v6717_v9 = vcombine.high %v6716_v23, %v6716_v23  ;;  %v6724_v33 = vrot.slane %v6716_v23, %v6715_v26 }
 0xb13   :  { %v7229_v46 = vadd.f32 %v7228_v4, %v7227_v31  ;;  %v7426_v38 = vrot.slane %v7425_v18, 2  ;;  %v6731_v55 = vrot.slane %v6717_v9, %v6715_v26  ;;  %v6735_v4 = vrot.slane %v6724_v33, %v15714_v14  ;;  %v15953_v26 = vld [vmem:[#allocation65_spill] sm:$0xff] }
 0xb14   :  { %v15961_v33 = vld [vmem:[#allocation69_spill] sm:$0xff] }
 0xb15   :  { %v7230_v19 = vrot.slane %v7229_v46, 1  ;;  %v7427_v51 = vadd.f32 %v7426_v38, %v7425_v18  ;;  %v14021_v18 = vrot.slane %v6731_v55, %v15714_v14  ;;  %v14030_v23 = vmul.f32 %v6735_v4, %v13170_v20  ;;  %v15965_v55 = vld [vmem:[#allocation71_spill] sm:$0xff] }
 0xb16   :  { %v14033_v40 = vmul.f32 %v6735_v4, %v13184_v52  ;;  %v14036_v22 = vmul.f32 %v6735_v4, %v13198_v39  ;;  %v14039_v63 = vmul.f32 %v6735_v4, %v13212_v54  ;;  %v14042_v31 = vmul.f32 %v6735_v4, %v13226_v34 }
 0xb17   :  { %v7231_v62 = vadd.f32 %v7230_v19, %v7229_v46  ;;  %v7428_v61 = vrot.slane %v7427_v51, 1  ;;  %v14024_v19 = vmul.f32 %v6735_v4, %v13148_v36  ;;  %15915 = vst [vmem:[#allocation96_spill] sm:$0xff] %v14030_v23  ;;  %v14045_v36 = vmul.f32 %v6735_v4, %v13240_v58  ;;  %v15955_v46 = vld [vmem:[#allocation66_spill] sm:$0xff] }
 0xb18   :  { %15916 = vst [vmem:[#allocation97_spill] sm:$0xff] %v14033_v40  ;;  %15917 = vst [vmem:[#allocation98_spill] sm:$0xff] %v14036_v22  ;;  %v14051_v20 = vmul.f32 %v6735_v4, %v13268_v42  ;;  %v14054_v52 = vmul.f32 %v6735_v4, %v13282_v45  ;;  %v14057_v39 = vmul.f32 %v6735_v4, %v13296_v12  ;;  %v16054_v22 = vld [vmem:[#allocation32_spill] sm:$0xff]  ;;  %v16055_v40 = vld [vmem:[#allocation34_spill] sm:$0xff] }
 0xb19   :  { %v14015_v10 = vmul.f32 0.001953125, %v7231_v62  ;;  %v7429_v56 = vadd.f32 %v7428_v61, %v7427_v51  ;;  %15913 = vst [vmem:[#allocation60_spill] sm:$0xff] %v14024_v19  ;;  %v14027_v51 = vmul.f32 %v6735_v4, %v13158_v48  ;;  %15918 = vst [vmem:[#allocation99_spill] sm:$0xff] %v14039_v63  ;;  %v14048_v48 = vmul.f32 %v6735_v4, %v13254_v53  ;;  %v15959_v61 = vld [vmem:[#allocation68_spill] sm:$0xff]  ;;  %v16053_v63 = vld [vmem:[#allocation30_spill] sm:$0xff] }
 0xb1a   :  { %15919 = vst [vmem:[#allocation100_spill] sm:$0xff] %v14042_v31  ;;  %15920 = vst [vmem:[#allocation101_spill] sm:$0xff] %v14045_v36  ;;  %v14060_v54 = vmul.f32 %v6735_v4, %v13310_v57  ;;  %v14063_v34 = vmul.f32 %v6735_v4, %v13322_v16  ;;  %v14066_v58 = vmul.f32 %v6735_v4, %v13333_v43  ;;  %v16051_v36 = vld [vmem:[#allocation31_spill] sm:$0xff]  ;;  %v16052_v31 = vld [vmem:[#allocation33_spill] sm:$0xff] }
 0xb1b   :  { %v7430_v5 = vmul.f32 0.001953125, %v7429_v56  ;;  %v7431_v30 = vmul.f32 %v14015_v10, %v14015_v10  ;;  %15914 = vst [vmem:[#allocation95_spill] sm:$0xff] %v14027_v51  ;;  %15921 = vst [vmem:[#allocation102_spill] sm:$0xff] %v14048_v48  ;;  %v14069_v53 = vmul.f32 %v6735_v4, %v13345_v6  ;;  %v14072_v42 = vmul.f32 %v6735_v4, %v13354_v1  ;;  %v16050_v48 = vld [vmem:[#allocation28_spill] sm:$0xff]  ;;  %v16059_v23 = vld [vmem:[#allocation86_spill] sm:$0xff] }
 0xb1c   :  { %15922 = vst [vmem:[#allocation103_spill] sm:$0xff] %v14051_v20  ;;  %15923 = vst [vmem:[#allocation104_spill] sm:$0xff] %v14054_v52  ;;  %v14075_v45 = vmul.f32 %v6735_v4, %v13366_v21  ;;  %v14078_v12 = vmul.f32 %v6735_v4, %v13375_v49  ;;  %v14081_v57 = vmul.f32 %v6735_v4, %v13387_v50  ;;  %v16048_v52 = vld [vmem:[#allocation29_spill] sm:$0xff]  ;;  %v16049_v20 = vld [vmem:[#allocation26_spill] sm:$0xff] }
 0xb1d   :  { %v7432_v3 = vsub.f32 %v7430_v5, %v7431_v30  ;;  %15924 = vst [vmem:[#allocation105_spill] sm:$0xff] %v14057_v39  ;;  %15925 = vst [vmem:[#allocation106_spill] sm:$0xff] %v14060_v54  ;;  %v14084_v16 = vmul.f32 %v6735_v4, %v13396_v25  ;;  %v14087_v43 = vmul.f32 %v6735_v4, %v13408_v44  ;;  %v15963_v30 = vld [vmem:[#allocation70_spill] sm:$0xff]  ;;  %v16046_v54 = vld [vmem:[#allocation24_spill] sm:$0xff] }
 0xb1e   :  { %15926 = vst [vmem:[#allocation107_spill] sm:$0xff] %v14063_v34  ;;  %15927 = vst [vmem:[#allocation108_spill] sm:$0xff] %v14066_v58  ;;  %v14090_v6 = vmul.f32 %v6735_v4, %v13417_v28  ;;  %v14093_v1 = vmul.f32 %v6735_v4, %v13429_v0  ;;  %v14096_v21 = vmul.f32 %v6735_v4, %v13436_v37  ;;  %v16044_v58 = vld [vmem:[#allocation25_spill] sm:$0xff]  ;;  %v16045_v34 = vld [vmem:[#allocation22_spill] sm:$0xff] }
 0xb1f   :  { %v7434_v17 = vadd.f32 1e-05, %v7432_v3  ;;  %15928 = vst [vmem:[#allocation109_spill] sm:$0xff] %v14069_v53  ;;  %15929 = vst [vmem:[#allocation110_spill] sm:$0xff] %v14072_v42  ;;  %v14099_v49 = vmul.f32 %v6735_v4, %v13445_v11  ;;  %v14102_v50 = vmul.f32 %v6735_v4, %v13452_v15  ;;  %v14105_v25 = vmul.f32 %v6735_v4, %v13459_v7  ;;  %v15947_v7 = vld [vmem:[#allocation62_spill] sm:$0xff]  ;;  %v16042_v42 = vld [vmem:[#allocation20_spill] sm:$0xff] }
 0xb20   :  { %15930 = vst [vmem:[#allocation111_spill] sm:$0xff] %v14075_v45  ;;  %15931 = vst [vmem:[#allocation112_spill] sm:$0xff] %v14078_v12  ;;  %v14108_v44 = vmul.f32 %v6735_v4, %v13466_v60  ;;  %v14111_v28 = vmul.f32 %v6735_v4, %v13473_v24  ;;  %v14114_v0 = vmul.f32 %v6735_v4, %v13480_v27  ;;  %v15949_v24 = vld [vmem:[#allocation63_spill] sm:$0xff]  ;;  %v15951_v27 = vld [vmem:[#allocation64_spill] sm:$0xff] }
 0xb21   :  { %8375 = vrsqrt.f32 %v7434_v17  ;;  %15932 = vst [vmem:[#allocation113_spill] sm:$0xff] %v14081_v57  ;;  %15933 = vst [vmem:[#allocation114_spill] sm:$0xff] %v14084_v16  ;;  %v14117_v37 = vmul.f32 %v6735_v4, %v13485_v47  ;;  %v14121_v11 = vmul.f32 %v14021_v18, %v13052_v8  ;;  %v14125_v15 = vmul.f32 %v14021_v18, %v13055_v59  ;;  %v7433_v8 = vld [vmem:[%s15367_s13] sm:$0x1]  ;;  %v16039_v57 = vld [vmem:[#allocation19_spill] sm:$0xff] }
 0xb22   :  { %15934 = vst [vmem:[#allocation115_spill] sm:$0xff] %v14087_v43  ;;  %15935 = vst [vmem:[#allocation116_spill] sm:$0xff] %v14090_v6  ;;  %v14129_v60 = vmul.f32 %v14021_v18, %v15947_v7  ;;  %v14133_v2 = vmul.f32 %v14021_v18, %v15949_v24  ;;  %v14137_v47 = vmul.f32 %v14021_v18, %v15951_v27  ;;  %v15967_v17 = vld [vmem:[#allocation72_spill] sm:$0xff]  ;;  %v15969_v24 = vld [vmem:[#allocation73_spill] sm:$0xff] }
 0xb23   :  { %15936 = vst [vmem:[#allocation117_spill] sm:$0xff] %v14093_v1  ;;  %15937 = vst [vmem:[#allocation118_spill] sm:$0xff] %v14096_v21  ;;  %v14144_v59 = vmul.f32 %v14021_v18, %v15953_v26  ;;  %v14148_v38 = vmul.f32 %v14021_v18, %v15955_v46  ;;  %v14152_v62 = vmul.f32 %v14021_v18, %v15957_v13  ;;  %v15971_v26 = vld [vmem:[#allocation74_spill] sm:$0xff]  ;;  %v15973_v13 = vld [vmem:[#allocation75_spill] sm:$0xff] }
 0xb24   :  { %15938 = vst [vmem:[#allocation119_spill] sm:$0xff] %v14099_v49  ;;  %15939 = vst [vmem:[#allocation120_spill] sm:$0xff] %v14102_v50  ;;  %v14156_v56 = vmul.f32 %v14021_v18, %v15959_v61  ;;  %v14160_v5 = vmul.f32 %v14021_v18, %v15961_v33  ;;  %v14164_v3 = vmul.f32 %v14021_v18, %v15963_v30  ;;  %v15975_v30 = vld [vmem:[#allocation76_spill] sm:$0xff]  ;;  %v16032_v50 = vld [vmem:[#allocation13_spill] sm:$0xff] }
 0xb25   :  { %15940 = vst [vmem:[#allocation121_spill] sm:$0xff] %v14105_v25  ;;  %15941 = vst [vmem:[#allocation122_spill] sm:$0xff] %v14108_v44  ;;  %v14168_v4 = vmul.f32 %v14021_v18, %v15965_v55  ;;  %v14172_v7 = vmul.f32 %v14021_v18, %v15967_v17  ;;  %v14176_v27 = vmul.f32 %v14021_v18, %v15969_v24  ;;  %v16030_v44 = vld [vmem:[#allocation8_spill] sm:$0xff]  ;;  %v16031_v25 = vld [vmem:[#allocation11_spill] sm:$0xff] }
 0xb26   :  { %15942 = vst [vmem:[#allocation123_spill] sm:$0xff] %v14111_v28  ;;  %15943 = vst [vmem:[#allocation124_spill] sm:$0xff] %v14114_v0  ;;  %v14180_v46 = vmul.f32 %v14021_v18, %v15971_v26  ;;  %v14184_v61 = vmul.f32 %v14021_v18, %v15973_v13  ;;  %v14188_v55 = vmul.f32 %v14021_v18, %v15975_v30  ;;  %v16028_v0 = vld [vmem:[#allocation9_spill] sm:$0xff]  ;;  %v16029_v28 = vld [vmem:[#allocation6_spill] sm:$0xff] }
 0xb27   :  { %15944 = vst [vmem:[#allocation125_spill] sm:$0xff] %v14117_v37  ;;  %15945 = vst [vmem:[#allocation126_spill] sm:$0xff] %v14121_v11  ;;  %v16026_v11 = vld [vmem:[#allocation4_spill] sm:$0xff]  ;;  %v16027_v37 = vld [vmem:[#allocation7_spill] sm:$0xff] }
 0xb28   :  { %15946 = vst [vmem:[#allocation127_spill] sm:$0xff] %v14125_v15  ;;  %15948 = vst [vmem:[#allocation62_spill] sm:$0xff] %v14129_v60  ;;  %v16024_v60 = vld [vmem:[#allocation5_spill] sm:$0xff]  ;;  %v16025_v15 = vld [vmem:[#allocation43_spill] sm:$0xff] }
 0xb29   :  { %15950 = vst [vmem:[#allocation63_spill] sm:$0xff] %v14133_v2  ;;  %15952 = vst [vmem:[#allocation64_spill] sm:$0xff] %v14137_v47  ;;  %v16022_v47 = vld [vmem:[#allocation48_spill] sm:$0xff]  ;;  %v16023_v2 = vld [vmem:[#allocation41_spill] sm:$0xff] }
 0xb2a   :  { %15954 = vst [vmem:[#allocation65_spill] sm:$0xff] %v14144_v59  ;;  %15956 = vst [vmem:[#allocation66_spill] sm:$0xff] %v14148_v38  ;;  %v16020_v38 = vld [vmem:[#allocation46_spill] sm:$0xff]  ;;  %v16021_v59 = vld [vmem:[#allocation39_spill] sm:$0xff] }
 0xb2b   :  { %15958 = vst [vmem:[#allocation67_spill] sm:$0xff] %v14152_v62  ;;  %15960 = vst [vmem:[#allocation68_spill] sm:$0xff] %v14156_v56  ;;  %v16018_v56 = vld [vmem:[#allocation44_spill] sm:$0xff]  ;;  %v16019_v62 = vld [vmem:[#allocation37_spill] sm:$0xff] }
 0xb2c   :  { %15962 = vst [vmem:[#allocation69_spill] sm:$0xff] %v14160_v5  ;;  %15964 = vst [vmem:[#allocation70_spill] sm:$0xff] %v14164_v3  ;;  %v16016_v3 = vld [vmem:[#allocation42_spill] sm:$0xff]  ;;  %v16017_v5 = vld [vmem:[#allocation49_spill] sm:$0xff] }
 0xb2d   :  { %15966 = vst [vmem:[#allocation71_spill] sm:$0xff] %v14168_v4  ;;  %15968 = vst [vmem:[#allocation72_spill] sm:$0xff] %v14172_v7  ;;  %v15977_v4 = vld [vmem:[#allocation77_spill] sm:$0xff]  ;;  %v15979_v7 = vld [vmem:[#allocation78_spill] sm:$0xff] }
 0xb2e   :  { %v8376_v9 = vpop.eup %8375  ;;  %15970 = vst [vmem:[#allocation73_spill] sm:$0xff] %v14176_v27  ;;  %15972 = vst [vmem:[#allocation74_spill] sm:$0xff] %v14180_v46  ;;  %v14192_v17 = vmul.f32 %v14021_v18, %v15977_v4  ;;  %v14196_v24 = vmul.f32 %v14021_v18, %v15979_v7  ;;  %v15981_v27 = vld [vmem:[#allocation79_spill] sm:$0xff]  ;;  %v15983_v46 = vld [vmem:[#allocation80_spill] sm:$0xff] }
 0xb2f   :  { %15974 = vst [vmem:[#allocation75_spill] sm:$0xff] %v14184_v61  ;;  %v7436_v33 = vmul.f32 %v8376_v9, %v7433_v8  ;;  %15976 = vst [vmem:[#allocation76_spill] sm:$0xff] %v14188_v55  ;;  %v14200_v26 = vmul.f32 %v14021_v18, %v15981_v27  ;;  %v14204_v13 = vmul.f32 %v14021_v18, %v15983_v46  ;;  %v15985_v8 = vld [vmem:[#allocation81_spill] sm:$0xff]  ;;  %v14213_v4 = vld [vmem:[%s15368_s14] sm:$0x1] }
 0xb30   :  { %15978 = vst [vmem:[#allocation77_spill] sm:$0xff] %v14192_v17  ;;  %15980 = vst [vmem:[#allocation78_spill] sm:$0xff] %v14196_v24  ;;  %v14208_v9 = vmul.f32 %v14021_v18, %v15985_v8  ;;  %v15987_v27 = vld [vmem:[#allocation82_spill] sm:$0xff]  ;;  %v15989_v46 = vld [vmem:[#allocation83_spill] sm:$0xff] }
 0xb31   :  { %15982 = vst [vmem:[#allocation79_spill] sm:$0xff] %v14200_v26  ;;  %15984 = vst [vmem:[#allocation80_spill] sm:$0xff] %v14204_v13  ;;  %v14216_v7 = vmul.f32 %v7436_v33, %v14015_v10  ;;  %v14219_v30 = vrot.slane %v7436_v33, %v15714_v14  ;;  %v14223_v26 = vmul.f32 %v14021_v18, %v15987_v27  ;;  %v15991_v8 = vld [vmem:[#allocation84_spill] sm:$0xff]  ;;  %v15993_v24 = vld [vmem:[#allocation47_spill] sm:$0xff] }
 0xb32   :  { %15986 = vst [vmem:[#allocation81_spill] sm:$0xff] %v14208_v9  ;;  %v14227_v13 = vmul.f32 %v14021_v18, %v15989_v46  ;;  %v14231_v9 = vmul.f32 %v14021_v18, %v15991_v8  ;;  %v14235_v17 = vmul.f32 %v14021_v18, %v15993_v24  ;;  %v15995_v10 = vld [vmem:[#allocation56_spill] sm:$0xff]  ;;  %v15997_v55 = vld [vmem:[#allocation61_spill] sm:$0xff]  ;;  %v16015_v61 = vld [vmem:[#allocation59_spill] sm:$0xff] }
 0xb33   :  { %15988 = vst [vmem:[#allocation82_spill] sm:$0xff] %v14223_v26  ;;  %v14239_v33 = vmul.f32 %v14021_v18, %v15995_v10  ;;  %v14243_v27 = vmul.f32 %v14021_v18, %v15997_v55  ;;  %v15999_v26 = vld [vmem:[#allocation52_spill] sm:$0xff]  ;;  %v7439_v55 = vsub.f32 %v14213_v4, %v14216_v7  ;;  %v16033_v49 = vld [vmem:[#allocation10_spill] sm:$0xff]  ;;  %v16035_v1 = vld [vmem:[#allocation15_spill] sm:$0xff] }
 0xb34   :  { %15990 = vst [vmem:[#allocation83_spill] sm:$0xff] %v14227_v13  ;;  %15992 = vst [vmem:[#allocation84_spill] sm:$0xff] %v14231_v9  ;;  %v14247_v46 = vmul.f32 %v14021_v18, %v15999_v26  ;;  %v16001_v13 = vld [vmem:[#allocation57_spill] sm:$0xff]  ;;  %v16003_v9 = vld [vmem:[#allocation50_spill] sm:$0xff] }
 0xb35   :  { %15994 = vst [vmem:[#allocation47_spill] sm:$0xff] %v14235_v17  ;;  %15996 = vst [vmem:[#allocation56_spill] sm:$0xff] %v14239_v33  ;;  %v14251_v8 = vmul.f32 %v14021_v18, %v16001_v13  ;;  %v14255_v24 = vmul.f32 %v14021_v18, %v16003_v9  ;;  %v16005_v17 = vld [vmem:[#allocation54_spill] sm:$0xff]  ;;  %v16008_v26 = vld [vmem:[#allocation53_spill] sm:$0xff] }
 0xb36   :  { %15998 = vst [vmem:[#allocation61_spill] sm:$0xff] %v14243_v27  ;;  %16000 = vst [vmem:[#allocation52_spill] sm:$0xff] %v14247_v46  ;;  %v14259_v10 = vmul.f32 %v14021_v18, %v16005_v17  ;;  %v16007_v27 = vld [vmem:[#allocation55_spill] sm:$0xff]  ;;  %v14269_v46 = vmul.f32 %v14219_v30, %v16008_v26  ;;  %v16009_v13 = vld [vmem:[#allocation58_spill] sm:$0xff] }
 0xb37   :  { %16002 = vst [vmem:[#allocation57_spill] sm:$0xff] %v14251_v8  ;;  %16004 = vst [vmem:[#allocation50_spill] sm:$0xff] %v14255_v24  ;;  %v14265_v33 = vmul.f32 %v14219_v30, %v16007_v27  ;;  %v14273_v8 = vmul.f32 %v16009_v13, %v14219_v30  ;;  %v16010_v9 = vld [vmem:[#allocation51_spill] sm:$0xff]  ;;  %v16011_v18 = vld [vmem:[#allocation45_spill] sm:$0xff] }
 0xb38   :  { %16006 = vst [vmem:[#allocation54_spill] sm:$0xff] %v14259_v10  ;;  %v14277_v24 = vmul.f32 %v16010_v9, %v14219_v30  ;;  %v14281_v17 = vmul.f32 %v14219_v30, %v16011_v18  ;;  %v16012_v4 = vld [vmem:[#allocation36_spill] sm:$0xff]  ;;  %v16014_v10 = vld [vmem:[#allocation38_spill] sm:$0xff]  ;;  %v14297_v9 = vmul.f32 %v14219_v30, %v16015_v61  ;;  %v14301_v18 = vmul.f32 %v14219_v30, %v16016_v3  ;;  %v16036_v6 = vld [vmem:[#allocation17_spill] sm:$0xff] }
 0xb39   :  { %v14285_v7 = vmul.f32 %v14219_v30, %v16012_v4  ;;  %v16013_v27 = vld [vmem:[#allocation40_spill] sm:$0xff]  ;;  %v14293_v13 = vmul.f32 %v16014_v10, %v14219_v30  ;;  %v14305_v4 = vmul.f32 %v16017_v5, %v14219_v30  ;;  %v14313_v10 = vmul.f32 %v14219_v30, %v16019_v62  ;;  %v16037_v43 = vld [vmem:[#allocation14_spill] sm:$0xff]  ;;  %v16040_v12 = vld [vmem:[#allocation21_spill] sm:$0xff] }
 0xb3a   :  { %v14289_v26 = vmul.f32 %v16013_v27, %v14219_v30  ;;  %v14309_v27 = vmul.f32 %v16018_v56, %v14219_v30  ;;  %v14317_v61 = vmul.f32 %v14219_v30, %v16020_v38  ;;  %v14321_v3 = vmul.f32 %v16021_v59, %v14219_v30  ;;  %v16034_v21 = vld [vmem:[#allocation12_spill] sm:$0xff]  ;;  %v16041_v45 = vld [vmem:[#allocation18_spill] sm:$0xff]  ;;  %v16043_v53 = vld [vmem:[#allocation23_spill] sm:$0xff] }
 0xb3b   :  { %v14325_v5 = vmul.f32 %v16022_v47, %v14219_v30  ;;  %v14329_v56 = vmul.f32 %v14219_v30, %v16023_v2  ;;  %v14333_v62 = vmul.f32 %v14219_v30, %v16024_v60  ;;  %v14337_v38 = vmul.f32 %v16025_v15, %v14219_v30  ;;  %v16038_v16 = vld [vmem:[#allocation16_spill] sm:$0xff]  ;;  %v16047_v39 = vld [vmem:[#allocation27_spill] sm:$0xff]  ;;  %v16063_v19 = vld [vmem:[#allocation85_spill] sm:$0xff] }
 0xb3c   :  { %v14341_v59 = vmul.f32 %v16026_v11, %v14219_v30  ;;  %v14345_v47 = vmul.f32 %v14219_v30, %v16027_v37  ;;  %v14349_v2 = vmul.f32 %v14219_v30, %v16028_v0  ;;  %v14353_v60 = vmul.f32 %v16029_v28, %v14219_v30  ;;  %v16061_v51 = vld [vmem:[#allocation35_spill] sm:$0xff] }
 0xb3d   :  { %v14357_v15 = vmul.f32 %v16030_v44, %v14219_v30  ;;  %v14361_v11 = vmul.f32 %v14219_v30, %v16031_v25  ;;  %v14365_v37 = vmul.f32 %v14219_v30, %v16032_v50  ;;  %v14369_v0 = vmul.f32 %v16033_v49, %v14219_v30 }
 0xb3e   :  { %v14373_v28 = vmul.f32 %v16034_v21, %v14219_v30  ;;  %v14377_v44 = vmul.f32 %v14219_v30, %v16035_v1  ;;  %v14381_v25 = vmul.f32 %v14219_v30, %v16036_v6  ;;  %v14385_v50 = vmul.f32 %v16037_v43, %v14219_v30 }
 0xb3f   :  { %v14389_v49 = vmul.f32 %v16038_v16, %v14219_v30  ;;  %v14393_v21 = vmul.f32 %v14219_v30, %v16039_v57  ;;  %v14397_v1 = vmul.f32 %v14219_v30, %v16040_v12  ;;  %v14401_v6 = vmul.f32 %v16041_v45, %v14219_v30 }
 0xb40   :  { %v14405_v43 = vmul.f32 %v16042_v42, %v14219_v30  ;;  %v14409_v16 = vmul.f32 %v14219_v30, %v16043_v53  ;;  %v14413_v57 = vmul.f32 %v14219_v30, %v16044_v58  ;;  %v14417_v12 = vmul.f32 %v16045_v34, %v14219_v30 }
 0xb41   :  { %v14421_v45 = vmul.f32 %v16046_v54, %v14219_v30  ;;  %v14425_v42 = vmul.f32 %v14219_v30, %v16047_v39  ;;  %v14429_v53 = vmul.f32 %v14219_v30, %v16048_v52  ;;  %v14433_v58 = vmul.f32 %v16049_v20, %v14219_v30 }
 0xb42   :  { %v14437_v34 = vmul.f32 %v16050_v48, %v14219_v30  ;;  %v14441_v54 = vmul.f32 %v14219_v30, %v16051_v36  ;;  %v14445_v39 = vmul.f32 %v14219_v30, %v16052_v31  ;;  %v14449_v52 = vmul.f32 %v16053_v63, %v14219_v30 }
 0xb43   :  { %v14453_v20 = vmul.f32 %v16054_v22, %v14219_v30  ;;  %v14457_v48 = vmul.f32 %v14219_v30, %v13866_v41  ;;  %v14461_v36 = vmul.f32 %v14219_v30, %v16055_v40  ;;  %v14465_v31 = vmul.f32 %v13857_v35, %v14219_v30 }
 0xb44   :  { %v14469_v63 = vmul.f32 %v13873_v29, %v14219_v30  ;;  %v14473_v22 = vmul.f32 %v14219_v30, %v13894_v32  ;;  %v14477_v41 = vmul.f32 %v14219_v30, %v16059_v23  ;;  %v14481_v40 = vmul.f32 %v16061_v51, %v14219_v30 }
 0xb45   :  { %16056 = vst [vmem:[#allocation55_spill] sm:$0xff] %v14465_v31  ;;  %v14485_v35 = vmul.f32 %v16063_v19, %v14219_v30  ;;  %v16065_v31 = vld [vmem:[#allocation88_spill] sm:$0xff] }
 0xb46   :  { %16057 = vst [vmem:[#allocation53_spill] sm:$0xff] %v14469_v63  ;;  %16058 = vst [vmem:[#allocation58_spill] sm:$0xff] %v14473_v22  ;;  %v14489_v29 = vmul.f32 %v14219_v30, %v16065_v31  ;;  %v16067_v63 = vld [vmem:[#allocation90_spill] sm:$0xff]  ;;  %v16069_v22 = vld [vmem:[#allocation87_spill] sm:$0xff] }
 0xb47   :  { %16060 = vst [vmem:[#allocation51_spill] sm:$0xff] %v14477_v41  ;;  %16062 = vst [vmem:[#allocation45_spill] sm:$0xff] %v14481_v40  ;;  %v14493_v32 = vmul.f32 %v14219_v30, %v16067_v63  ;;  %v14497_v23 = vmul.f32 %v16069_v22, %v14219_v30  ;;  %v16071_v41 = vld [vmem:[#allocation89_spill] sm:$0xff]  ;;  %v14504_v40 = vrot.slane %v7439_v55, %v15714_v14  ;;  %v16072_v19 = vld [vmem:[#allocation92_spill] sm:$0xff] }
 0xb48   :  { %16064 = vst [vmem:[#allocation36_spill] sm:$0xff] %v14485_v35  ;;  %16066 = vst [vmem:[#allocation40_spill] sm:$0xff] %v14489_v29  ;;  %v14501_v51 = vmul.f32 %v16071_v41, %v14219_v30  ;;  %v14508_v35 = vmul.f32 %v14219_v30, %v16072_v19  ;;  %v16073_v31 = vld [vmem:[#allocation94_spill] sm:$0xff]  ;;  %v16074_v63 = vld [vmem:[#allocation91_spill] sm:$0xff] }
 0xb49   :  { %16068 = vst [vmem:[#allocation38_spill] sm:$0xff] %v14493_v32  ;;  %16070 = vst [vmem:[#allocation59_spill] sm:$0xff] %v14497_v23  ;;  %v14512_v29 = vmul.f32 %v14219_v30, %v16073_v31  ;;  %v14516_v32 = vmul.f32 %v16074_v63, %v14219_v30  ;;  %v16075_v22 = vld [vmem:[#allocation93_spill] sm:$0xff]  ;;  %v14524_v14 = vadd.f32 %v14504_v40, %v14265_v33 }
 0xb4a   :  { %v14520_v23 = vmul.f32 %v16075_v22, %v14219_v30  ;;  %v14528_v55 = vadd.f32 %v14504_v40, %v14269_v46  ;;  %v14532_v41 = vadd.f32 %v14504_v40, %v14273_v8  ;;  %v14536_v19 = vadd.f32 %v14504_v40, %v14277_v24 }
 0xb4b   :  { %v14540_v30 = vadd.f32 %v14504_v40, %v14281_v17  ;;  %v14544_v33 = vadd.f32 %v14504_v40, %v14285_v7  ;;  %v14548_v46 = vadd.f32 %v14504_v40, %v14289_v26  ;;  %v14552_v8 = vadd.f32 %v14504_v40, %v14293_v13 }
 0xb4c   :  { %v14556_v24 = vadd.f32 %v14504_v40, %v14297_v9  ;;  %v14560_v17 = vadd.f32 %v14504_v40, %v14301_v18  ;;  %v14564_v7 = vadd.f32 %v14504_v40, %v14305_v4  ;;  %v14568_v26 = vadd.f32 %v14504_v40, %v14309_v27  ;;  %v16079_v31 = vld [vmem:[#allocation55_spill] sm:$0xff] }
 0xb4d   :  { %v14572_v13 = vadd.f32 %v14504_v40, %v14313_v10  ;;  %v14576_v9 = vadd.f32 %v14504_v40, %v14317_v61  ;;  %v14580_v18 = vadd.f32 %v14504_v40, %v14321_v3  ;;  %v14584_v4 = vadd.f32 %v14504_v40, %v14325_v5  ;;  %v16081_v63 = vld [vmem:[#allocation53_spill] sm:$0xff]  ;;  %v16083_v22 = vld [vmem:[#allocation58_spill] sm:$0xff] }
 0xb4e   :  { %v14588_v27 = vadd.f32 %v14504_v40, %v14329_v56  ;;  %v14592_v10 = vadd.f32 %v14504_v40, %v14333_v62  ;;  %v14596_v61 = vadd.f32 %v14504_v40, %v14337_v38  ;;  %v14600_v3 = vadd.f32 %v14504_v40, %v14341_v59 }
 0xb4f   :  { %v14604_v5 = vadd.f32 %v14504_v40, %v14345_v47  ;;  %v14608_v56 = vadd.f32 %v14504_v40, %v14349_v2  ;;  %v14612_v62 = vadd.f32 %v14504_v40, %v14353_v60  ;;  %v14616_v38 = vadd.f32 %v14504_v40, %v14357_v15 }
 0xb50   :  { %v14620_v59 = vadd.f32 %v14504_v40, %v14361_v11  ;;  %v14624_v47 = vadd.f32 %v14504_v40, %v14365_v37  ;;  %v14628_v2 = vadd.f32 %v14504_v40, %v14369_v0  ;;  %v14632_v60 = vadd.f32 %v14504_v40, %v14373_v28 }
 0xb51   :  { %v14636_v15 = vadd.f32 %v14504_v40, %v14377_v44  ;;  %v14640_v11 = vadd.f32 %v14504_v40, %v14381_v25  ;;  %v14644_v37 = vadd.f32 %v14504_v40, %v14385_v50  ;;  %v14648_v0 = vadd.f32 %v14504_v40, %v14389_v49 }
 0xb52   :  { %v14652_v28 = vadd.f32 %v14504_v40, %v14393_v21  ;;  %v14656_v44 = vadd.f32 %v14504_v40, %v14397_v1  ;;  %v14660_v25 = vadd.f32 %v14504_v40, %v14401_v6  ;;  %v14664_v50 = vadd.f32 %v14504_v40, %v14405_v43 }
 0xb53   :  { %v14668_v49 = vadd.f32 %v14504_v40, %v14409_v16  ;;  %v14672_v21 = vadd.f32 %v14504_v40, %v14413_v57  ;;  %v14676_v1 = vadd.f32 %v14504_v40, %v14417_v12  ;;  %v14680_v6 = vadd.f32 %v14504_v40, %v14421_v45 }
 0xb54   :  { %v14684_v43 = vadd.f32 %v14504_v40, %v14425_v42  ;;  %v14688_v16 = vadd.f32 %v14504_v40, %v14429_v53  ;;  %v14692_v57 = vadd.f32 %v14504_v40, %v14433_v58  ;;  %v14696_v12 = vadd.f32 %v14504_v40, %v14437_v34 }
 0xb55   :  { %v14700_v45 = vadd.f32 %v14504_v40, %v14441_v54  ;;  %v14704_v42 = vadd.f32 %v14504_v40, %v14445_v39  ;;  %v14708_v53 = vadd.f32 %v14504_v40, %v14449_v52  ;;  %v14712_v58 = vadd.f32 %v14504_v40, %v14453_v20 }
 0xb56   :  { %v14716_v34 = vadd.f32 %v14504_v40, %v14457_v48  ;;  %v14720_v54 = vadd.f32 %v14504_v40, %v14461_v36  ;;  %v14724_v39 = vadd.f32 %v14504_v40, %v16079_v31  ;;  %v14728_v52 = vadd.f32 %v14504_v40, %v16081_v63 }
 0xb57   :  { %16076 = vst [vmem:[#allocation42_spill] sm:$0xff] %v14712_v58  ;;  %v14732_v20 = vadd.f32 %v14504_v40, %v16083_v22  ;;  %v16085_v58 = vld [vmem:[#allocation51_spill] sm:$0xff] }
 0xb58   :  { %16077 = vst [vmem:[#allocation49_spill] sm:$0xff] %v14716_v34  ;;  %16078 = vst [vmem:[#allocation44_spill] sm:$0xff] %v14720_v54  ;;  %v14736_v48 = vadd.f32 %v14504_v40, %v16085_v58  ;;  %v16086_v34 = vld [vmem:[#allocation45_spill] sm:$0xff]  ;;  %v16087_v54 = vld [vmem:[#allocation36_spill] sm:$0xff] }
 0xb59   :  { %16080 = vst [vmem:[#allocation37_spill] sm:$0xff] %v14724_v39  ;;  %16082 = vst [vmem:[#allocation46_spill] sm:$0xff] %v14728_v52  ;;  %v14740_v36 = vadd.f32 %v14504_v40, %v16086_v34  ;;  %v14744_v31 = vadd.f32 %v14504_v40, %v16087_v54  ;;  %v16088_v39 = vld [vmem:[#allocation40_spill] sm:$0xff]  ;;  %v16089_v52 = vld [vmem:[#allocation38_spill] sm:$0xff]  ;;  %v14760_v34 = vadd.f32 %v14504_v40, %v14501_v51 }
 0xb5a   :  { %16084 = vst [vmem:[#allocation39_spill] sm:$0xff] %v14732_v20  ;;  %v14748_v63 = vadd.f32 %v14504_v40, %v16088_v39  ;;  %v14752_v22 = vadd.f32 %v14504_v40, %v16089_v52  ;;  %v16090_v20 = vld [vmem:[#allocation59_spill] sm:$0xff]  ;;  %v14764_v54 = vadd.f32 %v14504_v40, %v14508_v35  ;;  %v14768_v39 = vadd.f32 %v14504_v40, %v14512_v29 }
 0xb5b   :  { %v14756_v58 = vadd.f32 %v14504_v40, %v16090_v20  ;;  %16092 = vst [vmem:[#allocation41_spill] sm:$0xff] %v14760_v34  ;;  %v14772_v52 = vadd.f32 %v14504_v40, %v14516_v32  ;;  %v14776_v20 = vadd.f32 %v14504_v40, %v14520_v23  ;;  %v16097_v34 = vld [vmem:[#allocation95_spill] sm:$0xff] }
 0xb5c   :  { %16093 = vst [vmem:[#allocation5_spill] sm:$0xff] %v14764_v54  ;;  %16094 = vst [vmem:[#allocation43_spill] sm:$0xff] %v14768_v39  ;;  %v14784_v35 = vadd.f32 %v14528_v55, %v16097_v34  ;;  %v16098_v54 = vld [vmem:[#allocation96_spill] sm:$0xff]  ;;  %v16099_v39 = vld [vmem:[#allocation97_spill] sm:$0xff] }
 0xb5d   :  { %16091 = vst [vmem:[#allocation48_spill] sm:$0xff] %v14756_v58  ;;  %16095 = vst [vmem:[#allocation4_spill] sm:$0xff] %v14772_v52  ;;  %v16096_v58 = vld [vmem:[#allocation60_spill] sm:$0xff]  ;;  %v14788_v29 = vadd.f32 %v14532_v41, %v16098_v54  ;;  %v14792_v32 = vadd.f32 %v14536_v19, %v16099_v39  ;;  %v16100_v52 = vld [vmem:[#allocation98_spill] sm:$0xff] }
 0xb5e   :  { %v14780_v51 = vadd.f32 %v14524_v14, %v16096_v58  ;;  %v14796_v40 = vadd.f32 %v14540_v30, %v16100_v52  ;;  %v16101_v23 = vld [vmem:[#allocation99_spill] sm:$0xff]  ;;  %v16102_v58 = vld [vmem:[#allocation100_spill] sm:$0xff]  ;;  %v16103_v34 = vld [vmem:[#allocation101_spill] sm:$0xff] }
 0xb5f   :  { %v14800_v14 = vadd.f32 %v14544_v33, %v16101_v23  ;;  %v14804_v55 = vadd.f32 %v14548_v46, %v16102_v58  ;;  %v14808_v41 = vadd.f32 %v14552_v8, %v16103_v34  ;;  %v16104_v54 = vld [vmem:[#allocation102_spill] sm:$0xff]  ;;  %v16105_v39 = vld [vmem:[#allocation103_spill] sm:$0xff]  ;;  %v16106_v52 = vld [vmem:[#allocation104_spill] sm:$0xff] }
 0xb60   :  { %v14812_v19 = vadd.f32 %v14556_v24, %v16104_v54  ;;  %v14816_v30 = vadd.f32 %v14560_v17, %v16105_v39  ;;  %v14820_v33 = vadd.f32 %v14564_v7, %v16106_v52  ;;  %v16107_v23 = vld [vmem:[#allocation105_spill] sm:$0xff]  ;;  %v16108_v58 = vld [vmem:[#allocation106_spill] sm:$0xff]  ;;  %v16109_v34 = vld [vmem:[#allocation107_spill] sm:$0xff] }
 0xb61   :  { %v14824_v46 = vadd.f32 %v14568_v26, %v16107_v23  ;;  %v14828_v8 = vadd.f32 %v14572_v13, %v16108_v58  ;;  %v14832_v24 = vadd.f32 %v14576_v9, %v16109_v34  ;;  %v16110_v54 = vld [vmem:[#allocation108_spill] sm:$0xff]  ;;  %v16111_v39 = vld [vmem:[#allocation109_spill] sm:$0xff]  ;;  %v16112_v52 = vld [vmem:[#allocation110_spill] sm:$0xff] }
 0xb62   :  { %v14836_v17 = vadd.f32 %v14580_v18, %v16110_v54  ;;  %v14840_v7 = vadd.f32 %v14584_v4, %v16111_v39  ;;  %v14844_v26 = vadd.f32 %v14588_v27, %v16112_v52  ;;  %v16113_v23 = vld [vmem:[#allocation111_spill] sm:$0xff]  ;;  %v16114_v58 = vld [vmem:[#allocation112_spill] sm:$0xff]  ;;  %v16115_v34 = vld [vmem:[#allocation113_spill] sm:$0xff] }
 0xb63   :  { %v14848_v13 = vadd.f32 %v14592_v10, %v16113_v23  ;;  %v14852_v9 = vadd.f32 %v14596_v61, %v16114_v58  ;;  %v14856_v18 = vadd.f32 %v14600_v3, %v16115_v34  ;;  %v16116_v54 = vld [vmem:[#allocation114_spill] sm:$0xff]  ;;  %v16117_v39 = vld [vmem:[#allocation115_spill] sm:$0xff]  ;;  %v16118_v52 = vld [vmem:[#allocation116_spill] sm:$0xff] }
 0xb64   :  { %v14860_v4 = vadd.f32 %v14604_v5, %v16116_v54  ;;  %v14864_v27 = vadd.f32 %v14608_v56, %v16117_v39  ;;  %v14868_v10 = vadd.f32 %v14612_v62, %v16118_v52  ;;  %v16119_v23 = vld [vmem:[#allocation117_spill] sm:$0xff]  ;;  %v16120_v58 = vld [vmem:[#allocation118_spill] sm:$0xff]  ;;  %v16121_v34 = vld [vmem:[#allocation119_spill] sm:$0xff] }
 0xb65   :  { %v14872_v61 = vadd.f32 %v14616_v38, %v16119_v23  ;;  %v14876_v3 = vadd.f32 %v14620_v59, %v16120_v58  ;;  %v14880_v5 = vadd.f32 %v14624_v47, %v16121_v34  ;;  %v16122_v54 = vld [vmem:[#allocation120_spill] sm:$0xff]  ;;  %v16123_v39 = vld [vmem:[#allocation121_spill] sm:$0xff]  ;;  %v16124_v52 = vld [vmem:[#allocation122_spill] sm:$0xff] }
 0xb66   :  { %v14884_v56 = vadd.f32 %v14628_v2, %v16122_v54  ;;  %v14888_v62 = vadd.f32 %v14632_v60, %v16123_v39  ;;  %v14892_v38 = vadd.f32 %v14636_v15, %v16124_v52  ;;  %v16125_v23 = vld [vmem:[#allocation123_spill] sm:$0xff]  ;;  %v16126_v58 = vld [vmem:[#allocation124_spill] sm:$0xff]  ;;  %v16127_v34 = vld [vmem:[#allocation125_spill] sm:$0xff] }
 0xb67   :  { %v14896_v59 = vadd.f32 %v14640_v11, %v16125_v23  ;;  %v14900_v47 = vadd.f32 %v14644_v37, %v16126_v58  ;;  %v14904_v2 = vadd.f32 %v14648_v0, %v16127_v34  ;;  %v16128_v54 = vld [vmem:[#allocation126_spill] sm:$0xff]  ;;  %v16129_v39 = vld [vmem:[#allocation127_spill] sm:$0xff]  ;;  %v16132_v58 = vld [vmem:[#allocation64_spill] sm:$0xff] }
 0xb68   :  { %v14908_v60 = vadd.f32 %v14652_v28, %v16128_v54  ;;  %v14912_v15 = vadd.f32 %v14656_v44, %v16129_v39  ;;  %v16130_v52 = vld [vmem:[#allocation62_spill] sm:$0xff]  ;;  %v16131_v23 = vld [vmem:[#allocation63_spill] sm:$0xff]  ;;  %v14924_v0 = vadd.f32 %v14668_v49, %v16132_v58  ;;  %v16133_v34 = vld [vmem:[#allocation65_spill] sm:$0xff] }
 0xb69   :  { %v14916_v11 = vadd.f32 %v14660_v25, %v16130_v52  ;;  %v14920_v37 = vadd.f32 %v14664_v50, %v16131_v23  ;;  %v14928_v28 = vadd.f32 %v14672_v21, %v16133_v34  ;;  %v16134_v54 = vld [vmem:[#allocation66_spill] sm:$0xff]  ;;  %v16135_v39 = vld [vmem:[#allocation67_spill] sm:$0xff]  ;;  %v16136_v52 = vld [vmem:[#allocation68_spill] sm:$0xff] }
 0xb6a   :  { %v14932_v44 = vadd.f32 %v14676_v1, %v16134_v54  ;;  %v14936_v25 = vadd.f32 %v14680_v6, %v16135_v39  ;;  %v14940_v50 = vadd.f32 %v14684_v43, %v16136_v52  ;;  %v16137_v23 = vld [vmem:[#allocation69_spill] sm:$0xff]  ;;  %v16139_v58 = vld [vmem:[#allocation70_spill] sm:$0xff]  ;;  %v16141_v34 = vld [vmem:[#allocation71_spill] sm:$0xff] }
 0xb6b   :  { %v14944_v49 = vadd.f32 %v14688_v16, %v16137_v23  ;;  %v14948_v21 = vadd.f32 %v14692_v57, %v16139_v58  ;;  %v14952_v1 = vadd.f32 %v14696_v12, %v16141_v34  ;;  %v16143_v54 = vld [vmem:[#allocation72_spill] sm:$0xff]  ;;  %v16145_v39 = vld [vmem:[#allocation73_spill] sm:$0xff]  ;;  %v16147_v52 = vld [vmem:[#allocation74_spill] sm:$0xff] }
 0xb6c   :  { %v14956_v6 = vadd.f32 %v14700_v45, %v16143_v54  ;;  %v14960_v43 = vadd.f32 %v14704_v42, %v16145_v39  ;;  %v14964_v16 = vadd.f32 %v14708_v53, %v16147_v52  ;;  %v16149_v23 = vld [vmem:[#allocation75_spill] sm:$0xff]  ;;  %v16151_v58 = vld [vmem:[#allocation76_spill] sm:$0xff]  ;;  %v16153_v34 = vld [vmem:[#allocation77_spill] sm:$0xff] }
 0xb6d   :  { %16138 = vst [vmem:[#allocation7_spill] sm:$0xff] %v14944_v49  ;;  %16140 = vst [vmem:[#allocation9_spill] sm:$0xff] %v14948_v21  ;;  %v16150_v49 = vld [vmem:[#allocation42_spill] sm:$0xff]  ;;  %v16152_v21 = vld [vmem:[#allocation49_spill] sm:$0xff] }
 0xb6e   :  { %16142 = vst [vmem:[#allocation6_spill] sm:$0xff] %v14952_v1  ;;  %16144 = vst [vmem:[#allocation8_spill] sm:$0xff] %v14956_v6  ;;  %v14968_v57 = vadd.f32 %v16150_v49, %v16149_v23  ;;  %v14972_v12 = vadd.f32 %v16152_v21, %v16151_v58  ;;  %v16154_v1 = vld [vmem:[#allocation44_spill] sm:$0xff]  ;;  %v16155_v54 = vld [vmem:[#allocation78_spill] sm:$0xff] }
 0xb6f   :  { %16146 = vst [vmem:[#allocation11_spill] sm:$0xff] %v14960_v43  ;;  %16148 = vst [vmem:[#allocation13_spill] sm:$0xff] %v14964_v16  ;;  %v14976_v45 = vadd.f32 %v16154_v1, %v16153_v34  ;;  %v16156_v6 = vld [vmem:[#allocation37_spill] sm:$0xff]  ;;  %v16157_v39 = vld [vmem:[#allocation79_spill] sm:$0xff] }
 0xb70   :  { %v14980_v42 = vadd.f32 %v16156_v6, %v16155_v54  ;;  %v16158_v43 = vld [vmem:[#allocation46_spill] sm:$0xff]  ;;  %v16159_v52 = vld [vmem:[#allocation80_spill] sm:$0xff]  ;;  %v16160_v16 = vld [vmem:[#allocation39_spill] sm:$0xff] }
 0xb71   :  { %v14984_v53 = vadd.f32 %v16158_v43, %v16157_v39  ;;  %v14988_v49 = vadd.f32 %v16160_v16, %v16159_v52  ;;  %v16162_v23 = vld [vmem:[#allocation81_spill] sm:$0xff]  ;;  %v16164_v58 = vld [vmem:[#allocation82_spill] sm:$0xff]  ;;  %v16166_v34 = vld [vmem:[#allocation83_spill] sm:$0xff] }
 0xb72   :  { %v14992_v21 = vadd.f32 %v14736_v48, %v16162_v23  ;;  %v14996_v1 = vadd.f32 %v14740_v36, %v16164_v58  ;;  %v15000_v6 = vadd.f32 %v14744_v31, %v16166_v34  ;;  %v16168_v54 = vld [vmem:[#allocation84_spill] sm:$0xff]  ;;  %v16170_v39 = vld [vmem:[#allocation47_spill] sm:$0xff]  ;;  %v16173_v23 = vld [vmem:[#allocation61_spill] sm:$0xff] }
 0xb73   :  { %16161 = vst [vmem:[#allocation10_spill] sm:$0xff] %v14988_v49  ;;  %v15004_v43 = vadd.f32 %v14748_v63, %v16168_v54  ;;  %v15008_v16 = vadd.f32 %v14752_v22, %v16170_v39  ;;  %v16171_v52 = vld [vmem:[#allocation56_spill] sm:$0xff]  ;;  %v16177_v34 = vld [vmem:[#allocation54_spill] sm:$0xff]  ;;  %v16179_v54 = vld [vmem:[#allocation57_spill] sm:$0xff] }
 0xb74   :  { %16163 = vst [vmem:[#allocation12_spill] sm:$0xff] %v14992_v21  ;;  %16165 = vst [vmem:[#allocation15_spill] sm:$0xff] %v14996_v1  ;;  %v16172_v49 = vld [vmem:[#allocation48_spill] sm:$0xff]  ;;  %v16174_v21 = vld [vmem:[#allocation41_spill] sm:$0xff] }
 0xb75   :  { %16167 = vst [vmem:[#allocation17_spill] sm:$0xff] %v15000_v6  ;;  %16169 = vst [vmem:[#allocation14_spill] sm:$0xff] %v15004_v43  ;;  %v15012_v48 = vadd.f32 %v16172_v49, %v16171_v52  ;;  %v15016_v36 = vadd.f32 %v16174_v21, %v16173_v23  ;;  %v16175_v58 = vld [vmem:[#allocation52_spill] sm:$0xff]  ;;  %v16176_v1 = vld [vmem:[#allocation5_spill] sm:$0xff]  ;;  %v7644_v52 = vmax.f32 %v14780_v51, 0.0  ;;  %v7645_v21 = vmax.f32 %v14784_v35, 0.0 }
 0xb76   :  { %v15020_v31 = vadd.f32 %v16176_v1, %v16175_v58  ;;  %v16178_v6 = vld [vmem:[#allocation43_spill] sm:$0xff]  ;;  %v16180_v43 = vld [vmem:[#allocation4_spill] sm:$0xff]  ;;  %v16181_v39 = vld [vmem:[#allocation50_spill] sm:$0xff]  ;;  %v7646_v23 = vmax.f32 %v14788_v29, 0.0  ;;  %v7647_v1 = vmax.f32 %v14792_v32, 0.0  ;;  %v7648_v58 = vmax.f32 %v14796_v40, 0.0 }
 0xb77   :  { %v15024_v63 = vadd.f32 %v16178_v6, %v16177_v34  ;;  %v15028_v22 = vadd.f32 %v16180_v43, %v16179_v54  ;;  %v15032_v49 = vadd.f32 %v14776_v20, %v16181_v39  ;;  %v7649_v6 = vmax.f32 %v14800_v14, 0.0  ;;  %7708 = vst.msk [vmem:[%s15369_s15] sm:$0xff] %vm538_vm2, %v7644_v52  ;;  %7709 = vst.msk [vmem:[%s15369_s15 + $0x8] sm:$0xff] %vm538_vm2, %v7645_v21  ;;  %v16187_v39 = vld [vmem:[#allocation13_spill] sm:$0xff] }
 0xb78   :  { %v7650_v34 = vmax.f32 %v14804_v55, 0.0  ;;  %v7651_v43 = vmax.f32 %v14808_v41, 0.0  ;;  %v7652_v54 = vmax.f32 %v14812_v19, 0.0  ;;  %v7653_v20 = vmax.f32 %v14816_v30, 0.0  ;;  %7710 = vst.msk [vmem:[%s15369_s15 + $0x10] sm:$0xff] %vm538_vm2, %v7646_v23  ;;  %7711 = vst.msk [vmem:[%s15369_s15 + $0x18] sm:$0xff] %vm538_vm2, %v7647_v1 }
 0xb79   :  { %v7654_v51 = vmax.f32 %v14820_v33, 0.0  ;;  %v7655_v35 = vmax.f32 %v14824_v46, 0.0  ;;  %v7656_v29 = vmax.f32 %v14828_v8, 0.0  ;;  %v7657_v32 = vmax.f32 %v14832_v24, 0.0  ;;  %7712 = vst.msk [vmem:[%s15369_s15 + $0x20] sm:$0xff] %vm538_vm2, %v7648_v58  ;;  %7713 = vst.msk [vmem:[%s15369_s15 + $0x28] sm:$0xff] %vm538_vm2, %v7649_v6 }
 0xb7a   :  { %v7658_v40 = vmax.f32 %v14836_v17, 0.0  ;;  %v7659_v14 = vmax.f32 %v14840_v7, 0.0  ;;  %7714 = vst.msk [vmem:[%s15369_s15 + $0x30] sm:$0xff] %vm538_vm2, %v7650_v34  ;;  %7715 = vst.msk [vmem:[%s15369_s15 + $0x38] sm:$0xff] %vm538_vm2, %v7651_v43  ;;  %v7660_v55 = vmax.f32 %v14844_v26, 0.0  ;;  %v7661_v41 = vmax.f32 %v14848_v13, 0.0 }
 0xb7b   :  { %v7662_v19 = vmax.f32 %v14852_v9, 0.0  ;;  %v7663_v30 = vmax.f32 %v14856_v18, 0.0  ;;  %7716 = vst.msk [vmem:[%s15369_s15 + $0x40] sm:$0xff] %vm538_vm2, %v7652_v54  ;;  %7717 = vst.msk [vmem:[%s15369_s15 + $0x48] sm:$0xff] %vm538_vm2, %v7653_v20  ;;  %v7664_v33 = vmax.f32 %v14860_v4, 0.0  ;;  %v7665_v46 = vmax.f32 %v14864_v27, 0.0 }
 0xb7c   :  { %7718 = vst.msk [vmem:[%s15369_s15 + $0x50] sm:$0xff] %vm538_vm2, %v7654_v51  ;;  %7719 = vst.msk [vmem:[%s15369_s15 + $0x58] sm:$0xff] %vm538_vm2, %v7655_v35  ;;  %v7666_v8 = vmax.f32 %v14868_v10, 0.0  ;;  %v7667_v24 = vmax.f32 %v14872_v61, 0.0  ;;  %v7668_v17 = vmax.f32 %v14876_v3, 0.0  ;;  %v7669_v7 = vmax.f32 %v14880_v5, 0.0 }
 0xb7d   :  { %7720 = vst.msk [vmem:[%s15369_s15 + $0x60] sm:$0xff] %vm538_vm2, %v7656_v29  ;;  %7721 = vst.msk [vmem:[%s15369_s15 + $0x68] sm:$0xff] %vm538_vm2, %v7657_v32  ;;  %v7670_v26 = vmax.f32 %v14884_v56, 0.0  ;;  %v7671_v13 = vmax.f32 %v14888_v62, 0.0  ;;  %v7672_v9 = vmax.f32 %v14892_v38, 0.0  ;;  %v7673_v18 = vmax.f32 %v14896_v59, 0.0 }
 0xb7e   :  { %7722 = vst.msk [vmem:[%s15369_s15 + $0x70] sm:$0xff] %vm538_vm2, %v7658_v40  ;;  %7723 = vst.msk [vmem:[%s15369_s15 + $0x78] sm:$0xff] %vm538_vm2, %v7659_v14  ;;  %v7674_v4 = vmax.f32 %v14900_v47, 0.0  ;;  %v7675_v27 = vmax.f32 %v14904_v2, 0.0  ;;  %v7676_v10 = vmax.f32 %v14908_v60, 0.0  ;;  %v7677_v61 = vmax.f32 %v14912_v15, 0.0 }
 0xb7f   :  { %7724 = vst.msk [vmem:[%s15369_s15 + $0x80] sm:$0xff] %vm538_vm2, %v7660_v55  ;;  %7725 = vst.msk [vmem:[%s15369_s15 + $0x88] sm:$0xff] %vm538_vm2, %v7661_v41  ;;  %v7678_v3 = vmax.f32 %v14916_v11, 0.0  ;;  %v7679_v5 = vmax.f32 %v14920_v37, 0.0  ;;  %v7680_v56 = vmax.f32 %v14924_v0, 0.0  ;;  %v7681_v62 = vmax.f32 %v14928_v28, 0.0 }
 0xb80   :  { %7726 = vst.msk [vmem:[%s15369_s15 + $0x90] sm:$0xff] %vm538_vm2, %v7662_v19  ;;  %7727 = vst.msk [vmem:[%s15369_s15 + $0x98] sm:$0xff] %vm538_vm2, %v7663_v30  ;;  %v7682_v38 = vmax.f32 %v14932_v44, 0.0  ;;  %v7683_v59 = vmax.f32 %v14936_v25, 0.0  ;;  %v7684_v47 = vmax.f32 %v14940_v50, 0.0  ;;  %v16182_v2 = vld [vmem:[#allocation7_spill] sm:$0xff] }
 0xb81   :  { %7728 = vst.msk [vmem:[%s15369_s15 + $0xa0] sm:$0xff] %vm538_vm2, %v7664_v33  ;;  %7729 = vst.msk [vmem:[%s15369_s15 + $0xa8] sm:$0xff] %vm538_vm2, %v7665_v46  ;;  %v7685_v60 = vmax.f32 %v16182_v2, 0.0  ;;  %v16183_v15 = vld [vmem:[#allocation9_spill] sm:$0xff]  ;;  %v16184_v37 = vld [vmem:[#allocation6_spill] sm:$0xff]  ;;  %v7690_v52 = vmax.f32 %v16187_v39, 0.0 }
 0xb82   :  { %7730 = vst.msk [vmem:[%s15369_s15 + $0xb0] sm:$0xff] %vm538_vm2, %v7666_v8  ;;  %7731 = vst.msk [vmem:[%s15369_s15 + $0xb8] sm:$0xff] %vm538_vm2, %v7667_v24  ;;  %v7686_v11 = vmax.f32 %v16183_v15, 0.0  ;;  %v7687_v0 = vmax.f32 %v16184_v37, 0.0  ;;  %v16185_v28 = vld [vmem:[#allocation8_spill] sm:$0xff]  ;;  %v16186_v25 = vld [vmem:[#allocation11_spill] sm:$0xff] }
 0xb83   :  { %7732 = vst.msk [vmem:[%s15369_s15 + $0xc0] sm:$0xff] %vm538_vm2, %v7668_v17  ;;  %7733 = vst.msk [vmem:[%s15369_s15 + $0xc8] sm:$0xff] %vm538_vm2, %v7669_v7  ;;  %v7688_v44 = vmax.f32 %v16185_v28, 0.0  ;;  %v7689_v50 = vmax.f32 %v16186_v25, 0.0  ;;  %v7691_v21 = vmax.f32 %v14968_v57, 0.0  ;;  %v7692_v57 = vmax.f32 %v14972_v12, 0.0 }
 0xb84   :  { %7734 = vst.msk [vmem:[%s15369_s15 + $0xd0] sm:$0xff] %vm538_vm2, %v7670_v26  ;;  %7735 = vst.msk [vmem:[%s15369_s15 + $0xd8] sm:$0xff] %vm538_vm2, %v7671_v13  ;;  %v7693_v23 = vmax.f32 %v14976_v45, 0.0  ;;  %v7694_v1 = vmax.f32 %v14980_v42, 0.0  ;;  %v7695_v58 = vmax.f32 %v14984_v53, 0.0  ;;  %v16188_v12 = vld [vmem:[#allocation10_spill] sm:$0xff] }
 0xb85   :  { %7736 = vst.msk [vmem:[%s15369_s15 + $0xe0] sm:$0xff] %vm538_vm2, %v7672_v9  ;;  %7737 = vst.msk [vmem:[%s15369_s15 + $0xe8] sm:$0xff] %vm538_vm2, %v7673_v18  ;;  %v7696_v45 = vmax.f32 %v16188_v12, 0.0  ;;  %v16189_v42 = vld [vmem:[#allocation12_spill] sm:$0xff]  ;;  %v16190_v6 = vld [vmem:[#allocation15_spill] sm:$0xff]  ;;  %v7701_v35 = vmax.f32 %v15008_v16, 0.0 }
 0xb86   :  { %7738 = vst.msk [vmem:[%s15369_s15 + $0xf0] sm:$0xff] %vm538_vm2, %v7674_v4  ;;  %7739 = vst.msk [vmem:[%s15369_s15 + $0xf8] sm:$0xff] %vm538_vm2, %v7675_v27  ;;  %v7697_v53 = vmax.f32 %v16189_v42, 0.0  ;;  %v7698_v34 = vmax.f32 %v16190_v6, 0.0  ;;  %v16191_v43 = vld [vmem:[#allocation17_spill] sm:$0xff]  ;;  %v16192_v20 = vld [vmem:[#allocation14_spill] sm:$0xff] }
 0xb87   :  { %7740 = vst.msk [vmem:[%s15369_s15 + $0x100] sm:$0xff] %vm538_vm2, %v7676_v10  ;;  %7741 = vst.msk [vmem:[%s15369_s15 + $0x108] sm:$0xff] %vm538_vm2, %v7677_v61  ;;  %v7699_v54 = vmax.f32 %v16191_v43, 0.0  ;;  %v7700_v51 = vmax.f32 %v16192_v20, 0.0  ;;  %v7702_v29 = vmax.f32 %v15012_v48, 0.0  ;;  %v7703_v32 = vmax.f32 %v15016_v36, 0.0 }
 0xb88   :  { %7742 = vst.msk [vmem:[%s15369_s15 + $0x110] sm:$0xff] %vm538_vm2, %v7678_v3  ;;  %7743 = vst.msk [vmem:[%s15369_s15 + $0x118] sm:$0xff] %vm538_vm2, %v7679_v5  ;;  %v7704_v16 = vmax.f32 %v15020_v31, 0.0  ;;  %v7705_v48 = vmax.f32 %v15024_v63, 0.0  ;;  %v7706_v36 = vmax.f32 %v15028_v22, 0.0  ;;  %v7707_v40 = vmax.f32 %v15032_v49, 0.0 }
 0xb89   :  { %7744 = vst.msk [vmem:[%s15369_s15 + $0x120] sm:$0xff] %vm538_vm2, %v7680_v56  ;;  %7745 = vst.msk [vmem:[%s15369_s15 + $0x128] sm:$0xff] %vm538_vm2, %v7681_v62 }
 0xb8a   :  { %7746 = vst.msk [vmem:[%s15369_s15 + $0x130] sm:$0xff] %vm538_vm2, %v7682_v38  ;;  %7747 = vst.msk [vmem:[%s15369_s15 + $0x138] sm:$0xff] %vm538_vm2, %v7683_v59 }
 0xb8b   :  { %7748 = vst.msk [vmem:[%s15369_s15 + $0x140] sm:$0xff] %vm538_vm2, %v7684_v47  ;;  %7749 = vst.msk [vmem:[%s15369_s15 + $0x148] sm:$0xff] %vm538_vm2, %v7685_v60 }
 0xb8c   :  { %7750 = vst.msk [vmem:[%s15369_s15 + $0x150] sm:$0xff] %vm538_vm2, %v7686_v11  ;;  %7751 = vst.msk [vmem:[%s15369_s15 + $0x158] sm:$0xff] %vm538_vm2, %v7687_v0 }
 0xb8d   :  { %7752 = vst.msk [vmem:[%s15369_s15 + $0x160] sm:$0xff] %vm538_vm2, %v7688_v44  ;;  %7753 = vst.msk [vmem:[%s15369_s15 + $0x168] sm:$0xff] %vm538_vm2, %v7689_v50 }
 0xb8e   :  { %7754 = vst.msk [vmem:[%s15369_s15 + $0x170] sm:$0xff] %vm538_vm2, %v7690_v52  ;;  %7755 = vst.msk [vmem:[%s15369_s15 + $0x178] sm:$0xff] %vm538_vm2, %v7691_v21 }
 0xb8f   :  { %7756 = vst.msk [vmem:[%s15369_s15 + $0x180] sm:$0xff] %vm538_vm2, %v7692_v57  ;;  %7757 = vst.msk [vmem:[%s15369_s15 + $0x188] sm:$0xff] %vm538_vm2, %v7693_v23 }
 0xb90   :  { %7758 = vst.msk [vmem:[%s15369_s15 + $0x190] sm:$0xff] %vm538_vm2, %v7694_v1  ;;  %7759 = vst.msk [vmem:[%s15369_s15 + $0x198] sm:$0xff] %vm538_vm2, %v7695_v58 }
 0xb91   :  { %7760 = vst.msk [vmem:[%s15369_s15 + $0x1a0] sm:$0xff] %vm538_vm2, %v7696_v45  ;;  %7761 = vst.msk [vmem:[%s15369_s15 + $0x1a8] sm:$0xff] %vm538_vm2, %v7697_v53 }
 0xb92   :  { %7762 = vst.msk [vmem:[%s15369_s15 + $0x1b0] sm:$0xff] %vm538_vm2, %v7698_v34  ;;  %7763 = vst.msk [vmem:[%s15369_s15 + $0x1b8] sm:$0xff] %vm538_vm2, %v7699_v54 }
 0xb93   :  { %7764 = vst.msk [vmem:[%s15369_s15 + $0x1c0] sm:$0xff] %vm538_vm2, %v7700_v51  ;;  %7765 = vst.msk [vmem:[%s15369_s15 + $0x1c8] sm:$0xff] %vm538_vm2, %v7701_v35 }
 0xb94   :  { %7766 = vst.msk [vmem:[%s15369_s15 + $0x1d0] sm:$0xff] %vm538_vm2, %v7702_v29  ;;  %7767 = vst.msk [vmem:[%s15369_s15 + $0x1d8] sm:$0xff] %vm538_vm2, %v7703_v32 }
 0xb95   :  { %7768 = vst.msk [vmem:[%s15369_s15 + $0x1e0] sm:$0xff] %vm538_vm2, %v7704_v16  ;;  %7769 = vst.msk [vmem:[%s15369_s15 + $0x1e8] sm:$0xff] %vm538_vm2, %v7705_v48 }
 0xb96   :  { %7770 = vst.msk [vmem:[%s15369_s15 + $0x1f0] sm:$0xff] %vm538_vm2, %v7706_v36  ;;  %7771 = vst.msk [vmem:[%s15369_s15 + $0x1f8] sm:$0xff] %vm538_vm2, %v7707_v40 }

</bundles_post_ra>
